<compile_context>
chip_gen: v7x
topology: tpu7x:2x2x1
jax: 0.10.0
libtpu: 0.0.40
codegen_flags: <defaults>
</compile_context>

<pallas_src>
import jax
import jax.numpy as jnp
from jax import lax
from jax.experimental import pallas as pl
from jax.experimental.pallas import tpu as pltpu

jax.config.update("jax_default_matmul_precision", "highest")

# ---- model hyper-parameters (small, consistent with the module) ----
EMBED = 32
HEADS = 4
HEAD_DIM = EMBED // HEADS
FF_EXPANSION = 4
FF_HIDDEN = FF_EXPANSION * EMBED          # 128 -> lane-dense FFN hidden dim
NUM_LATENTS = 2
TOK = 2 * NUM_LATENTS                      # mu tokens + logvar tokens
MOTION_DIM = 4                             # motion_feature_dim
NFRAMES = 8
SEQ = TOK + NFRAMES                        # 12
BATCH = 2
NUM_LAYERS = 2
DIM_LATENT = 16
LAT_PAD = 128                              # lane-dense padded latent projection width
MAX_LEN = 64
CLAMP = 1e6


# ------------------------- in-kernel helpers -------------------------
def _layernorm(z, g, b, eps):
    mu = jnp.mean(z, axis=-1, keepdims=True)
    var = jnp.mean((z - mu) ** 2, axis=-1, keepdims=True)
    return (z - mu) * lax.rsqrt(var + eps) * g + b


# ------------------------------ kernel ------------------------------
def encoder_kernel(x_ref, bias_ref, base_ref,
                   wm_ref, bm_ref,
                   wq_ref, wk_ref, wv_ref, wfc_ref, bfc_ref,
                   g1_ref, b1_ref, g2_ref, b2_ref,
                   w1_ref, c1_ref, w2_ref, c2_ref,
                   wlat_ref, blat_ref,
                   out_ref,
                   seq_ref, cat_ref):
    f32 = jnp.float32
    scale = 1.0 / jnp.sqrt(jnp.float32(EMBED))

    # Hoist all (tiny) weight loads out of the batch loop — everything stays
    # VMEM/vreg resident for the single kernel invocation.
    wm, bm = wm_ref[...], bm_ref[...]
    wlat, blat = wlat_ref[...], blat_ref[...]
    Wq = [wq_ref[l] for l in range(NUM_LAYERS)]
    Wk = [wk_ref[l] for l in range(NUM_LAYERS)]
    Wv = [wv_ref[l] for l in range(NUM_LAYERS)]
    Wfc = [wfc_ref[l] for l in range(NUM_LAYERS)]
    Bfc = [bfc_ref[l] for l in range(NUM_LAYERS)]
    G1 = [g1_ref[l] for l in range(NUM_LAYERS)]
    B1 = [b1_ref[l] for l in range(NUM_LAYERS)]
    G2 = [g2_ref[l] for l in range(NUM_LAYERS)]
    B2 = [b2_ref[l] for l in range(NUM_LAYERS)]
    W1 = [w1_ref[l] for l in range(NUM_LAYERS)]
    C1 = [c1_ref[l] for l in range(NUM_LAYERS)]
    W2 = [w2_ref[l] for l in range(NUM_LAYERS)]
    C2 = [c2_ref[l] for l in range(NUM_LAYERS)]

    for n in range(BATCH):   # static unroll: all batches in ONE kernel invocation
        # ---- fused input assembly: [mu_tok ; logvar_tok ; motion_emb(x)] + pos. enc.
        # `base` already holds (tokens ; zeros) + PE, so only motion rows need work.
        me = jnp.dot(x_ref[n], wm, preferred_element_type=f32) + bm      # (NFRAMES, E)
        seq_ref[0:TOK, :] = base_ref[0:TOK, :]
        seq_ref[TOK:SEQ, :] = base_ref[TOK:SEQ, :] + me
        h = seq_ref[...]                                                  # (SEQ, E)
        bias = bias_ref[n]                                                # (1, SEQ) additive key mask

        for l in range(NUM_LAYERS):   # static unroll over layers
            # -- SelfAttention: block-diagonal per-head projections, one matmul each --
            q = jnp.dot(h, Wq[l], preferred_element_type=f32)             # (SEQ, E)
            k = jnp.dot(h, Wk[l], preferred_element_type=f32)
            v = jnp.dot(h, Wv[l], preferred_element_type=f32)
            for hh in range(HEADS):
                lo = hh * HEAD_DIM
                qh = q[:, lo:lo + HEAD_DIM]
                kh = k[:, lo:lo + HEAD_DIM]
                vh = v[:, lo:lo + HEAD_DIM]
                e = lax.dot_general(qh, kh, (((1,), (1,)), ((), ())),
                                    preferred_element_type=f32)           # (SEQ, SEQ)
                # additive mask bias (== masked_fill(-1e20)+clamp: both underflow to 0)
                e = (e + bias) * scale
                e = e - jnp.max(e, axis=-1, keepdims=True)
                p = jnp.exp(e)
                attn_w = p * pl.reciprocal(jnp.sum(p, axis=-1, keepdims=True),
                                           approx=True)
                cat_ref[:, lo:lo + HEAD_DIM] = jnp.dot(attn_w, vh,
                                                       preferred_element_type=f32)
            # -- fused (concat-over-heads) output projection --
            attn = jnp.dot(cat_ref[...], Wfc[l], preferred_element_type=f32) + Bfc[l]

            # -- TransformerBlock: residual + clamp + norm1, FFN, norm2 (dropout = id) --
            xres = jnp.clip(attn + h, -CLAMP, CLAMP)
            xn = _layernorm(xres, G1[l], B1[l], 1e-6)
            hid = jnp.maximum(
                jnp.dot(xn, W1[l], preferred_element_type=f32) + C1[l], 0.0)
            ff = jnp.dot(hid, W2[l], preferred_element_type=f32) + C2[l]
            h = _layernorm(ff + xn, G2[l], B2[l], 1e-6)

        # ---- latent projector on the mu/logvar token rows (lane-padded to 128 cols)
        out_ref[n] = jnp.dot(h[0:TOK, :], wlat, preferred_element_type=f32) + blat


# ------------------------------ wrapper ------------------------------
def _sinusoidal_pe(max_len, d):
    pos = jnp.arange(max_len, dtype=jnp.float32)[:, None]
    idx = jnp.arange(0, d, 2, dtype=jnp.float32)[None, :]
    ang = pos / jnp.power(10000.0, idx / d)
    pe = jnp.zeros((max_len, d), jnp.float32)
    pe = pe.at[:, 0::2].set(jnp.sin(ang))
    pe = pe.at[:, 1::2].set(jnp.cos(ang))
    return pe


def motion_encoder_forward(x, mask, p):
    bs = x.shape[0]
    f32 = jnp.float32

    # --- trace-time weight preparation (free for the kernel) ---
    eye_h = jnp.eye(HEADS, dtype=f32)
    blk = lambda w: jnp.kron(eye_h, w.T)   # per-head Linear -> block-diag (E,E), pre-T

    wq_s = jnp.stack([blk(lw["wq"]) for lw in p["layers"]])
    wk_s = jnp.stack([blk(lw["wk"]) for lw in p["layers"]])
    wv_s = jnp.stack([blk(lw["wv"]) for lw in p["layers"]])
    wfc_s = jnp.stack([lw["wfc"].T for lw in p["layers"]])
    bfc_s = jnp.stack([lw["bfc"].reshape(1, EMBED) for lw in p["layers"]])
    g1_s = jnp.stack([lw["g1"].reshape(1, EMBED) for lw in p["layers"]])
    b1_s = jnp.stack([lw["b1"].reshape(1, EMBED) for lw in p["layers"]])
    g2_s = jnp.stack([lw["g2"].reshape(1, EMBED) for lw in p["layers"]])
    b2_s = jnp.stack([lw["b2"].reshape(1, EMBED) for lw in p["layers"]])
    w1_s = jnp.stack([lw["w1"].T for lw in p["layers"]])
    c1_s = jnp.stack([lw["c1"].reshape(1, FF_HIDDEN) for lw in p["layers"]])
    w2_s = jnp.stack([lw["w2"].T for lw in p["layers"]])
    c2_s = jnp.stack([lw["c2"].reshape(1, EMBED) for lw in p["layers"]])

    wm_t = p["wm"].T                                    # (MOTION_DIM, E)
    bm = p["bm"].reshape(1, EMBED)
    wlat_pad = jnp.zeros((EMBED, LAT_PAD), f32).at[:, :DIM_LATENT].set(p["wlat"].T)
    blat_pad = jnp.zeros((1, LAT_PAD), f32).at[0, :DIM_LATENT].set(p["blat"])

    # tokens + positional encoding for all rows; motion rows get the embedding in-kernel
    pe = _sinusoidal_pe(MAX_LEN, EMBED)
    base = jnp.concatenate([p["mu_token"], p["logvar_token"],
                            jnp.zeros((NFRAMES, EMBED), f32)], axis=0) + pe[:SEQ]

    # key-padding mask -> additive bias; token keys are always visible
    key_mask = jnp.concatenate(
        [jnp.ones((bs, 1, 1, TOK), bool), mask.astype(bool)], axis=3)    # (bs,1,1,SEQ)
    mask_bias = ((key_mask.astype(f32) - 1.0) * CLAMP).reshape(bs, 1, SEQ)

    vmem = pl.BlockSpec(memory_space=pltpu.MemorySpace.VMEM)
    y = pl.pallas_call(
        encoder_kernel,
        out_shape=jax.ShapeDtypeStruct((bs, TOK, LAT_PAD), f32),
        in_specs=[vmem] * 20,
        out_specs=vmem,
        scratch_shapes=[pltpu.VMEM((SEQ, EMBED), f32),    # assembled input sequence
                        pltpu.VMEM((SEQ, EMBED), f32)],   # concatenated head outputs
    )(x, mask_bias, base, wm_t, bm,
      wq_s, wk_s, wv_s, wfc_s, bfc_s,
      g1_s, b1_s, g2_s, b2_s,
      w1_s, c1_s, w2_s, c2_s,
      wlat_pad, blat_pad)

    mu = y[:, :NUM_LATENTS, :DIM_LATENT]
    logvar = y[:, NUM_LATENTS:TOK, :DIM_LATENT]
    return mu, logvar


# -------------------------- pure-JAX reference --------------------------
def _ln_ref(z, g, b, eps):
    mu = jnp.mean(z, axis=-1, keepdims=True)
    var = jnp.mean((z - mu) ** 2, axis=-1, keepdims=True)
    return (z - mu) / jnp.sqrt(var + eps) * g + b


def _attn_ref(queries, keys, values, mask, wq, wk, wv, wfc, bfc):
    N, Lq, _ = queries.shape
    Lk, Lv = keys.shape[1], values.shape[1]
    qh = queries.reshape(N, Lq, HEADS, HEAD_DIM) @ wq.T
    kh = keys.reshape(N, Lk, HEADS, HEAD_DIM) @ wk.T
    vh = values.reshape(N, Lv, HEADS, HEAD_DIM) @ wv.T
    energy = jnp.einsum("nqhd,nkhd->nhqk", qh, kh)
    energy = jnp.where(mask, energy, -1e20)
    energy = jnp.clip(energy, -CLAMP, CLAMP)
    att = jax.nn.softmax(energy / jnp.sqrt(jnp.float32(EMBED)), axis=3)
    o = jnp.einsum("nhql,nlhd->nqhd", att, vh).reshape(N, Lq, EMBED)
    return o @ wfc.T + bfc


def _block_ref(h, mask, lw):
    # TransformerBlock.forward(value, key, query, mask) with value = key = query = h
    att = _attn_ref(h, h, h, mask, lw["wq"], lw["wk"], lw["wv"], lw["wfc"], lw["bfc"])
    x = jnp.clip(att + h, -CLAMP, CLAMP)
    x = _ln_ref(x, lw["g1"], lw["b1"], 1e-6)
    ff = jnp.maximum(x @ lw["w1"].T + lw["c1"], 0.0) @ lw["w2"].T + lw["c2"]
    return _ln_ref(ff + x, lw["g2"], lw["b2"], 1e-6)


def reference_forward(x, mask, p):
    bs = x.shape[0]
    mu_tok = jnp.broadcast_to(p["mu_token"][None], (bs, NUM_LATENTS, EMBED))
    lv_tok = jnp.broadcast_to(p["logvar_token"][None], (bs, NUM_LATENTS, EMBED))
    me = x @ p["wm"].T + p["bm"]
    seq = jnp.concatenate([mu_tok, lv_tok, me], axis=1)
    token_mask = jnp.ones((bs, 1, 1, TOK), bool)
    full_mask = jnp.concatenate([token_mask, mask.astype(bool)], axis=3)
    out = seq + _sinusoidal_pe(MAX_LEN, EMBED)[None, :SEQ, :]
    for lw in p["layers"]:
        out = _block_ref(out, full_mask, lw)
    mu = out[:, :NUM_LATENTS, :] @ p["wlat"].T + p["blat"]
    logvar = out[:, NUM_LATENTS:TOK, :] @ p["wlat"].T + p["blat"]
    return mu, logvar


# ------------------------------ init ------------------------------
def init_params(key):
    ks = jax.random.split(key, 6 + NUM_LAYERS)

    def lin(k, o, i, scale=0.08):
        return jax.random.normal(k, (o, i), jnp.float32) * scale

    p = {}
    p["mu_token"] = jax.random.normal(ks[0], (NUM_LATENTS, EMBED), jnp.float32)
    p["logvar_token"] = jax.random.normal(ks[1], (NUM_LATENTS, EMBED), jnp.float32)
    p["wm"] = lin(ks[2], EMBED, MOTION_DIM)
    p["bm"] = jax.random.normal(ks[3], (EMBED,), jnp.float32) * 0.05
    p["wlat"] = lin(ks[4], DIM_LATENT, EMBED)
    p["blat"] = jax.random.normal(ks[5], (DIM_LATENT,), jnp.float32) * 0.05
    layers = []
    for l in range(NUM_LAYERS):
        kk = jax.random.split(ks[6 + l], 9)
        layers.append({
            "wq": lin(kk[0], HEAD_DIM, HEAD_DIM),
            "wk": lin(kk[1], HEAD_DIM, HEAD_DIM),
            "wv": lin(kk[2], HEAD_DIM, HEAD_DIM),
            "wfc": lin(kk[3], EMBED, EMBED),
            "bfc": jax.random.normal(kk[4], (EMBED,), jnp.float32) * 0.05,
            "g1": jnp.ones((EMBED,), jnp.float32),
            "b1": jnp.zeros((EMBED,), jnp.float32),
            "g2": jnp.ones((EMBED,), jnp.float32),
            "b2": jnp.zeros((EMBED,), jnp.float32),
            "w1": lin(kk[5], FF_HIDDEN, EMBED),
            "c1": jax.random.normal(kk[6], (FF_HIDDEN,), jnp.float32) * 0.05,
            "w2": lin(kk[7], EMBED, FF_HIDDEN),
            "c2": jax.random.normal(kk[8], (EMBED,), jnp.float32) * 0.05,
        })
    p["layers"] = layers
    return p


if __name__ == "__main__":
    key = jax.random.PRNGKey(0)
    kx, kp = jax.random.split(key, 2)

    params = init_params(kp)
    x = jax.random.normal(kx, (BATCH, NFRAMES, MOTION_DIM), jnp.float32)
    # key-padding mask the module expects: (bs, 1, 1, nframes) bool; pad last 2 frames of batch 1
    frame_valid = jnp.array([[True] * NFRAMES,
                             [True] * (NFRAMES - 2) + [False, False]])
    mask = frame_valid[:, None, None, :]

    mu, logvar = motion_encoder_forward(x, mask, params)
    mu = jax.block_until_ready(mu)
    logvar = jax.block_until_ready(logvar)

    mu_ref, logvar_ref = reference_forward(x, mask, params)
    assert mu.shape == (BATCH, NUM_LATENTS, DIM_LATENT)
    assert logvar.shape == (BATCH, NUM_LATENTS, DIM_LATENT)
    assert bool(jnp.allclose(mu, mu_ref, atol=1e-2, rtol=1e-2)), "mu mismatch vs reference"
    assert bool(jnp.allclose(logvar, logvar_ref, atol=1e-2, rtol=1e-2)), "logvar mismatch vs reference"

    print("KERNEL_OK")
</pallas_src>

<mosaic_0001>
module attributes {stable_mosaic.version = 11 : i64} {
  func.func @encoder_kernel(%arg0: memref<2x8x4xf32, #tpu.memory_space<vmem>>, %arg1: memref<2x1x12xf32, #tpu.memory_space<vmem>>, %arg2: memref<12x32xf32, #tpu.memory_space<vmem>>, %arg3: memref<4x32xf32, #tpu.memory_space<vmem>>, %arg4: memref<1x32xf32, #tpu.memory_space<vmem>>, %arg5: memref<2x32x32xf32, #tpu.memory_space<vmem>>, %arg6: memref<2x32x32xf32, #tpu.memory_space<vmem>>, %arg7: memref<2x32x32xf32, #tpu.memory_space<vmem>>, %arg8: memref<2x32x32xf32, #tpu.memory_space<vmem>>, %arg9: memref<2x1x32xf32, #tpu.memory_space<vmem>>, %arg10: memref<2x1x32xf32, #tpu.memory_space<vmem>>, %arg11: memref<2x1x32xf32, #tpu.memory_space<vmem>>, %arg12: memref<2x1x32xf32, #tpu.memory_space<vmem>>, %arg13: memref<2x1x32xf32, #tpu.memory_space<vmem>>, %arg14: memref<2x32x128xf32, #tpu.memory_space<vmem>>, %arg15: memref<2x1x128xf32, #tpu.memory_space<vmem>>, %arg16: memref<2x128x32xf32, #tpu.memory_space<vmem>>, %arg17: memref<2x1x32xf32, #tpu.memory_space<vmem>>, %arg18: memref<32x128xf32, #tpu.memory_space<vmem>>, %arg19: memref<1x128xf32, #tpu.memory_space<vmem>>, %arg20: memref<2x4x128xf32, #tpu.memory_space<vmem>>, %arg21: memref<12x32xf32, #tpu.memory_space<vmem>>, %arg22: memref<12x32xf32, #tpu.memory_space<vmem>>) attributes {dimension_semantics = [], scalar_prefetch = 0 : i64, scratch_operands = 2 : i64, tpu.core_type = #tpu.core_type<tc>} {
    %cst = arith.constant 3.200000e+01 : f32
    %0 = math.sqrt %cst : f32
    %cst_0 = arith.constant 1.000000e+00 : f32
    %1 = arith.divf %cst_0, %0 : f32
    %c0 = arith.constant 0 : index
    %c0_1 = arith.constant 0 : index
    %2 = vector.load %arg3[%c0, %c0_1] : memref<4x32xf32, #tpu.memory_space<vmem>>, vector<4x32xf32>
    %c0_2 = arith.constant 0 : index
    %c0_3 = arith.constant 0 : index
    %3 = vector.load %arg4[%c0_2, %c0_3] : memref<1x32xf32, #tpu.memory_space<vmem>>, vector<1x32xf32>
    %c0_4 = arith.constant 0 : index
    %c0_5 = arith.constant 0 : index
    %4 = vector.load %arg18[%c0_4, %c0_5] : memref<32x128xf32, #tpu.memory_space<vmem>>, vector<32x128xf32>
    %c0_6 = arith.constant 0 : index
    %c0_7 = arith.constant 0 : index
    %5 = vector.load %arg19[%c0_6, %c0_7] : memref<1x128xf32, #tpu.memory_space<vmem>>, vector<1x128xf32>
    %c0_8 = arith.constant 0 : index
    %c0_9 = arith.constant 0 : index
    %c0_10 = arith.constant 0 : index
    %6 = vector.load %arg5[%c0_8, %c0_9, %c0_10] : memref<2x32x32xf32, #tpu.memory_space<vmem>>, vector<1x32x32xf32>
    %7 = vector.shape_cast %6 : vector<1x32x32xf32> to vector<32x32xf32>
    %c1 = arith.constant 1 : index
    %c0_11 = arith.constant 0 : index
    %c0_12 = arith.constant 0 : index
    %8 = vector.load %arg5[%c1, %c0_11, %c0_12] : memref<2x32x32xf32, #tpu.memory_space<vmem>>, vector<1x32x32xf32>
    %9 = vector.shape_cast %8 : vector<1x32x32xf32> to vector<32x32xf32>
    %c0_13 = arith.constant 0 : index
    %c0_14 = arith.constant 0 : index
    %c0_15 = arith.constant 0 : index
    %10 = vector.load %arg6[%c0_13, %c0_14, %c0_15] : memref<2x32x32xf32, #tpu.memory_space<vmem>>, vector<1x32x32xf32>
    %11 = vector.shape_cast %10 : vector<1x32x32xf32> to vector<32x32xf32>
    %c1_16 = arith.constant 1 : index
    %c0_17 = arith.constant 0 : index
    %c0_18 = arith.constant 0 : index
    %12 = vector.load %arg6[%c1_16, %c0_17, %c0_18] : memref<2x32x32xf32, #tpu.memory_space<vmem>>, vector<1x32x32xf32>
    %13 = vector.shape_cast %12 : vector<1x32x32xf32> to vector<32x32xf32>
    %c0_19 = arith.constant 0 : index
    %c0_20 = arith.constant 0 : index
    %c0_21 = arith.constant 0 : index
    %14 = vector.load %arg7[%c0_19, %c0_20, %c0_21] : memref<2x32x32xf32, #tpu.memory_space<vmem>>, vector<1x32x32xf32>
    %15 = vector.shape_cast %14 : vector<1x32x32xf32> to vector<32x32xf32>
    %c1_22 = arith.constant 1 : index
    %c0_23 = arith.constant 0 : index
    %c0_24 = arith.constant 0 : index
    %16 = vector.load %arg7[%c1_22, %c0_23, %c0_24] : memref<2x32x32xf32, #tpu.memory_space<vmem>>, vector<1x32x32xf32>
    %17 = vector.shape_cast %16 : vector<1x32x32xf32> to vector<32x32xf32>
    %c0_25 = arith.constant 0 : index
    %c0_26 = arith.constant 0 : index
    %c0_27 = arith.constant 0 : index
    %18 = vector.load %arg8[%c0_25, %c0_26, %c0_27] : memref<2x32x32xf32, #tpu.memory_space<vmem>>, vector<1x32x32xf32>
    %19 = vector.shape_cast %18 : vector<1x32x32xf32> to vector<32x32xf32>
    %c1_28 = arith.constant 1 : index
    %c0_29 = arith.constant 0 : index
    %c0_30 = arith.constant 0 : index
    %20 = vector.load %arg8[%c1_28, %c0_29, %c0_30] : memref<2x32x32xf32, #tpu.memory_space<vmem>>, vector<1x32x32xf32>
    %21 = vector.shape_cast %20 : vector<1x32x32xf32> to vector<32x32xf32>
    %c0_31 = arith.constant 0 : index
    %c0_32 = arith.constant 0 : index
    %c0_33 = arith.constant 0 : index
    %22 = vector.load %arg9[%c0_31, %c0_32, %c0_33] : memref<2x1x32xf32, #tpu.memory_space<vmem>>, vector<1x1x32xf32>
    %23 = vector.shape_cast %22 : vector<1x1x32xf32> to vector<1x32xf32>
    %c1_34 = arith.constant 1 : index
    %c0_35 = arith.constant 0 : index
    %c0_36 = arith.constant 0 : index
    %24 = vector.load %arg9[%c1_34, %c0_35, %c0_36] : memref<2x1x32xf32, #tpu.memory_space<vmem>>, vector<1x1x32xf32>
    %25 = vector.shape_cast %24 : vector<1x1x32xf32> to vector<1x32xf32>
    %c0_37 = arith.constant 0 : index
    %c0_38 = arith.constant 0 : index
    %c0_39 = arith.constant 0 : index
    %26 = vector.load %arg10[%c0_37, %c0_38, %c0_39] : memref<2x1x32xf32, #tpu.memory_space<vmem>>, vector<1x1x32xf32>
    %27 = vector.shape_cast %26 : vector<1x1x32xf32> to vector<1x32xf32>
    %c1_40 = arith.constant 1 : index
    %c0_41 = arith.constant 0 : index
    %c0_42 = arith.constant 0 : index
    %28 = vector.load %arg10[%c1_40, %c0_41, %c0_42] : memref<2x1x32xf32, #tpu.memory_space<vmem>>, vector<1x1x32xf32>
    %29 = vector.shape_cast %28 : vector<1x1x32xf32> to vector<1x32xf32>
    %c0_43 = arith.constant 0 : index
    %c0_44 = arith.constant 0 : index
    %c0_45 = arith.constant 0 : index
    %30 = vector.load %arg11[%c0_43, %c0_44, %c0_45] : memref<2x1x32xf32, #tpu.memory_space<vmem>>, vector<1x1x32xf32>
    %31 = vector.shape_cast %30 : vector<1x1x32xf32> to vector<1x32xf32>
    %c1_46 = arith.constant 1 : index
    %c0_47 = arith.constant 0 : index
    %c0_48 = arith.constant 0 : index
    %32 = vector.load %arg11[%c1_46, %c0_47, %c0_48] : memref<2x1x32xf32, #tpu.memory_space<vmem>>, vector<1x1x32xf32>
    %33 = vector.shape_cast %32 : vector<1x1x32xf32> to vector<1x32xf32>
    %c0_49 = arith.constant 0 : index
    %c0_50 = arith.constant 0 : index
    %c0_51 = arith.constant 0 : index
    %34 = vector.load %arg12[%c0_49, %c0_50, %c0_51] : memref<2x1x32xf32, #tpu.memory_space<vmem>>, vector<1x1x32xf32>
    %35 = vector.shape_cast %34 : vector<1x1x32xf32> to vector<1x32xf32>
    %c1_52 = arith.constant 1 : index
    %c0_53 = arith.constant 0 : index
    %c0_54 = arith.constant 0 : index
    %36 = vector.load %arg12[%c1_52, %c0_53, %c0_54] : memref<2x1x32xf32, #tpu.memory_space<vmem>>, vector<1x1x32xf32>
    %37 = vector.shape_cast %36 : vector<1x1x32xf32> to vector<1x32xf32>
    %c0_55 = arith.constant 0 : index
    %c0_56 = arith.constant 0 : index
    %c0_57 = arith.constant 0 : index
    %38 = vector.load %arg13[%c0_55, %c0_56, %c0_57] : memref<2x1x32xf32, #tpu.memory_space<vmem>>, vector<1x1x32xf32>
    %39 = vector.shape_cast %38 : vector<1x1x32xf32> to vector<1x32xf32>
    %c1_58 = arith.constant 1 : index
    %c0_59 = arith.constant 0 : index
    %c0_60 = arith.constant 0 : index
    %40 = vector.load %arg13[%c1_58, %c0_59, %c0_60] : memref<2x1x32xf32, #tpu.memory_space<vmem>>, vector<1x1x32xf32>
    %41 = vector.shape_cast %40 : vector<1x1x32xf32> to vector<1x32xf32>
    %c0_61 = arith.constant 0 : index
    %c0_62 = arith.constant 0 : index
    %c0_63 = arith.constant 0 : index
    %42 = vector.load %arg14[%c0_61, %c0_62, %c0_63] : memref<2x32x128xf32, #tpu.memory_space<vmem>>, vector<1x32x128xf32>
    %43 = vector.shape_cast %42 : vector<1x32x128xf32> to vector<32x128xf32>
    %c1_64 = arith.constant 1 : index
    %c0_65 = arith.constant 0 : index
    %c0_66 = arith.constant 0 : index
    %44 = vector.load %arg14[%c1_64, %c0_65, %c0_66] : memref<2x32x128xf32, #tpu.memory_space<vmem>>, vector<1x32x128xf32>
    %45 = vector.shape_cast %44 : vector<1x32x128xf32> to vector<32x128xf32>
    %c0_67 = arith.constant 0 : index
    %c0_68 = arith.constant 0 : index
    %c0_69 = arith.constant 0 : index
    %46 = vector.load %arg15[%c0_67, %c0_68, %c0_69] : memref<2x1x128xf32, #tpu.memory_space<vmem>>, vector<1x1x128xf32>
    %47 = vector.shape_cast %46 : vector<1x1x128xf32> to vector<1x128xf32>
    %c1_70 = arith.constant 1 : index
    %c0_71 = arith.constant 0 : index
    %c0_72 = arith.constant 0 : index
    %48 = vector.load %arg15[%c1_70, %c0_71, %c0_72] : memref<2x1x128xf32, #tpu.memory_space<vmem>>, vector<1x1x128xf32>
    %49 = vector.shape_cast %48 : vector<1x1x128xf32> to vector<1x128xf32>
    %c0_73 = arith.constant 0 : index
    %c0_74 = arith.constant 0 : index
    %c0_75 = arith.constant 0 : index
    %50 = vector.load %arg16[%c0_73, %c0_74, %c0_75] : memref<2x128x32xf32, #tpu.memory_space<vmem>>, vector<1x128x32xf32>
    %51 = vector.shape_cast %50 : vector<1x128x32xf32> to vector<128x32xf32>
    %c1_76 = arith.constant 1 : index
    %c0_77 = arith.constant 0 : index
    %c0_78 = arith.constant 0 : index
    %52 = vector.load %arg16[%c1_76, %c0_77, %c0_78] : memref<2x128x32xf32, #tpu.memory_space<vmem>>, vector<1x128x32xf32>
    %53 = vector.shape_cast %52 : vector<1x128x32xf32> to vector<128x32xf32>
    %c0_79 = arith.constant 0 : index
    %c0_80 = arith.constant 0 : index
    %c0_81 = arith.constant 0 : index
    %54 = vector.load %arg17[%c0_79, %c0_80, %c0_81] : memref<2x1x32xf32, #tpu.memory_space<vmem>>, vector<1x1x32xf32>
    %55 = vector.shape_cast %54 : vector<1x1x32xf32> to vector<1x32xf32>
    %c1_82 = arith.constant 1 : index
    %c0_83 = arith.constant 0 : index
    %c0_84 = arith.constant 0 : index
    %56 = vector.load %arg17[%c1_82, %c0_83, %c0_84] : memref<2x1x32xf32, #tpu.memory_space<vmem>>, vector<1x1x32xf32>
    %57 = vector.shape_cast %56 : vector<1x1x32xf32> to vector<1x32xf32>
    %c0_85 = arith.constant 0 : index
    %c0_86 = arith.constant 0 : index
    %c0_87 = arith.constant 0 : index
    %58 = vector.load %arg0[%c0_85, %c0_86, %c0_87] : memref<2x8x4xf32, #tpu.memory_space<vmem>>, vector<1x8x4xf32>
    %59 = vector.shape_cast %58 : vector<1x8x4xf32> to vector<8x4xf32>
    %cst_88 = arith.constant dense<0.000000e+00> : vector<8x32xf32>
    %60 = tpu.matmul %59, %2, %cst_88 {dimension_numbers = #tpu.dot_dimension_numbers<[1], [0], [0], [1], [0, 0, 1, 1], [], []>, precision = #tpu.contract_precision<fp32>} : vector<8x4xf32>, vector<4x32xf32>, vector<8x32xf32> -> vector<8x32xf32>
    %61 = vector.broadcast %3 : vector<1x32xf32> to vector<8x32xf32>
    %62 = arith.addf %60, %61 : vector<8x32xf32>
    %c0_89 = arith.constant 0 : index
    %c0_90 = arith.constant 0 : index
    %63 = vector.load %arg2[%c0_89, %c0_90] : memref<12x32xf32, #tpu.memory_space<vmem>>, vector<4x32xf32>
    %c0_91 = arith.constant 0 : index
    %c0_92 = arith.constant 0 : index
    %64 = vector.load %arg21[%c0_91, %c0_92] : memref<12x32xf32, #tpu.memory_space<vmem>>, vector<4x32xf32>
    tpu.vector_store %arg21[%c0_91, %c0_92], %63 {strides = array<i32>} : memref<12x32xf32, #tpu.memory_space<vmem>>, vector<4x32xf32>,
    %c4 = arith.constant 4 : index
    %c0_93 = arith.constant 0 : index
    %65 = vector.load %arg2[%c4, %c0_93] : memref<12x32xf32, #tpu.memory_space<vmem>>, vector<8x32xf32>
    %66 = arith.addf %65, %62 : vector<8x32xf32>
    %c4_94 = arith.constant 4 : index
    %c0_95 = arith.constant 0 : index
    %67 = vector.load %arg21[%c4_94, %c0_95] : memref<12x32xf32, #tpu.memory_space<vmem>>, vector<8x32xf32>
    tpu.vector_store %arg21[%c4_94, %c0_95], %66 {strides = array<i32>} : memref<12x32xf32, #tpu.memory_space<vmem>>, vector<8x32xf32>,
    %c0_96 = arith.constant 0 : index
    %c0_97 = arith.constant 0 : index
    %68 = vector.load %arg21[%c0_96, %c0_97] : memref<12x32xf32, #tpu.memory_space<vmem>>, vector<12x32xf32>
    %c0_98 = arith.constant 0 : index
    %c0_99 = arith.constant 0 : index
    %c0_100 = arith.constant 0 : index
    %69 = vector.load %arg1[%c0_98, %c0_99, %c0_100] : memref<2x1x12xf32, #tpu.memory_space<vmem>>, vector<1x1x12xf32>
    %70 = vector.shape_cast %69 : vector<1x1x12xf32> to vector<1x12xf32>
    %cst_101 = arith.constant dense<0.000000e+00> : vector<12x32xf32>
    %71 = tpu.matmul %68, %7, %cst_101 {dimension_numbers = #tpu.dot_dimension_numbers<[1], [0], [0], [1], [0, 0, 1, 1], [], []>, precision = #tpu.contract_precision<fp32>} : vector<12x32xf32>, vector<32x32xf32>, vector<12x32xf32> -> vector<12x32xf32>
    %cst_102 = arith.constant dense<0.000000e+00> : vector<12x32xf32>
    %72 = tpu.matmul %68, %11, %cst_102 {dimension_numbers = #tpu.dot_dimension_numbers<[1], [0], [0], [1], [0, 0, 1, 1], [], []>, precision = #tpu.contract_precision<fp32>} : vector<12x32xf32>, vector<32x32xf32>, vector<12x32xf32> -> vector<12x32xf32>
    %cst_103 = arith.constant dense<0.000000e+00> : vector<12x32xf32>
    %73 = tpu.matmul %68, %15, %cst_103 {dimension_numbers = #tpu.dot_dimension_numbers<[1], [0], [0], [1], [0, 0, 1, 1], [], []>, precision = #tpu.contract_precision<fp32>} : vector<12x32xf32>, vector<32x32xf32>, vector<12x32xf32> -> vector<12x32xf32>
    %74 = vector.extract_strided_slice %71 {offsets = [0, 0], sizes = [12, 8], strides = [1, 1]} : vector<12x32xf32> to vector<12x8xf32>
    %75 = vector.extract_strided_slice %72 {offsets = [0, 0], sizes = [12, 8], strides = [1, 1]} : vector<12x32xf32> to vector<12x8xf32>
    %76 = vector.extract_strided_slice %73 {offsets = [0, 0], sizes = [12, 8], strides = [1, 1]} : vector<12x32xf32> to vector<12x8xf32>
    %cst_104 = arith.constant dense<0.000000e+00> : vector<12x12xf32>
    %77 = tpu.matmul %74, %75, %cst_104 {dimension_numbers = #tpu.dot_dimension_numbers<[1], [1], [0], [0], [0, 0, 1, 0], [], []>, precision = #tpu.contract_precision<fp32>} : vector<12x8xf32>, vector<12x8xf32>, vector<12x12xf32> -> vector<12x12xf32>
    %78 = vector.broadcast %70 : vector<1x12xf32> to vector<12x12xf32>
    %79 = arith.addf %77, %78 : vector<12x12xf32>
    %80 = vector.broadcast %1 : f32 to vector<12x12xf32>
    %81 = arith.mulf %79, %80 : vector<12x12xf32>
    %cst_105 = arith.constant dense<0xFF800000> : vector<12xf32>
    %82 = vector.multi_reduction <maximumf>, %81, %cst_105 [1] : vector<12x12xf32> to vector<12xf32>
    %83 = vector.shape_cast %82 : vector<12xf32> to vector<12x1xf32>
    %84 = vector.broadcast %83 : vector<12x1xf32> to vector<12x12xf32>
    %85 = arith.subf %81, %84 : vector<12x12xf32>
    %86 = math.exp %85 : vector<12x12xf32>
    %cst_106 = arith.constant dense<0.000000e+00> : vector<12xf32>
    %87 = vector.multi_reduction <add>, %86, %cst_106 [1] : vector<12x12xf32> to vector<12xf32>
    %88 = vector.shape_cast %87 : vector<12xf32> to vector<12x1xf32>
    %89 = tpu.reciprocal %88 {approx = true} : vector<12x1xf32> -> vector<12x1xf32>
    %90 = vector.broadcast %89 : vector<12x1xf32> to vector<12x12xf32>
    %91 = arith.mulf %86, %90 : vector<12x12xf32>
    %cst_107 = arith.constant dense<0.000000e+00> : vector<12x8xf32>
    %92 = tpu.matmul %91, %76, %cst_107 {dimension_numbers = #tpu.dot_dimension_numbers<[1], [0], [0], [1], [0, 0, 1, 1], [], []>, precision = #tpu.contract_precision<fp32>} : vector<12x12xf32>, vector<12x8xf32>, vector<12x8xf32> -> vector<12x8xf32>
    %c0_108 = arith.constant 0 : index
    %c0_109 = arith.constant 0 : index
    %93 = vector.load %arg22[%c0_108, %c0_109] : memref<12x32xf32, #tpu.memory_space<vmem>>, vector<12x8xf32>
    tpu.vector_store %arg22[%c0_108, %c0_109], %92 {strides = array<i32>} : memref<12x32xf32, #tpu.memory_space<vmem>>, vector<12x8xf32>,
    %94 = vector.extract_strided_slice %71 {offsets = [0, 8], sizes = [12, 8], strides = [1, 1]} : vector<12x32xf32> to vector<12x8xf32>
    %95 = vector.extract_strided_slice %72 {offsets = [0, 8], sizes = [12, 8], strides = [1, 1]} : vector<12x32xf32> to vector<12x8xf32>
    %96 = vector.extract_strided_slice %73 {offsets = [0, 8], sizes = [12, 8], strides = [1, 1]} : vector<12x32xf32> to vector<12x8xf32>
    %cst_110 = arith.constant dense<0.000000e+00> : vector<12x12xf32>
    %97 = tpu.matmul %94, %95, %cst_110 {dimension_numbers = #tpu.dot_dimension_numbers<[1], [1], [0], [0], [0, 0, 1, 0], [], []>, precision = #tpu.contract_precision<fp32>} : vector<12x8xf32>, vector<12x8xf32>, vector<12x12xf32> -> vector<12x12xf32>
    %98 = vector.broadcast %70 : vector<1x12xf32> to vector<12x12xf32>
    %99 = arith.addf %97, %98 : vector<12x12xf32>
    %100 = vector.broadcast %1 : f32 to vector<12x12xf32>
    %101 = arith.mulf %99, %100 : vector<12x12xf32>
    %cst_111 = arith.constant dense<0xFF800000> : vector<12xf32>
    %102 = vector.multi_reduction <maximumf>, %101, %cst_111 [1] : vector<12x12xf32> to vector<12xf32>
    %103 = vector.shape_cast %102 : vector<12xf32> to vector<12x1xf32>
    %104 = vector.broadcast %103 : vector<12x1xf32> to vector<12x12xf32>
    %105 = arith.subf %101, %104 : vector<12x12xf32>
    %106 = math.exp %105 : vector<12x12xf32>
    %cst_112 = arith.constant dense<0.000000e+00> : vector<12xf32>
    %107 = vector.multi_reduction <add>, %106, %cst_112 [1] : vector<12x12xf32> to vector<12xf32>
    %108 = vector.shape_cast %107 : vector<12xf32> to vector<12x1xf32>
    %109 = tpu.reciprocal %108 {approx = true} : vector<12x1xf32> -> vector<12x1xf32>
    %110 = vector.broadcast %109 : vector<12x1xf32> to vector<12x12xf32>
    %111 = arith.mulf %106, %110 : vector<12x12xf32>
    %cst_113 = arith.constant dense<0.000000e+00> : vector<12x8xf32>
    %112 = tpu.matmul %111, %96, %cst_113 {dimension_numbers = #tpu.dot_dimension_numbers<[1], [0], [0], [1], [0, 0, 1, 1], [], []>, precision = #tpu.contract_precision<fp32>} : vector<12x12xf32>, vector<12x8xf32>, vector<12x8xf32> -> vector<12x8xf32>
    %c0_114 = arith.constant 0 : index
    %c8 = arith.constant 8 : index
    %113 = vector.load %arg22[%c0_114, %c8] : memref<12x32xf32, #tpu.memory_space<vmem>>, vector<12x8xf32>
    tpu.vector_store %arg22[%c0_114, %c8], %112 {strides = array<i32>} : memref<12x32xf32, #tpu.memory_space<vmem>>, vector<12x8xf32>,
    %114 = vector.extract_strided_slice %71 {offsets = [0, 16], sizes = [12, 8], strides = [1, 1]} : vector<12x32xf32> to vector<12x8xf32>
    %115 = vector.extract_strided_slice %72 {offsets = [0, 16], sizes = [12, 8], strides = [1, 1]} : vector<12x32xf32> to vector<12x8xf32>
    %116 = vector.extract_strided_slice %73 {offsets = [0, 16], sizes = [12, 8], strides = [1, 1]} : vector<12x32xf32> to vector<12x8xf32>
    %cst_115 = arith.constant dense<0.000000e+00> : vector<12x12xf32>
    %117 = tpu.matmul %114, %115, %cst_115 {dimension_numbers = #tpu.dot_dimension_numbers<[1], [1], [0], [0], [0, 0, 1, 0], [], []>, precision = #tpu.contract_precision<fp32>} : vector<12x8xf32>, vector<12x8xf32>, vector<12x12xf32> -> vector<12x12xf32>
    %118 = vector.broadcast %70 : vector<1x12xf32> to vector<12x12xf32>
    %119 = arith.addf %117, %118 : vector<12x12xf32>
    %120 = vector.broadcast %1 : f32 to vector<12x12xf32>
    %121 = arith.mulf %119, %120 : vector<12x12xf32>
    %cst_116 = arith.constant dense<0xFF800000> : vector<12xf32>
    %122 = vector.multi_reduction <maximumf>, %121, %cst_116 [1] : vector<12x12xf32> to vector<12xf32>
    %123 = vector.shape_cast %122 : vector<12xf32> to vector<12x1xf32>
    %124 = vector.broadcast %123 : vector<12x1xf32> to vector<12x12xf32>
    %125 = arith.subf %121, %124 : vector<12x12xf32>
    %126 = math.exp %125 : vector<12x12xf32>
    %cst_117 = arith.constant dense<0.000000e+00> : vector<12xf32>
    %127 = vector.multi_reduction <add>, %126, %cst_117 [1] : vector<12x12xf32> to vector<12xf32>
    %128 = vector.shape_cast %127 : vector<12xf32> to vector<12x1xf32>
    %129 = tpu.reciprocal %128 {approx = true} : vector<12x1xf32> -> vector<12x1xf32>
    %130 = vector.broadcast %129 : vector<12x1xf32> to vector<12x12xf32>
    %131 = arith.mulf %126, %130 : vector<12x12xf32>
    %cst_118 = arith.constant dense<0.000000e+00> : vector<12x8xf32>
    %132 = tpu.matmul %131, %116, %cst_118 {dimension_numbers = #tpu.dot_dimension_numbers<[1], [0], [0], [1], [0, 0, 1, 1], [], []>, precision = #tpu.contract_precision<fp32>} : vector<12x12xf32>, vector<12x8xf32>, vector<12x8xf32> -> vector<12x8xf32>
    %c0_119 = arith.constant 0 : index
    %c16 = arith.constant 16 : index
    %133 = vector.load %arg22[%c0_119, %c16] : memref<12x32xf32, #tpu.memory_space<vmem>>, vector<12x8xf32>
    tpu.vector_store %arg22[%c0_119, %c16], %132 {strides = array<i32>} : memref<12x32xf32, #tpu.memory_space<vmem>>, vector<12x8xf32>,
    %134 = vector.extract_strided_slice %71 {offsets = [0, 24], sizes = [12, 8], strides = [1, 1]} : vector<12x32xf32> to vector<12x8xf32>
    %135 = vector.extract_strided_slice %72 {offsets = [0, 24], sizes = [12, 8], strides = [1, 1]} : vector<12x32xf32> to vector<12x8xf32>
    %136 = vector.extract_strided_slice %73 {offsets = [0, 24], sizes = [12, 8], strides = [1, 1]} : vector<12x32xf32> to vector<12x8xf32>
    %cst_120 = arith.constant dense<0.000000e+00> : vector<12x12xf32>
    %137 = tpu.matmul %134, %135, %cst_120 {dimension_numbers = #tpu.dot_dimension_numbers<[1], [1], [0], [0], [0, 0, 1, 0], [], []>, precision = #tpu.contract_precision<fp32>} : vector<12x8xf32>, vector<12x8xf32>, vector<12x12xf32> -> vector<12x12xf32>
    %138 = vector.broadcast %70 : vector<1x12xf32> to vector<12x12xf32>
    %139 = arith.addf %137, %138 : vector<12x12xf32>
    %140 = vector.broadcast %1 : f32 to vector<12x12xf32>
    %141 = arith.mulf %139, %140 : vector<12x12xf32>
    %cst_121 = arith.constant dense<0xFF800000> : vector<12xf32>
    %142 = vector.multi_reduction <maximumf>, %141, %cst_121 [1] : vector<12x12xf32> to vector<12xf32>
    %143 = vector.shape_cast %142 : vector<12xf32> to vector<12x1xf32>
    %144 = vector.broadcast %143 : vector<12x1xf32> to vector<12x12xf32>
    %145 = arith.subf %141, %144 : vector<12x12xf32>
    %146 = math.exp %145 : vector<12x12xf32>
    %cst_122 = arith.constant dense<0.000000e+00> : vector<12xf32>
    %147 = vector.multi_reduction <add>, %146, %cst_122 [1] : vector<12x12xf32> to vector<12xf32>
    %148 = vector.shape_cast %147 : vector<12xf32> to vector<12x1xf32>
    %149 = tpu.reciprocal %148 {approx = true} : vector<12x1xf32> -> vector<12x1xf32>
    %150 = vector.broadcast %149 : vector<12x1xf32> to vector<12x12xf32>
    %151 = arith.mulf %146, %150 : vector<12x12xf32>
    %cst_123 = arith.constant dense<0.000000e+00> : vector<12x8xf32>
    %152 = tpu.matmul %151, %136, %cst_123 {dimension_numbers = #tpu.dot_dimension_numbers<[1], [0], [0], [1], [0, 0, 1, 1], [], []>, precision = #tpu.contract_precision<fp32>} : vector<12x12xf32>, vector<12x8xf32>, vector<12x8xf32> -> vector<12x8xf32>
    %c0_124 = arith.constant 0 : index
    %c24 = arith.constant 24 : index
    %153 = vector.load %arg22[%c0_124, %c24] : memref<12x32xf32, #tpu.memory_space<vmem>>, vector<12x8xf32>
    tpu.vector_store %arg22[%c0_124, %c24], %152 {strides = array<i32>} : memref<12x32xf32, #tpu.memory_space<vmem>>, vector<12x8xf32>,
    %c0_125 = arith.constant 0 : index
    %c0_126 = arith.constant 0 : index
    %154 = vector.load %arg22[%c0_125, %c0_126] : memref<12x32xf32, #tpu.memory_space<vmem>>, vector<12x32xf32>
    %cst_127 = arith.constant dense<0.000000e+00> : vector<12x32xf32>
    %155 = tpu.matmul %154, %19, %cst_127 {dimension_numbers = #tpu.dot_dimension_numbers<[1], [0], [0], [1], [0, 0, 1, 1], [], []>, precision = #tpu.contract_precision<fp32>} : vector<12x32xf32>, vector<32x32xf32>, vector<12x32xf32> -> vector<12x32xf32>
    %156 = vector.broadcast %23 : vector<1x32xf32> to vector<12x32xf32>
    %157 = arith.addf %155, %156 : vector<12x32xf32>
    %158 = arith.addf %157, %68 : vector<12x32xf32>
    %cst_128 = arith.constant -1.000000e+06 : f32
    %cst_129 = arith.constant 1.000000e+06 : f32
    %159 = vector.broadcast %cst_128 : f32 to vector<12x32xf32>
    %160 = arith.maximumf %159, %158 : vector<12x32xf32>
    %161 = vector.broadcast %cst_129 : f32 to vector<12x32xf32>
    %162 = arith.minimumf %161, %160 : vector<12x32xf32>
    %cst_130 = arith.constant dense<0.000000e+00> : vector<12xf32>
    %163 = vector.multi_reduction <add>, %162, %cst_130 [1] : vector<12x32xf32> to vector<12xf32>
    %164 = vector.shape_cast %163 : vector<12xf32> to vector<12x1xf32>
    %cst_131 = arith.constant 3.200000e+01 : f32
    %165 = vector.broadcast %cst_131 : f32 to vector<12x1xf32>
    %166 = arith.divf %164, %165 : vector<12x1xf32>
    %167 = vector.broadcast %166 : vector<12x1xf32> to vector<12x32xf32>
    %168 = arith.subf %162, %167 : vector<12x32xf32>
    %169 = arith.mulf %168, %168 : vector<12x32xf32>
    %cst_132 = arith.constant dense<0.000000e+00> : vector<12xf32>
    %170 = vector.multi_reduction <add>, %169, %cst_132 [1] : vector<12x32xf32> to vector<12xf32>
    %171 = vector.shape_cast %170 : vector<12xf32> to vector<12x1xf32>
    %cst_133 = arith.constant 3.200000e+01 : f32
    %172 = vector.broadcast %cst_133 : f32 to vector<12x1xf32>
    %173 = arith.divf %171, %172 : vector<12x1xf32>
    %174 = vector.broadcast %166 : vector<12x1xf32> to vector<12x32xf32>
    %175 = arith.subf %162, %174 : vector<12x32xf32>
    %cst_134 = arith.constant 9.99999997E-7 : f32
    %176 = vector.broadcast %cst_134 : f32 to vector<12x1xf32>
    %177 = arith.addf %173, %176 : vector<12x1xf32>
    %178 = math.rsqrt %177 : vector<12x1xf32>
    %179 = vector.broadcast %178 : vector<12x1xf32> to vector<12x32xf32>
    %180 = arith.mulf %175, %179 : vector<12x32xf32>
    %181 = vector.broadcast %27 : vector<1x32xf32> to vector<12x32xf32>
    %182 = arith.mulf %180, %181 : vector<12x32xf32>
    %183 = vector.broadcast %31 : vector<1x32xf32> to vector<12x32xf32>
    %184 = arith.addf %182, %183 : vector<12x32xf32>
    %cst_135 = arith.constant dense<0.000000e+00> : vector<12x128xf32>
    %185 = tpu.matmul %184, %43, %cst_135 {dimension_numbers = #tpu.dot_dimension_numbers<[1], [0], [0], [1], [0, 0, 1, 1], [], []>, precision = #tpu.contract_precision<fp32>} : vector<12x32xf32>, vector<32x128xf32>, vector<12x128xf32> -> vector<12x128xf32>
    %186 = vector.broadcast %47 : vector<1x128xf32> to vector<12x128xf32>
    %187 = arith.addf %185, %186 : vector<12x128xf32>
    %cst_136 = arith.constant 0.000000e+00 : f32
    %188 = vector.broadcast %cst_136 : f32 to vector<12x128xf32>
    %189 = arith.maximumf %187, %188 : vector<12x128xf32>
    %cst_137 = arith.constant dense<0.000000e+00> : vector<12x32xf32>
    %190 = tpu.matmul %189, %51, %cst_137 {dimension_numbers = #tpu.dot_dimension_numbers<[1], [0], [0], [1], [0, 0, 1, 1], [], []>, precision = #tpu.contract_precision<fp32>} : vector<12x128xf32>, vector<128x32xf32>, vector<12x32xf32> -> vector<12x32xf32>
    %191 = vector.broadcast %55 : vector<1x32xf32> to vector<12x32xf32>
    %192 = arith.addf %190, %191 : vector<12x32xf32>
    %193 = arith.addf %192, %184 : vector<12x32xf32>
    %cst_138 = arith.constant dense<0.000000e+00> : vector<12xf32>
    %194 = vector.multi_reduction <add>, %193, %cst_138 [1] : vector<12x32xf32> to vector<12xf32>
    %195 = vector.shape_cast %194 : vector<12xf32> to vector<12x1xf32>
    %cst_139 = arith.constant 3.200000e+01 : f32
    %196 = vector.broadcast %cst_139 : f32 to vector<12x1xf32>
    %197 = arith.divf %195, %196 : vector<12x1xf32>
    %198 = vector.broadcast %197 : vector<12x1xf32> to vector<12x32xf32>
    %199 = arith.subf %193, %198 : vector<12x32xf32>
    %200 = arith.mulf %199, %199 : vector<12x32xf32>
    %cst_140 = arith.constant dense<0.000000e+00> : vector<12xf32>
    %201 = vector.multi_reduction <add>, %200, %cst_140 [1] : vector<12x32xf32> to vector<12xf32>
    %202 = vector.shape_cast %201 : vector<12xf32> to vector<12x1xf32>
    %cst_141 = arith.constant 3.200000e+01 : f32
    %203 = vector.broadcast %cst_141 : f32 to vector<12x1xf32>
    %204 = arith.divf %202, %203 : vector<12x1xf32>
    %205 = vector.broadcast %197 : vector<12x1xf32> to vector<12x32xf32>
    %206 = arith.subf %193, %205 : vector<12x32xf32>
    %cst_142 = arith.constant 9.99999997E-7 : f32
    %207 = vector.broadcast %cst_142 : f32 to vector<12x1xf32>
    %208 = arith.addf %204, %207 : vector<12x1xf32>
    %209 = math.rsqrt %208 : vector<12x1xf32>
    %210 = vector.broadcast %209 : vector<12x1xf32> to vector<12x32xf32>
    %211 = arith.mulf %206, %210 : vector<12x32xf32>
    %212 = vector.broadcast %35 : vector<1x32xf32> to vector<12x32xf32>
    %213 = arith.mulf %211, %212 : vector<12x32xf32>
    %214 = vector.broadcast %39 : vector<1x32xf32> to vector<12x32xf32>
    %215 = arith.addf %213, %214 : vector<12x32xf32>
    %cst_143 = arith.constant dense<0.000000e+00> : vector<12x32xf32>
    %216 = tpu.matmul %215, %9, %cst_143 {dimension_numbers = #tpu.dot_dimension_numbers<[1], [0], [0], [1], [0, 0, 1, 1], [], []>, precision = #tpu.contract_precision<fp32>} : vector<12x32xf32>, vector<32x32xf32>, vector<12x32xf32> -> vector<12x32xf32>
    %cst_144 = arith.constant dense<0.000000e+00> : vector<12x32xf32>
    %217 = tpu.matmul %215, %13, %cst_144 {dimension_numbers = #tpu.dot_dimension_numbers<[1], [0], [0], [1], [0, 0, 1, 1], [], []>, precision = #tpu.contract_precision<fp32>} : vector<12x32xf32>, vector<32x32xf32>, vector<12x32xf32> -> vector<12x32xf32>
    %cst_145 = arith.constant dense<0.000000e+00> : vector<12x32xf32>
    %218 = tpu.matmul %215, %17, %cst_145 {dimension_numbers = #tpu.dot_dimension_numbers<[1], [0], [0], [1], [0, 0, 1, 1], [], []>, precision = #tpu.contract_precision<fp32>} : vector<12x32xf32>, vector<32x32xf32>, vector<12x32xf32> -> vector<12x32xf32>
    %219 = vector.extract_strided_slice %216 {offsets = [0, 0], sizes = [12, 8], strides = [1, 1]} : vector<12x32xf32> to vector<12x8xf32>
    %220 = vector.extract_strided_slice %217 {offsets = [0, 0], sizes = [12, 8], strides = [1, 1]} : vector<12x32xf32> to vector<12x8xf32>
    %221 = vector.extract_strided_slice %218 {offsets = [0, 0], sizes = [12, 8], strides = [1, 1]} : vector<12x32xf32> to vector<12x8xf32>
    %cst_146 = arith.constant dense<0.000000e+00> : vector<12x12xf32>
    %222 = tpu.matmul %219, %220, %cst_146 {dimension_numbers = #tpu.dot_dimension_numbers<[1], [1], [0], [0], [0, 0, 1, 0], [], []>, precision = #tpu.contract_precision<fp32>} : vector<12x8xf32>, vector<12x8xf32>, vector<12x12xf32> -> vector<12x12xf32>
    %223 = vector.broadcast %70 : vector<1x12xf32> to vector<12x12xf32>
    %224 = arith.addf %222, %223 : vector<12x12xf32>
    %225 = vector.broadcast %1 : f32 to vector<12x12xf32>
    %226 = arith.mulf %224, %225 : vector<12x12xf32>
    %cst_147 = arith.constant dense<0xFF800000> : vector<12xf32>
    %227 = vector.multi_reduction <maximumf>, %226, %cst_147 [1] : vector<12x12xf32> to vector<12xf32>
    %228 = vector.shape_cast %227 : vector<12xf32> to vector<12x1xf32>
    %229 = vector.broadcast %228 : vector<12x1xf32> to vector<12x12xf32>
    %230 = arith.subf %226, %229 : vector<12x12xf32>
    %231 = math.exp %230 : vector<12x12xf32>
    %cst_148 = arith.constant dense<0.000000e+00> : vector<12xf32>
    %232 = vector.multi_reduction <add>, %231, %cst_148 [1] : vector<12x12xf32> to vector<12xf32>
    %233 = vector.shape_cast %232 : vector<12xf32> to vector<12x1xf32>
    %234 = tpu.reciprocal %233 {approx = true} : vector<12x1xf32> -> vector<12x1xf32>
    %235 = vector.broadcast %234 : vector<12x1xf32> to vector<12x12xf32>
    %236 = arith.mulf %231, %235 : vector<12x12xf32>
    %cst_149 = arith.constant dense<0.000000e+00> : vector<12x8xf32>
    %237 = tpu.matmul %236, %221, %cst_149 {dimension_numbers = #tpu.dot_dimension_numbers<[1], [0], [0], [1], [0, 0, 1, 1], [], []>, precision = #tpu.contract_precision<fp32>} : vector<12x12xf32>, vector<12x8xf32>, vector<12x8xf32> -> vector<12x8xf32>
    %c0_150 = arith.constant 0 : index
    %c0_151 = arith.constant 0 : index
    %238 = vector.load %arg22[%c0_150, %c0_151] : memref<12x32xf32, #tpu.memory_space<vmem>>, vector<12x8xf32>
    tpu.vector_store %arg22[%c0_150, %c0_151], %237 {strides = array<i32>} : memref<12x32xf32, #tpu.memory_space<vmem>>, vector<12x8xf32>,
    %239 = vector.extract_strided_slice %216 {offsets = [0, 8], sizes = [12, 8], strides = [1, 1]} : vector<12x32xf32> to vector<12x8xf32>
    %240 = vector.extract_strided_slice %217 {offsets = [0, 8], sizes = [12, 8], strides = [1, 1]} : vector<12x32xf32> to vector<12x8xf32>
    %241 = vector.extract_strided_slice %218 {offsets = [0, 8], sizes = [12, 8], strides = [1, 1]} : vector<12x32xf32> to vector<12x8xf32>
    %cst_152 = arith.constant dense<0.000000e+00> : vector<12x12xf32>
    %242 = tpu.matmul %239, %240, %cst_152 {dimension_numbers = #tpu.dot_dimension_numbers<[1], [1], [0], [0], [0, 0, 1, 0], [], []>, precision = #tpu.contract_precision<fp32>} : vector<12x8xf32>, vector<12x8xf32>, vector<12x12xf32> -> vector<12x12xf32>
    %243 = vector.broadcast %70 : vector<1x12xf32> to vector<12x12xf32>
    %244 = arith.addf %242, %243 : vector<12x12xf32>
    %245 = vector.broadcast %1 : f32 to vector<12x12xf32>
    %246 = arith.mulf %244, %245 : vector<12x12xf32>
    %cst_153 = arith.constant dense<0xFF800000> : vector<12xf32>
    %247 = vector.multi_reduction <maximumf>, %246, %cst_153 [1] : vector<12x12xf32> to vector<12xf32>
    %248 = vector.shape_cast %247 : vector<12xf32> to vector<12x1xf32>
    %249 = vector.broadcast %248 : vector<12x1xf32> to vector<12x12xf32>
    %250 = arith.subf %246, %249 : vector<12x12xf32>
    %251 = math.exp %250 : vector<12x12xf32>
    %cst_154 = arith.constant dense<0.000000e+00> : vector<12xf32>
    %252 = vector.multi_reduction <add>, %251, %cst_154 [1] : vector<12x12xf32> to vector<12xf32>
    %253 = vector.shape_cast %252 : vector<12xf32> to vector<12x1xf32>
    %254 = tpu.reciprocal %253 {approx = true} : vector<12x1xf32> -> vector<12x1xf32>
    %255 = vector.broadcast %254 : vector<12x1xf32> to vector<12x12xf32>
    %256 = arith.mulf %251, %255 : vector<12x12xf32>
    %cst_155 = arith.constant dense<0.000000e+00> : vector<12x8xf32>
    %257 = tpu.matmul %256, %241, %cst_155 {dimension_numbers = #tpu.dot_dimension_numbers<[1], [0], [0], [1], [0, 0, 1, 1], [], []>, precision = #tpu.contract_precision<fp32>} : vector<12x12xf32>, vector<12x8xf32>, vector<12x8xf32> -> vector<12x8xf32>
    %c0_156 = arith.constant 0 : index
    %c8_157 = arith.constant 8 : index
    %258 = vector.load %arg22[%c0_156, %c8_157] : memref<12x32xf32, #tpu.memory_space<vmem>>, vector<12x8xf32>
    tpu.vector_store %arg22[%c0_156, %c8_157], %257 {strides = array<i32>} : memref<12x32xf32, #tpu.memory_space<vmem>>, vector<12x8xf32>,
    %259 = vector.extract_strided_slice %216 {offsets = [0, 16], sizes = [12, 8], strides = [1, 1]} : vector<12x32xf32> to vector<12x8xf32>
    %260 = vector.extract_strided_slice %217 {offsets = [0, 16], sizes = [12, 8], strides = [1, 1]} : vector<12x32xf32> to vector<12x8xf32>
    %261 = vector.extract_strided_slice %218 {offsets = [0, 16], sizes = [12, 8], strides = [1, 1]} : vector<12x32xf32> to vector<12x8xf32>
    %cst_158 = arith.constant dense<0.000000e+00> : vector<12x12xf32>
    %262 = tpu.matmul %259, %260, %cst_158 {dimension_numbers = #tpu.dot_dimension_numbers<[1], [1], [0], [0], [0, 0, 1, 0], [], []>, precision = #tpu.contract_precision<fp32>} : vector<12x8xf32>, vector<12x8xf32>, vector<12x12xf32> -> vector<12x12xf32>
    %263 = vector.broadcast %70 : vector<1x12xf32> to vector<12x12xf32>
    %264 = arith.addf %262, %263 : vector<12x12xf32>
    %265 = vector.broadcast %1 : f32 to vector<12x12xf32>
    %266 = arith.mulf %264, %265 : vector<12x12xf32>
    %cst_159 = arith.constant dense<0xFF800000> : vector<12xf32>
    %267 = vector.multi_reduction <maximumf>, %266, %cst_159 [1] : vector<12x12xf32> to vector<12xf32>
    %268 = vector.shape_cast %267 : vector<12xf32> to vector<12x1xf32>
    %269 = vector.broadcast %268 : vector<12x1xf32> to vector<12x12xf32>
    %270 = arith.subf %266, %269 : vector<12x12xf32>
    %271 = math.exp %270 : vector<12x12xf32>
    %cst_160 = arith.constant dense<0.000000e+00> : vector<12xf32>
    %272 = vector.multi_reduction <add>, %271, %cst_160 [1] : vector<12x12xf32> to vector<12xf32>
    %273 = vector.shape_cast %272 : vector<12xf32> to vector<12x1xf32>
    %274 = tpu.reciprocal %273 {approx = true} : vector<12x1xf32> -> vector<12x1xf32>
    %275 = vector.broadcast %274 : vector<12x1xf32> to vector<12x12xf32>
    %276 = arith.mulf %271, %275 : vector<12x12xf32>
    %cst_161 = arith.constant dense<0.000000e+00> : vector<12x8xf32>
    %277 = tpu.matmul %276, %261, %cst_161 {dimension_numbers = #tpu.dot_dimension_numbers<[1], [0], [0], [1], [0, 0, 1, 1], [], []>, precision = #tpu.contract_precision<fp32>} : vector<12x12xf32>, vector<12x8xf32>, vector<12x8xf32> -> vector<12x8xf32>
    %c0_162 = arith.constant 0 : index
    %c16_163 = arith.constant 16 : index
    %278 = vector.load %arg22[%c0_162, %c16_163] : memref<12x32xf32, #tpu.memory_space<vmem>>, vector<12x8xf32>
    tpu.vector_store %arg22[%c0_162, %c16_163], %277 {strides = array<i32>} : memref<12x32xf32, #tpu.memory_space<vmem>>, vector<12x8xf32>,
    %279 = vector.extract_strided_slice %216 {offsets = [0, 24], sizes = [12, 8], strides = [1, 1]} : vector<12x32xf32> to vector<12x8xf32>
    %280 = vector.extract_strided_slice %217 {offsets = [0, 24], sizes = [12, 8], strides = [1, 1]} : vector<12x32xf32> to vector<12x8xf32>
    %281 = vector.extract_strided_slice %218 {offsets = [0, 24], sizes = [12, 8], strides = [1, 1]} : vector<12x32xf32> to vector<12x8xf32>
    %cst_164 = arith.constant dense<0.000000e+00> : vector<12x12xf32>
    %282 = tpu.matmul %279, %280, %cst_164 {dimension_numbers = #tpu.dot_dimension_numbers<[1], [1], [0], [0], [0, 0, 1, 0], [], []>, precision = #tpu.contract_precision<fp32>} : vector<12x8xf32>, vector<12x8xf32>, vector<12x12xf32> -> vector<12x12xf32>
    %283 = vector.broadcast %70 : vector<1x12xf32> to vector<12x12xf32>
    %284 = arith.addf %282, %283 : vector<12x12xf32>
    %285 = vector.broadcast %1 : f32 to vector<12x12xf32>
    %286 = arith.mulf %284, %285 : vector<12x12xf32>
    %cst_165 = arith.constant dense<0xFF800000> : vector<12xf32>
    %287 = vector.multi_reduction <maximumf>, %286, %cst_165 [1] : vector<12x12xf32> to vector<12xf32>
    %288 = vector.shape_cast %287 : vector<12xf32> to vector<12x1xf32>
    %289 = vector.broadcast %288 : vector<12x1xf32> to vector<12x12xf32>
    %290 = arith.subf %286, %289 : vector<12x12xf32>
    %291 = math.exp %290 : vector<12x12xf32>
    %cst_166 = arith.constant dense<0.000000e+00> : vector<12xf32>
    %292 = vector.multi_reduction <add>, %291, %cst_166 [1] : vector<12x12xf32> to vector<12xf32>
    %293 = vector.shape_cast %292 : vector<12xf32> to vector<12x1xf32>
    %294 = tpu.reciprocal %293 {approx = true} : vector<12x1xf32> -> vector<12x1xf32>
    %295 = vector.broadcast %294 : vector<12x1xf32> to vector<12x12xf32>
    %296 = arith.mulf %291, %295 : vector<12x12xf32>
    %cst_167 = arith.constant dense<0.000000e+00> : vector<12x8xf32>
    %297 = tpu.matmul %296, %281, %cst_167 {dimension_numbers = #tpu.dot_dimension_numbers<[1], [0], [0], [1], [0, 0, 1, 1], [], []>, precision = #tpu.contract_precision<fp32>} : vector<12x12xf32>, vector<12x8xf32>, vector<12x8xf32> -> vector<12x8xf32>
    %c0_168 = arith.constant 0 : index
    %c24_169 = arith.constant 24 : index
    %298 = vector.load %arg22[%c0_168, %c24_169] : memref<12x32xf32, #tpu.memory_space<vmem>>, vector<12x8xf32>
    tpu.vector_store %arg22[%c0_168, %c24_169], %297 {strides = array<i32>} : memref<12x32xf32, #tpu.memory_space<vmem>>, vector<12x8xf32>,
    %c0_170 = arith.constant 0 : index
    %c0_171 = arith.constant 0 : index
    %299 = vector.load %arg22[%c0_170, %c0_171] : memref<12x32xf32, #tpu.memory_space<vmem>>, vector<12x32xf32>
    %cst_172 = arith.constant dense<0.000000e+00> : vector<12x32xf32>
    %300 = tpu.matmul %299, %21, %cst_172 {dimension_numbers = #tpu.dot_dimension_numbers<[1], [0], [0], [1], [0, 0, 1, 1], [], []>, precision = #tpu.contract_precision<fp32>} : vector<12x32xf32>, vector<32x32xf32>, vector<12x32xf32> -> vector<12x32xf32>
    %301 = vector.broadcast %25 : vector<1x32xf32> to vector<12x32xf32>
    %302 = arith.addf %300, %301 : vector<12x32xf32>
    %303 = arith.addf %302, %215 : vector<12x32xf32>
    %cst_173 = arith.constant -1.000000e+06 : f32
    %cst_174 = arith.constant 1.000000e+06 : f32
    %304 = vector.broadcast %cst_173 : f32 to vector<12x32xf32>
    %305 = arith.maximumf %304, %303 : vector<12x32xf32>
    %306 = vector.broadcast %cst_174 : f32 to vector<12x32xf32>
    %307 = arith.minimumf %306, %305 : vector<12x32xf32>
    %cst_175 = arith.constant dense<0.000000e+00> : vector<12xf32>
    %308 = vector.multi_reduction <add>, %307, %cst_175 [1] : vector<12x32xf32> to vector<12xf32>
    %309 = vector.shape_cast %308 : vector<12xf32> to vector<12x1xf32>
    %cst_176 = arith.constant 3.200000e+01 : f32
    %310 = vector.broadcast %cst_176 : f32 to vector<12x1xf32>
    %311 = arith.divf %309, %310 : vector<12x1xf32>
    %312 = vector.broadcast %311 : vector<12x1xf32> to vector<12x32xf32>
    %313 = arith.subf %307, %312 : vector<12x32xf32>
    %314 = arith.mulf %313, %313 : vector<12x32xf32>
    %cst_177 = arith.constant dense<0.000000e+00> : vector<12xf32>
    %315 = vector.multi_reduction <add>, %314, %cst_177 [1] : vector<12x32xf32> to vector<12xf32>
    %316 = vector.shape_cast %315 : vector<12xf32> to vector<12x1xf32>
    %cst_178 = arith.constant 3.200000e+01 : f32
    %317 = vector.broadcast %cst_178 : f32 to vector<12x1xf32>
    %318 = arith.divf %316, %317 : vector<12x1xf32>
    %319 = vector.broadcast %311 : vector<12x1xf32> to vector<12x32xf32>
    %320 = arith.subf %307, %319 : vector<12x32xf32>
    %cst_179 = arith.constant 9.99999997E-7 : f32
    %321 = vector.broadcast %cst_179 : f32 to vector<12x1xf32>
    %322 = arith.addf %318, %321 : vector<12x1xf32>
    %323 = math.rsqrt %322 : vector<12x1xf32>
    %324 = vector.broadcast %323 : vector<12x1xf32> to vector<12x32xf32>
    %325 = arith.mulf %320, %324 : vector<12x32xf32>
    %326 = vector.broadcast %29 : vector<1x32xf32> to vector<12x32xf32>
    %327 = arith.mulf %325, %326 : vector<12x32xf32>
    %328 = vector.broadcast %33 : vector<1x32xf32> to vector<12x32xf32>
    %329 = arith.addf %327, %328 : vector<12x32xf32>
    %cst_180 = arith.constant dense<0.000000e+00> : vector<12x128xf32>
    %330 = tpu.matmul %329, %45, %cst_180 {dimension_numbers = #tpu.dot_dimension_numbers<[1], [0], [0], [1], [0, 0, 1, 1], [], []>, precision = #tpu.contract_precision<fp32>} : vector<12x32xf32>, vector<32x128xf32>, vector<12x128xf32> -> vector<12x128xf32>
    %331 = vector.broadcast %49 : vector<1x128xf32> to vector<12x128xf32>
    %332 = arith.addf %330, %331 : vector<12x128xf32>
    %cst_181 = arith.constant 0.000000e+00 : f32
    %333 = vector.broadcast %cst_181 : f32 to vector<12x128xf32>
    %334 = arith.maximumf %332, %333 : vector<12x128xf32>
    %cst_182 = arith.constant dense<0.000000e+00> : vector<12x32xf32>
    %335 = tpu.matmul %334, %53, %cst_182 {dimension_numbers = #tpu.dot_dimension_numbers<[1], [0], [0], [1], [0, 0, 1, 1], [], []>, precision = #tpu.contract_precision<fp32>} : vector<12x128xf32>, vector<128x32xf32>, vector<12x32xf32> -> vector<12x32xf32>
    %336 = vector.broadcast %57 : vector<1x32xf32> to vector<12x32xf32>
    %337 = arith.addf %335, %336 : vector<12x32xf32>
    %338 = arith.addf %337, %329 : vector<12x32xf32>
    %cst_183 = arith.constant dense<0.000000e+00> : vector<12xf32>
    %339 = vector.multi_reduction <add>, %338, %cst_183 [1] : vector<12x32xf32> to vector<12xf32>
    %340 = vector.shape_cast %339 : vector<12xf32> to vector<12x1xf32>
    %cst_184 = arith.constant 3.200000e+01 : f32
    %341 = vector.broadcast %cst_184 : f32 to vector<12x1xf32>
    %342 = arith.divf %340, %341 : vector<12x1xf32>
    %343 = vector.broadcast %342 : vector<12x1xf32> to vector<12x32xf32>
    %344 = arith.subf %338, %343 : vector<12x32xf32>
    %345 = arith.mulf %344, %344 : vector<12x32xf32>
    %cst_185 = arith.constant dense<0.000000e+00> : vector<12xf32>
    %346 = vector.multi_reduction <add>, %345, %cst_185 [1] : vector<12x32xf32> to vector<12xf32>
    %347 = vector.shape_cast %346 : vector<12xf32> to vector<12x1xf32>
    %cst_186 = arith.constant 3.200000e+01 : f32
    %348 = vector.broadcast %cst_186 : f32 to vector<12x1xf32>
    %349 = arith.divf %347, %348 : vector<12x1xf32>
    %350 = vector.broadcast %342 : vector<12x1xf32> to vector<12x32xf32>
    %351 = arith.subf %338, %350 : vector<12x32xf32>
    %cst_187 = arith.constant 9.99999997E-7 : f32
    %352 = vector.broadcast %cst_187 : f32 to vector<12x1xf32>
    %353 = arith.addf %349, %352 : vector<12x1xf32>
    %354 = math.rsqrt %353 : vector<12x1xf32>
    %355 = vector.broadcast %354 : vector<12x1xf32> to vector<12x32xf32>
    %356 = arith.mulf %351, %355 : vector<12x32xf32>
    %357 = vector.broadcast %37 : vector<1x32xf32> to vector<12x32xf32>
    %358 = arith.mulf %356, %357 : vector<12x32xf32>
    %359 = vector.broadcast %41 : vector<1x32xf32> to vector<12x32xf32>
    %360 = arith.addf %358, %359 : vector<12x32xf32>
    %361 = vector.extract_strided_slice %360 {offsets = [0, 0], sizes = [4, 32], strides = [1, 1]} : vector<12x32xf32> to vector<4x32xf32>
    %cst_188 = arith.constant dense<0.000000e+00> : vector<4x128xf32>
    %362 = tpu.matmul %361, %4, %cst_188 {dimension_numbers = #tpu.dot_dimension_numbers<[1], [0], [0], [1], [0, 0, 1, 1], [], []>, precision = #tpu.contract_precision<fp32>} : vector<4x32xf32>, vector<32x128xf32>, vector<4x128xf32> -> vector<4x128xf32>
    %363 = vector.broadcast %5 : vector<1x128xf32> to vector<4x128xf32>
    %364 = arith.addf %362, %363 : vector<4x128xf32>
    %c0_189 = arith.constant 0 : index
    %c0_190 = arith.constant 0 : index
    %c0_191 = arith.constant 0 : index
    %365 = vector.load %arg20[%c0_189, %c0_190, %c0_191] : memref<2x4x128xf32, #tpu.memory_space<vmem>>, vector<1x4x128xf32>
    %366 = vector.shape_cast %365 : vector<1x4x128xf32> to vector<4x128xf32>
    %367 = vector.shape_cast %364 : vector<4x128xf32> to vector<1x4x128xf32>
    tpu.vector_store %arg20[%c0_189, %c0_190, %c0_191], %367 {strides = array<i32>} : memref<2x4x128xf32, #tpu.memory_space<vmem>>, vector<1x4x128xf32>,
    %c1_192 = arith.constant 1 : index
    %c0_193 = arith.constant 0 : index
    %c0_194 = arith.constant 0 : index
    %368 = vector.load %arg0[%c1_192, %c0_193, %c0_194] : memref<2x8x4xf32, #tpu.memory_space<vmem>>, vector<1x8x4xf32>
    %369 = vector.shape_cast %368 : vector<1x8x4xf32> to vector<8x4xf32>
    %cst_195 = arith.constant dense<0.000000e+00> : vector<8x32xf32>
    %370 = tpu.matmul %369, %2, %cst_195 {dimension_numbers = #tpu.dot_dimension_numbers<[1], [0], [0], [1], [0, 0, 1, 1], [], []>, precision = #tpu.contract_precision<fp32>} : vector<8x4xf32>, vector<4x32xf32>, vector<8x32xf32> -> vector<8x32xf32>
    %371 = vector.broadcast %3 : vector<1x32xf32> to vector<8x32xf32>
    %372 = arith.addf %370, %371 : vector<8x32xf32>
    %c0_196 = arith.constant 0 : index
    %c0_197 = arith.constant 0 : index
    %373 = vector.load %arg2[%c0_196, %c0_197] : memref<12x32xf32, #tpu.memory_space<vmem>>, vector<4x32xf32>
    %c0_198 = arith.constant 0 : index
    %c0_199 = arith.constant 0 : index
    %374 = vector.load %arg21[%c0_198, %c0_199] : memref<12x32xf32, #tpu.memory_space<vmem>>, vector<4x32xf32>
    tpu.vector_store %arg21[%c0_198, %c0_199], %373 {strides = array<i32>} : memref<12x32xf32, #tpu.memory_space<vmem>>, vector<4x32xf32>,
    %c4_200 = arith.constant 4 : index
    %c0_201 = arith.constant 0 : index
    %375 = vector.load %arg2[%c4_200, %c0_201] : memref<12x32xf32, #tpu.memory_space<vmem>>, vector<8x32xf32>
    %376 = arith.addf %375, %372 : vector<8x32xf32>
    %c4_202 = arith.constant 4 : index
    %c0_203 = arith.constant 0 : index
    %377 = vector.load %arg21[%c4_202, %c0_203] : memref<12x32xf32, #tpu.memory_space<vmem>>, vector<8x32xf32>
    tpu.vector_store %arg21[%c4_202, %c0_203], %376 {strides = array<i32>} : memref<12x32xf32, #tpu.memory_space<vmem>>, vector<8x32xf32>,
    %c0_204 = arith.constant 0 : index
    %c0_205 = arith.constant 0 : index
    %378 = vector.load %arg21[%c0_204, %c0_205] : memref<12x32xf32, #tpu.memory_space<vmem>>, vector<12x32xf32>
    %c1_206 = arith.constant 1 : index
    %c0_207 = arith.constant 0 : index
    %c0_208 = arith.constant 0 : index
    %379 = vector.load %arg1[%c1_206, %c0_207, %c0_208] : memref<2x1x12xf32, #tpu.memory_space<vmem>>, vector<1x1x12xf32>
    %380 = vector.shape_cast %379 : vector<1x1x12xf32> to vector<1x12xf32>
    %cst_209 = arith.constant dense<0.000000e+00> : vector<12x32xf32>
    %381 = tpu.matmul %378, %7, %cst_209 {dimension_numbers = #tpu.dot_dimension_numbers<[1], [0], [0], [1], [0, 0, 1, 1], [], []>, precision = #tpu.contract_precision<fp32>} : vector<12x32xf32>, vector<32x32xf32>, vector<12x32xf32> -> vector<12x32xf32>
    %cst_210 = arith.constant dense<0.000000e+00> : vector<12x32xf32>
    %382 = tpu.matmul %378, %11, %cst_210 {dimension_numbers = #tpu.dot_dimension_numbers<[1], [0], [0], [1], [0, 0, 1, 1], [], []>, precision = #tpu.contract_precision<fp32>} : vector<12x32xf32>, vector<32x32xf32>, vector<12x32xf32> -> vector<12x32xf32>
    %cst_211 = arith.constant dense<0.000000e+00> : vector<12x32xf32>
    %383 = tpu.matmul %378, %15, %cst_211 {dimension_numbers = #tpu.dot_dimension_numbers<[1], [0], [0], [1], [0, 0, 1, 1], [], []>, precision = #tpu.contract_precision<fp32>} : vector<12x32xf32>, vector<32x32xf32>, vector<12x32xf32> -> vector<12x32xf32>
    %384 = vector.extract_strided_slice %381 {offsets = [0, 0], sizes = [12, 8], strides = [1, 1]} : vector<12x32xf32> to vector<12x8xf32>
    %385 = vector.extract_strided_slice %382 {offsets = [0, 0], sizes = [12, 8], strides = [1, 1]} : vector<12x32xf32> to vector<12x8xf32>
    %386 = vector.extract_strided_slice %383 {offsets = [0, 0], sizes = [12, 8], strides = [1, 1]} : vector<12x32xf32> to vector<12x8xf32>
    %cst_212 = arith.constant dense<0.000000e+00> : vector<12x12xf32>
    %387 = tpu.matmul %384, %385, %cst_212 {dimension_numbers = #tpu.dot_dimension_numbers<[1], [1], [0], [0], [0, 0, 1, 0], [], []>, precision = #tpu.contract_precision<fp32>} : vector<12x8xf32>, vector<12x8xf32>, vector<12x12xf32> -> vector<12x12xf32>
    %388 = vector.broadcast %380 : vector<1x12xf32> to vector<12x12xf32>
    %389 = arith.addf %387, %388 : vector<12x12xf32>
    %390 = vector.broadcast %1 : f32 to vector<12x12xf32>
    %391 = arith.mulf %389, %390 : vector<12x12xf32>
    %cst_213 = arith.constant dense<0xFF800000> : vector<12xf32>
    %392 = vector.multi_reduction <maximumf>, %391, %cst_213 [1] : vector<12x12xf32> to vector<12xf32>
    %393 = vector.shape_cast %392 : vector<12xf32> to vector<12x1xf32>
    %394 = vector.broadcast %393 : vector<12x1xf32> to vector<12x12xf32>
    %395 = arith.subf %391, %394 : vector<12x12xf32>
    %396 = math.exp %395 : vector<12x12xf32>
    %cst_214 = arith.constant dense<0.000000e+00> : vector<12xf32>
    %397 = vector.multi_reduction <add>, %396, %cst_214 [1] : vector<12x12xf32> to vector<12xf32>
    %398 = vector.shape_cast %397 : vector<12xf32> to vector<12x1xf32>
    %399 = tpu.reciprocal %398 {approx = true} : vector<12x1xf32> -> vector<12x1xf32>
    %400 = vector.broadcast %399 : vector<12x1xf32> to vector<12x12xf32>
    %401 = arith.mulf %396, %400 : vector<12x12xf32>
    %cst_215 = arith.constant dense<0.000000e+00> : vector<12x8xf32>
    %402 = tpu.matmul %401, %386, %cst_215 {dimension_numbers = #tpu.dot_dimension_numbers<[1], [0], [0], [1], [0, 0, 1, 1], [], []>, precision = #tpu.contract_precision<fp32>} : vector<12x12xf32>, vector<12x8xf32>, vector<12x8xf32> -> vector<12x8xf32>
    %c0_216 = arith.constant 0 : index
    %c0_217 = arith.constant 0 : index
    %403 = vector.load %arg22[%c0_216, %c0_217] : memref<12x32xf32, #tpu.memory_space<vmem>>, vector<12x8xf32>
    tpu.vector_store %arg22[%c0_216, %c0_217], %402 {strides = array<i32>} : memref<12x32xf32, #tpu.memory_space<vmem>>, vector<12x8xf32>,
    %404 = vector.extract_strided_slice %381 {offsets = [0, 8], sizes = [12, 8], strides = [1, 1]} : vector<12x32xf32> to vector<12x8xf32>
    %405 = vector.extract_strided_slice %382 {offsets = [0, 8], sizes = [12, 8], strides = [1, 1]} : vector<12x32xf32> to vector<12x8xf32>
    %406 = vector.extract_strided_slice %383 {offsets = [0, 8], sizes = [12, 8], strides = [1, 1]} : vector<12x32xf32> to vector<12x8xf32>
    %cst_218 = arith.constant dense<0.000000e+00> : vector<12x12xf32>
    %407 = tpu.matmul %404, %405, %cst_218 {dimension_numbers = #tpu.dot_dimension_numbers<[1], [1], [0], [0], [0, 0, 1, 0], [], []>, precision = #tpu.contract_precision<fp32>} : vector<12x8xf32>, vector<12x8xf32>, vector<12x12xf32> -> vector<12x12xf32>
    %408 = vector.broadcast %380 : vector<1x12xf32> to vector<12x12xf32>
    %409 = arith.addf %407, %408 : vector<12x12xf32>
    %410 = vector.broadcast %1 : f32 to vector<12x12xf32>
    %411 = arith.mulf %409, %410 : vector<12x12xf32>
    %cst_219 = arith.constant dense<0xFF800000> : vector<12xf32>
    %412 = vector.multi_reduction <maximumf>, %411, %cst_219 [1] : vector<12x12xf32> to vector<12xf32>
    %413 = vector.shape_cast %412 : vector<12xf32> to vector<12x1xf32>
    %414 = vector.broadcast %413 : vector<12x1xf32> to vector<12x12xf32>
    %415 = arith.subf %411, %414 : vector<12x12xf32>
    %416 = math.exp %415 : vector<12x12xf32>
    %cst_220 = arith.constant dense<0.000000e+00> : vector<12xf32>
    %417 = vector.multi_reduction <add>, %416, %cst_220 [1] : vector<12x12xf32> to vector<12xf32>
    %418 = vector.shape_cast %417 : vector<12xf32> to vector<12x1xf32>
    %419 = tpu.reciprocal %418 {approx = true} : vector<12x1xf32> -> vector<12x1xf32>
    %420 = vector.broadcast %419 : vector<12x1xf32> to vector<12x12xf32>
    %421 = arith.mulf %416, %420 : vector<12x12xf32>
    %cst_221 = arith.constant dense<0.000000e+00> : vector<12x8xf32>
    %422 = tpu.matmul %421, %406, %cst_221 {dimension_numbers = #tpu.dot_dimension_numbers<[1], [0], [0], [1], [0, 0, 1, 1], [], []>, precision = #tpu.contract_precision<fp32>} : vector<12x12xf32>, vector<12x8xf32>, vector<12x8xf32> -> vector<12x8xf32>
    %c0_222 = arith.constant 0 : index
    %c8_223 = arith.constant 8 : index
    %423 = vector.load %arg22[%c0_222, %c8_223] : memref<12x32xf32, #tpu.memory_space<vmem>>, vector<12x8xf32>
    tpu.vector_store %arg22[%c0_222, %c8_223], %422 {strides = array<i32>} : memref<12x32xf32, #tpu.memory_space<vmem>>, vector<12x8xf32>,
    %424 = vector.extract_strided_slice %381 {offsets = [0, 16], sizes = [12, 8], strides = [1, 1]} : vector<12x32xf32> to vector<12x8xf32>
    %425 = vector.extract_strided_slice %382 {offsets = [0, 16], sizes = [12, 8], strides = [1, 1]} : vector<12x32xf32> to vector<12x8xf32>
    %426 = vector.extract_strided_slice %383 {offsets = [0, 16], sizes = [12, 8], strides = [1, 1]} : vector<12x32xf32> to vector<12x8xf32>
    %cst_224 = arith.constant dense<0.000000e+00> : vector<12x12xf32>
    %427 = tpu.matmul %424, %425, %cst_224 {dimension_numbers = #tpu.dot_dimension_numbers<[1], [1], [0], [0], [0, 0, 1, 0], [], []>, precision = #tpu.contract_precision<fp32>} : vector<12x8xf32>, vector<12x8xf32>, vector<12x12xf32> -> vector<12x12xf32>
    %428 = vector.broadcast %380 : vector<1x12xf32> to vector<12x12xf32>
    %429 = arith.addf %427, %428 : vector<12x12xf32>
    %430 = vector.broadcast %1 : f32 to vector<12x12xf32>
    %431 = arith.mulf %429, %430 : vector<12x12xf32>
    %cst_225 = arith.constant dense<0xFF800000> : vector<12xf32>
    %432 = vector.multi_reduction <maximumf>, %431, %cst_225 [1] : vector<12x12xf32> to vector<12xf32>
    %433 = vector.shape_cast %432 : vector<12xf32> to vector<12x1xf32>
    %434 = vector.broadcast %433 : vector<12x1xf32> to vector<12x12xf32>
    %435 = arith.subf %431, %434 : vector<12x12xf32>
    %436 = math.exp %435 : vector<12x12xf32>
    %cst_226 = arith.constant dense<0.000000e+00> : vector<12xf32>
    %437 = vector.multi_reduction <add>, %436, %cst_226 [1] : vector<12x12xf32> to vector<12xf32>
    %438 = vector.shape_cast %437 : vector<12xf32> to vector<12x1xf32>
    %439 = tpu.reciprocal %438 {approx = true} : vector<12x1xf32> -> vector<12x1xf32>
    %440 = vector.broadcast %439 : vector<12x1xf32> to vector<12x12xf32>
    %441 = arith.mulf %436, %440 : vector<12x12xf32>
    %cst_227 = arith.constant dense<0.000000e+00> : vector<12x8xf32>
    %442 = tpu.matmul %441, %426, %cst_227 {dimension_numbers = #tpu.dot_dimension_numbers<[1], [0], [0], [1], [0, 0, 1, 1], [], []>, precision = #tpu.contract_precision<fp32>} : vector<12x12xf32>, vector<12x8xf32>, vector<12x8xf32> -> vector<12x8xf32>
    %c0_228 = arith.constant 0 : index
    %c16_229 = arith.constant 16 : index
    %443 = vector.load %arg22[%c0_228, %c16_229] : memref<12x32xf32, #tpu.memory_space<vmem>>, vector<12x8xf32>
    tpu.vector_store %arg22[%c0_228, %c16_229], %442 {strides = array<i32>} : memref<12x32xf32, #tpu.memory_space<vmem>>, vector<12x8xf32>,
    %444 = vector.extract_strided_slice %381 {offsets = [0, 24], sizes = [12, 8], strides = [1, 1]} : vector<12x32xf32> to vector<12x8xf32>
    %445 = vector.extract_strided_slice %382 {offsets = [0, 24], sizes = [12, 8], strides = [1, 1]} : vector<12x32xf32> to vector<12x8xf32>
    %446 = vector.extract_strided_slice %383 {offsets = [0, 24], sizes = [12, 8], strides = [1, 1]} : vector<12x32xf32> to vector<12x8xf32>
    %cst_230 = arith.constant dense<0.000000e+00> : vector<12x12xf32>
    %447 = tpu.matmul %444, %445, %cst_230 {dimension_numbers = #tpu.dot_dimension_numbers<[1], [1], [0], [0], [0, 0, 1, 0], [], []>, precision = #tpu.contract_precision<fp32>} : vector<12x8xf32>, vector<12x8xf32>, vector<12x12xf32> -> vector<12x12xf32>
    %448 = vector.broadcast %380 : vector<1x12xf32> to vector<12x12xf32>
    %449 = arith.addf %447, %448 : vector<12x12xf32>
    %450 = vector.broadcast %1 : f32 to vector<12x12xf32>
    %451 = arith.mulf %449, %450 : vector<12x12xf32>
    %cst_231 = arith.constant dense<0xFF800000> : vector<12xf32>
    %452 = vector.multi_reduction <maximumf>, %451, %cst_231 [1] : vector<12x12xf32> to vector<12xf32>
    %453 = vector.shape_cast %452 : vector<12xf32> to vector<12x1xf32>
    %454 = vector.broadcast %453 : vector<12x1xf32> to vector<12x12xf32>
    %455 = arith.subf %451, %454 : vector<12x12xf32>
    %456 = math.exp %455 : vector<12x12xf32>
    %cst_232 = arith.constant dense<0.000000e+00> : vector<12xf32>
    %457 = vector.multi_reduction <add>, %456, %cst_232 [1] : vector<12x12xf32> to vector<12xf32>
    %458 = vector.shape_cast %457 : vector<12xf32> to vector<12x1xf32>
    %459 = tpu.reciprocal %458 {approx = true} : vector<12x1xf32> -> vector<12x1xf32>
    %460 = vector.broadcast %459 : vector<12x1xf32> to vector<12x12xf32>
    %461 = arith.mulf %456, %460 : vector<12x12xf32>
    %cst_233 = arith.constant dense<0.000000e+00> : vector<12x8xf32>
    %462 = tpu.matmul %461, %446, %cst_233 {dimension_numbers = #tpu.dot_dimension_numbers<[1], [0], [0], [1], [0, 0, 1, 1], [], []>, precision = #tpu.contract_precision<fp32>} : vector<12x12xf32>, vector<12x8xf32>, vector<12x8xf32> -> vector<12x8xf32>
    %c0_234 = arith.constant 0 : index
    %c24_235 = arith.constant 24 : index
    %463 = vector.load %arg22[%c0_234, %c24_235] : memref<12x32xf32, #tpu.memory_space<vmem>>, vector<12x8xf32>
    tpu.vector_store %arg22[%c0_234, %c24_235], %462 {strides = array<i32>} : memref<12x32xf32, #tpu.memory_space<vmem>>, vector<12x8xf32>,
    %c0_236 = arith.constant 0 : index
    %c0_237 = arith.constant 0 : index
    %464 = vector.load %arg22[%c0_236, %c0_237] : memref<12x32xf32, #tpu.memory_space<vmem>>, vector<12x32xf32>
    %cst_238 = arith.constant dense<0.000000e+00> : vector<12x32xf32>
    %465 = tpu.matmul %464, %19, %cst_238 {dimension_numbers = #tpu.dot_dimension_numbers<[1], [0], [0], [1], [0, 0, 1, 1], [], []>, precision = #tpu.contract_precision<fp32>} : vector<12x32xf32>, vector<32x32xf32>, vector<12x32xf32> -> vector<12x32xf32>
    %466 = vector.broadcast %23 : vector<1x32xf32> to vector<12x32xf32>
    %467 = arith.addf %465, %466 : vector<12x32xf32>
    %468 = arith.addf %467, %378 : vector<12x32xf32>
    %cst_239 = arith.constant -1.000000e+06 : f32
    %cst_240 = arith.constant 1.000000e+06 : f32
    %469 = vector.broadcast %cst_239 : f32 to vector<12x32xf32>
    %470 = arith.maximumf %469, %468 : vector<12x32xf32>
    %471 = vector.broadcast %cst_240 : f32 to vector<12x32xf32>
    %472 = arith.minimumf %471, %470 : vector<12x32xf32>
    %cst_241 = arith.constant dense<0.000000e+00> : vector<12xf32>
    %473 = vector.multi_reduction <add>, %472, %cst_241 [1] : vector<12x32xf32> to vector<12xf32>
    %474 = vector.shape_cast %473 : vector<12xf32> to vector<12x1xf32>
    %cst_242 = arith.constant 3.200000e+01 : f32
    %475 = vector.broadcast %cst_242 : f32 to vector<12x1xf32>
    %476 = arith.divf %474, %475 : vector<12x1xf32>
    %477 = vector.broadcast %476 : vector<12x1xf32> to vector<12x32xf32>
    %478 = arith.subf %472, %477 : vector<12x32xf32>
    %479 = arith.mulf %478, %478 : vector<12x32xf32>
    %cst_243 = arith.constant dense<0.000000e+00> : vector<12xf32>
    %480 = vector.multi_reduction <add>, %479, %cst_243 [1] : vector<12x32xf32> to vector<12xf32>
    %481 = vector.shape_cast %480 : vector<12xf32> to vector<12x1xf32>
    %cst_244 = arith.constant 3.200000e+01 : f32
    %482 = vector.broadcast %cst_244 : f32 to vector<12x1xf32>
    %483 = arith.divf %481, %482 : vector<12x1xf32>
    %484 = vector.broadcast %476 : vector<12x1xf32> to vector<12x32xf32>
    %485 = arith.subf %472, %484 : vector<12x32xf32>
    %cst_245 = arith.constant 9.99999997E-7 : f32
    %486 = vector.broadcast %cst_245 : f32 to vector<12x1xf32>
    %487 = arith.addf %483, %486 : vector<12x1xf32>
    %488 = math.rsqrt %487 : vector<12x1xf32>
    %489 = vector.broadcast %488 : vector<12x1xf32> to vector<12x32xf32>
    %490 = arith.mulf %485, %489 : vector<12x32xf32>
    %491 = vector.broadcast %27 : vector<1x32xf32> to vector<12x32xf32>
    %492 = arith.mulf %490, %491 : vector<12x32xf32>
    %493 = vector.broadcast %31 : vector<1x32xf32> to vector<12x32xf32>
    %494 = arith.addf %492, %493 : vector<12x32xf32>
    %cst_246 = arith.constant dense<0.000000e+00> : vector<12x128xf32>
    %495 = tpu.matmul %494, %43, %cst_246 {dimension_numbers = #tpu.dot_dimension_numbers<[1], [0], [0], [1], [0, 0, 1, 1], [], []>, precision = #tpu.contract_precision<fp32>} : vector<12x32xf32>, vector<32x128xf32>, vector<12x128xf32> -> vector<12x128xf32>
    %496 = vector.broadcast %47 : vector<1x128xf32> to vector<12x128xf32>
    %497 = arith.addf %495, %496 : vector<12x128xf32>
    %cst_247 = arith.constant 0.000000e+00 : f32
    %498 = vector.broadcast %cst_247 : f32 to vector<12x128xf32>
    %499 = arith.maximumf %497, %498 : vector<12x128xf32>
    %cst_248 = arith.constant dense<0.000000e+00> : vector<12x32xf32>
    %500 = tpu.matmul %499, %51, %cst_248 {dimension_numbers = #tpu.dot_dimension_numbers<[1], [0], [0], [1], [0, 0, 1, 1], [], []>, precision = #tpu.contract_precision<fp32>} : vector<12x128xf32>, vector<128x32xf32>, vector<12x32xf32> -> vector<12x32xf32>
    %501 = vector.broadcast %55 : vector<1x32xf32> to vector<12x32xf32>
    %502 = arith.addf %500, %501 : vector<12x32xf32>
    %503 = arith.addf %502, %494 : vector<12x32xf32>
    %cst_249 = arith.constant dense<0.000000e+00> : vector<12xf32>
    %504 = vector.multi_reduction <add>, %503, %cst_249 [1] : vector<12x32xf32> to vector<12xf32>
    %505 = vector.shape_cast %504 : vector<12xf32> to vector<12x1xf32>
    %cst_250 = arith.constant 3.200000e+01 : f32
    %506 = vector.broadcast %cst_250 : f32 to vector<12x1xf32>
    %507 = arith.divf %505, %506 : vector<12x1xf32>
    %508 = vector.broadcast %507 : vector<12x1xf32> to vector<12x32xf32>
    %509 = arith.subf %503, %508 : vector<12x32xf32>
    %510 = arith.mulf %509, %509 : vector<12x32xf32>
    %cst_251 = arith.constant dense<0.000000e+00> : vector<12xf32>
    %511 = vector.multi_reduction <add>, %510, %cst_251 [1] : vector<12x32xf32> to vector<12xf32>
    %512 = vector.shape_cast %511 : vector<12xf32> to vector<12x1xf32>
    %cst_252 = arith.constant 3.200000e+01 : f32
    %513 = vector.broadcast %cst_252 : f32 to vector<12x1xf32>
    %514 = arith.divf %512, %513 : vector<12x1xf32>
    %515 = vector.broadcast %507 : vector<12x1xf32> to vector<12x32xf32>
    %516 = arith.subf %503, %515 : vector<12x32xf32>
    %cst_253 = arith.constant 9.99999997E-7 : f32
    %517 = vector.broadcast %cst_253 : f32 to vector<12x1xf32>
    %518 = arith.addf %514, %517 : vector<12x1xf32>
    %519 = math.rsqrt %518 : vector<12x1xf32>
    %520 = vector.broadcast %519 : vector<12x1xf32> to vector<12x32xf32>
    %521 = arith.mulf %516, %520 : vector<12x32xf32>
    %522 = vector.broadcast %35 : vector<1x32xf32> to vector<12x32xf32>
    %523 = arith.mulf %521, %522 : vector<12x32xf32>
    %524 = vector.broadcast %39 : vector<1x32xf32> to vector<12x32xf32>
    %525 = arith.addf %523, %524 : vector<12x32xf32>
    %cst_254 = arith.constant dense<0.000000e+00> : vector<12x32xf32>
    %526 = tpu.matmul %525, %9, %cst_254 {dimension_numbers = #tpu.dot_dimension_numbers<[1], [0], [0], [1], [0, 0, 1, 1], [], []>, precision = #tpu.contract_precision<fp32>} : vector<12x32xf32>, vector<32x32xf32>, vector<12x32xf32> -> vector<12x32xf32>
    %cst_255 = arith.constant dense<0.000000e+00> : vector<12x32xf32>
    %527 = tpu.matmul %525, %13, %cst_255 {dimension_numbers = #tpu.dot_dimension_numbers<[1], [0], [0], [1], [0, 0, 1, 1], [], []>, precision = #tpu.contract_precision<fp32>} : vector<12x32xf32>, vector<32x32xf32>, vector<12x32xf32> -> vector<12x32xf32>
    %cst_256 = arith.constant dense<0.000000e+00> : vector<12x32xf32>
    %528 = tpu.matmul %525, %17, %cst_256 {dimension_numbers = #tpu.dot_dimension_numbers<[1], [0], [0], [1], [0, 0, 1, 1], [], []>, precision = #tpu.contract_precision<fp32>} : vector<12x32xf32>, vector<32x32xf32>, vector<12x32xf32> -> vector<12x32xf32>
    %529 = vector.extract_strided_slice %526 {offsets = [0, 0], sizes = [12, 8], strides = [1, 1]} : vector<12x32xf32> to vector<12x8xf32>
    %530 = vector.extract_strided_slice %527 {offsets = [0, 0], sizes = [12, 8], strides = [1, 1]} : vector<12x32xf32> to vector<12x8xf32>
    %531 = vector.extract_strided_slice %528 {offsets = [0, 0], sizes = [12, 8], strides = [1, 1]} : vector<12x32xf32> to vector<12x8xf32>
    %cst_257 = arith.constant dense<0.000000e+00> : vector<12x12xf32>
    %532 = tpu.matmul %529, %530, %cst_257 {dimension_numbers = #tpu.dot_dimension_numbers<[1], [1], [0], [0], [0, 0, 1, 0], [], []>, precision = #tpu.contract_precision<fp32>} : vector<12x8xf32>, vector<12x8xf32>, vector<12x12xf32> -> vector<12x12xf32>
    %533 = vector.broadcast %380 : vector<1x12xf32> to vector<12x12xf32>
    %534 = arith.addf %532, %533 : vector<12x12xf32>
    %535 = vector.broadcast %1 : f32 to vector<12x12xf32>
    %536 = arith.mulf %534, %535 : vector<12x12xf32>
    %cst_258 = arith.constant dense<0xFF800000> : vector<12xf32>
    %537 = vector.multi_reduction <maximumf>, %536, %cst_258 [1] : vector<12x12xf32> to vector<12xf32>
    %538 = vector.shape_cast %537 : vector<12xf32> to vector<12x1xf32>
    %539 = vector.broadcast %538 : vector<12x1xf32> to vector<12x12xf32>
    %540 = arith.subf %536, %539 : vector<12x12xf32>
    %541 = math.exp %540 : vector<12x12xf32>
    %cst_259 = arith.constant dense<0.000000e+00> : vector<12xf32>
    %542 = vector.multi_reduction <add>, %541, %cst_259 [1] : vector<12x12xf32> to vector<12xf32>
    %543 = vector.shape_cast %542 : vector<12xf32> to vector<12x1xf32>
    %544 = tpu.reciprocal %543 {approx = true} : vector<12x1xf32> -> vector<12x1xf32>
    %545 = vector.broadcast %544 : vector<12x1xf32> to vector<12x12xf32>
    %546 = arith.mulf %541, %545 : vector<12x12xf32>
    %cst_260 = arith.constant dense<0.000000e+00> : vector<12x8xf32>
    %547 = tpu.matmul %546, %531, %cst_260 {dimension_numbers = #tpu.dot_dimension_numbers<[1], [0], [0], [1], [0, 0, 1, 1], [], []>, precision = #tpu.contract_precision<fp32>} : vector<12x12xf32>, vector<12x8xf32>, vector<12x8xf32> -> vector<12x8xf32>
    %c0_261 = arith.constant 0 : index
    %c0_262 = arith.constant 0 : index
    %548 = vector.load %arg22[%c0_261, %c0_262] : memref<12x32xf32, #tpu.memory_space<vmem>>, vector<12x8xf32>
    tpu.vector_store %arg22[%c0_261, %c0_262], %547 {strides = array<i32>} : memref<12x32xf32, #tpu.memory_space<vmem>>, vector<12x8xf32>,
    %549 = vector.extract_strided_slice %526 {offsets = [0, 8], sizes = [12, 8], strides = [1, 1]} : vector<12x32xf32> to vector<12x8xf32>
    %550 = vector.extract_strided_slice %527 {offsets = [0, 8], sizes = [12, 8], strides = [1, 1]} : vector<12x32xf32> to vector<12x8xf32>
    %551 = vector.extract_strided_slice %528 {offsets = [0, 8], sizes = [12, 8], strides = [1, 1]} : vector<12x32xf32> to vector<12x8xf32>
    %cst_263 = arith.constant dense<0.000000e+00> : vector<12x12xf32>
    %552 = tpu.matmul %549, %550, %cst_263 {dimension_numbers = #tpu.dot_dimension_numbers<[1], [1], [0], [0], [0, 0, 1, 0], [], []>, precision = #tpu.contract_precision<fp32>} : vector<12x8xf32>, vector<12x8xf32>, vector<12x12xf32> -> vector<12x12xf32>
    %553 = vector.broadcast %380 : vector<1x12xf32> to vector<12x12xf32>
    %554 = arith.addf %552, %553 : vector<12x12xf32>
    %555 = vector.broadcast %1 : f32 to vector<12x12xf32>
    %556 = arith.mulf %554, %555 : vector<12x12xf32>
    %cst_264 = arith.constant dense<0xFF800000> : vector<12xf32>
    %557 = vector.multi_reduction <maximumf>, %556, %cst_264 [1] : vector<12x12xf32> to vector<12xf32>
    %558 = vector.shape_cast %557 : vector<12xf32> to vector<12x1xf32>
    %559 = vector.broadcast %558 : vector<12x1xf32> to vector<12x12xf32>
    %560 = arith.subf %556, %559 : vector<12x12xf32>
    %561 = math.exp %560 : vector<12x12xf32>
    %cst_265 = arith.constant dense<0.000000e+00> : vector<12xf32>
    %562 = vector.multi_reduction <add>, %561, %cst_265 [1] : vector<12x12xf32> to vector<12xf32>
    %563 = vector.shape_cast %562 : vector<12xf32> to vector<12x1xf32>
    %564 = tpu.reciprocal %563 {approx = true} : vector<12x1xf32> -> vector<12x1xf32>
    %565 = vector.broadcast %564 : vector<12x1xf32> to vector<12x12xf32>
    %566 = arith.mulf %561, %565 : vector<12x12xf32>
    %cst_266 = arith.constant dense<0.000000e+00> : vector<12x8xf32>
    %567 = tpu.matmul %566, %551, %cst_266 {dimension_numbers = #tpu.dot_dimension_numbers<[1], [0], [0], [1], [0, 0, 1, 1], [], []>, precision = #tpu.contract_precision<fp32>} : vector<12x12xf32>, vector<12x8xf32>, vector<12x8xf32> -> vector<12x8xf32>
    %c0_267 = arith.constant 0 : index
    %c8_268 = arith.constant 8 : index
    %568 = vector.load %arg22[%c0_267, %c8_268] : memref<12x32xf32, #tpu.memory_space<vmem>>, vector<12x8xf32>
    tpu.vector_store %arg22[%c0_267, %c8_268], %567 {strides = array<i32>} : memref<12x32xf32, #tpu.memory_space<vmem>>, vector<12x8xf32>,
    %569 = vector.extract_strided_slice %526 {offsets = [0, 16], sizes = [12, 8], strides = [1, 1]} : vector<12x32xf32> to vector<12x8xf32>
    %570 = vector.extract_strided_slice %527 {offsets = [0, 16], sizes = [12, 8], strides = [1, 1]} : vector<12x32xf32> to vector<12x8xf32>
    %571 = vector.extract_strided_slice %528 {offsets = [0, 16], sizes = [12, 8], strides = [1, 1]} : vector<12x32xf32> to vector<12x8xf32>
    %cst_269 = arith.constant dense<0.000000e+00> : vector<12x12xf32>
    %572 = tpu.matmul %569, %570, %cst_269 {dimension_numbers = #tpu.dot_dimension_numbers<[1], [1], [0], [0], [0, 0, 1, 0], [], []>, precision = #tpu.contract_precision<fp32>} : vector<12x8xf32>, vector<12x8xf32>, vector<12x12xf32> -> vector<12x12xf32>
    %573 = vector.broadcast %380 : vector<1x12xf32> to vector<12x12xf32>
    %574 = arith.addf %572, %573 : vector<12x12xf32>
    %575 = vector.broadcast %1 : f32 to vector<12x12xf32>
    %576 = arith.mulf %574, %575 : vector<12x12xf32>
    %cst_270 = arith.constant dense<0xFF800000> : vector<12xf32>
    %577 = vector.multi_reduction <maximumf>, %576, %cst_270 [1] : vector<12x12xf32> to vector<12xf32>
    %578 = vector.shape_cast %577 : vector<12xf32> to vector<12x1xf32>
    %579 = vector.broadcast %578 : vector<12x1xf32> to vector<12x12xf32>
    %580 = arith.subf %576, %579 : vector<12x12xf32>
    %581 = math.exp %580 : vector<12x12xf32>
    %cst_271 = arith.constant dense<0.000000e+00> : vector<12xf32>
    %582 = vector.multi_reduction <add>, %581, %cst_271 [1] : vector<12x12xf32> to vector<12xf32>
    %583 = vector.shape_cast %582 : vector<12xf32> to vector<12x1xf32>
    %584 = tpu.reciprocal %583 {approx = true} : vector<12x1xf32> -> vector<12x1xf32>
    %585 = vector.broadcast %584 : vector<12x1xf32> to vector<12x12xf32>
    %586 = arith.mulf %581, %585 : vector<12x12xf32>
    %cst_272 = arith.constant dense<0.000000e+00> : vector<12x8xf32>
    %587 = tpu.matmul %586, %571, %cst_272 {dimension_numbers = #tpu.dot_dimension_numbers<[1], [0], [0], [1], [0, 0, 1, 1], [], []>, precision = #tpu.contract_precision<fp32>} : vector<12x12xf32>, vector<12x8xf32>, vector<12x8xf32> -> vector<12x8xf32>
    %c0_273 = arith.constant 0 : index
    %c16_274 = arith.constant 16 : index
    %588 = vector.load %arg22[%c0_273, %c16_274] : memref<12x32xf32, #tpu.memory_space<vmem>>, vector<12x8xf32>
    tpu.vector_store %arg22[%c0_273, %c16_274], %587 {strides = array<i32>} : memref<12x32xf32, #tpu.memory_space<vmem>>, vector<12x8xf32>,
    %589 = vector.extract_strided_slice %526 {offsets = [0, 24], sizes = [12, 8], strides = [1, 1]} : vector<12x32xf32> to vector<12x8xf32>
    %590 = vector.extract_strided_slice %527 {offsets = [0, 24], sizes = [12, 8], strides = [1, 1]} : vector<12x32xf32> to vector<12x8xf32>
    %591 = vector.extract_strided_slice %528 {offsets = [0, 24], sizes = [12, 8], strides = [1, 1]} : vector<12x32xf32> to vector<12x8xf32>
    %cst_275 = arith.constant dense<0.000000e+00> : vector<12x12xf32>
    %592 = tpu.matmul %589, %590, %cst_275 {dimension_numbers = #tpu.dot_dimension_numbers<[1], [1], [0], [0], [0, 0, 1, 0], [], []>, precision = #tpu.contract_precision<fp32>} : vector<12x8xf32>, vector<12x8xf32>, vector<12x12xf32> -> vector<12x12xf32>
    %593 = vector.broadcast %380 : vector<1x12xf32> to vector<12x12xf32>
    %594 = arith.addf %592, %593 : vector<12x12xf32>
    %595 = vector.broadcast %1 : f32 to vector<12x12xf32>
    %596 = arith.mulf %594, %595 : vector<12x12xf32>
    %cst_276 = arith.constant dense<0xFF800000> : vector<12xf32>
    %597 = vector.multi_reduction <maximumf>, %596, %cst_276 [1] : vector<12x12xf32> to vector<12xf32>
    %598 = vector.shape_cast %597 : vector<12xf32> to vector<12x1xf32>
    %599 = vector.broadcast %598 : vector<12x1xf32> to vector<12x12xf32>
    %600 = arith.subf %596, %599 : vector<12x12xf32>
    %601 = math.exp %600 : vector<12x12xf32>
    %cst_277 = arith.constant dense<0.000000e+00> : vector<12xf32>
    %602 = vector.multi_reduction <add>, %601, %cst_277 [1] : vector<12x12xf32> to vector<12xf32>
    %603 = vector.shape_cast %602 : vector<12xf32> to vector<12x1xf32>
    %604 = tpu.reciprocal %603 {approx = true} : vector<12x1xf32> -> vector<12x1xf32>
    %605 = vector.broadcast %604 : vector<12x1xf32> to vector<12x12xf32>
    %606 = arith.mulf %601, %605 : vector<12x12xf32>
    %cst_278 = arith.constant dense<0.000000e+00> : vector<12x8xf32>
    %607 = tpu.matmul %606, %591, %cst_278 {dimension_numbers = #tpu.dot_dimension_numbers<[1], [0], [0], [1], [0, 0, 1, 1], [], []>, precision = #tpu.contract_precision<fp32>} : vector<12x12xf32>, vector<12x8xf32>, vector<12x8xf32> -> vector<12x8xf32>
    %c0_279 = arith.constant 0 : index
    %c24_280 = arith.constant 24 : index
    %608 = vector.load %arg22[%c0_279, %c24_280] : memref<12x32xf32, #tpu.memory_space<vmem>>, vector<12x8xf32>
    tpu.vector_store %arg22[%c0_279, %c24_280], %607 {strides = array<i32>} : memref<12x32xf32, #tpu.memory_space<vmem>>, vector<12x8xf32>,
    %c0_281 = arith.constant 0 : index
    %c0_282 = arith.constant 0 : index
    %609 = vector.load %arg22[%c0_281, %c0_282] : memref<12x32xf32, #tpu.memory_space<vmem>>, vector<12x32xf32>
    %cst_283 = arith.constant dense<0.000000e+00> : vector<12x32xf32>
    %610 = tpu.matmul %609, %21, %cst_283 {dimension_numbers = #tpu.dot_dimension_numbers<[1], [0], [0], [1], [0, 0, 1, 1], [], []>, precision = #tpu.contract_precision<fp32>} : vector<12x32xf32>, vector<32x32xf32>, vector<12x32xf32> -> vector<12x32xf32>
    %611 = vector.broadcast %25 : vector<1x32xf32> to vector<12x32xf32>
    %612 = arith.addf %610, %611 : vector<12x32xf32>
    %613 = arith.addf %612, %525 : vector<12x32xf32>
    %cst_284 = arith.constant -1.000000e+06 : f32
    %cst_285 = arith.constant 1.000000e+06 : f32
    %614 = vector.broadcast %cst_284 : f32 to vector<12x32xf32>
    %615 = arith.maximumf %614, %613 : vector<12x32xf32>
    %616 = vector.broadcast %cst_285 : f32 to vector<12x32xf32>
    %617 = arith.minimumf %616, %615 : vector<12x32xf32>
    %cst_286 = arith.constant dense<0.000000e+00> : vector<12xf32>
    %618 = vector.multi_reduction <add>, %617, %cst_286 [1] : vector<12x32xf32> to vector<12xf32>
    %619 = vector.shape_cast %618 : vector<12xf32> to vector<12x1xf32>
    %cst_287 = arith.constant 3.200000e+01 : f32
    %620 = vector.broadcast %cst_287 : f32 to vector<12x1xf32>
    %621 = arith.divf %619, %620 : vector<12x1xf32>
    %622 = vector.broadcast %621 : vector<12x1xf32> to vector<12x32xf32>
    %623 = arith.subf %617, %622 : vector<12x32xf32>
    %624 = arith.mulf %623, %623 : vector<12x32xf32>
    %cst_288 = arith.constant dense<0.000000e+00> : vector<12xf32>
    %625 = vector.multi_reduction <add>, %624, %cst_288 [1] : vector<12x32xf32> to vector<12xf32>
    %626 = vector.shape_cast %625 : vector<12xf32> to vector<12x1xf32>
    %cst_289 = arith.constant 3.200000e+01 : f32
    %627 = vector.broadcast %cst_289 : f32 to vector<12x1xf32>
    %628 = arith.divf %626, %627 : vector<12x1xf32>
    %629 = vector.broadcast %621 : vector<12x1xf32> to vector<12x32xf32>
    %630 = arith.subf %617, %629 : vector<12x32xf32>
    %cst_290 = arith.constant 9.99999997E-7 : f32
    %631 = vector.broadcast %cst_290 : f32 to vector<12x1xf32>
    %632 = arith.addf %628, %631 : vector<12x1xf32>
    %633 = math.rsqrt %632 : vector<12x1xf32>
    %634 = vector.broadcast %633 : vector<12x1xf32> to vector<12x32xf32>
    %635 = arith.mulf %630, %634 : vector<12x32xf32>
    %636 = vector.broadcast %29 : vector<1x32xf32> to vector<12x32xf32>
    %637 = arith.mulf %635, %636 : vector<12x32xf32>
    %638 = vector.broadcast %33 : vector<1x32xf32> to vector<12x32xf32>
    %639 = arith.addf %637, %638 : vector<12x32xf32>
    %cst_291 = arith.constant dense<0.000000e+00> : vector<12x128xf32>
    %640 = tpu.matmul %639, %45, %cst_291 {dimension_numbers = #tpu.dot_dimension_numbers<[1], [0], [0], [1], [0, 0, 1, 1], [], []>, precision = #tpu.contract_precision<fp32>} : vector<12x32xf32>, vector<32x128xf32>, vector<12x128xf32> -> vector<12x128xf32>
    %641 = vector.broadcast %49 : vector<1x128xf32> to vector<12x128xf32>
    %642 = arith.addf %640, %641 : vector<12x128xf32>
    %cst_292 = arith.constant 0.000000e+00 : f32
    %643 = vector.broadcast %cst_292 : f32 to vector<12x128xf32>
    %644 = arith.maximumf %642, %643 : vector<12x128xf32>
    %cst_293 = arith.constant dense<0.000000e+00> : vector<12x32xf32>
    %645 = tpu.matmul %644, %53, %cst_293 {dimension_numbers = #tpu.dot_dimension_numbers<[1], [0], [0], [1], [0, 0, 1, 1], [], []>, precision = #tpu.contract_precision<fp32>} : vector<12x128xf32>, vector<128x32xf32>, vector<12x32xf32> -> vector<12x32xf32>
    %646 = vector.broadcast %57 : vector<1x32xf32> to vector<12x32xf32>
    %647 = arith.addf %645, %646 : vector<12x32xf32>
    %648 = arith.addf %647, %639 : vector<12x32xf32>
    %cst_294 = arith.constant dense<0.000000e+00> : vector<12xf32>
    %649 = vector.multi_reduction <add>, %648, %cst_294 [1] : vector<12x32xf32> to vector<12xf32>
    %650 = vector.shape_cast %649 : vector<12xf32> to vector<12x1xf32>
    %cst_295 = arith.constant 3.200000e+01 : f32
    %651 = vector.broadcast %cst_295 : f32 to vector<12x1xf32>
    %652 = arith.divf %650, %651 : vector<12x1xf32>
    %653 = vector.broadcast %652 : vector<12x1xf32> to vector<12x32xf32>
    %654 = arith.subf %648, %653 : vector<12x32xf32>
    %655 = arith.mulf %654, %654 : vector<12x32xf32>
    %cst_296 = arith.constant dense<0.000000e+00> : vector<12xf32>
    %656 = vector.multi_reduction <add>, %655, %cst_296 [1] : vector<12x32xf32> to vector<12xf32>
    %657 = vector.shape_cast %656 : vector<12xf32> to vector<12x1xf32>
    %cst_297 = arith.constant 3.200000e+01 : f32
    %658 = vector.broadcast %cst_297 : f32 to vector<12x1xf32>
    %659 = arith.divf %657, %658 : vector<12x1xf32>
    %660 = vector.broadcast %652 : vector<12x1xf32> to vector<12x32xf32>
    %661 = arith.subf %648, %660 : vector<12x32xf32>
    %cst_298 = arith.constant 9.99999997E-7 : f32
    %662 = vector.broadcast %cst_298 : f32 to vector<12x1xf32>
    %663 = arith.addf %659, %662 : vector<12x1xf32>
    %664 = math.rsqrt %663 : vector<12x1xf32>
    %665 = vector.broadcast %664 : vector<12x1xf32> to vector<12x32xf32>
    %666 = arith.mulf %661, %665 : vector<12x32xf32>
    %667 = vector.broadcast %37 : vector<1x32xf32> to vector<12x32xf32>
    %668 = arith.mulf %666, %667 : vector<12x32xf32>
    %669 = vector.broadcast %41 : vector<1x32xf32> to vector<12x32xf32>
    %670 = arith.addf %668, %669 : vector<12x32xf32>
    %671 = vector.extract_strided_slice %670 {offsets = [0, 0], sizes = [4, 32], strides = [1, 1]} : vector<12x32xf32> to vector<4x32xf32>
    %cst_299 = arith.constant dense<0.000000e+00> : vector<4x128xf32>
    %672 = tpu.matmul %671, %4, %cst_299 {dimension_numbers = #tpu.dot_dimension_numbers<[1], [0], [0], [1], [0, 0, 1, 1], [], []>, precision = #tpu.contract_precision<fp32>} : vector<4x32xf32>, vector<32x128xf32>, vector<4x128xf32> -> vector<4x128xf32>
    %673 = vector.broadcast %5 : vector<1x128xf32> to vector<4x128xf32>
    %674 = arith.addf %672, %673 : vector<4x128xf32>
    %c1_300 = arith.constant 1 : index
    %c0_301 = arith.constant 0 : index
    %c0_302 = arith.constant 0 : index
    %675 = vector.load %arg20[%c1_300, %c0_301, %c0_302] : memref<2x4x128xf32, #tpu.memory_space<vmem>>, vector<1x4x128xf32>
    %676 = vector.shape_cast %675 : vector<1x4x128xf32> to vector<4x128xf32>
    %677 = vector.shape_cast %674 : vector<4x128xf32> to vector<1x4x128xf32>
    tpu.vector_store %arg20[%c1_300, %c0_301, %c0_302], %677 {strides = array<i32>} : memref<2x4x128xf32, #tpu.memory_space<vmem>>, vector<1x4x128xf32>,
    return
  }
}

</mosaic_0001>

<bundles_post_ra>
// kernel: tpu_custom_call.1
= control target key start
LH: loop header
LB: loop body
LE: loop exit
PB: predicated region body
PF: predicated region fallthrough
CT: control target
= control target key end

     0   :  { %s45736_s0 = inlined_call_operand.vmem [shape: f32[2,8,4], index: 0, kind: input, shape index: {}]   ;;  %s45737_s1 = inlined_call_operand.hbm [shape: f32[2,1,12], index: 1, kind: input, shape index: {}]   ;;  %s45738_s2 = inlined_call_operand.vmem [shape: f32[12,32], index: 2, kind: input, shape index: {}]   ;;  %s45739_s3 = inlined_call_operand.vmem [shape: f32[4,32], index: 3, kind: input, shape index: {}]   ;;  %s45740_s4 = inlined_call_operand.hbm [shape: f32[1,32], index: 4, kind: input, shape index: {}]   ;;  %s45741_s5 = inlined_call_operand.vmem [shape: f32[2,32,32], index: 5, kind: input, shape index: {}]   ;;  %s45742_s6 = inlined_call_operand.vmem [shape: f32[2,32,32], index: 6, kind: input, shape index: {}]   ;;  %s45743_s7 = inlined_call_operand.vmem [shape: f32[2,32,32], index: 7, kind: input, shape index: {}]   ;;  %s45744_s8 = inlined_call_operand.vmem [shape: f32[2,32,32], index: 8, kind: input, shape index: {}]   ;;  %s45745_s9 = inlined_call_operand.hbm [shape: f32[2,1,32], index: 9, kind: input, shape index: {}]   ;;  %s45746_s10 = inlined_call_operand.hbm [shape: f32[2,1,32], index: 10, kind: input, shape index: {}]   ;;  %s45747_s11 = inlined_call_operand.hbm [shape: f32[2,1,32], index: 11, kind: input, shape index: {}]   ;;  %s45748_s12 = inlined_call_operand.hbm [shape: f32[2,1,32], index: 12, kind: input, shape index: {}]   ;;  %s45749_s13 = inlined_call_operand.hbm [shape: f32[2,1,32], index: 13, kind: input, shape index: {}]   ;;  %s45750_s14 = inlined_call_operand.vmem [shape: f32[2,32,128], index: 14, kind: input, shape index: {}]   ;;  %s45751_s15 = inlined_call_operand.hbm [shape: f32[2,1,128], index: 15, kind: input, shape index: {}]   ;;  %s45752_s16 = inlined_call_operand.vmem [shape: f32[2,128,32], index: 16, kind: input, shape index: {}]   ;;  %s45753_s17 = inlined_call_operand.hbm [shape: f32[2,1,32], index: 17, kind: input, shape index: {}]   ;;  %s45754_s18 = inlined_call_operand.hbm [shape: f32[32,128], index: 18, kind: input, shape index: {}]   ;;  %s45755_s19 = inlined_call_operand.vmem [shape: f32[1,128], index: 19, kind: input, shape index: {}]   ;;  %s45756_s20 = inlined_call_operand.hbm [shape: f32[2,4,128], index: 20, kind: output, shape index: {}]  }
   0x1   :  { %46036 = sst [smem:[#allocation141_spill]] %s45736_s0 }
   0x2   :  { %46037 = sst [smem:[#allocation142_spill]] %s45737_s1 }
   0x3   :  { %46038 = sst [smem:[#allocation143_spill]] %s45738_s2 }
   0x4   :  { %46039 = sst [smem:[#allocation144_spill]] %s45739_s3 }
   0x5   :  { %46040 = sst [smem:[#allocation145_spill]] %s45740_s4 }
   0x6   :  { %25 = vsyncpa [#allocation5], 0 }
   0x7   :  { %26 = vsyncpa [#allocation8], 0 }
   0x8   :  { %27 = vsyncpa [#allocation11], 0 }
   0x9   :  { %28 = vsyncpa [#allocation14], 0 }
   0xa   :  { %29 = vsyncpa [#allocation17], 0 }
   0xb   :  { %30 = vsyncpa [#allocation20], 0 }
   0xc   :  { %31 = vsyncpa [#allocation6], 0  ;;  %s42377_s1 = smov [#allocation7]   ;;  %s46041_s2 = sld [smem:[#allocation145_spill]] }
   0xd   :  { %s56_s22 = sshll.u32 %s42377_s1, 4  ;;  %s57_s22 = int_to_ptr.vmem [resolvable:$true] %s56_s22 }
  0x12   :  { %s42121_s25 = scalar_lea.hbm %s46041_s2, 16 }
  0x13   :  { %p42122_p0 = scmp.ne.s32.totalorder %s46041_s2, %s42121_s25  ;;  %p42125_p1 = scmp.lt.u32.totalorder %s42121_s25, %s46041_s2 }
  0x15   :  { %p42127_p2 = pnand %p42125_p1, %p42122_p0 }
  0x17   :  { %42130 = shalt.err (!%p42127_p2)
}
  0x18   :  { %s42131_s4 = scalar_lea.vmem %s57_s22, 16  ;;  %s42135_s29 = scalar_lea.vmem %s57_s22, 32 }
  0x19   :  { %p42132_p3 = scmp.ne.s32.totalorder %s57_s22, %s42131_s4  ;;  %p42136_p4 = scmp.lt.s32.totalorder %s57_s22, %s57_s22 }
  0x1a   :  { %p42137_p5 = scmp.lt.s32.totalorder %s42135_s29, %s42131_s4 }
  0x1c   :  { %p42138_p6 = por %p42137_p5, %p42136_p4 }
  0x1e   :  { %p42139_p7 = pnand %p42138_p6, %p42132_p3 }
  0x20   :  { %42142 = shalt.err (!%p42139_p7)
}
  0x21   :  { %59 = dma.hbm_to_vmem [thread:$0]  %s46041_s2, 16, %s57_s22, [#allocation8]  }
  0x22   :  { %s42378_s21 = smov [#allocation10]   ;;  %s42379_s23 = smov [#allocation13]  }
  0x23   :  { %s85_s1 = sshll.u32 %s42378_s21, 4  ;;  %s109_s24 = sshll.u32 %s42379_s23, 4  ;;  %s86_s1 = int_to_ptr.vmem [resolvable:$true] %s85_s1  ;;  %s110_s24 = int_to_ptr.vmem [resolvable:$true] %s109_s24 }
  0x24   :  { %s42143_s26 = scalar_lea.hbm %s45746_s10, 32 }
  0x25   :  { %p42144_p8 = scmp.ne.s32.totalorder %s45746_s10, %s42143_s26  ;;  %p42147_p9 = scmp.lt.u32.totalorder %s42143_s26, %s45746_s10 }
  0x27   :  { %p42149_p10 = pnand %p42147_p9, %p42144_p8 }
  0x29   :  { %42152 = shalt.err (!%p42149_p10)
}
  0x2a   :  { %s42153_s22 = scalar_lea.vmem %s86_s1, 32  ;;  %p42158_p12 = scmp.lt.s32.totalorder %s86_s1, %s86_s1 }
  0x2b   :  { %p42154_p11 = scmp.ne.s32.totalorder %s86_s1, %s42153_s22  ;;  %p42159_p13 = scmp.lt.s32.totalorder %s42153_s22, %s42153_s22 }
  0x2d   :  { %p42160_p0 = por %p42159_p13, %p42158_p12 }
  0x2f   :  { %p42161_p1 = pnand %p42160_p0, %p42154_p11 }
  0x31   :  { %42164 = shalt.err (!%p42161_p1)
}
  0x32   :  { %s42380_s2 = smov 16   ;;  %s42381_s30 = smov 1  }
  0x33   :  { %91 = dma.hbm_to_vmem [thread:$0]  %s45746_s10, 32, %s86_s1, [#allocation11], %s42380_s2, %s42380_s2, %s42381_s30  }
  0x34   :  { %s42165_s3 = scalar_lea.hbm %s45748_s12, 32 }
  0x35   :  { %p42166_p2 = scmp.ne.s32.totalorder %s45748_s12, %s42165_s3  ;;  %p42169_p3 = scmp.lt.u32.totalorder %s42165_s3, %s45748_s12 }
  0x37   :  { %p42171_p4 = pnand %p42169_p3, %p42166_p2 }
  0x39   :  { %42174 = shalt.err (!%p42171_p4)
}
  0x3a   :  { %s42175_s29 = scalar_lea.vmem %s110_s24, 32  ;;  %p42180_p6 = scmp.lt.s32.totalorder %s110_s24, %s110_s24 }
  0x3b   :  { %p42176_p5 = scmp.ne.s32.totalorder %s110_s24, %s42175_s29  ;;  %p42181_p7 = scmp.lt.s32.totalorder %s42175_s29, %s42175_s29 }
  0x3d   :  { %p42182_p8 = por %p42181_p7, %p42180_p6 }
  0x3f   :  { %p42183_p9 = pnand %p42182_p8, %p42176_p5 }
  0x41   :  { %42186 = shalt.err (!%p42183_p9)
}
  0x42   :  { %115 = dma.hbm_to_vmem [thread:$0]  %s45748_s12, 32, %s110_s24, [#allocation14], %s42380_s2, %s42380_s2, %s42381_s30  }
  0x43   :  { %s42382_s22 = smov [#allocation16]   ;;  %s42383_s21 = smov [#allocation4]  }
  0x44   :  { %s135_s0 = sshll.u32 %s42382_s22, 4  ;;  %s39_s23 = sshll.u32 %s42383_s21, 4  ;;  %s136_s0 = int_to_ptr.vmem [resolvable:$true] %s135_s0  ;;  %s40_s23 = int_to_ptr.vmem [resolvable:$true] %s39_s23 }
  0x45   :  { %s42187_s26 = scalar_lea.hbm %s45751_s15, 32 }
  0x46   :  { %p42188_p10 = scmp.ne.s32.totalorder %s45751_s15, %s42187_s26  ;;  %p42191_p11 = scmp.lt.u32.totalorder %s42187_s26, %s45751_s15 }
  0x48   :  { %p42193_p12 = pnand %p42191_p11, %p42188_p10 }
  0x4a   :  { %42196 = shalt.err (!%p42193_p12)
}
  0x4b   :  { %s42197_s12 = scalar_lea.vmem %s136_s0, 32  ;;  %p42202_p0 = scmp.lt.s32.totalorder %s136_s0, %s136_s0 }
  0x4c   :  { %p42198_p13 = scmp.ne.s32.totalorder %s136_s0, %s42197_s12  ;;  %p42203_p1 = scmp.lt.s32.totalorder %s42197_s12, %s42197_s12 }
  0x4e   :  { %p42204_p2 = por %p42203_p1, %p42202_p0 }
  0x50   :  { %p42205_p3 = pnand %p42204_p2, %p42198_p13 }
  0x52   :  { %42208 = shalt.err (!%p42205_p3)
}
  0x53   :  { %141 = dma.hbm_to_vmem [thread:$0]  %s45751_s15, 32, %s136_s0, [#allocation17], %s42380_s2, %s42380_s2, %s42381_s30  }
  0x54   :  { %s46042_s21 = sld [smem:[#allocation142_spill]] }
  0x5a   :  { %s42209_s25 = scalar_lea.hbm %s46042_s21, 32 }
  0x5b   :  { %p42210_p4 = scmp.ne.s32.totalorder %s46042_s21, %s42209_s25  ;;  %p42213_p5 = scmp.lt.u32.totalorder %s42209_s25, %s46042_s21 }
  0x5d   :  { %p42215_p6 = pnand %p42213_p5, %p42210_p4 }
  0x5f   :  { %42218 = shalt.err (!%p42215_p6)
}
  0x60   :  { %s42219_s4 = scalar_lea.vmem %s40_s23, 32  ;;  %p42224_p8 = scmp.lt.s32.totalorder %s40_s23, %s40_s23 }
  0x61   :  { %p42220_p7 = scmp.ne.s32.totalorder %s40_s23, %s42219_s4  ;;  %p42225_p9 = scmp.lt.s32.totalorder %s42219_s4, %s42219_s4 }
  0x63   :  { %p42226_p10 = por %p42225_p9, %p42224_p8 }
  0x65   :  { %p42227_p11 = pnand %p42226_p10, %p42220_p7 }
  0x67   :  { %42230 = shalt.err (!%p42227_p11)
}
  0x68   :  { %45 = dma.hbm_to_vmem [thread:$0]  %s46042_s21, 32, %s40_s23, [#allocation5], %s42380_s2, %s42380_s2, %s42381_s30  }
  0x69   :  { %s42384_s29 = smov [#allocation9]   ;;  %s42385_s24 = smov [#allocation12]  }
  0x6a   :  { %s73_s12 = sshll.u32 %s42384_s29, 4  ;;  %s97_s10 = sshll.u32 %s42385_s24, 4  ;;  %s74_s12 = int_to_ptr.vmem [resolvable:$true] %s73_s12  ;;  %s98_s10 = int_to_ptr.vmem [resolvable:$true] %s97_s10 }
  0x6b   :  { %s42231_s25 = scalar_lea.hbm %s45745_s9, 32 }
  0x6c   :  { %p42232_p12 = scmp.ne.s32.totalorder %s45745_s9, %s42231_s25  ;;  %p42235_p13 = scmp.lt.u32.totalorder %s42231_s25, %s45745_s9 }
  0x6e   :  { %p42237_p0 = pnand %p42235_p13, %p42232_p12 }
  0x70   :  { %42240 = shalt.err (!%p42237_p0)
}
  0x71   :  { %s42241_s23 = scalar_lea.vmem %s74_s12, 32  ;;  %p42246_p2 = scmp.lt.s32.totalorder %s74_s12, %s74_s12 }
  0x72   :  { %p42242_p1 = scmp.ne.s32.totalorder %s74_s12, %s42241_s23  ;;  %p42247_p3 = scmp.lt.s32.totalorder %s42241_s23, %s42241_s23 }
  0x74   :  { %p42248_p4 = por %p42247_p3, %p42246_p2 }
  0x76   :  { %p42249_p5 = pnand %p42248_p4, %p42242_p1 }
  0x78   :  { %42252 = shalt.err (!%p42249_p5)
}
  0x79   :  { %79 = dma.hbm_to_vmem [thread:$0]  %s45745_s9, 32, %s74_s12, [#allocation8], %s42380_s2, %s42380_s2, %s42381_s30  }
  0x7a   :  { %s42253_s29 = scalar_lea.hbm %s45747_s11, 32 }
  0x7b   :  { %p42254_p6 = scmp.ne.s32.totalorder %s45747_s11, %s42253_s29  ;;  %p42257_p7 = scmp.lt.u32.totalorder %s42253_s29, %s45747_s11 }
  0x7d   :  { %p42259_p8 = pnand %p42257_p7, %p42254_p6 }
  0x7f   :  { %42262 = shalt.err (!%p42259_p8)
}
  0x80   :  { %s42263_s3 = scalar_lea.vmem %s98_s10, 32  ;;  %p42268_p10 = scmp.lt.s32.totalorder %s98_s10, %s98_s10 }
  0x81   :  { %p42264_p9 = scmp.ne.s32.totalorder %s98_s10, %s42263_s3  ;;  %p42269_p11 = scmp.lt.s32.totalorder %s42263_s3, %s42263_s3 }
  0x83   :  { %p42270_p12 = por %p42269_p11, %p42268_p10 }
  0x85   :  { %p42271_p13 = pnand %p42270_p12, %p42264_p9 }
  0x87   :  { %42274 = shalt.err (!%p42271_p13)
}
  0x88   :  { %103 = dma.hbm_to_vmem [thread:$0]  %s45747_s11, 32, %s98_s10, [#allocation11], %s42380_s2, %s42380_s2, %s42381_s30  }
  0x89   :  { %s42386_s26 = smov [#allocation15]   ;;  %s42387_s28 = smov [#allocation18]  }
  0x8a   :  { %s121_s27 = sshll.u32 %s42386_s26, 4  ;;  %s149_s23 = sshll.u32 %s42387_s28, 4  ;;  %s122_s27 = int_to_ptr.vmem [resolvable:$true] %s121_s27  ;;  %s150_s23 = int_to_ptr.vmem [resolvable:$true] %s149_s23 }
  0x8b   :  { %s42275_s15 = scalar_lea.hbm %s45749_s13, 32 }
  0x8c   :  { %p42276_p0 = scmp.ne.s32.totalorder %s45749_s13, %s42275_s15  ;;  %p42279_p1 = scmp.lt.u32.totalorder %s42275_s15, %s45749_s13 }
  0x8e   :  { %p42281_p2 = pnand %p42279_p1, %p42276_p0 }
  0x90   :  { %42284 = shalt.err (!%p42281_p2)
}
  0x91   :  { %s42285_s11 = scalar_lea.vmem %s122_s27, 32  ;;  %p42290_p4 = scmp.lt.s32.totalorder %s122_s27, %s122_s27 }
  0x92   :  { %p42286_p3 = scmp.ne.s32.totalorder %s122_s27, %s42285_s11  ;;  %p42291_p5 = scmp.lt.s32.totalorder %s42285_s11, %s42285_s11 }
  0x94   :  { %p42292_p6 = por %p42291_p5, %p42290_p4 }
  0x96   :  { %p42293_p7 = pnand %p42292_p6, %p42286_p3 }
  0x98   :  { %42296 = shalt.err (!%p42293_p7)
}
  0x99   :  { %127 = dma.hbm_to_vmem [thread:$0]  %s45749_s13, 32, %s122_s27, [#allocation14], %s42380_s2, %s42380_s2, %s42381_s30  }
  0x9a   :  { %s42297_s9 = scalar_lea.hbm %s45753_s17, 32 }
  0x9b   :  { %p42298_p8 = scmp.ne.s32.totalorder %s45753_s17, %s42297_s9  ;;  %p42301_p9 = scmp.lt.u32.totalorder %s42297_s9, %s45753_s17 }
  0x9d   :  { %p42303_p10 = pnand %p42301_p9, %p42298_p8 }
  0x9f   :  { %42306 = shalt.err (!%p42303_p10)
}
  0xa0   :  { %s42307_s4 = scalar_lea.vmem %s150_s23, 32  ;;  %p42312_p12 = scmp.lt.s32.totalorder %s150_s23, %s150_s23 }
  0xa1   :  { %p42308_p11 = scmp.ne.s32.totalorder %s150_s23, %s42307_s4  ;;  %p42313_p13 = scmp.lt.s32.totalorder %s42307_s4, %s42307_s4 }
  0xa3   :  { %p42314_p0 = por %p42313_p13, %p42312_p12 }
  0xa5   :  { %p42315_p1 = pnand %p42314_p0, %p42308_p11 }
  0xa7   :  { %42318 = shalt.err (!%p42315_p1)
}
  0xa8   :  { %155 = dma.hbm_to_vmem [thread:$0]  %s45753_s17, 32, %s150_s23, [#allocation17], %s42380_s2, %s42380_s2, %s42381_s30  }
  0xa9   :  { %s42388_s15 = smov [#allocation19]   ;;  %s42319_s1 = scalar_lea.hbm %s45754_s18, 512 }
  0xaa   :  { %s161_s0 = sshll.u32 %s42388_s15, 4  ;;  %p42320_p2 = scmp.ne.s32.totalorder %s45754_s18, %s42319_s1  ;;  %s162_s0 = int_to_ptr.vmem [resolvable:$true] %s161_s0 }
  0xab   :  { %p42323_p3 = scmp.lt.u32.totalorder %s42319_s1, %s45754_s18 }
  0xad   :  { %p42325_p4 = pnand %p42323_p3, %p42320_p2 }
  0xaf   :  { %42328 = shalt.err (!%p42325_p4)
}
  0xb0   :  { %s42329_s3 = scalar_lea.vmem %s162_s0, 512  ;;  %p42334_p6 = scmp.lt.s32.totalorder %s162_s0, %s162_s0 }
  0xb1   :  { %p42330_p5 = scmp.ne.s32.totalorder %s162_s0, %s42329_s3  ;;  %p42335_p7 = scmp.lt.s32.totalorder %s42329_s3, %s42329_s3 }
  0xb3   :  { %p42336_p8 = por %p42335_p7, %p42334_p6 }
  0xb5   :  { %p42337_p9 = pnand %p42336_p8, %p42330_p5 }
  0xb7   :  { %42340 = shalt.err (!%p42337_p9)
}
  0xb8   :  { %s42389_s17 = smov 128   ;;  %s42390_s30 = smov 8  }
  0xb9   :  { %167 = dma.hbm_to_vmem [thread:$0]  %s45754_s18, 512, %s162_s0, [#allocation20], %s42389_s17, %s42389_s17, %s42390_s30  }
  0xba   :  { %42363 = dma.done.wait [#allocation5], 32  }
  0xbb   :  { %42364 = vsyncadd [#allocation5], 4294967264 }
  0xbc   :  { %42365 = dma.done.wait [#allocation8], 48  }
  0xbd   :  { %42366 = vsyncadd [#allocation8], 4294967248 }
  0xbe   :  { %42367 = dma.done.wait [#allocation11], 64  }
  0xbf   :  { %42368 = vsyncadd [#allocation11], 4294967232 }
  0xc0   :  { %42369 = dma.done.wait [#allocation14], 64  }
  0xc1   :  { %42370 = vsyncadd [#allocation14], 4294967232 }
  0xc2   :  { %42371 = dma.done.wait [#allocation17], 64  }
  0xc3   :  { %42372 = vsyncadd [#allocation17], 4294967232 }
  0xc4   :  { %42373 = dma.done.wait [#allocation20], 512  }
  0xc5   :  { %42374 = vsyncadd [#allocation20], 4294966784  ;;  %v45761_v0 = vmov 0.0   ;;  %vm42392_vm0 = vmmov 0   ;;  %vm317_vm1 = vcmask 1043456   ;;  %vm313_vm2 = vcmask 31744  }
  0xc6   :  { %35042 = vmatprep.subr.mxu0 %v45761_v0  ;;  %35044 = vmatprep.mubr.msk.f32.mxu0 %vm42392_vm0, %v45761_v0  ;;  %s46043_s26 = sld [smem:[#allocation144_spill]]  ;;  %s46044_s4 = sld [smem:[#allocation141_spill]]  ;;  %v216_v15 = vld [vmem:[%s45742_s6] sm:$0xff]  ;;  %v217_v16 = vld [vmem:[%s45742_s6 + $0x8] sm:$0xff]  ;;  %v218_v21 = vld [vmem:[%s45742_s6 + $0x10] sm:$0xff]  ;;  %vm768_vm3 = vcmask 257024  }
  0xc7   :  { %35057 = vmatprep.subr.mxu1 %v45761_v0  ;;  %35059 = vmatprep.mubr.msk.f32.mxu1 %vm42392_vm0, %v45761_v0  ;;  %v1312_v17 = vand.u32 4294901760, %v216_v15  ;;  %v1315_v18 = vand.u32 4294901760, %v217_v16  ;;  %v219_v22 = vld [vmem:[%s45742_s6 + $0x18] sm:$0xff]  ;;  %s46045_s25 = sld [smem:[#allocation143_spill]]  ;;  %v1318_v26 = vand.u32 4294901760, %v218_v21  ;;  %v207_v41 = vld [vmem:[%s45741_s5] sm:$0xff] }
  0xc8   :  { %v1321_v27 = vand.u32 4294901760, %v219_v22  ;;  %v208_v42 = vld [vmem:[%s45741_s5 + $0x8] sm:$0xff]  ;;  %v784_v44 = vand.u32 4294901760, %v207_v41  ;;  %v209_v51 = vld [vmem:[%s45741_s5 + $0x10] sm:$0xff]  ;;  %v210_v52 = vld [vmem:[%s45741_s5 + $0x18] sm:$0xff]  ;;  %vm772_vm4 = vcmask 261120  }
  0xc9   :  { %v42701_v19 = vsub.f32 %v216_v15, %v1312_v17  ;;  %v42703_v20 = vsub.f32 %v217_v16, %v1315_v18  ;;  %v1416_v30 = vsub.f32 %v218_v21, %v1318_v26  ;;  %v787_v45 = vand.u32 4294901760, %v208_v42  ;;  %s42393_s17 = smov 120   ;;  %s42394_s23 = smov 112  }
  0xca   :  { %v1423_v31 = vsub.f32 %v219_v22, %v1321_v27  ;;  %v42731_v46 = vpack.c.bf16 %v1315_v18, %v1312_v17  ;;  %v42733_v47 = vpack.c.bf16 %v1321_v27, %v1318_v26  ;;  %v874_v49 = vsub.f32 %v207_v41, %v784_v44  ;;  %s42395_s9 = smov 104   ;;  %s42396_s0 = smov 24  }
  0xcb   :  { %v1403_v24 = vand.u32 4294901760, %v42701_v19  ;;  %v1410_v25 = vand.u32 4294901760, %v42703_v20  ;;  %v1417_v34 = vand.u32 4294901760, %v1416_v30  ;;  %v42736_v48 = vpack.c.bf16 %v787_v45, %v784_v44 }
  0xcc   :  { %v200_v1 = vld [vmem:[%s46043_s26] sm:$0xf]  ;;  %v1424_v35 = vand.u32 4294901760, %v1423_v31  ;;  %46048 = vst [vmem:[#allocation31_spill] sm:$0xff] %v42731_v46  ;;  %46049 = vst [vmem:[#allocation32_spill] sm:$0xff] %v42733_v47  ;;  %v42741_v50 = vpack.c.bf16 %v42703_v20, %v42701_v19  ;;  %v881_v53 = vsub.f32 %v208_v42, %v787_v45  ;;  %v790_v54 = vand.u32 4294901760, %v209_v51 }
  0xcd   :  { %v306_v2 = vld [vmem:[%s46044_s4] sm:$0xff]  ;;  %v319_v3 = vsel %vm317_vm1, %v200_v1, 0  ;;  %v1404_v28 = vsub.f32 %v42701_v19, %v1403_v24  ;;  %v1411_v29 = vsub.f32 %v42703_v20, %v1410_v25  ;;  %v1418_v37 = vsub.f32 %v1416_v30, %v1417_v34 }
  0xce   :  { %v315_v4 = vsel %vm313_vm2, %v306_v2, 0  ;;  %v42665_v5 = vand.u32 4294901760, %v319_v3  ;;  %v767_v23 = vld [vmem:[%s46045_s25] sm:$0xf]  ;;  %v1425_v38 = vsub.f32 %v1423_v31, %v1424_v35  ;;  %46050 = vst [vmem:[#allocation33_spill] sm:$0xff] %v42741_v50  ;;  %v793_v55 = vand.u32 4294901760, %v210_v52 }
  0xcf   :  { %v387_v6 = vand.u32 4294901760, %v315_v4  ;;  %769 = vst.msk [vmem:[#allocation2] sm:$0xf] %vm768_vm3, %v767_v23  ;;  %v1405_v32 = vand.u32 4294901760, %v1404_v28  ;;  %v1412_v33 = vand.u32 4294901760, %v1411_v29  ;;  %v1419_v39 = vand.u32 4294901760, %v1418_v37 }
  0xd0   :  { %35043 = vmatpush3.msra.mxu0 %v42665_v5  ;;  %v42669_v8 = vsub.f32 %v319_v3, %v42665_v5  ;;  %35058 = vmatpush3.msra.mxu1 %v42665_v5  ;;  %v1426_v40 = vand.u32 4294901760, %v1425_v38  ;;  %v875_v56 = vand.u32 4294901760, %v874_v49  ;;  %v882_v57 = vand.u32 4294901760, %v881_v53  ;;  %v33011_v23 = vld [vmem:[#allocation7] ss:$0 sm:$0xff] }
  0xd1   :  { %v388_v7 = vsub.f32 %v315_v4, %v387_v6  ;;  %35047 = vmatprep.subr.mxu0 %v45761_v0  ;;  %35067 = vmatprep.subr.mxu1 %v45761_v0  ;;  %v42719_v36 = vpack.c.bf16 %v1412_v33, %v1405_v32  ;;  %v42752_v58 = vpack.c.bf16 %v793_v55, %v790_v54  ;;  %v17136_v44 = vld [vmem:[%s46045_s25] sm:$0xf]  ;;  %vm2373_vm5 = vcmask 64512  }
  0xd2   :  { %v42675_v10 = vand.u32 4294901760, %v42669_v8  ;;  %v42729_v43 = vpack.c.bf16 %v1426_v40, %v1419_v39  ;;  %v42754_v59 = vpack.c.bf16 %v1423_v31, %v1416_v30  ;;  %v876_v60 = vsub.f32 %v874_v49, %v875_v56  ;;  %v770_v40 = vld [vmem:[%s46045_s25 + $0x4] sm:$0xff] }
  0xd3   :  { %v389_v9 = vand.u32 4294901760, %v388_v7  ;;  %46046 = vst [vmem:[#allocation29_spill] sm:$0xff] %v42719_v36  ;;  %v883_v61 = vsub.f32 %v881_v53, %v882_v57  ;;  %v888_v62 = vsub.f32 %v209_v51, %v790_v54  ;;  %v895_v63 = vsub.f32 %v210_v52, %v793_v55 }
  0xd4   :  { %v401_v12 = vsub.f32 %v42669_v8, %v42675_v10  ;;  %46047 = vst [vmem:[#allocation30_spill] sm:$0xff] %v42729_v43  ;;  %46051 = vst [vmem:[#allocation34_spill] sm:$0xff] %v42754_v59  ;;  %v877_v1 = vand.u32 4294901760, %v876_v60  ;;  %v42763_v15 = vpack.c.bf16 %v881_v53, %v874_v49  ;;  %v42765_v16 = vpack.c.bf16 %v1410_v25, %v1403_v24 }
  0xd5   :  { %v390_v11 = vsub.f32 %v388_v7, %v389_v9  ;;  %35060 = vmatmul.mubr.f32.vlgmr.msra.gmra.mrb[0].mxu1 %v389_v9  ;;  %v884_v2 = vand.u32 4294901760, %v883_v61  ;;  %v889_v3 = vand.u32 4294901760, %v888_v62  ;;  %v896_v4 = vand.u32 4294901760, %v895_v63 }
  0xd6   :  { %35068 = vmatpush3.msra.mxu1 %v42665_v5  ;;  %35069 = vmatprep.mubr.msk.f32.mxu1 %vm42392_vm0, %v45761_v0  ;;  %v42682_v14 = vand.u32 4294901760, %v401_v12  ;;  %46052 = vst [vmem:[#allocation35_spill] sm:$0xff] %v42763_v15  ;;  %46053 = vst [vmem:[#allocation36_spill] sm:$0xff] %v42765_v16  ;;  %v42767_v17 = vpack.c.bf16 %v895_v63, %v888_v62  ;;  %v42769_v18 = vpack.c.bf16 %v1424_v35, %v1417_v34  ;;  %vm2894_vm6 = vcmask 93184  }
  0xd7   :  { %v391_v13 = vand.u32 4294901760, %v390_v11  ;;  %38795 = vmatprep.subr.bf16.mxu1 %v42719_v36  ;;  %v897_v9 = vsub.f32 %v895_v63, %v896_v4  ;;  %v42771_v19 = vpack.c.bf16 %v882_v57, %v875_v56  ;;  %v42773_v20 = vpack.c.bf16 %v896_v4, %v889_v3 }
  0xd8   :  { %46054 = vst [vmem:[#allocation37_spill] sm:$0xff] %v42767_v17  ;;  %46055 = vst [vmem:[#allocation38_spill] sm:$0xff] %v42769_v18  ;;  %vm2890_vm7 = vcmask 97280   ;;  %vm3426_vm8 = vcmask 60416   ;;  %vm4494_vm9 = vcmask 130112   ;;  %vm4496_vm10 = vcmask 126016  }
  0xd9   :  { %35045 = vmatmul.mubr.f32.vlgmr.msra.gmra.mrb[0].mxu0 %v391_v13  ;;  %35070 = vmatmul.mubr.f32.vlgmr.msra.gmra.mrb[2].mxu1 %v387_v6  ;;  %v898_v12 = vand.u32 4294901760, %v897_v9  ;;  %46056 = vst [vmem:[#allocation39_spill] sm:$0xff] %v42771_v19  ;;  %46057 = vst [vmem:[#allocation40_spill] sm:$0xff] %v42773_v20  ;;  %v227_v9 = vld [vmem:[%s45743_s7 + $0x10] sm:$0xff]  ;;  %vm5565_vm11 = vcmask 191616   ;;  %vm5563_vm12 = vcmask 195712  }
  0xda   :  { %35048 = vmatpush3.msra.mxu0 %v42682_v14  ;;  %35049 = vmatprep.mubr.msk.f32.mxu0 %vm42392_vm0, %v45761_v0  ;;  %vm6634_vm13 = vcmask 257216   ;;  %vm6632_vm14 = vcmask 261312  }
  0xdb   :  { %35052 = vmatprep.subr.mxu0 %v45761_v0  ;;  %38797 = vmatpush3.bf16.msra.mxu1 %v42719_v36 }
  0xdc   :  { %38799 = vmatprep.subr.bf16.mxu1 %v42729_v43 }
  0xdd   :  { %35050 = vmatmul.mubr.f32.vlgmr.msra.gmra.mrb[2].mxu0 %v387_v6 }
  0xde   :  { %35053 = vmatpush3.msra.mxu0 %v42669_v8  ;;  %35054 = vmatprep.mubr.msk.f32.mxu0 %vm42392_vm0, %v45761_v0 }
  0xdf   :  { %35062 = vmatprep.subr.mxu0 %v45761_v0  ;;  %38801 = vmatpush3.bf16.msra.mxu1 %v42729_v43 }
  0xe0   :  { %38803 = vmatprep.subr.bf16.mxu1 %v42741_v50 }
  0xe1   :  { %35055 = vmatmul.mubr.f32.vlgmr.msra.gmra.mrb[4].mxu0 %v388_v7  ;;  %v890_v7 = vsub.f32 %v888_v62, %v889_v3  ;;  %v226_v3 = vld [vmem:[%s45743_s7 + $0x8] sm:$0xff] }
  0xe2   :  { %35063 = vmatpush3.msra.mxu0 %v42675_v10  ;;  %35064 = vmatprep.mubr.msk.f32.mxu0 %vm42392_vm0, %v45761_v0 }
  0xe3   :  { %38739 = vmatprep.subr.bf16.mxu0 %v42736_v48  ;;  %v891_v11 = vand.u32 4294901760, %v890_v7  ;;  %v1843_v7 = vand.u32 4294901760, %v226_v3 }
  0xe5   :  { %35065 = vmatmul.mubr.f32.vlgmr.msra.gmra.mrb[6].mxu0 %v387_v6  ;;  %v42758_v6 = vpack.c.bf16 %v884_v2, %v877_v1  ;;  %v42761_v13 = vpack.c.bf16 %v898_v12, %v891_v11  ;;  %v225_v2 = vld [vmem:[%s45743_s7] sm:$0xff]  ;;  %v228_v11 = vld [vmem:[%s45743_s7 + $0x18] sm:$0xff]  ;;  %v1846_v12 = vand.u32 4294901760, %v227_v9 }
  0xe6   :  { %38741 = vmatpush3.bf16.msra.mxu0 %v42736_v48  ;;  %v1840_v4 = vand.u32 4294901760, %v225_v2 }
  0xe7   :  { %38743 = vmatprep.subr.bf16.mxu0 %v42752_v58 }
  0xea   :  { %38745 = vmatpush3.bf16.msra.mxu0 %v42752_v58 }
  0xeb   :  { %38747 = vmatprep.subr.bf16.mxu0 %v42758_v6 }
 0x1a8   :  { %v617_v21 = vpop.f32.mrb[0].mxu1 }
 0x1a9   :  { %v35061_v22 = vpop.f32.mrb[1].mxu1 }
 0x1aa   :  { %v1930_v22 = vsub.f32 %v225_v2, %v1840_v4 }
 0x1ac   :  { %v393_v26 = vpop.f32.mrb[0].mxu0  ;;  %v763_v27 = vpop.f32.mrb[2].mxu1 }
 0x1ad   :  { %v35046_v28 = vpop.f32.mrb[1].mxu0  ;;  %v35071_v29 = vpop.f32.mrb[3].mxu1  ;;  %v394_v30 = vadd.f32 %v33011_v23, %v393_v26  ;;  %v1937_v23 = vsub.f32 %v226_v3, %v1843_v7  ;;  %v1931_v26 = vand.u32 4294901760, %v1930_v22 }
 0x1ae   :  { %v1944_v28 = vsub.f32 %v227_v9, %v1846_v12 }
 0x1b0   :  { %v469_v31 = vpop.f32.mrb[2].mxu0 }
 0x1b1   :  { %v470_v32 = vadd.f32 %v469_v31, %v394_v30  ;;  %v35051_v24 = vpop.f32.mrb[3].mxu0  ;;  %v42883_v30 = vpack.c.bf16 %v1843_v7, %v1840_v4  ;;  %v1932_v31 = vsub.f32 %v1930_v22, %v1931_v26 }
 0x1b2   :  { %v1945_v24 = vand.u32 4294901760, %v1944_v28 }
 0x1b3   :  { %46058 = vst [vmem:[#allocation41_spill] sm:$0xff] %v42883_v30 }
 0x1b4   :  { %v543_v25 = vpop.f32.mrb[4].mxu0 }
 0x1b5   :  { %v544_v33 = vadd.f32 %v543_v25, %v470_v32  ;;  %v35056_v37 = vpop.f32.mrb[5].mxu0 }
 0x1b6   :  { %v1933_v37 = vand.u32 4294901760, %v1932_v31 }
 0x1b7   :  { %v618_v34 = vadd.f32 %v617_v21, %v544_v33  ;;  %v1849_v21 = vand.u32 4294901760, %v228_v11 }
 0x1b8   :  { %v691_v35 = vpop.f32.mrb[6].mxu0 }
 0x1b9   :  { %v692_v38 = vadd.f32 %v691_v35, %v618_v34  ;;  %v35066_v39 = vpop.f32.mrb[7].mxu0  ;;  %v1951_v29 = vsub.f32 %v228_v11, %v1849_v21  ;;  %v42887_v33 = vpack.c.bf16 %v1849_v21, %v1846_v12  ;;  %v1946_v35 = vsub.f32 %v1944_v28, %v1945_v24 }
 0x1bb   :  { %v764_v41 = vadd.f32 %v763_v27, %v692_v38  ;;  %v1938_v27 = vand.u32 4294901760, %v1937_v23  ;;  %v1952_v25 = vand.u32 4294901760, %v1951_v29  ;;  %46059 = vst [vmem:[#allocation42_spill] sm:$0xff] %v42887_v33 }
 0x1bd   :  { %v771_v42 = vadd.f32 %v770_v40, %v764_v41  ;;  %v1939_v32 = vsub.f32 %v1937_v23, %v1938_v27  ;;  %v1953_v38 = vsub.f32 %v1951_v29, %v1952_v25  ;;  %v1947_v40 = vand.u32 4294901760, %v1946_v35 }
 0x1bf   :  { %773 = vst.msk [vmem:[#allocation2 + $0x4] sm:$0xff] %vm772_vm4, %v771_v42  ;;  %v1940_v34 = vand.u32 4294901760, %v1939_v32  ;;  %v1954_v41 = vand.u32 4294901760, %v1953_v38 }
 0x1c1   :  { %v42894_v39 = vpack.c.bf16 %v1940_v34, %v1933_v37  ;;  %v42898_v42 = vpack.c.bf16 %v1954_v41, %v1947_v40 }
 0x1c3   :  { %46060 = vst [vmem:[#allocation43_spill] sm:$0xff] %v42894_v39  ;;  %46061 = vst [vmem:[#allocation44_spill] sm:$0xff] %v42898_v42 }
 0x1c6   :  { %v42782_v45 = vld [vmem:[#allocation2] sm:$0xff]  ;;  %v775_v49 = vld [vmem:[#allocation2 + $0x8] sm:$0xf] }
 0x1c7   :  { %v778_v51 = vsel %vm772_vm4, %v42782_v45, 0  ;;  %v781_v52 = vsel %vm772_vm4, %v775_v49, 0  ;;  %17137 = vst.msk [vmem:[#allocation2] sm:$0xf] %vm768_vm3, %v17136_v44  ;;  %v42904_v44 = vpack.c.bf16 %v1937_v23, %v1930_v22  ;;  %v42908_v49 = vpack.c.bf16 %v1951_v29, %v1944_v28 }
 0x1c8   :  { %v42788_v53 = vand.u32 4294901760, %v778_v51  ;;  %v42790_v54 = vand.u32 4294901760, %v781_v52 }
 0x1c9   :  { %46062 = vst [vmem:[#allocation45_spill] sm:$0xff] %v42904_v44  ;;  %46063 = vst [vmem:[#allocation46_spill] sm:$0xff] %v42908_v49 }
 0x1ca   :  { %35157 = vmatprep.mubr.f32.mxu1 %v42788_v53  ;;  %v42794_v55 = vsub.f32 %v778_v51, %v42788_v53  ;;  %v42797_v56 = vsub.f32 %v781_v52, %v42790_v54  ;;  %v42920_v51 = vpack.c.bf16 %v1938_v27, %v1931_v26  ;;  %v42924_v52 = vpack.c.bf16 %v1952_v25, %v1945_v24 }
 0x1cb   :  { %35158 = vmatmul.mubr.f32.vlgmr.msra.gmra.mrb[4].mxu1 %v42790_v54 }
 0x1cc   :  { %38805 = vmatpush3.bf16.msra.mxu1 %v42741_v50  ;;  %35168 = vmatprep.mubr.f32.mxu1 %v42794_v55  ;;  %v42803_v57 = vand.u32 4294901760, %v42794_v55  ;;  %v42806_v60 = vand.u32 4294901760, %v42797_v56  ;;  %46064 = vst [vmem:[#allocation47_spill] sm:$0xff] %v42920_v51  ;;  %46065 = vst [vmem:[#allocation48_spill] sm:$0xff] %v42924_v52 }
 0x1cd   :  { %38807 = vmatprep.subr.bf16.mxu1 %v42754_v59 }
 0x1ce   :  { %v855_v61 = vsub.f32 %v42794_v55, %v42803_v57  ;;  %v865_v62 = vsub.f32 %v42797_v56, %v42806_v60 }
 0x1d0   :  { %38809 = vmatpush3.bf16.msra.mxu1 %v42754_v59  ;;  %v42814_v63 = vand.u32 4294901760, %v855_v61  ;;  %v42816_v1 = vand.u32 4294901760, %v865_v62 }
 0x1d1   :  { %38811 = vmatprep.subr.bf16.mxu1 %v42731_v46 }
 0x1d2   :  { %35080 = vmatprep.mubr.f32.mxu0 %v42814_v63 }
 0x1d3   :  { %35081 = vmatmul.mubr.f32.vlgmr.msra.gmra.mrb[8].mxu0 %v42816_v1  ;;  %35169 = vmatmul.mubr.f32.vlgmr.msra.gmra.mrb[4].mxu1 %v42797_v56 }
 0x1d4   :  { %38749 = vmatpush3.bf16.msra.mxu0 %v42758_v6  ;;  %35091 = vmatprep.mubr.f32.mxu0 %v42788_v53 }
 0x1d5   :  { %38813 = vmatpush3.bf16.msra.mxu1 %v42731_v46  ;;  %35179 = vmatprep.mubr.f32.mxu1 %v42803_v57 }
 0x1d6   :  { %38751 = vmatprep.subr.bf16.mxu0 %v42761_v13  ;;  %38815 = vmatprep.subr.bf16.mxu1 %v42733_v47 }
 0x1d8   :  { %38753 = vmatpush3.bf16.msra.mxu0 %v42761_v13 }
 0x1d9   :  { %38817 = vmatpush3.bf16.msra.mxu1 %v42733_v47  ;;  %38755 = vmatprep.subr.bf16.mxu0 %v42763_v15 }
 0x1da   :  { %38819 = vmatprep.subr.bf16.mxu1 %v42765_v16 }
 0x1db   :  { %35092 = vmatmul.mubr.f32.vlgmr.msra.gmra.mrb[8].mxu0 %v42790_v54 }
 0x1dc   :  { %38757 = vmatpush3.bf16.msra.mxu0 %v42763_v15  ;;  %35180 = vmatmul.mubr.f32.vlgmr.msra.gmra.mrb[4].mxu1 %v42806_v60 }
 0x1dd   :  { %35102 = vmatprep.mubr.f32.mxu0 %v42794_v55  ;;  %38821 = vmatpush3.bf16.msra.mxu1 %v42765_v16 }
 0x1de   :  { %35190 = vmatprep.mubr.f32.mxu1 %v42788_v53  ;;  %38759 = vmatprep.subr.bf16.mxu0 %v42767_v17 }
 0x1df   :  { %38823 = vmatprep.subr.bf16.mxu1 %v42769_v18 }
 0x1e0   :  { %38761 = vmatpush3.bf16.msra.mxu0 %v42767_v17 }
 0x1e1   :  { %38825 = vmatpush3.bf16.msra.mxu1 %v42769_v18  ;;  %38763 = vmatprep.subr.bf16.mxu0 %v42736_v48 }
 0x1e2   :  { %38827 = vmatprep.subr.bf16.mxu1 %v42731_v46 }
 0x1e3   :  { %35103 = vmatmul.mubr.f32.vlgmr.msra.gmra.mrb[8].mxu0 %v42797_v56 }
 0x1e4   :  { %38765 = vmatpush3.bf16.msra.mxu0 %v42736_v48  ;;  %35191 = vmatmul.mubr.f32.vlgmr.msra.gmra.mrb[4].mxu1 %v42790_v54 }
 0x1e5   :  { %35113 = vmatprep.mubr.f32.mxu0 %v42803_v57  ;;  %38829 = vmatpush3.bf16.msra.mxu1 %v42731_v46 }
 0x1e6   :  { %35201 = vmatprep.mubr.f32.mxu1 %v42788_v53  ;;  %38767 = vmatprep.subr.bf16.mxu0 %v42752_v58 }
 0x1e7   :  { %38831 = vmatprep.subr.bf16.mxu1 %v42733_v47 }
 0x1e8   :  { %38769 = vmatpush3.bf16.msra.mxu0 %v42752_v58 }
 0x1e9   :  { %38833 = vmatpush3.bf16.msra.mxu1 %v42733_v47  ;;  %38771 = vmatprep.subr.bf16.mxu0 %v42771_v19 }
 0x1eb   :  { %35114 = vmatmul.mubr.f32.vlgmr.msra.gmra.mrb[8].mxu0 %v42806_v60 }
 0x1ec   :  { %38773 = vmatpush3.bf16.msra.mxu0 %v42771_v19  ;;  %35202 = vmatmul.mubr.f32.vlgmr.msra.gmra.mrb[4].mxu1 %v42790_v54 }
 0x1ed   :  { %35124 = vmatprep.mubr.f32.mxu0 %v42788_v53  ;;  %38775 = vmatprep.subr.bf16.mxu0 %v42773_v20 }
 0x1f0   :  { %38777 = vmatpush3.bf16.msra.mxu0 %v42773_v20 }
 0x1f1   :  { %38779 = vmatprep.subr.bf16.mxu0 %v42736_v48 }
 0x1f3   :  { %35125 = vmatmul.mubr.f32.vlgmr.msra.gmra.mrb[8].mxu0 %v42790_v54 }
 0x1f4   :  { %38781 = vmatpush3.bf16.msra.mxu0 %v42736_v48  ;;  %35135 = vmatprep.mubr.f32.mxu0 %v42788_v53 }
 0x1f5   :  { %38783 = vmatprep.subr.bf16.mxu0 %v42752_v58 }
 0x1f8   :  { %38785 = vmatpush3.bf16.msra.mxu0 %v42752_v58 }
 0x1f9   :  { %38787 = vmatprep.subr.bf16.mxu0 %v42731_v46 }
 0x1fb   :  { %35136 = vmatmul.mubr.f32.vlgmr.msra.gmra.mrb[8].mxu0 %v42790_v54 }
 0x1fc   :  { %38789 = vmatpush3.bf16.msra.mxu0 %v42731_v46  ;;  %35146 = vmatprep.mubr.f32.mxu0 %v42814_v63 }
 0x1fd   :  { %38791 = vmatprep.subr.bf16.mxu0 %v42733_v47 }
 0x200   :  { %38793 = vmatpush3.bf16.msra.mxu0 %v42733_v47 }
 0x201   :  { %38835 = vmatprep.subr.bf16.mxu0 %v42883_v30 }
 0x203   :  { %35147 = vmatmul.mubr.f32.vlgmr.msra.gmra.mrb[10].mxu0 %v42816_v1 }
 0x204   :  { %38837 = vmatpush3.bf16.msra.mxu0 %v42883_v30  ;;  %35212 = vmatprep.mubr.f32.mxu0 %v42814_v63 }
 0x205   :  { %38839 = vmatprep.subr.bf16.mxu0 %v42887_v33 }
 0x208   :  { %38841 = vmatpush3.bf16.msra.mxu0 %v42887_v33 }
 0x209   :  { %38843 = vmatprep.subr.bf16.mxu0 %v42894_v39 }
 0x20b   :  { %35213 = vmatmul.mubr.f32.vlgmr.msra.gmra.mrb[12].mxu0 %v42816_v1 }
 0x20c   :  { %38845 = vmatpush3.bf16.msra.mxu0 %v42894_v39  ;;  %35223 = vmatprep.mubr.f32.mxu0 %v42788_v53 }
 0x20d   :  { %38847 = vmatprep.subr.bf16.mxu0 %v42898_v42 }
 0x210   :  { %38849 = vmatpush3.bf16.msra.mxu0 %v42898_v42 }
 0x211   :  { %38851 = vmatprep.subr.bf16.mxu0 %v42904_v44 }
 0x213   :  { %35224 = vmatmul.mubr.f32.vlgmr.msra.gmra.mrb[12].mxu0 %v42790_v54 }
 0x214   :  { %38853 = vmatpush3.bf16.msra.mxu0 %v42904_v44  ;;  %35234 = vmatprep.mubr.f32.mxu0 %v42794_v55 }
 0x215   :  { %38855 = vmatprep.subr.bf16.mxu0 %v42908_v49 }
 0x218   :  { %38857 = vmatpush3.bf16.msra.mxu0 %v42908_v49 }
 0x219   :  { %38859 = vmatprep.subr.bf16.mxu0 %v42883_v30 }
 0x21b   :  { %35235 = vmatmul.mubr.f32.vlgmr.msra.gmra.mrb[12].mxu0 %v42797_v56 }
 0x21c   :  { %38861 = vmatpush3.bf16.msra.mxu0 %v42883_v30  ;;  %35245 = vmatprep.mubr.f32.mxu0 %v42803_v57 }
 0x21d   :  { %38863 = vmatprep.subr.bf16.mxu0 %v42887_v33 }
 0x220   :  { %38865 = vmatpush3.bf16.msra.mxu0 %v42887_v33 }
 0x221   :  { %38867 = vmatprep.subr.bf16.mxu0 %v42920_v51 }
 0x223   :  { %35246 = vmatmul.mubr.f32.vlgmr.msra.gmra.mrb[12].mxu0 %v42806_v60 }
 0x224   :  { %38869 = vmatpush3.bf16.msra.mxu0 %v42920_v51  ;;  %35256 = vmatprep.mubr.f32.mxu0 %v42788_v53 }
 0x225   :  { %38871 = vmatprep.subr.bf16.mxu0 %v42924_v52 }
 0x228   :  { %38873 = vmatpush3.bf16.msra.mxu0 %v42924_v52 }
 0x229   :  { %38875 = vmatprep.subr.bf16.mxu0 %v42883_v30 }
 0x22b   :  { %35257 = vmatmul.mubr.f32.vlgmr.msra.gmra.mrb[12].mxu0 %v42790_v54 }
 0x22c   :  { %38877 = vmatpush3.bf16.msra.mxu0 %v42883_v30  ;;  %35267 = vmatprep.mubr.f32.mxu0 %v42788_v53 }
 0x22d   :  { %38879 = vmatprep.subr.bf16.mxu0 %v42887_v33 }
 0x230   :  { %38881 = vmatpush3.bf16.msra.mxu0 %v42887_v33 }
 0x233   :  { %35268 = vmatmul.mubr.f32.vlgmr.msra.gmra.mrb[12].mxu0 %v42790_v54 }
 0x2bf   :  { %v35203_v55 = vpop.f32.mrb[4].mxu1 }
 0x2c0   :  { %v1829_v56 = vpop.f32.mrb[5].mxu1 }
 0x2ce   :  { %v42938_v57 = vpop.f32.mrb[8].mxu0 }
 0x2cf   :  { %v42940_v60 = vpop.f32.mrb[9].mxu0  ;;  %v2378_v62 = vsel %vm2373_vm5, %v42938_v57, 0 }
 0x2d0   :  { %v2375_v61 = vsel %vm2373_vm5, %v42940_v60, 0  ;;  %3428 = vrot.lane.b32.xlu1 %v42940_v60, %s42393_s17  ;;  %v42950_v54 = vand.u32 4294901760, %v2378_v62 }
 0x2d1   :  { %v2453_v53 = vand.u32 4294901760, %v2375_v61 }
 0x2d2   :  { %v2464_v11 = vsub.f32 %v2378_v62, %v42950_v54 }
 0x2d3   :  { %v2454_v63 = vsub.f32 %v2375_v61, %v2453_v53 }
 0x2d4   :  { %3430 = vrot.lane.b32.xlu1 %v42938_v57, %s42393_s17  ;;  %v2465_v31 = vand.u32 4294901760, %v2464_v11 }
 0x2d5   :  { %v2455_v1 = vand.u32 4294901760, %v2454_v63 }
 0x2d6   :  { %v35148_v2 = vpop.f32.mrb[10].mxu0  ;;  %v2466_v37 = vsub.f32 %v2464_v11, %v2465_v31 }
 0x2d7   :  { %v42952_v3 = vadd.f32 %v35203_v55, %v35148_v2  ;;  %v1386_v4 = vpop.f32.mrb[11].mxu0  ;;  %v2456_v7 = vsub.f32 %v2454_v63, %v2455_v1 }
 0x2d8   :  { %v42954_v9 = vadd.f32 %v1829_v56, %v1386_v4  ;;  %v2467_v40 = vand.u32 4294901760, %v2466_v37 }
 0x2d9   :  { %v2384_v12 = vsel %vm2373_vm5, %v42952_v3, 0  ;;  %v2457_v21 = vand.u32 4294901760, %v2456_v7 }
 0x2da   :  { %v2390_v22 = vand.u32 4294901760, %v2384_v12  ;;  %v2381_v23 = vsel %vm2373_vm5, %v42954_v9, 0  ;;  %3432 = vrot.lane.b32.xlu0 %v42954_v9, %s42393_s17 }
 0x2db   :  { %v2387_v26 = vand.u32 4294901760, %v2381_v23  ;;  %35274 = vmatprep.mubr.f32.mxu1 %v2457_v21 }
 0x2dc   :  { %v2482_v27 = vsub.f32 %v2384_v12, %v2390_v22 }
 0x2dd   :  { %v38882_v28 = vpack.c.bf16 %v2390_v22, %v2387_v26  ;;  %v2475_v29 = vsub.f32 %v2381_v23, %v2387_v26 }
 0x2de   :  { %3434 = vrot.lane.b32.xlu0 %v42952_v3, %s42393_s17  ;;  %v2483_v32 = vand.u32 4294901760, %v2482_v27 }
 0x2df   :  { %38883 = vmatprep.subr.bf16.mxu1 %v38882_v28  ;;  %v2476_v24 = vand.u32 4294901760, %v2475_v29  ;;  %v38890_v55 = vpack.c.bf16 %v2482_v27, %v2475_v29 }
 0x2e0   :  { %38885 = vmatpush3.bf16.xpose.msra.mxu1 %v38882_v28  ;;  %v2484_v25 = vsub.f32 %v2482_v27, %v2483_v32 }
 0x2e1   :  { %v2477_v34 = vsub.f32 %v2475_v29, %v2476_v24  ;;  %v38898_v56 = vpack.c.bf16 %v2483_v32, %v2476_v24 }
 0x2e2   :  { %v2485_v35 = vand.u32 4294901760, %v2484_v25 }
 0x2e3   :  { %v2478_v38 = vand.u32 4294901760, %v2477_v34 }
 0x2e5   :  { %v38886_v41 = vpack.c.bf16 %v2485_v35, %v2478_v38 }
 0x2e7   :  { %35275 = vmatmul.mubr.f32.vlgmr.msra.gmra.mrb[6].mxu1 %v2467_v40  ;;  %38887 = vmatprep.subr.bf16.mxu1 %v38886_v41 }
 0x2e8   :  { %38889 = vmatpush3.bf16.xpose.msra.mxu1 %v38886_v41  ;;  %35281 = vmatprep.mubr.f32.mxu1 %v2453_v53 }
 0x2e9   :  { %38891 = vmatprep.subr.bf16.mxu1 %v38890_v55 }
 0x2ef   :  { %35282 = vmatmul.mubr.f32.vlgmr.msra.gmra.mrb[6].mxu1 %v42950_v54 }
 0x2f0   :  { %38893 = vmatpush3.bf16.xpose.msra.mxu1 %v38890_v55  ;;  %35288 = vmatprep.mubr.f32.mxu1 %v2454_v63 }
 0x2f1   :  { %38895 = vmatprep.subr.bf16.mxu1 %v38882_v28 }
 0x2f7   :  { %35289 = vmatmul.mubr.f32.vlgmr.msra.gmra.mrb[6].mxu1 %v2464_v11 }
 0x2f8   :  { %38897 = vmatpush3.bf16.xpose.msra.mxu1 %v38882_v28  ;;  %35295 = vmatprep.mubr.f32.mxu1 %v2455_v1 }
 0x2f9   :  { %38899 = vmatprep.subr.bf16.mxu1 %v38898_v56 }
 0x2ff   :  { %35296 = vmatmul.mubr.f32.vlgmr.msra.gmra.mrb[6].mxu1 %v2465_v31 }
 0x300   :  { %38901 = vmatpush3.bf16.xpose.msra.mxu1 %v38898_v56  ;;  %35302 = vmatprep.mubr.f32.mxu1 %v2453_v53 }
 0x301   :  { %38903 = vmatprep.subr.bf16.mxu1 %v38882_v28 }
 0x306   :  { %v42966_v61 = vpop.f32.mrb[12].mxu0 }
 0x307   :  { %v2921_v62 = vsel %vm317_vm1, %v42966_v61, 0  ;;  %v42970_v2 = vpop.f32.mrb[13].mxu0  ;;  %35303 = vmatmul.mubr.f32.vlgmr.msra.gmra.mrb[6].mxu1 %v42950_v54 }
 0x308   :  { %v2927_v63 = vand.u32 4294901760, %v2921_v62  ;;  %v2924_v4 = vand.u32 4294901760, %v42970_v2  ;;  %38905 = vmatpush3.bf16.xpose.msra.mxu1 %v38882_v28  ;;  %35309 = vmatprep.mubr.f32.mxu1 %v2453_v53 }
 0x30a   :  { %v3019_v1 = vsub.f32 %v2921_v62, %v2927_v63  ;;  %v42974_v7 = vpack.c.bf16 %v2927_v63, %v2924_v4  ;;  %v3012_v11 = vsub.f32 %v42970_v2, %v2924_v4 }
 0x30c   :  { %38907 = vmatprep.subr.bf16.mxu0 %v42974_v7  ;;  %v3013_v12 = vand.u32 4294901760, %v3012_v11  ;;  %v3020_v21 = vand.u32 4294901760, %v3019_v1  ;;  %v42978_v22 = vpack.c.bf16 %v3019_v1, %v3012_v11 }
 0x30d   :  { %38909 = vmatpush3.bf16.msra.mxu0 %v42974_v7 }
 0x30e   :  { %v3014_v23 = vsub.f32 %v3012_v11, %v3013_v12  ;;  %v3021_v26 = vsub.f32 %v3019_v1, %v3020_v21  ;;  %v42981_v27 = vpack.c.bf16 %v3020_v21, %v3013_v12 }
 0x30f   :  { %35310 = vmatmul.mubr.f32.vlgmr.msra.gmra.mrb[6].mxu1 %v42950_v54 }
 0x310   :  { %v3015_v53 = vand.u32 4294901760, %v3014_v23  ;;  %v3022_v28 = vand.u32 4294901760, %v3021_v26 }
 0x312   :  { %v42984_v29 = vpack.c.bf16 %v3022_v28, %v3015_v53 }
 0x314   :  { %38911 = vmatprep.subr.bf16.mxu0 %v42984_v29 }
 0x342   :  { %v3429_v31 = vpop.permute.xlu1 %3428 }
 0x343   :  { %v3436_v32 = vsel %vm2373_vm5, %v3429_v31, 0 }
 0x344   :  { %v3511_v24 = vand.u32 4294901760, %v3436_v32 }
 0x346   :  { %v3512_v25 = vsub.f32 %v3436_v32, %v3511_v24  ;;  %v3431_v37 = vpop.permute.xlu1 %3430 }
 0x347   :  { %v3438_v35 = vsel %vm2373_vm5, %v3431_v37, 0 }
 0x348   :  { %v3513_v34 = vand.u32 4294901760, %v3512_v25  ;;  %v3521_v40 = vand.u32 4294901760, %v3438_v35 }
 0x34a   :  { %v3514_v38 = vsub.f32 %v3512_v25, %v3513_v34  ;;  %v3522_v62 = vsub.f32 %v3438_v35, %v3521_v40 }
 0x34c   :  { %v3433_v41 = vpop.permute.xlu0 %3432  ;;  %v3515_v55 = vand.u32 4294901760, %v3514_v38  ;;  %v3523_v21 = vand.u32 4294901760, %v3522_v62 }
 0x34d   :  { %v3440_v54 = vsel %vm2373_vm5, %v3433_v41, 0 }
 0x34e   :  { %v3445_v56 = vand.u32 4294901760, %v3440_v54  ;;  %35358 = vmatprep.mubr.f32.mxu1 %v3515_v55  ;;  %v3524_v31 = vsub.f32 %v3522_v62, %v3523_v21 }
 0x350   :  { %v3533_v63 = vsub.f32 %v3440_v54, %v3445_v56  ;;  %v3435_v4 = vpop.permute.xlu0 %3434  ;;  %v3525_v41 = vand.u32 4294901760, %v3524_v31 }
 0x351   :  { %v3442_v1 = vsel %vm2373_vm5, %v3435_v4, 0 }
 0x352   :  { %v3534_v11 = vand.u32 4294901760, %v3533_v63  ;;  %v3448_v12 = vand.u32 4294901760, %v3442_v1 }
 0x354   :  { %v38930_v23 = vpack.c.bf16 %v3448_v12, %v3445_v56  ;;  %v3540_v26 = vsub.f32 %v3442_v1, %v3448_v12  ;;  %v3535_v28 = vsub.f32 %v3533_v63, %v3534_v11  ;;  %v42991_v56 = vld [vmem:[#allocation4] ss:$0 sm:$0xff] }
 0x356   :  { %v3541_v53 = vand.u32 4294901760, %v3540_v26  ;;  %38931 = vmatprep.subr.bf16.mxu1 %v38930_v23  ;;  %v3536_v37 = vand.u32 4294901760, %v3535_v28  ;;  %v38938_v35 = vpack.c.bf16 %v3540_v26, %v3533_v63 }
 0x357   :  { %38933 = vmatpush3.bf16.xpose.msra.mxu1 %v38930_v23 }
 0x358   :  { %v3542_v32 = vsub.f32 %v3540_v26, %v3541_v53  ;;  %v38946_v54 = vpack.c.bf16 %v3541_v53, %v3534_v11 }
 0x35a   :  { %v3543_v38 = vand.u32 4294901760, %v3542_v32 }
 0x35c   :  { %v38934_v55 = vpack.c.bf16 %v3543_v38, %v3536_v37 }
 0x35e   :  { %35359 = vmatmul.mubr.f32.vlgmr.msra.gmra.mrb[8].mxu1 %v3525_v41  ;;  %38935 = vmatprep.subr.bf16.mxu1 %v38934_v55 }
 0x35f   :  { %38937 = vmatpush3.bf16.xpose.msra.mxu1 %v38934_v55  ;;  %35365 = vmatprep.mubr.f32.mxu1 %v3511_v24 }
 0x360   :  { %38939 = vmatprep.subr.bf16.mxu1 %v38938_v35 }
 0x366   :  { %35366 = vmatmul.mubr.f32.vlgmr.msra.gmra.mrb[8].mxu1 %v3521_v40 }
 0x367   :  { %38941 = vmatpush3.bf16.xpose.msra.mxu1 %v38938_v35  ;;  %35372 = vmatprep.mubr.f32.mxu1 %v3512_v25 }
 0x368   :  { %38943 = vmatprep.subr.bf16.mxu1 %v38930_v23 }
 0x36e   :  { %35373 = vmatmul.mubr.f32.vlgmr.msra.gmra.mrb[8].mxu1 %v3522_v62 }
 0x36f   :  { %38945 = vmatpush3.bf16.xpose.msra.mxu1 %v38930_v23  ;;  %35379 = vmatprep.mubr.f32.mxu1 %v3513_v34 }
 0x370   :  { %38947 = vmatprep.subr.bf16.mxu1 %v38946_v54 }
 0x376   :  { %35380 = vmatmul.mubr.f32.vlgmr.msra.gmra.mrb[8].mxu1 %v3523_v21 }
 0x377   :  { %38949 = vmatpush3.bf16.xpose.msra.mxu1 %v38946_v54  ;;  %35386 = vmatprep.mubr.f32.mxu1 %v3511_v24 }
 0x378   :  { %38951 = vmatprep.subr.bf16.mxu1 %v38930_v23 }
 0x37e   :  { %35387 = vmatmul.mubr.f32.vlgmr.msra.gmra.mrb[8].mxu1 %v3521_v40 }
 0x37f   :  { %38953 = vmatpush3.bf16.xpose.msra.mxu1 %v38930_v23  ;;  %35393 = vmatprep.mubr.f32.mxu1 %v3511_v24 }
 0x386   :  { %35394 = vmatmul.mubr.f32.vlgmr.msra.gmra.mrb[8].mxu1 %v3521_v40 }
 0x3e2   :  { %v35311_v63 = vpop.f32.mrb[6].mxu1 }
 0x3e3   :  { %v41308_v4 = vadd.f32 %v35311_v63, %v42991_v56  ;;  %v2878_v25 = vpop.f32.mrb[7].mxu1 }
 0x3e4   :  { %v41309_v62 = vadd.f32 %v42991_v56, %v2878_v25 }
 0x3e5   :  { %v2889_v1 = vmul.f32 0.17677669, %v41308_v4 }
 0x3e6   :  { %v2888_v34 = vmul.f32 0.17677669, %v41309_v62 }
 0x3e7   :  { %v2895_v11 = vsel %vm2894_vm6, %v2889_v1, -inf }
 0x3e8   :  { %2896 = vmax.xlane.f32.xlu1 %v2895_v11  ;;  %v2891_v12 = vsel %vm2890_vm7, %v2888_v34, -inf }
 0x3e9   :  { %2892 = vmax.xlane.f32.xlu0 %v2891_v12 }
 0x459   :  { %v35395_v24 = vpop.f32.mrb[8].mxu1 }
 0x45a   :  { %v3936_v40 = vpop.f32.mrb[9].mxu1  ;;  %v41310_v21 = vadd.f32 %v35395_v24, %v42991_v56 }
 0x45b   :  { %v41311_v23 = vadd.f32 %v42991_v56, %v3936_v40 }
 0x45c   :  { %v3947_v53 = vmul.f32 0.17677669, %v41310_v21 }
 0x45d   :  { %v3946_v26 = vmul.f32 0.17677669, %v41311_v23 }
 0x45e   :  { %v3951_v31 = vsel %vm2894_vm6, %v3947_v53, -inf }
 0x45f   :  { %v3948_v28 = vsel %vm2890_vm7, %v3946_v26, -inf }
 0x460   :  { %3949 = vmax.xlane.f32.xlu0 %v3948_v28 }
 0x464   :  { %3952 = vmax.xlane.f32.xlu0 %v3951_v31 }
 0x475   :  { %v2897_v32 = vpop.xlane.xlu1 %2896 }
 0x476   :  { %v2899_v37 = vsub.f32 %v2889_v1, %v2897_v32  ;;  %v2893_v38 = vpop.xlane.xlu0 %2892 }
 0x477   :  { %v2898_v41 = vsub.f32 %v2888_v34, %v2893_v38 }
 0x478   :  { %v2902_v55 = vmul.f32 1.442695, %v2899_v37 }
 0x479   :  { %v2900_v35 = vmul.f32 1.442695, %v2898_v41 }
 0x47a   :  { %41944 = vpow2.f32 %v2902_v55 }
 0x47b   :  { %41946 = vpow2.f32 %v2900_v35 }
 0x484   :  { %v41945_v54 = vpop.eup %41944 }
 0x485   :  { %v41947_v63 = vpop.eup %41946  ;;  %v2907_v4 = vsel %vm2894_vm6, %v41945_v54, 0.0 }
 0x486   :  { %2908 = vadd.xlane.f32.xlu0 %v2907_v4  ;;  %v2904_v25 = vsel %vm2890_vm7, %v41947_v63, 0.0 }
 0x487   :  { %2905 = vadd.xlane.f32.xlu1 %v2904_v25 }
 0x4ed   :  { %v3950_v62 = vpop.xlane.xlu0 %3949 }
 0x4ee   :  { %v3954_v11 = vsub.f32 %v3946_v26, %v3950_v62 }
 0x4f0   :  { %v3956_v12 = vmul.f32 1.442695, %v3954_v11 }
 0x4f1   :  { %v3953_v24 = vpop.xlane.xlu0 %3952 }
 0x4f2   :  { %41948 = vpow2.f32 %v3956_v12  ;;  %v3955_v1 = vsub.f32 %v3947_v53, %v3953_v24 }
 0x4f4   :  { %v3958_v40 = vmul.f32 1.442695, %v3955_v1 }
 0x4f6   :  { %41950 = vpow2.f32 %v3958_v40 }
 0x4fc   :  { %v43003_v34 = vpop.eup %41948 }
 0x4fd   :  { %v3960_v21 = vsel %vm2890_vm7, %v43003_v34, 0.0 }
 0x4fe   :  { %3961 = vadd.xlane.f32.xlu1 %v3960_v21 }
 0x500   :  { %v43007_v23 = vpop.eup %41950 }
 0x501   :  { %v3963_v28 = vsel %vm2894_vm6, %v43007_v23, 0.0 }
 0x502   :  { %3964 = vadd.xlane.f32.xlu0 %v3963_v28 }
 0x50f   :  { %3973 = vrot.lane.b32.xlu1 %v42966_v61, %s42393_s17 }
 0x513   :  { %4502 = vrot.lane.b32.xlu1 %v42954_v9, %s42394_s23  ;;  %v2909_v26 = vpop.xlane.xlu0 %2908 }
 0x514   :  { %41952 = vrcp.f32 %v2909_v26  ;;  %v2906_v53 = vpop.xlane.xlu1 %2905 }
 0x515   :  { %41954 = vrcp.f32 %v2906_v53 }
 0x517   :  { %4504 = vrot.lane.b32.xlu1 %v42952_v3, %s42394_s23 }
 0x518   :  { %3971 = vrot.lane.b32.xlu0 %v42970_v2, %s42393_s17 }
 0x51b   :  { %4500 = vrot.lane.b32.xlu1 %v42938_v57, %s42394_s23 }
 0x51c   :  { %4498 = vrot.lane.b32.xlu0 %v42940_v60, %s42394_s23 }
 0x51e   :  { %v41953_v31 = vpop.eup %41952 }
 0x51f   :  { %v41955_v32 = vpop.eup %41954  ;;  %v2913_v37 = vmul.f32 %v41953_v31, %v41945_v54 }
 0x520   :  { %v2912_v38 = vmul.f32 %v41955_v32, %v41947_v63 }
 0x521   :  { %v2918_v41 = vsel %vm2890_vm7, %v2913_v37, 0 }
 0x522   :  { %v2915_v55 = vsel %vm2890_vm7, %v2912_v38, 0  ;;  %v3000_v35 = vand.u32 4294901760, %v2918_v41 }
 0x523   :  { %v2990_v4 = vand.u32 4294901760, %v2915_v55 }
 0x524   :  { %v3001_v25 = vsub.f32 %v2918_v41, %v3000_v35 }
 0x525   :  { %v2991_v62 = vsub.f32 %v2915_v55, %v2990_v4 }
 0x526   :  { %v3002_v11 = vand.u32 4294901760, %v3001_v25 }
 0x527   :  { %v2992_v12 = vand.u32 4294901760, %v2991_v62 }
 0x528   :  { %v3003_v24 = vsub.f32 %v3001_v25, %v3002_v11 }
 0x529   :  { %v2993_v1 = vsub.f32 %v2991_v62, %v2992_v12 }
 0x52a   :  { %v3004_v21 = vand.u32 4294901760, %v3003_v24 }
 0x52b   :  { %v2994_v40 = vand.u32 4294901760, %v2993_v1 }
 0x52d   :  { %35316 = vmatprep.mubr.f32.mxu0 %v2994_v40 }
 0x52e   :  { %35317 = vmatmul.mubr.f32.vlgmr.msra.gmra.mrb[14].mxu0 %v3004_v21 }
 0x52f   :  { %38913 = vmatpush3.bf16.msra.mxu0 %v42984_v29  ;;  %35323 = vmatprep.mubr.f32.mxu0 %v2990_v4 }
 0x530   :  { %38915 = vmatprep.subr.bf16.mxu0 %v42978_v22 }
 0x536   :  { %35324 = vmatmul.mubr.f32.vlgmr.msra.gmra.mrb[14].mxu0 %v3000_v35 }
 0x537   :  { %38917 = vmatpush3.bf16.msra.mxu0 %v42978_v22  ;;  %35330 = vmatprep.mubr.f32.mxu0 %v2991_v62 }
 0x538   :  { %38919 = vmatprep.subr.bf16.mxu0 %v42974_v7 }
 0x53e   :  { %35331 = vmatmul.mubr.f32.vlgmr.msra.gmra.mrb[14].mxu0 %v3001_v25 }
 0x53f   :  { %38921 = vmatpush3.bf16.msra.mxu0 %v42974_v7  ;;  %35337 = vmatprep.mubr.f32.mxu0 %v2992_v12 }
 0x540   :  { %38923 = vmatprep.subr.bf16.mxu0 %v42981_v27 }
 0x546   :  { %35338 = vmatmul.mubr.f32.vlgmr.msra.gmra.mrb[14].mxu0 %v3002_v11 }
 0x547   :  { %38925 = vmatpush3.bf16.msra.mxu0 %v42981_v27  ;;  %35344 = vmatprep.mubr.f32.mxu0 %v2990_v4 }
 0x548   :  { %38927 = vmatprep.subr.bf16.mxu0 %v42974_v7 }
 0x54e   :  { %35345 = vmatmul.mubr.f32.vlgmr.msra.gmra.mrb[14].mxu0 %v3000_v35 }
 0x54f   :  { %38929 = vmatpush3.bf16.msra.mxu0 %v42974_v7  ;;  %35351 = vmatprep.mubr.f32.mxu0 %v2990_v4 }
 0x556   :  { %35352 = vmatmul.mubr.f32.vlgmr.msra.gmra.mrb[14].mxu0 %v3000_v35 }
 0x58b   :  { %v3962_v22 = vpop.xlane.xlu1 %3961 }
 0x58c   :  { %41956 = vrcp.f32 %v3962_v22 }
 0x58f   :  { %v3974_v29 = vpop.permute.xlu1 %3973  ;;  %v3965_v54 = vpop.xlane.xlu0 %3964 }
 0x590   :  { %v3982_v63 = vsel %vm317_vm1, %v3974_v29, 0  ;;  %41958 = vrcp.f32 %v3965_v54 }
 0x591   :  { %v3988_v28 = vand.u32 4294901760, %v3982_v63 }
 0x593   :  { %v4080_v26 = vsub.f32 %v3982_v63, %v3988_v28  ;;  %v3972_v53 = vpop.permute.xlu0 %3971 }
 0x594   :  { %v3985_v31 = vand.u32 4294901760, %v3972_v53 }
 0x595   :  { %v4081_v27 = vand.u32 4294901760, %v4080_v26 }
 0x596   :  { %v41957_v32 = vpop.eup %41956  ;;  %v43035_v37 = vpack.c.bf16 %v3988_v28, %v3985_v31  ;;  %v4073_v38 = vsub.f32 %v3972_v53, %v3985_v31 }
 0x597   :  { %v3968_v7 = vmul.f32 %v41957_v32, %v43003_v34  ;;  %v4082_v55 = vsub.f32 %v4080_v26, %v4081_v27 }
 0x598   :  { %v4074_v41 = vand.u32 4294901760, %v4073_v38  ;;  %38955 = vmatprep.subr.bf16.mxu0 %v43035_v37  ;;  %v38962_v32 = vpack.c.bf16 %v4080_v26, %v4073_v38 }
 0x599   :  { %38957 = vmatpush3.bf16.msra.mxu0 %v43035_v37  ;;  %v3977_v25 = vsel %vm2890_vm7, %v3968_v7, 0  ;;  %v4083_v12 = vand.u32 4294901760, %v4082_v55 }
 0x59a   :  { %v41959_v35 = vpop.eup %41958  ;;  %v4075_v4 = vsub.f32 %v4073_v38, %v4074_v41  ;;  %v4051_v24 = vand.u32 4294901760, %v3977_v25  ;;  %v38970_v55 = vpack.c.bf16 %v4081_v27, %v4074_v41 }
 0x59b   :  { %v3969_v62 = vmul.f32 %v41959_v35, %v43007_v23  ;;  %v4503_v23 = vpop.permute.xlu1 %4502  ;;  %v4499_v35 = vpop.permute.xlu0 %4498 }
 0x59c   :  { %v4076_v11 = vand.u32 4294901760, %v4075_v4  ;;  %v4052_v21 = vsub.f32 %v3977_v25, %v4051_v24  ;;  %v4510_v26 = vsel %vm2373_vm5, %v4503_v23, 0  ;;  %v4506_v38 = vsel %vm2373_vm5, %v4499_v35, 0 }
 0x59d   :  { %v3980_v1 = vsel %vm2890_vm7, %v3969_v62, 0  ;;  %v4515_v62 = vand.u32 4294901760, %v4510_v26 }
 0x59e   :  { %v38958_v40 = vpack.c.bf16 %v4083_v12, %v4076_v11  ;;  %v4061_v34 = vand.u32 4294901760, %v3980_v1  ;;  %v4053_v22 = vand.u32 4294901760, %v4052_v21  ;;  %v4581_v11 = vand.u32 4294901760, %v4506_v38 }
 0x59f   :  { %v4505_v7 = vpop.permute.xlu1 %4504  ;;  %v4603_v27 = vsub.f32 %v4510_v26, %v4515_v62 }
 0x5a0   :  { %38959 = vmatprep.subr.bf16.mxu0 %v38958_v40  ;;  %v4062_v29 = vsub.f32 %v3980_v1, %v4061_v34  ;;  %v4054_v54 = vsub.f32 %v4052_v21, %v4053_v22  ;;  %v4512_v4 = vsel %vm2373_vm5, %v4505_v7, 0  ;;  %v4582_v41 = vsub.f32 %v4506_v38, %v4581_v11 }
 0x5a1   :  { %v4518_v25 = vand.u32 4294901760, %v4512_v4 }
 0x5a2   :  { %v4063_v63 = vand.u32 4294901760, %v4062_v29  ;;  %v4055_v28 = vand.u32 4294901760, %v4054_v54  ;;  %v4583_v54 = vand.u32 4294901760, %v4582_v41 }
 0x5a3   :  { %v4610_v12 = vsub.f32 %v4512_v4, %v4518_v25  ;;  %v4501_v1 = vpop.permute.xlu1 %4500 }
 0x5a4   :  { %v4064_v53 = vsub.f32 %v4062_v29, %v4063_v63  ;;  %35400 = vmatprep.mubr.f32.mxu0 %v4055_v28  ;;  %v38978_v28 = vpack.c.bf16 %v4518_v25, %v4515_v62 }
 0x5a5   :  { %v38986_v25 = vpack.c.bf16 %v4610_v12, %v4603_v27 }
 0x5a6   :  { %v4065_v31 = vand.u32 4294901760, %v4064_v53 }
 0x5a8   :  { %35401 = vmatmul.mubr.f32.vlgmr.msra.gmra.mrb[16].mxu0 %v4065_v31  ;;  %v4584_v31 = vsub.f32 %v4582_v41, %v4583_v54 }
 0x5a9   :  { %38961 = vmatpush3.bf16.msra.mxu0 %v38958_v40  ;;  %35407 = vmatprep.mubr.f32.mxu0 %v4051_v24  ;;  %v4508_v40 = vsel %vm2373_vm5, %v4501_v1, 0 }
 0x5aa   :  { %38963 = vmatprep.subr.bf16.mxu0 %v38962_v32 }
 0x5b0   :  { %35408 = vmatmul.mubr.f32.vlgmr.msra.gmra.mrb[16].mxu0 %v4061_v34 }
 0x5b1   :  { %38965 = vmatpush3.bf16.msra.mxu0 %v38962_v32  ;;  %35414 = vmatprep.mubr.f32.mxu0 %v4052_v21  ;;  %v4611_v21 = vand.u32 4294901760, %v4610_v12 }
 0x5b2   :  { %38967 = vmatprep.subr.bf16.mxu0 %v43035_v37 }
 0x5b8   :  { %35415 = vmatmul.mubr.f32.vlgmr.msra.gmra.mrb[16].mxu0 %v4062_v29  ;;  %v4591_v29 = vand.u32 4294901760, %v4508_v40 }
 0x5b9   :  { %38969 = vmatpush3.bf16.msra.mxu0 %v43035_v37  ;;  %35421 = vmatprep.mubr.f32.mxu0 %v4053_v22  ;;  %v4604_v22 = vand.u32 4294901760, %v4603_v27 }
 0x5ba   :  { %38971 = vmatprep.subr.bf16.mxu0 %v38970_v55  ;;  %v4592_v53 = vsub.f32 %v4508_v40, %v4591_v29 }
 0x5bb   :  { %v4605_v32 = vsub.f32 %v4603_v27, %v4604_v22 }
 0x5bc   :  { %v4593_v7 = vand.u32 4294901760, %v4592_v53 }
 0x5bd   :  { %v4606_v35 = vand.u32 4294901760, %v4605_v32 }
 0x5be   :  { %v4594_v26 = vsub.f32 %v4592_v53, %v4593_v7 }
 0x5c0   :  { %35422 = vmatmul.mubr.f32.vlgmr.msra.gmra.mrb[16].mxu0 %v4063_v63  ;;  %v4612_v63 = vsub.f32 %v4610_v12, %v4611_v21  ;;  %v4595_v38 = vand.u32 4294901760, %v4594_v26 }
 0x5c1   :  { %38973 = vmatpush3.bf16.msra.mxu0 %v38970_v55  ;;  %35428 = vmatprep.mubr.f32.mxu0 %v4051_v24  ;;  %v4585_v55 = vand.u32 4294901760, %v4584_v31 }
 0x5c2   :  { %38975 = vmatprep.subr.bf16.mxu0 %v43035_v37  ;;  %v4613_v23 = vand.u32 4294901760, %v4612_v63 }
 0x5c4   :  { %v38982_v4 = vpack.c.bf16 %v4613_v23, %v4606_v35 }
 0x5c8   :  { %35429 = vmatmul.mubr.f32.vlgmr.msra.gmra.mrb[16].mxu0 %v4061_v34 }
 0x5c9   :  { %38977 = vmatpush3.bf16.msra.mxu0 %v43035_v37  ;;  %35435 = vmatprep.mubr.f32.mxu0 %v4051_v24  ;;  %v38994_v37 = vpack.c.bf16 %v4611_v21, %v4604_v22 }
 0x5ca   :  { %38979 = vmatprep.subr.bf16.mxu0 %v38978_v28 }
 0x5d0   :  { %35436 = vmatmul.mubr.f32.vlgmr.msra.gmra.mrb[16].mxu0 %v4061_v34 }
 0x5d1   :  { %35442 = vmatprep.mubr.f32.mxu0 %v4585_v55 }
 0x5d2   :  { %38981 = vmatpush3.bf16.xpose.msra.mxu0 %v38978_v28 }
 0x5d3   :  { %38983 = vmatprep.subr.bf16.mxu0 %v38982_v4 }
 0x5d9   :  { %35443 = vmatmul.mubr.f32.vlgmr.msra.gmra.mrb[18].mxu0 %v4595_v38 }
 0x5da   :  { %38985 = vmatpush3.bf16.xpose.msra.mxu0 %v38982_v4  ;;  %35449 = vmatprep.mubr.f32.mxu0 %v4581_v11 }
 0x5db   :  { %38987 = vmatprep.subr.bf16.mxu0 %v38986_v25 }
 0x5e1   :  { %35450 = vmatmul.mubr.f32.vlgmr.msra.gmra.mrb[18].mxu0 %v4591_v29 }
 0x5e2   :  { %38989 = vmatpush3.bf16.xpose.msra.mxu0 %v38986_v25  ;;  %35456 = vmatprep.mubr.f32.mxu0 %v4582_v41 }
 0x5e3   :  { %38991 = vmatprep.subr.bf16.mxu0 %v38978_v28 }
 0x5e9   :  { %35457 = vmatmul.mubr.f32.vlgmr.msra.gmra.mrb[18].mxu0 %v4592_v53 }
 0x5ea   :  { %38993 = vmatpush3.bf16.xpose.msra.mxu0 %v38978_v28  ;;  %35463 = vmatprep.mubr.f32.mxu0 %v4583_v54 }
 0x5eb   :  { %38995 = vmatprep.subr.bf16.mxu0 %v38994_v37 }
 0x5f1   :  { %35464 = vmatmul.mubr.f32.vlgmr.msra.gmra.mrb[18].mxu0 %v4593_v7 }
 0x5f2   :  { %38997 = vmatpush3.bf16.xpose.msra.mxu0 %v38994_v37  ;;  %35470 = vmatprep.mubr.f32.mxu0 %v4581_v11 }
 0x5f3   :  { %38999 = vmatprep.subr.bf16.mxu0 %v38978_v28 }
 0x5f9   :  { %35471 = vmatmul.mubr.f32.vlgmr.msra.gmra.mrb[18].mxu0 %v4591_v29 }
 0x5fa   :  { %39001 = vmatpush3.bf16.xpose.msra.mxu0 %v38978_v28  ;;  %35477 = vmatprep.mubr.f32.mxu0 %v4581_v11 }
 0x601   :  { %35478 = vmatmul.mubr.f32.vlgmr.msra.gmra.mrb[18].mxu0 %v4591_v29 }
 0x629   :  { %v35353_v24 = vpop.f32.mrb[14].mxu0 }
 0x62a   :  { %3427 = vst.msk [vmem:[#allocation3 + $0x8] sm:$0xf] %vm3426_vm8, %v35353_v24  ;;  %v3415_v34 = vpop.f32.mrb[15].mxu0 }
 0x62b   :  { %3425 = vst.msk [vmem:[#allocation3] sm:$0xff] %vm2373_vm5, %v3415_v34 }
 0x6a3   :  { %v43053_v62 = vpop.f32.mrb[16].mxu0 }
 0x6a4   :  { %v43055_v12 = vpop.f32.mrb[17].mxu0 }
 0x6d4   :  { %v35479_v1 = vpop.f32.mrb[18].mxu0 }
 0x6d5   :  { %v41312_v27 = vadd.f32 %v35479_v1, %v42991_v56  ;;  %v5006_v41 = vpop.f32.mrb[19].mxu0 }
 0x6d6   :  { %v41313_v40 = vadd.f32 %v42991_v56, %v5006_v41 }
 0x6d7   :  { %v5017_v21 = vmul.f32 0.17677669, %v41312_v27 }
 0x6d8   :  { %v5016_v11 = vmul.f32 0.17677669, %v41313_v40 }
 0x6d9   :  { %v5021_v22 = vsel %vm2894_vm6, %v5017_v21, -inf }
 0x6da   :  { %5022 = vmax.xlane.f32.xlu1 %v5021_v22  ;;  %v5018_v29 = vsel %vm2890_vm7, %v5016_v11, -inf }
 0x6db   :  { %5019 = vmax.xlane.f32.xlu0 %v5018_v29 }
 0x6eb   :  { %5042 = vrot.lane.b32.xlu1 %v42966_v61, %s42394_s23 }
 0x6ef   :  { %5571 = vrot.lane.b32.xlu1 %v42954_v9, %s42395_s9 }
 0x6f3   :  { %5573 = vrot.lane.b32.xlu1 %v42952_v3, %s42395_s9 }
 0x6f7   :  { %5569 = vrot.lane.b32.xlu1 %v42938_v57, %s42395_s9 }
 0x767   :  { %v5023_v54 = vpop.xlane.xlu1 %5022 }
 0x768   :  { %v5025_v28 = vsub.f32 %v5017_v21, %v5023_v54  ;;  %v5020_v63 = vpop.xlane.xlu0 %5019 }
 0x769   :  { %v5024_v53 = vsub.f32 %v5016_v11, %v5020_v63 }
 0x76a   :  { %v5028_v31 = vmul.f32 1.442695, %v5025_v28 }
 0x76b   :  { %v5026_v32 = vmul.f32 1.442695, %v5024_v53  ;;  %v5043_v57 = vpop.permute.xlu1 %5042 }
 0x76c   :  { %41960 = vpow2.f32 %v5028_v31  ;;  %v5051_v3 = vsel %vm317_vm1, %v5043_v57, 0 }
 0x76d   :  { %41962 = vpow2.f32 %v5026_v32  ;;  %v5057_v4 = vand.u32 4294901760, %v5051_v3 }
 0x76f   :  { %v5149_v38 = vsub.f32 %v5051_v3, %v5057_v4 }
 0x771   :  { %v5150_v37 = vand.u32 4294901760, %v5149_v38 }
 0x776   :  { %v41961_v23 = vpop.eup %41960 }
 0x777   :  { %v5033_v7 = vsel %vm2894_vm6, %v41961_v23, 0.0  ;;  %v41963_v55 = vpop.eup %41962 }
 0x778   :  { %5034 = vadd.xlane.f32.xlu0 %v5033_v7  ;;  %v5030_v9 = vsel %vm2890_vm7, %v41963_v55, 0.0 }
 0x77c   :  { %5031 = vadd.xlane.f32.xlu0 %v5030_v9 }
 0x792   :  { %5040 = vrot.lane.b32.xlu0 %v42970_v2, %s42394_s23 }
 0x796   :  { %5567 = vrot.lane.b32.xlu0 %v42940_v60, %s42395_s9  ;;  %v5151_v60 = vsub.f32 %v5149_v38, %v5150_v37 }
 0x798   :  { %v5152_v63 = vand.u32 4294901760, %v5151_v60 }
 0x805   :  { %v5035_v35 = vpop.xlane.xlu0 %5034 }
 0x806   :  { %41964 = vrcp.f32 %v5035_v35 }
 0x809   :  { %v5032_v26 = vpop.xlane.xlu0 %5031 }
 0x80a   :  { %41966 = vrcp.f32 %v5032_v26 }
 0x80d   :  { %v5041_v25 = vpop.permute.xlu0 %5040 }
 0x80e   :  { %v5054_v24 = vand.u32 4294901760, %v5041_v25 }
 0x810   :  { %v41965_v34 = vpop.eup %41964  ;;  %v43076_v1 = vpack.c.bf16 %v5057_v4, %v5054_v24  ;;  %v5142_v27 = vsub.f32 %v5041_v25, %v5054_v24 }
 0x811   :  { %v5039_v41 = vmul.f32 %v41965_v34, %v41961_v23 }
 0x812   :  { %v5143_v40 = vand.u32 4294901760, %v5142_v27  ;;  %39003 = vmatprep.subr.bf16.mxu1 %v43076_v1  ;;  %v39010_v25 = vpack.c.bf16 %v5149_v38, %v5142_v27 }
 0x813   :  { %39005 = vmatpush3.bf16.msra.mxu1 %v43076_v1  ;;  %v5049_v21 = vsel %vm2890_vm7, %v5039_v41, 0  ;;  %v5568_v41 = vpop.permute.xlu0 %5567 }
 0x814   :  { %v41967_v11 = vpop.eup %41966  ;;  %v5144_v22 = vsub.f32 %v5142_v27, %v5143_v40  ;;  %v43081_v29 = vand.u32 4294901760, %v5049_v21  ;;  %v39018_v34 = vpack.c.bf16 %v5150_v37, %v5143_v40  ;;  %v5575_v27 = vsel %vm2373_vm5, %v5568_v41, 0 }
 0x815   :  { %v5038_v54 = vmul.f32 %v41967_v11, %v41963_v55  ;;  %v5572_v55 = vpop.permute.xlu1 %5571 }
 0x816   :  { %v5145_v28 = vand.u32 4294901760, %v5144_v22  ;;  %v5131_v53 = vsub.f32 %v5049_v21, %v43081_v29  ;;  %v5579_v38 = vsel %vm2373_vm5, %v5572_v55, 0  ;;  %v5650_v22 = vand.u32 4294901760, %v5575_v27 }
 0x817   :  { %v5046_v31 = vsel %vm2890_vm7, %v5038_v54, 0  ;;  %v5584_v11 = vand.u32 4294901760, %v5579_v38 }
 0x818   :  { %v39006_v32 = vpack.c.bf16 %v5152_v63, %v5145_v28  ;;  %v5120_v23 = vand.u32 4294901760, %v5046_v31  ;;  %v5132_v7 = vand.u32 4294901760, %v5131_v53  ;;  %v5651_v40 = vsub.f32 %v5575_v27, %v5650_v22 }
 0x819   :  { %v5574_v24 = vpop.permute.xlu1 %5573  ;;  %v5672_v37 = vsub.f32 %v5579_v38, %v5584_v11 }
 0x81a   :  { %39007 = vmatprep.subr.bf16.mxu1 %v39006_v32  ;;  %v5121_v9 = vsub.f32 %v5046_v31, %v5120_v23  ;;  %v5133_v3 = vsub.f32 %v5131_v53, %v5132_v7  ;;  %v5581_v60 = vsel %vm2373_vm5, %v5574_v24, 0 }
 0x81b   :  { %v5587_v21 = vand.u32 4294901760, %v5581_v60  ;;  %v5673_v31 = vand.u32 4294901760, %v5672_v37 }
 0x81c   :  { %v5122_v57 = vand.u32 4294901760, %v5121_v9  ;;  %v5134_v26 = vand.u32 4294901760, %v5133_v3 }
 0x81d   :  { %v5679_v54 = vsub.f32 %v5581_v60, %v5587_v21  ;;  %v5570_v28 = vpop.permute.xlu1 %5569 }
 0x81e   :  { %v5123_v35 = vsub.f32 %v5121_v9, %v5122_v57  ;;  %v5577_v63 = vsel %vm2373_vm5, %v5570_v28, 0 }
 0x820   :  { %v5124_v4 = vand.u32 4294901760, %v5123_v35 }
 0x822   :  { %35484 = vmatprep.mubr.f32.mxu1 %v5124_v4  ;;  %v5674_v4 = vsub.f32 %v5672_v37, %v5673_v31 }
 0x823   :  { %35485 = vmatmul.mubr.f32.vlgmr.msra.gmra.mrb[10].mxu1 %v5134_v26 }
 0x824   :  { %39009 = vmatpush3.bf16.msra.mxu1 %v39006_v32  ;;  %35491 = vmatprep.mubr.f32.mxu1 %v5120_v23  ;;  %v5660_v32 = vand.u32 4294901760, %v5577_v63  ;;  %v5675_v24 = vand.u32 4294901760, %v5674_v4 }
 0x825   :  { %39011 = vmatprep.subr.bf16.mxu1 %v39010_v25 }
 0x826   :  { %v5661_v3 = vsub.f32 %v5577_v63, %v5660_v32 }
 0x82b   :  { %35492 = vmatmul.mubr.f32.vlgmr.msra.gmra.mrb[10].mxu1 %v43081_v29 }
 0x82c   :  { %39013 = vmatpush3.bf16.msra.mxu1 %v39010_v25  ;;  %35498 = vmatprep.mubr.f32.mxu1 %v5121_v9  ;;  %v5652_v9 = vand.u32 4294901760, %v5651_v40  ;;  %v5662_v25 = vand.u32 4294901760, %v5661_v3 }
 0x82d   :  { %39015 = vmatprep.subr.bf16.mxu1 %v43076_v1 }
 0x82e   :  { %v5653_v35 = vsub.f32 %v5651_v40, %v5652_v9  ;;  %v5663_v41 = vsub.f32 %v5661_v3, %v5662_v25 }
 0x830   :  { %v5654_v55 = vand.u32 4294901760, %v5653_v35  ;;  %v5664_v60 = vand.u32 4294901760, %v5663_v41 }
 0x833   :  { %35499 = vmatmul.mubr.f32.vlgmr.msra.gmra.mrb[10].mxu1 %v5131_v53  ;;  %v5680_v53 = vand.u32 4294901760, %v5679_v54 }
 0x834   :  { %39017 = vmatpush3.bf16.msra.mxu1 %v43076_v1  ;;  %35505 = vmatprep.mubr.f32.mxu1 %v5122_v57  ;;  %v39026_v57 = vpack.c.bf16 %v5587_v21, %v5584_v11 }
 0x835   :  { %39019 = vmatprep.subr.bf16.mxu1 %v39018_v34 }
 0x83b   :  { %35506 = vmatmul.mubr.f32.vlgmr.msra.gmra.mrb[10].mxu1 %v5132_v7  ;;  %v5681_v7 = vsub.f32 %v5679_v54, %v5680_v53 }
 0x83c   :  { %39021 = vmatpush3.bf16.msra.mxu1 %v39018_v34  ;;  %35512 = vmatprep.mubr.f32.mxu1 %v5120_v23 }
 0x83d   :  { %39023 = vmatprep.subr.bf16.mxu1 %v43076_v1  ;;  %v5682_v26 = vand.u32 4294901760, %v5681_v7 }
 0x83f   :  { %v39030_v34 = vpack.c.bf16 %v5682_v26, %v5675_v24 }
 0x843   :  { %35513 = vmatmul.mubr.f32.vlgmr.msra.gmra.mrb[10].mxu1 %v43081_v29 }
 0x844   :  { %39025 = vmatpush3.bf16.msra.mxu1 %v43076_v1  ;;  %35519 = vmatprep.mubr.f32.mxu1 %v5120_v23  ;;  %v39034_v1 = vpack.c.bf16 %v5679_v54, %v5672_v37  ;;  %v39042_v23 = vpack.c.bf16 %v5680_v53, %v5673_v31 }
 0x845   :  { %39027 = vmatprep.subr.bf16.mxu1 %v39026_v57 }
 0x84b   :  { %35520 = vmatmul.mubr.f32.vlgmr.msra.gmra.mrb[10].mxu1 %v43081_v29 }
 0x84c   :  { %35526 = vmatprep.mubr.f32.mxu1 %v5654_v55 }
 0x84d   :  { %39029 = vmatpush3.bf16.xpose.msra.mxu1 %v39026_v57 }
 0x84e   :  { %39031 = vmatprep.subr.bf16.mxu1 %v39030_v34 }
 0x854   :  { %35527 = vmatmul.mubr.f32.vlgmr.msra.gmra.mrb[12].mxu1 %v5664_v60 }
 0x855   :  { %39033 = vmatpush3.bf16.xpose.msra.mxu1 %v39030_v34  ;;  %35533 = vmatprep.mubr.f32.mxu1 %v5650_v22 }
 0x856   :  { %39035 = vmatprep.subr.bf16.mxu1 %v39034_v1 }
 0x85c   :  { %35534 = vmatmul.mubr.f32.vlgmr.msra.gmra.mrb[12].mxu1 %v5660_v32 }
 0x85d   :  { %39037 = vmatpush3.bf16.xpose.msra.mxu1 %v39034_v1  ;;  %35540 = vmatprep.mubr.f32.mxu1 %v5651_v40 }
 0x85e   :  { %39039 = vmatprep.subr.bf16.mxu1 %v39026_v57 }
 0x864   :  { %35541 = vmatmul.mubr.f32.vlgmr.msra.gmra.mrb[12].mxu1 %v5661_v3 }
 0x865   :  { %39041 = vmatpush3.bf16.xpose.msra.mxu1 %v39026_v57  ;;  %35547 = vmatprep.mubr.f32.mxu1 %v5652_v9 }
 0x866   :  { %39043 = vmatprep.subr.bf16.mxu1 %v39042_v23 }
 0x86c   :  { %35548 = vmatmul.mubr.f32.vlgmr.msra.gmra.mrb[12].mxu1 %v5662_v25 }
 0x86d   :  { %39045 = vmatpush3.bf16.xpose.msra.mxu1 %v39042_v23  ;;  %35554 = vmatprep.mubr.f32.mxu1 %v5650_v22 }
 0x86e   :  { %39047 = vmatprep.subr.bf16.mxu1 %v39026_v57 }
 0x874   :  { %35555 = vmatmul.mubr.f32.vlgmr.msra.gmra.mrb[12].mxu1 %v5660_v32 }
 0x875   :  { %39049 = vmatpush3.bf16.xpose.msra.mxu1 %v39026_v57  ;;  %35561 = vmatprep.mubr.f32.mxu1 %v5650_v22 }
 0x87c   :  { %35562 = vmatmul.mubr.f32.vlgmr.msra.gmra.mrb[12].mxu1 %v5660_v32 }
 0x91e   :  { %v35521_v29 = vpop.f32.mrb[10].mxu1 }
 0x91f   :  { %v5545_v38 = vpop.f32.mrb[11].mxu1 }
 0x94f   :  { %v35563_v27 = vpop.f32.mrb[12].mxu1 }
 0x950   :  { %v41314_v21 = vadd.f32 %v35563_v27, %v42991_v56  ;;  %v6075_v11 = vpop.f32.mrb[13].mxu1 }
 0x951   :  { %v41315_v54 = vadd.f32 %v42991_v56, %v6075_v11 }
 0x952   :  { %v6086_v28 = vmul.f32 0.17677669, %v41314_v21 }
 0x953   :  { %v6085_v37 = vmul.f32 0.17677669, %v41315_v54 }
 0x954   :  { %v6090_v40 = vsel %vm2894_vm6, %v6086_v28, -inf }
 0x955   :  { %6091 = vmax.xlane.f32.xlu1 %v6090_v40  ;;  %v6087_v63 = vsel %vm2890_vm7, %v6085_v37, -inf }
 0x956   :  { %6088 = vmax.xlane.f32.xlu0 %v6087_v63 }
 0x966   :  { %6111 = vrot.lane.b32.xlu1 %v42966_v61, %s42395_s9 }
 0x96a   :  { %4488 = vrot.lane.b32.xlu1 %v43055_v12, %s42390_s30 }
 0x96e   :  { %4490 = vrot.lane.b32.xlu1 %v43053_v62, %s42390_s30 }
 0x972   :  { %5559 = vrot.lane.b32.xlu1 %v35521_v29, %s42380_s2 }
 0x9e2   :  { %v6092_v56 = vpop.xlane.xlu1 %6091 }
 0x9e3   :  { %v6094_v22 = vsub.f32 %v6086_v28, %v6092_v56  ;;  %v6089_v53 = vpop.xlane.xlu0 %6088 }
 0x9e4   :  { %v6093_v31 = vsub.f32 %v6085_v37, %v6089_v53 }
 0x9e5   :  { %v6097_v32 = vmul.f32 1.442695, %v6094_v22 }
 0x9e6   :  { %v6095_v9 = vmul.f32 1.442695, %v6093_v31  ;;  %v6112_v57 = vpop.permute.xlu1 %6111 }
 0x9e7   :  { %41968 = vpow2.f32 %v6097_v32  ;;  %v6120_v26 = vsel %vm317_vm1, %v6112_v57, 0 }
 0x9e8   :  { %41970 = vpow2.f32 %v6095_v9  ;;  %v6126_v55 = vand.u32 4294901760, %v6120_v26 }
 0x9ea   :  { %v4489_v7 = vpop.permute.xlu1 %4488  ;;  %v6218_v34 = vsub.f32 %v6120_v26, %v6126_v55 }
 0x9eb   :  { %4495 = vst.msk [vmem:[#allocation3] sm:$0xff] %vm4494_vm9, %v4489_v7 }
 0x9ec   :  { %v6219_v60 = vand.u32 4294901760, %v6218_v34 }
 0x9ee   :  { %v4491_v61 = vpop.permute.xlu1 %4490 }
 0x9ef   :  { %4497 = vst.msk [vmem:[#allocation3 + $0x8] sm:$0xf] %vm4496_vm10, %v4491_v61 }
 0x9f1   :  { %v41969_v62 = vpop.eup %41968 }
 0x9f2   :  { %v5560_v12 = vpop.permute.xlu1 %5559  ;;  %v6102_v3 = vsel %vm2894_vm6, %v41969_v62, 0.0  ;;  %v41971_v35 = vpop.eup %41970 }
 0x9f3   :  { %5566 = vst.msk [vmem:[#allocation3 + $0x8] sm:$0xf] %vm5565_vm11, %v5560_v12  ;;  %6103 = vadd.xlane.f32.xlu0 %v6102_v3  ;;  %v6099_v4 = vsel %vm2890_vm7, %v41971_v35, 0.0 }
 0x9f7   :  { %6100 = vadd.xlane.f32.xlu0 %v6099_v4 }
 0xa0d   :  { %6109 = vrot.lane.b32.xlu0 %v42970_v2, %s42395_s9 }
 0xa11   :  { %5557 = vrot.lane.b32.xlu0 %v5545_v38, %s42380_s2  ;;  %v6220_v38 = vsub.f32 %v6218_v34, %v6219_v60 }
 0xa13   :  { %v6221_v22 = vand.u32 4294901760, %v6220_v38 }
 0xa80   :  { %v6104_v25 = vpop.xlane.xlu0 %6103 }
 0xa81   :  { %41972 = vrcp.f32 %v6104_v25  ;;  %v234_v25 = vld [vmem:[%s45744_s8] sm:$0xff] }
 0xa84   :  { %v6101_v24 = vpop.xlane.xlu0 %6100 }
 0xa85   :  { %41974 = vrcp.f32 %v6101_v24  ;;  %v236_v24 = vld [vmem:[%s45744_s8 + $0x10] sm:$0xff] }
 0xa88   :  { %v6110_v41 = vpop.permute.xlu0 %6109 }
 0xa89   :  { %v6123_v1 = vand.u32 4294901760, %v6110_v41 }
 0xa8b   :  { %v41973_v23 = vpop.eup %41972  ;;  %v39050_v29 = vpack.c.bf16 %v6126_v55, %v6123_v1  ;;  %v6211_v27 = vsub.f32 %v6110_v41, %v6123_v1  ;;  %v235_v55 = vld [vmem:[%s45744_s8 + $0x8] sm:$0xff]  ;;  %v6657_v1 = vand.u32 4294901760, %v236_v24 }
 0xa8c   :  { %v6108_v21 = vmul.f32 %v41973_v23, %v41969_v62  ;;  %v5558_v11 = vpop.permute.xlu0 %5557  ;;  %v6654_v41 = vand.u32 4294901760, %v235_v55 }
 0xa8d   :  { %v6212_v2 = vand.u32 4294901760, %v6211_v27  ;;  %5564 = vst.msk [vmem:[#allocation3] sm:$0xff] %vm5563_vm12, %v5558_v11  ;;  %39051 = vmatprep.subr.bf16.mxu0 %v39050_v29  ;;  %v39058_v26 = vpack.c.bf16 %v6218_v34, %v6211_v27  ;;  %v6651_v34 = vand.u32 4294901760, %v234_v25 }
 0xa8e   :  { %39053 = vmatpush3.bf16.msra.mxu0 %v39050_v29  ;;  %v6118_v54 = vsel %vm2890_vm7, %v6108_v21, 0 }
 0xa8f   :  { %v41975_v28 = vpop.eup %41974  ;;  %v6213_v37 = vsub.f32 %v6211_v27, %v6212_v2  ;;  %v6199_v40 = vand.u32 4294901760, %v6118_v54  ;;  %v6741_v11 = vsub.f32 %v234_v25, %v6651_v34 }
 0xa90   :  { %v6107_v63 = vmul.f32 %v41975_v28, %v41971_v35  ;;  %v39066_v35 = vpack.c.bf16 %v6219_v60, %v6212_v2  ;;  %v237_v60 = vld [vmem:[%s45744_s8 + $0x18] sm:$0xff]  ;;  %v6748_v2 = vsub.f32 %v235_v55, %v6654_v41 }
 0xa91   :  { %v6214_v56 = vand.u32 4294901760, %v6213_v37  ;;  %v6200_v53 = vsub.f32 %v6118_v54, %v6199_v40  ;;  %v6660_v23 = vand.u32 4294901760, %v237_v60  ;;  %v6742_v54 = vand.u32 4294901760, %v6741_v11 }
 0xa92   :  { %v6115_v31 = vsel %vm2890_vm7, %v6107_v63, 0  ;;  %v6749_v28 = vand.u32 4294901760, %v6748_v2  ;;  %v6755_v63 = vsub.f32 %v236_v24, %v6657_v1 }
 0xa93   :  { %v39054_v32 = vpack.c.bf16 %v6221_v22, %v6214_v56  ;;  %v6189_v9 = vand.u32 4294901760, %v6115_v31  ;;  %v6201_v57 = vand.u32 4294901760, %v6200_v53  ;;  %v43133_v27 = vpack.c.bf16 %v6660_v23, %v6657_v1 }
 0xa94   :  { %v6743_v37 = vsub.f32 %v6741_v11, %v6742_v54  ;;  %v6762_v56 = vsub.f32 %v237_v60, %v6660_v23 }
 0xa95   :  { %39055 = vmatprep.subr.bf16.mxu0 %v39054_v32  ;;  %v6190_v7 = vsub.f32 %v6115_v31, %v6189_v9  ;;  %v6202_v62 = vsub.f32 %v6200_v53, %v6201_v57  ;;  %46067 = vst [vmem:[#allocation50_spill] sm:$0xff] %v43133_v27  ;;  %v6756_v31 = vand.u32 4294901760, %v6755_v63 }
 0xa96   :  { %v6744_v22 = vand.u32 4294901760, %v6743_v37 }
 0xa97   :  { %v6191_v61 = vand.u32 4294901760, %v6190_v7  ;;  %v6203_v4 = vand.u32 4294901760, %v6202_v62 }
 0xa99   :  { %v6192_v12 = vsub.f32 %v6190_v7, %v6191_v61 }
 0xa9b   :  { %v6193_v3 = vand.u32 4294901760, %v6192_v12 }
 0xa9d   :  { %35568 = vmatprep.mubr.f32.mxu0 %v6193_v3  ;;  %v43146_v3 = vpack.c.bf16 %v6748_v2, %v6741_v11 }
 0xa9e   :  { %35569 = vmatmul.mubr.f32.vlgmr.msra.gmra.mrb[20].mxu0 %v6203_v4  ;;  %v43148_v4 = vpack.c.bf16 %v6762_v56, %v6755_v63 }
 0xa9f   :  { %39057 = vmatpush3.bf16.msra.mxu0 %v39054_v32  ;;  %35575 = vmatprep.mubr.f32.mxu0 %v6189_v9  ;;  %v6763_v32 = vand.u32 4294901760, %v6762_v56  ;;  %46070 = vst [vmem:[#allocation53_spill] sm:$0xff] %v43146_v3 }
 0xaa0   :  { %39059 = vmatprep.subr.bf16.mxu0 %v39058_v26  ;;  %46071 = vst [vmem:[#allocation54_spill] sm:$0xff] %v43148_v4 }
 0xaa6   :  { %35576 = vmatmul.mubr.f32.vlgmr.msra.gmra.mrb[20].mxu0 %v6199_v40 }
 0xaa7   :  { %39061 = vmatpush3.bf16.msra.mxu0 %v39058_v26  ;;  %35582 = vmatprep.mubr.f32.mxu0 %v6190_v7  ;;  %v6764_v7 = vsub.f32 %v6762_v56, %v6763_v32  ;;  %v43150_v26 = vpack.c.bf16 %v6749_v28, %v6742_v54 }
 0xaa8   :  { %39063 = vmatprep.subr.bf16.mxu0 %v39050_v29 }
 0xaa9   :  { %v6765_v62 = vand.u32 4294901760, %v6764_v7  ;;  %46072 = vst [vmem:[#allocation55_spill] sm:$0xff] %v43150_v26 }
 0xaae   :  { %35583 = vmatmul.mubr.f32.vlgmr.msra.gmra.mrb[20].mxu0 %v6200_v53 }
 0xaaf   :  { %39065 = vmatpush3.bf16.msra.mxu0 %v39050_v29  ;;  %35589 = vmatprep.mubr.f32.mxu0 %v6191_v61 }
 0xab0   :  { %39067 = vmatprep.subr.bf16.mxu0 %v39066_v35 }
 0xab6   :  { %35590 = vmatmul.mubr.f32.vlgmr.msra.gmra.mrb[20].mxu0 %v6201_v57  ;;  %v6757_v57 = vsub.f32 %v6755_v63, %v6756_v31  ;;  %v33013_v63 = vld [vmem:[#allocation9] ss:$0 sm:$0xff] }
 0xab7   :  { %39069 = vmatpush3.bf16.msra.mxu0 %v39066_v35  ;;  %35596 = vmatprep.mubr.f32.mxu0 %v6189_v9  ;;  %v43152_v35 = vpack.c.bf16 %v6763_v32, %v6756_v31  ;;  %v42100_v32 = vld [vmem:[#allocation2 + $0x8] sm:$0xf] }
 0xab8   :  { %39071 = vmatprep.subr.bf16.mxu0 %v39050_v29  ;;  %v6758_v61 = vand.u32 4294901760, %v6757_v57 }
 0xab9   :  { %46073 = vst [vmem:[#allocation56_spill] sm:$0xff] %v43152_v35 }
 0xaba   :  { %v43144_v12 = vpack.c.bf16 %v6765_v62, %v6758_v61 }
 0xabc   :  { %46069 = vst [vmem:[#allocation52_spill] sm:$0xff] %v43144_v12 }
 0xabe   :  { %35597 = vmatmul.mubr.f32.vlgmr.msra.gmra.mrb[20].mxu0 %v6199_v40 }
 0xabf   :  { %39073 = vmatpush3.bf16.msra.mxu0 %v39050_v29  ;;  %35603 = vmatprep.mubr.f32.mxu0 %v6189_v9  ;;  %v43131_v29 = vpack.c.bf16 %v6654_v41, %v6651_v34 }
 0xac1   :  { %46066 = vst [vmem:[#allocation49_spill] sm:$0xff] %v43131_v29  ;;  %39075 = vmatprep.subr.bf16.mxu0 %v43131_v29 }
 0xac6   :  { %35604 = vmatmul.mubr.f32.vlgmr.msra.gmra.mrb[20].mxu0 %v6199_v40  ;;  %v6750_v40 = vsub.f32 %v6748_v2, %v6749_v28 }
 0xac7   :  { %39077 = vmatpush3.bf16.msra.mxu0 %v43131_v29 }
 0xac8   :  { %39079 = vmatprep.subr.bf16.mxu0 %v43133_v27  ;;  %v6751_v53 = vand.u32 4294901760, %v6750_v40 }
 0xaca   :  { %v43141_v9 = vpack.c.bf16 %v6751_v53, %v6744_v22 }
 0xacb   :  { %39081 = vmatpush3.bf16.msra.mxu0 %v43133_v27 }
 0xacc   :  { %46068 = vst [vmem:[#allocation51_spill] sm:$0xff] %v43141_v9  ;;  %39083 = vmatprep.subr.bf16.mxu0 %v43141_v9 }
 0xb99   :  { %v35605_v21 = vpop.f32.mrb[20].mxu0 }
 0xb9a   :  { %6628 = vrot.lane.b32.xlu1 %v35605_v21, %s42396_s0  ;;  %v6614_v38 = vpop.f32.mrb[21].mxu0 }
 0xb9b   :  { %6626 = vrot.lane.b32.xlu0 %v6614_v38, %s42396_s0 }
 0xc0c   :  { %v6629_v25 = vpop.permute.xlu1 %6628 }
 0xc0d   :  { %6635 = vst.msk [vmem:[#allocation3 + $0x8] sm:$0xf] %vm6634_vm13, %v6629_v25  ;;  %v6627_v55 = vpop.permute.xlu0 %6626 }
 0xc0e   :  { %6633 = vst.msk [vmem:[#allocation3] sm:$0xff] %vm6632_vm14, %v6627_v55 }
 0xc14   :  { %v6637_v24 = vld [vmem:[#allocation3 + $0x8] sm:$0xf] }
 0xc15   :  { %v6636_v34 = vld [vmem:[#allocation3] sm:$0xff]  ;;  %v6648_v41 = vsel %vm772_vm4, %v6637_v24, 0 }
 0xc16   :  { %v6645_v60 = vsel %vm772_vm4, %v6636_v34, 0  ;;  %v6729_v1 = vand.u32 4294901760, %v6648_v41 }
 0xc17   :  { %v6719_v23 = vand.u32 4294901760, %v6645_v60 }
 0xc18   :  { %v6730_v21 = vsub.f32 %v6648_v41, %v6729_v1 }
 0xc19   :  { %v6720_v11 = vsub.f32 %v6645_v60, %v6719_v23 }
 0xc1a   :  { %v6731_v2 = vand.u32 4294901760, %v6730_v21 }
 0xc1b   :  { %v6721_v38 = vand.u32 4294901760, %v6720_v11 }
 0xc1c   :  { %v6732_v54 = vsub.f32 %v6730_v21, %v6731_v2 }
 0xc1d   :  { %v6722_v28 = vsub.f32 %v6720_v11, %v6721_v38 }
 0xc1e   :  { %v6733_v40 = vand.u32 4294901760, %v6732_v54  ;;  %v259_v54 = vld [vmem:[%s45750_s14 + $0x8] sm:$0xff] }
 0xc1f   :  { %v6723_v37 = vand.u32 4294901760, %v6722_v28  ;;  %v260_v28 = vld [vmem:[%s45750_s14 + $0x10] sm:$0xff] }
 0xc21   :  { %35614 = vmatprep.mubr.f32.mxu0 %v6723_v37 }
 0xc22   :  { %35615 = vmatmul.mubr.f32.vlgmr.msra.gmra.mrb[22].mxu0 %v6733_v40  ;;  %v7243_v40 = vand.u32 4294901760, %v259_v54 }
 0xc23   :  { %39085 = vmatpush3.bf16.msra.mxu0 %v43141_v9  ;;  %35625 = vmatprep.mubr.f32.mxu0 %v6719_v23 }
 0xc24   :  { %39087 = vmatprep.subr.bf16.mxu0 %v43144_v12 }
 0xc27   :  { %39089 = vmatpush3.bf16.msra.mxu0 %v43144_v12 }
 0xc28   :  { %39091 = vmatprep.subr.bf16.mxu0 %v43146_v3 }
 0xc2a   :  { %35626 = vmatmul.mubr.f32.vlgmr.msra.gmra.mrb[22].mxu0 %v6729_v1 }
 0xc2b   :  { %39093 = vmatpush3.bf16.msra.mxu0 %v43146_v3  ;;  %35636 = vmatprep.mubr.f32.mxu0 %v6720_v11  ;;  %v33016_v3 = vld [vmem:[#allocation10] ss:$0 sm:$0xff] }
 0xc2c   :  { %39095 = vmatprep.subr.bf16.mxu0 %v43148_v4 }
 0xc2f   :  { %39097 = vmatpush3.bf16.msra.mxu0 %v43148_v4 }
 0xc30   :  { %39099 = vmatprep.subr.bf16.mxu0 %v43131_v29 }
 0xc32   :  { %35637 = vmatmul.mubr.f32.vlgmr.msra.gmra.mrb[22].mxu0 %v6730_v21 }
 0xc33   :  { %39101 = vmatpush3.bf16.msra.mxu0 %v43131_v29  ;;  %35647 = vmatprep.mubr.f32.mxu0 %v6721_v38  ;;  %v258_v38 = vld [vmem:[%s45750_s14] sm:$0xff] }
 0xc34   :  { %39103 = vmatprep.subr.bf16.mxu0 %v43133_v27  ;;  %v7240_v37 = vand.u32 4294901760, %v258_v38 }
 0xc37   :  { %39105 = vmatpush3.bf16.msra.mxu0 %v43133_v27 }
 0xc38   :  { %39107 = vmatprep.subr.bf16.mxu0 %v43150_v26 }
 0xc3a   :  { %35648 = vmatmul.mubr.f32.vlgmr.msra.gmra.mrb[22].mxu0 %v6731_v2 }
 0xc3b   :  { %39109 = vmatpush3.bf16.msra.mxu0 %v43150_v26  ;;  %35658 = vmatprep.mubr.f32.mxu0 %v6719_v23 }
 0xc3c   :  { %39111 = vmatprep.subr.bf16.mxu0 %v43152_v35 }
 0xc3f   :  { %39113 = vmatpush3.bf16.msra.mxu0 %v43152_v35 }
 0xc40   :  { %39115 = vmatprep.subr.bf16.mxu0 %v43131_v29 }
 0xc42   :  { %35659 = vmatmul.mubr.f32.vlgmr.msra.gmra.mrb[22].mxu0 %v6729_v1 }
 0xc43   :  { %39117 = vmatpush3.bf16.msra.mxu0 %v43131_v29  ;;  %35669 = vmatprep.mubr.f32.mxu0 %v6719_v23 }
 0xc44   :  { %39119 = vmatprep.subr.bf16.mxu0 %v43133_v27 }
 0xc47   :  { %39121 = vmatpush3.bf16.msra.mxu0 %v43133_v27 }
 0xc4a   :  { %35670 = vmatmul.mubr.f32.vlgmr.msra.gmra.mrb[22].mxu0 %v6729_v1 }
 0xd1d   :  { %v35671_v56 = vpop.f32.mrb[22].mxu0 }
 0xd1e   :  { %v41316_v22 = vadd.f32 %v35671_v56, %v33013_v63  ;;  %v7168_v53 = vpop.f32.mrb[23].mxu0  ;;  %v7246_v56 = vand.u32 4294901760, %v260_v28 }
 0xd1f   :  { %v41317_v31 = vadd.f32 %v33013_v63, %v7168_v53  ;;  %v261_v63 = vld [vmem:[%s45750_s14 + $0x18] sm:$0xff]  ;;  %v43202_v53 = vpack.c.bf16 %v7243_v40, %v7240_v37 }
 0xd20   :  { %v7179_v57 = vadd.f32 %v42100_v32, %v41316_v22  ;;  %v7249_v22 = vand.u32 4294901760, %v261_v63  ;;  %v7330_v32 = vsub.f32 %v258_v38, %v7240_v37 }
 0xd21   :  { %v7178_v7 = vadd.f32 %v41317_v31, %v42782_v45  ;;  %46074 = vst [vmem:[#allocation57_spill] sm:$0xff] %v43202_v53  ;;  %39123 = vmatprep.subr.bf16.mxu1 %v43202_v53 }
 0xd22   :  { %v33015_v61 = vclamps-f32 %v7179_v57, 1000000.0  ;;  %v43204_v31 = vpack.c.bf16 %v7249_v22, %v7246_v56  ;;  %39125 = vmatpush3.bf16.msra.mxu1 %v43202_v53  ;;  %v7337_v57 = vsub.f32 %v259_v54, %v7243_v40 }
 0xd23   :  { %v33014_v62 = vclamps-f32 %v7178_v7, 1000000.0  ;;  %v7331_v7 = vand.u32 4294901760, %v7330_v32 }
 0xd24   :  { %v7187_v25 = vsel %vm768_vm3, %v33015_v61, 0.0  ;;  %46075 = vst [vmem:[#allocation58_spill] sm:$0xff] %v43204_v31  ;;  %39127 = vmatprep.subr.bf16.mxu1 %v43204_v31  ;;  %v43215_v40 = vpack.c.bf16 %v7337_v57, %v7330_v32 }
 0xd25   :  { %7188 = vadd.xlane.f32.xlu1 %v7187_v25  ;;  %v7184_v55 = vsel %vm772_vm4, %v33014_v62, 0.0 }
 0xd26   :  { %7185 = vadd.xlane.f32.xlu0 %v7184_v55  ;;  %39129 = vmatpush3.bf16.msra.mxu1 %v43204_v31  ;;  %v7344_v55 = vsub.f32 %v260_v28, %v7246_v56  ;;  %46078 = vst [vmem:[#allocation61_spill] sm:$0xff] %v43215_v40  ;;  %v43226_v56 = vld [vmem:[%s45752_s16] sm:$0xff] }
 0xdb2   :  { %v7189_v24 = vpop.xlane.xlu1 %7188 }
 0xdb3   :  { %v7192_v34 = vmul.f32 0.03125, %v7189_v24  ;;  %v7186_v41 = vpop.xlane.xlu0 %7185  ;;  %v7351_v24 = vsub.f32 %v261_v63, %v7249_v22  ;;  %v43231_v22 = vld [vmem:[%s45752_s16 + $0x8] sm:$0xff] }
 0xdb4   :  { %v7191_v60 = vmul.f32 0.03125, %v7186_v41 }
 0xdb5   :  { %v43180_v1 = vsub.f32 %v33015_v61, %v7192_v34  ;;  %v7338_v61 = vand.u32 4294901760, %v7337_v57  ;;  %v43217_v0 = vpack.c.bf16 %v7351_v24, %v7344_v55 }
 0xdb6   :  { %v43182_v23 = vsub.f32 %v33014_v62, %v7191_v60  ;;  %v7332_v62 = vsub.f32 %v7330_v32, %v7331_v7  ;;  %v7345_v60 = vand.u32 4294901760, %v7344_v55  ;;  %v43236_v32 = vld [vmem:[%s45752_s16 + $0x10] sm:$0xff] }
 0xdb7   :  { %v7196_v11 = vmul.f32 %v43180_v1, %v43180_v1  ;;  %v7339_v25 = vsub.f32 %v7337_v57, %v7338_v61  ;;  %46079 = vst [vmem:[#allocation62_spill] sm:$0xff] %v43217_v0  ;;  %v43219_v28 = vpack.c.bf16 %v7338_v61, %v7331_v7  ;;  %v45768_v57 = vand.u32 4294901760, %v43226_v56  ;;  %v43243_v61 = vld [vmem:[%s45752_s16 + $0x18] sm:$0xff] }
 0xdb8   :  { %v7195_v21 = vmul.f32 %v43182_v23, %v43182_v23  ;;  %v7333_v34 = vand.u32 4294901760, %v7332_v62  ;;  %v45767_v7 = vand.u32 4294901760, %v43231_v22  ;;  %v45764_v62 = vand.u32 4294901760, %v43236_v32 }
 0xdb9   :  { %v7200_v2 = vsel %vm768_vm3, %v7196_v11, 0.0  ;;  %v7340_v41 = vand.u32 4294901760, %v7339_v25  ;;  %v7346_v11 = vsub.f32 %v7344_v55, %v7345_v60  ;;  %46080 = vst [vmem:[#allocation63_spill] sm:$0xff] %v43219_v28  ;;  %v43249_v25 = vld [vmem:[%s45752_s16 + $0x20] sm:$0xff]  ;;  %v43254_v55 = vld [vmem:[%s45752_s16 + $0x28] sm:$0xff] }
 0xdba   :  { %v7197_v45 = vsel %vm772_vm4, %v7195_v21, 0.0  ;;  %v7352_v21 = vand.u32 4294901760, %v7351_v24  ;;  %v46095_v44 = vand.u32 4294901760, %v43249_v25 }
 0xdbb   :  { %7198 = vadd.xlane.f32.xlu0 %v7197_v45  ;;  %v43210_v45 = vpack.c.bf16 %v7340_v41, %v7333_v34  ;;  %v7347_v38 = vand.u32 4294901760, %v7346_v11  ;;  %v43261_v34 = vpack.c.bf16 %v45767_v7, %v45768_v57  ;;  %v45766_v41 = vand.u32 4294901760, %v43249_v25  ;;  %v43274_v11 = vld [vmem:[%s45752_s16 + $0x30] sm:$0xff] }
 0xdbc   :  { %v43221_v63 = vpack.c.bf16 %v7352_v21, %v7345_v60  ;;  %v45765_v60 = vand.u32 4294901760, %v43254_v55  ;;  %v43484_v42 = vsub.f32 %v43249_v25, %v46095_v44 }
 0xdbd   :  { %46076 = vst [vmem:[#allocation59_spill] sm:$0xff] %v43210_v45  ;;  %39131 = vmatprep.subr.bf16.mxu1 %v43210_v45  ;;  %39171 = vmatprep.subr.bf16.mxu0 %v43261_v34 }
 0xdbe   :  { %46081 = vst [vmem:[#allocation64_spill] sm:$0xff] %v43221_v63  ;;  %39173 = vmatpush3.bf16.msra.mxu0 %v43261_v34 }
 0xdbf   :  { %7201 = vadd.xlane.f32.xlu0 %v7200_v2  ;;  %v7353_v2 = vsub.f32 %v7351_v24, %v7352_v21  ;;  %v45763_v24 = vand.u32 4294901760, %v43243_v61 }
 0xdc1   :  { %v7354_v54 = vand.u32 4294901760, %v7353_v2  ;;  %v43269_v21 = vpack.c.bf16 %v45763_v24, %v45764_v62  ;;  %v43279_v2 = vld [vmem:[%s45752_s16 + $0x38] sm:$0xff] }
 0xdc2   :  { %v45779_v24 = vand.u32 4294901760, %v43279_v2 }
 0xdc3   :  { %v43213_v37 = vpack.c.bf16 %v7354_v54, %v7347_v38  ;;  %39175 = vmatprep.subr.bf16.mxu0 %v43269_v21  ;;  %v43288_v38 = vpack.c.bf16 %v45765_v60, %v45766_v41  ;;  %v45780_v54 = vand.u32 4294901760, %v43274_v11 }
 0xdc4   :  { %39177 = vmatpush3.bf16.msra.mxu0 %v43269_v21 }
 0xdc5   :  { %46077 = vst [vmem:[#allocation60_spill] sm:$0xff] %v43213_v37  ;;  %39179 = vmatprep.subr.bf16.mxu0 %v43288_v38  ;;  %v43298_v62 = vpack.c.bf16 %v45779_v24, %v45780_v54  ;;  %v33017_v24 = vld [vmem:[#allocation12] ss:$0 sm:$0xff] }
 0xdc8   :  { %39181 = vmatpush3.bf16.msra.mxu0 %v43288_v38 }
 0xdc9   :  { %39183 = vmatprep.subr.bf16.mxu0 %v43298_v62 }
 0xdcc   :  { %39185 = vmatpush3.bf16.msra.mxu0 %v43298_v62 }
 0xe48   :  { %v7199_v60 = vpop.xlane.xlu0 %7198 }
 0xe49   :  { %v7203_v41 = vmul.f32 0.03125, %v7199_v60 }
 0xe4b   :  { %v7205_v7 = vadd.f32 1e-06, %v7203_v41 }
 0xe4c   :  { %v7202_v57 = vpop.xlane.xlu0 %7201 }
 0xe4d   :  { %41976 = vrsqrt.f32 %v7205_v7  ;;  %v7204_v35 = vmul.f32 0.03125, %v7202_v57 }
 0xe4f   :  { %v7206_v26 = vadd.f32 1e-06, %v7204_v35 }
 0xe51   :  { %41978 = vrsqrt.f32 %v7206_v26 }
 0xe57   :  { %v41977_v4 = vpop.eup %41976 }
 0xe58   :  { %v7209_v12 = vmul.f32 %v41977_v4, %v43182_v23 }
 0xe5a   :  { %v7217_v54 = vmul.f32 %v33016_v3, %v7209_v12 }
 0xe5b   :  { %v41979_v9 = vpop.eup %41978 }
 0xe5c   :  { %v7210_v27 = vmul.f32 %v41979_v9, %v43180_v1  ;;  %v43305_v29 = vadd.f32 %v33017_v24, %v7217_v54  ;;  %v281_v54 = vld [vmem:[%s45752_s16 + $0x58] sm:$0xff] }
 0xe5e   :  { %v7218_v18 = vmul.f32 %v33016_v3, %v7210_v27  ;;  %v7234_v41 = vsel %vm772_vm4, %v43305_v29, 0 }
 0xe5f   :  { %v7308_v60 = vand.u32 4294901760, %v7234_v41 }
 0xe60   :  { %v43309_v7 = vadd.f32 %v33017_v24, %v7218_v18  ;;  %v280_v24 = vld [vmem:[%s45752_s16 + $0x50] sm:$0xff] }
 0xe61   :  { %v7309_v35 = vsub.f32 %v7234_v41, %v7308_v60  ;;  %v7806_v41 = vand.u32 4294901760, %v280_v24 }
 0xe62   :  { %v7237_v26 = vsel %vm772_vm4, %v43309_v7, 0 }
 0xe63   :  { %v7310_v57 = vand.u32 4294901760, %v7309_v35  ;;  %v7318_v4 = vand.u32 4294901760, %v7237_v26 }
 0xe65   :  { %v7311_v23 = vsub.f32 %v7309_v35, %v7310_v57  ;;  %v7319_v12 = vsub.f32 %v7237_v26, %v7318_v4  ;;  %v282_v26 = vld [vmem:[%s45752_s16 + $0x60] sm:$0xff] }
 0xe67   :  { %v7312_v16 = vand.u32 4294901760, %v7311_v23  ;;  %v7320_v59 = vand.u32 4294901760, %v7319_v12 }
 0xe69   :  { %35680 = vmatprep.mubr.f32.mxu1 %v7312_v16  ;;  %v7321_v9 = vsub.f32 %v7319_v12, %v7320_v59  ;;  %v279_v16 = vld [vmem:[%s45752_s16 + $0x48] sm:$0xff] }
 0xe6a   :  { %v7803_v27 = vand.u32 4294901760, %v279_v16 }
 0xe6b   :  { %v7322_v1 = vand.u32 4294901760, %v7321_v9  ;;  %v46082_v9 = vand.u32 4294901760, %v43226_v56 }
 0xe6c   :  { %v43395_v47 = vsub.f32 %v279_v16, %v7803_v27 }
 0xe6d   :  { %35681 = vmatmul.mubr.f32.vlgmr.msra.gmra.mrb[14].mxu1 %v7322_v1  ;;  %v43363_v1 = vsub.f32 %v43226_v56, %v46082_v9 }
 0xe6e   :  { %39133 = vmatpush3.bf16.msra.mxu1 %v43210_v45  ;;  %35691 = vmatprep.mubr.f32.mxu1 %v7308_v60  ;;  %v45821_v46 = vand.u32 4294901760, %v43395_v47 }
 0xe6f   :  { %39135 = vmatprep.subr.bf16.mxu1 %v43213_v37  ;;  %v45817_v56 = vand.u32 4294901760, %v43363_v1 }
 0xe72   :  { %39137 = vmatpush3.bf16.msra.mxu1 %v43213_v37 }
 0xe73   :  { %39139 = vmatprep.subr.bf16.mxu1 %v43215_v40 }
 0xe75   :  { %35692 = vmatmul.mubr.f32.vlgmr.msra.gmra.mrb[14].mxu1 %v7318_v4 }
 0xe76   :  { %39141 = vmatpush3.bf16.msra.mxu1 %v43215_v40  ;;  %35702 = vmatprep.mubr.f32.mxu1 %v7309_v35  ;;  %v285_v40 = vld [vmem:[%s45752_s16 + $0x78] sm:$0xff] }
 0xe77   :  { %39143 = vmatprep.subr.bf16.mxu1 %v43217_v0  ;;  %v7821_v45 = vand.u32 4294901760, %v285_v40 }
 0xe7a   :  { %39145 = vmatpush3.bf16.msra.mxu1 %v43217_v0  ;;  %v284_v0 = vld [vmem:[%s45752_s16 + $0x70] sm:$0xff] }
 0xe7b   :  { %39147 = vmatprep.subr.bf16.mxu1 %v43202_v53  ;;  %v7818_v37 = vand.u32 4294901760, %v284_v0 }
 0xe7d   :  { %35703 = vmatmul.mubr.f32.vlgmr.msra.gmra.mrb[14].mxu1 %v7319_v12 }
 0xe7e   :  { %39149 = vmatpush3.bf16.msra.mxu1 %v43202_v53  ;;  %35713 = vmatprep.mubr.f32.mxu1 %v7310_v57  ;;  %v283_v57 = vld [vmem:[%s45752_s16 + $0x68] sm:$0xff] }
 0xe7f   :  { %39151 = vmatprep.subr.bf16.mxu1 %v43204_v31  ;;  %v7815_v23 = vand.u32 4294901760, %v283_v57 }
 0xe82   :  { %39153 = vmatpush3.bf16.msra.mxu1 %v43204_v31 }
 0xe83   :  { %39155 = vmatprep.subr.bf16.mxu1 %v43219_v28 }
 0xe85   :  { %35714 = vmatmul.mubr.f32.vlgmr.msra.gmra.mrb[14].mxu1 %v7320_v59  ;;  %v278_v59 = vld [vmem:[%s45752_s16 + $0x40] sm:$0xff] }
 0xe86   :  { %39157 = vmatpush3.bf16.msra.mxu1 %v43219_v28  ;;  %35724 = vmatprep.mubr.f32.mxu1 %v7308_v60  ;;  %v7800_v18 = vand.u32 4294901760, %v278_v59 }
 0xe87   :  { %39159 = vmatprep.subr.bf16.mxu1 %v43221_v63 }
 0xe88   :  { %v43338_v3 = vpack.c.bf16 %v7803_v27, %v7800_v18  ;;  %v43393_v36 = vsub.f32 %v278_v59, %v7800_v18 }
 0xe8a   :  { %39161 = vmatpush3.bf16.msra.mxu1 %v43221_v63  ;;  %39187 = vmatprep.subr.bf16.mxu0 %v43338_v3  ;;  %v46083_v63 = vand.u32 4294901760, %v43231_v22 }
 0xe8b   :  { %39163 = vmatprep.subr.bf16.mxu1 %v43202_v53  ;;  %39189 = vmatpush3.bf16.msra.mxu0 %v43338_v3 }
 0xe8c   :  { %v43368_v28 = vsub.f32 %v43231_v22, %v46083_v63  ;;  %v43380_v63 = vpack.c.bf16 %v7821_v45, %v7818_v37  ;;  %v7880_v22 = vsub.f32 %v43363_v1, %v45817_v56  ;;  %v45822_v56 = vand.u32 4294901760, %v43393_v36 }
 0xe8d   :  { %35725 = vmatmul.mubr.f32.vlgmr.msra.gmra.mrb[14].mxu1 %v7318_v4 }
 0xe8e   :  { %39165 = vmatpush3.bf16.msra.mxu1 %v43202_v53  ;;  %35735 = vmatprep.mubr.f32.mxu1 %v7308_v60  ;;  %v7809_v60 = vand.u32 4294901760, %v281_v54  ;;  %v45820_v9 = vand.u32 4294901760, %v43368_v28  ;;  %v7881_v53 = vand.u32 4294901760, %v7880_v22  ;;  %v43402_v22 = vsub.f32 %v280_v24, %v7806_v41 }
 0xe8f   :  { %39167 = vmatprep.subr.bf16.mxu1 %v43204_v31 }
 0xe90   :  { %v43348_v35 = vpack.c.bf16 %v7809_v60, %v7806_v41  ;;  %v45825_v59 = vand.u32 4294901760, %v43402_v22  ;;  %v43419_v41 = vsub.f32 %v283_v57, %v7815_v23  ;;  %v43433_v57 = vsub.f32 %v284_v0, %v7818_v37 }
 0xe92   :  { %39169 = vmatpush3.bf16.msra.mxu1 %v43204_v31  ;;  %39191 = vmatprep.subr.bf16.mxu0 %v43348_v35  ;;  %v7887_v31 = vsub.f32 %v43368_v28, %v45820_v9  ;;  %v7936_v9 = vsub.f32 %v43393_v36, %v45822_v56  ;;  %v7950_v27 = vsub.f32 %v43402_v22, %v45825_v59 }
 0xe93   :  { %39193 = vmatpush3.bf16.msra.mxu0 %v43348_v35 }
 0xe94   :  { %v7888_v50 = vand.u32 4294901760, %v7887_v31  ;;  %v43404_v31 = vsub.f32 %v281_v54, %v7809_v60 }
 0xe95   :  { %35736 = vmatmul.mubr.f32.vlgmr.msra.gmra.mrb[14].mxu1 %v7318_v4  ;;  %v7812_v4 = vand.u32 4294901760, %v282_v26 }
 0xe96   :  { %v43390_v43 = vpack.c.bf16 %v7888_v50, %v7881_v53  ;;  %v7943_v50 = vsub.f32 %v43395_v47, %v45821_v46  ;;  %v7937_v53 = vand.u32 4294901760, %v7936_v9  ;;  %v45830_v16 = vand.u32 4294901760, %v43404_v31 }
 0xe97   :  { %v43358_v12 = vpack.c.bf16 %v7815_v23, %v7812_v4  ;;  %v43417_v54 = vsub.f32 %v282_v26, %v7812_v4  ;;  %v7951_v9 = vand.u32 4294901760, %v7950_v27  ;;  %v43435_v4 = vsub.f32 %v285_v40, %v7821_v45 }
 0xe98   :  { %v7944_v18 = vand.u32 4294901760, %v7943_v50  ;;  %v7957_v24 = vsub.f32 %v43404_v31, %v45830_v16  ;;  %v45828_v50 = vand.u32 4294901760, %v43419_v41  ;;  %v43451_v40 = vpack.c.bf16 %v43368_v28, %v43363_v1 }
 0xe99   :  { %39195 = vmatprep.subr.bf16.mxu0 %v43358_v12  ;;  %v45829_v56 = vand.u32 4294901760, %v43417_v54  ;;  %v45826_v27 = vand.u32 4294901760, %v43435_v4 }
 0xe9a   :  { %39197 = vmatpush3.bf16.msra.mxu0 %v43358_v12  ;;  %v43421_v60 = vpack.c.bf16 %v7944_v18, %v7937_v53  ;;  %v7958_v46 = vand.u32 4294901760, %v7957_v24  ;;  %v7971_v26 = vsub.f32 %v43419_v41, %v45828_v50  ;;  %v45827_v18 = vand.u32 4294901760, %v43433_v57  ;;  %46088 = vst [vmem:[#allocation69_spill] sm:$0xff] %v43451_v40 }
 0xe9b   :  { %39199 = vmatprep.subr.bf16.mxu0 %v43380_v63  ;;  %v7964_v59 = vsub.f32 %v43417_v54, %v45829_v56 }
 0xe9c   :  { %46084 = vst [vmem:[#allocation65_spill] sm:$0xff] %v43421_v60  ;;  %v43425_v52 = vpack.c.bf16 %v7958_v46, %v7951_v9  ;;  %v7972_v53 = vand.u32 4294901760, %v7971_v26  ;;  %v7978_v24 = vsub.f32 %v43433_v57, %v45827_v18  ;;  %v7985_v9 = vsub.f32 %v43435_v4, %v45826_v27 }
 0xe9d   :  { %v7965_v23 = vand.u32 4294901760, %v7964_v59  ;;  %v43455_v59 = vpack.c.bf16 %v43395_v47, %v43393_v36  ;;  %v43459_v26 = vpack.c.bf16 %v43404_v31, %v43402_v22 }
 0xe9e   :  { %39201 = vmatpush3.bf16.msra.mxu0 %v43380_v63  ;;  %46085 = vst [vmem:[#allocation66_spill] sm:$0xff] %v43425_v52  ;;  %v7979_v0 = vand.u32 4294901760, %v7978_v24  ;;  %v7986_v37 = vand.u32 4294901760, %v7985_v9  ;;  %v33018_v24 = vld [vmem:[#allocation16] ss:$0 sm:$0xff]  ;;  %v46093_v9 = vand.u32 4294901760, %v43236_v32 }
 0xe9f   :  { %39203 = vmatprep.subr.bf16.mxu0 %v43390_v43  ;;  %v43439_v46 = vpack.c.bf16 %v7972_v53, %v7965_v23  ;;  %46089 = vst [vmem:[#allocation70_spill] sm:$0xff] %v43455_v59  ;;  %46090 = vst [vmem:[#allocation71_spill] sm:$0xff] %v43459_v26  ;;  %v43463_v23 = vpack.c.bf16 %v43419_v41, %v43417_v54  ;;  %v43467_v53 = vpack.c.bf16 %v43435_v4, %v43433_v57 }
 0xea0   :  { %v43447_v45 = vpack.c.bf16 %v7986_v37, %v7979_v0  ;;  %v43472_v0 = vsub.f32 %v43236_v32, %v46093_v9  ;;  %v46094_v37 = vand.u32 4294901760, %v43243_v61  ;;  %v46096_v9 = vand.u32 4294901760, %v43254_v55 }
 0xea1   :  { %46086 = vst [vmem:[#allocation67_spill] sm:$0xff] %v43439_v46  ;;  %46091 = vst [vmem:[#allocation72_spill] sm:$0xff] %v43463_v23 }
 0xea2   :  { %46087 = vst [vmem:[#allocation68_spill] sm:$0xff] %v43447_v45  ;;  %46092 = vst [vmem:[#allocation73_spill] sm:$0xff] %v43467_v53  ;;  %v43477_v27 = vsub.f32 %v43243_v61, %v46094_v37  ;;  %v45841_v51 = vand.u32 4294901760, %v43472_v0  ;;  %v43489_v39 = vsub.f32 %v43254_v55, %v46096_v9  ;;  %v46098_v9 = vand.u32 4294901760, %v43279_v2 }
 0xea3   :  { %v46099_v55 = vand.u32 4294901760, %v43484_v42 }
 0xea4   :  { %v45844_v49 = vand.u32 4294901760, %v43477_v27 }
 0xea5   :  { %v7908_v20 = vsub.f32 %v43484_v42, %v46099_v55 }
 0xea6   :  { %v7901_v44 = vsub.f32 %v43477_v27, %v45844_v49 }
 0xea7   :  { %v7909_v17 = vand.u32 4294901760, %v7908_v20 }
 0xea8   :  { %v7902_v30 = vand.u32 4294901760, %v7901_v44 }
 0xf68   :  { %v35737_v18 = vpop.f32.mrb[14].mxu1 }
 0xf69   :  { %v41318_v50 = vadd.f32 %v35737_v18, %v33018_v24  ;;  %v7757_v56 = vpop.f32.mrb[15].mxu1 }
 0xf6a   :  { %v41319_v16 = vadd.f32 %v33018_v24, %v7757_v56  ;;  %v7894_v56 = vsub.f32 %v43472_v0, %v45841_v51  ;;  %v43514_v51 = vsub.f32 %v43279_v2, %v46098_v9  ;;  %v46100_v2 = vand.u32 4294901760, %v43489_v39 }
 0xf6b   :  { %v7768_v32 = vmax.f32 %v41318_v50, 0.0 }
 0xf6c   :  { %v7767_v61 = vmax.f32 %v41319_v16, 0.0  ;;  %v46097_v16 = vand.u32 4294901760, %v43274_v11  ;;  %v7895_v25 = vand.u32 4294901760, %v7894_v56  ;;  %v7928_v9 = vand.u32 4294901760, %v43514_v51 }
 0xf6d   :  { %v43491_v37 = vand.u32 4294901760, %v7768_v32 }
 0xf6e   :  { %v43493_v18 = vand.u32 4294901760, %v7767_v61  ;;  %v43509_v24 = vsub.f32 %v43274_v11, %v46097_v16  ;;  %v7915_v16 = vsub.f32 %v43489_v39, %v46100_v2  ;;  %v43533_v44 = vpack.c.bf16 %v7902_v30, %v7895_v25 }
 0xf6f   :  { %v43503_v50 = vsub.f32 %v7768_v32, %v43491_v37  ;;  %v7929_v2 = vsub.f32 %v43514_v51, %v7928_v9 }
 0xf70   :  { %v43517_v33 = vsub.f32 %v7767_v61, %v43493_v18  ;;  %v7921_v61 = vand.u32 4294901760, %v43509_v24  ;;  %46101 = vst [vmem:[#allocation74_spill] sm:$0xff] %v43533_v44  ;;  %v7916_v55 = vand.u32 4294901760, %v7915_v16  ;;  %v46110_v16 = vand.u32 4294901760, %v43472_v0 }
 0xf71   :  { %v45855_v49 = vand.u32 4294901760, %v43503_v50  ;;  %v7930_v30 = vand.u32 4294901760, %v7929_v2  ;;  %v46113_v2 = vand.u32 4294901760, %v43503_v50 }
 0xf72   :  { %v7858_v32 = vand.u32 4294901760, %v43517_v33 }
 0xf73   :  { %v7869_v11 = vsub.f32 %v43503_v50, %v45855_v49  ;;  %v7922_v49 = vsub.f32 %v43509_v24, %v7921_v61 }
 0xf74   :  { %v7859_v19 = vsub.f32 %v43517_v33, %v7858_v32 }
 0xf75   :  { %v7870_v15 = vand.u32 4294901760, %v7869_v11  ;;  %v7923_v20 = vand.u32 4294901760, %v7922_v49  ;;  %v43578_v49 = vpack.c.bf16 %v43514_v51, %v43509_v24  ;;  %v46122_v51 = vand.u32 4294901760, %v43404_v31 }
 0xf76   :  { %v7860_v56 = vand.u32 4294901760, %v7859_v19  ;;  %v43544_v19 = vpack.c.bf16 %v7916_v55, %v7909_v17  ;;  %v43572_v17 = vpack.c.bf16 %v43489_v39, %v43484_v42  ;;  %v46128_v31 = vand.u32 4294901760, %v43435_v4 }
 0xf77   :  { %v43548_v25 = vpack.c.bf16 %v7930_v30, %v7923_v20  ;;  %46106 = vst [vmem:[#allocation79_spill] sm:$0xff] %v43578_v49 }
 0xf78   :  { %35770 = vmatprep.mubr.f32.mxu0 %v7860_v56  ;;  %46102 = vst [vmem:[#allocation75_spill] sm:$0xff] %v43544_v19  ;;  %46105 = vst [vmem:[#allocation78_spill] sm:$0xff] %v43572_v17  ;;  %v46111_v56 = vand.u32 4294901760, %v43477_v27 }
 0xf79   :  { %35771 = vmatmul.mubr.f32.vlgmr.msra.gmra.mrb[24].mxu0 %v7870_v15  ;;  %46103 = vst [vmem:[#allocation76_spill] sm:$0xff] %v43548_v25  ;;  %v43564_v15 = vpack.c.bf16 %v43477_v27, %v43472_v0  ;;  %v43638_v27 = vpack.c.bf16 %v7928_v9, %v7921_v61 }
 0xf7a   :  { %39205 = vmatpush3.bf16.msra.mxu0 %v43390_v43  ;;  %35805 = vmatprep.mubr.f32.mxu0 %v43493_v18  ;;  %v43619_v55 = vpack.c.bf16 %v46111_v56, %v46110_v16 }
 0xf7b   :  { %39207 = vmatprep.subr.bf16.mxu0 %v43533_v44  ;;  %46104 = vst [vmem:[#allocation77_spill] sm:$0xff] %v43564_v15  ;;  %46117 = vst [vmem:[#allocation83_spill] sm:$0xff] %v43638_v27 }
 0xf7c   :  { %46112 = vst [vmem:[#allocation81_spill] sm:$0xff] %v43619_v55 }
 0xf7e   :  { %39209 = vmatpush3.bf16.msra.mxu0 %v43533_v44 }
 0xf7f   :  { %39211 = vmatprep.subr.bf16.mxu0 %v43544_v19 }
 0xf82   :  { %39213 = vmatpush3.bf16.msra.mxu0 %v43544_v19 }
 0xf83   :  { %39215 = vmatprep.subr.bf16.mxu0 %v43548_v25 }
 0xf86   :  { %39217 = vmatpush3.bf16.msra.mxu0 %v43548_v25 }
 0xf87   :  { %39219 = vmatprep.subr.bf16.mxu0 %v43421_v60 }
 0xf8a   :  { %39221 = vmatpush3.bf16.msra.mxu0 %v43421_v60 }
 0xf8b   :  { %39223 = vmatprep.subr.bf16.mxu0 %v43425_v52 }
 0xf8e   :  { %39225 = vmatpush3.bf16.msra.mxu0 %v43425_v52 }
 0xf8f   :  { %39227 = vmatprep.subr.bf16.mxu0 %v43439_v46 }
 0xf92   :  { %39229 = vmatpush3.bf16.msra.mxu0 %v43439_v46  ;;  %v33025_v46 = vld [vmem:[#allocation10 + $0x1] ss:$0 sm:$0xff] }
 0xf93   :  { %39231 = vmatprep.subr.bf16.mxu0 %v43447_v45 }
 0xf96   :  { %39233 = vmatpush3.bf16.msra.mxu0 %v43447_v45 }
 0xf97   :  { %39235 = vmatprep.subr.bf16.mxu0 %v43451_v40 }
 0xf99   :  { %35806 = vmatmul.mubr.f32.vlgmr.msra.gmra.mrb[24].mxu0 %v43491_v37 }
 0xf9a   :  { %39237 = vmatpush3.bf16.msra.mxu0 %v43451_v40  ;;  %35840 = vmatprep.mubr.f32.mxu0 %v43517_v33  ;;  %v46107_v33 = vand.u32 4294901760, %v43363_v1  ;;  %v46115_v1 = vand.u32 4294901760, %v43489_v39  ;;  %v46119_v39 = vand.u32 4294901760, %v43395_v47  ;;  %v46125_v47 = vand.u32 4294901760, %v43419_v41 }
 0xf9b   :  { %39239 = vmatprep.subr.bf16.mxu0 %v43564_v15 }
 0xf9e   :  { %39241 = vmatpush3.bf16.msra.mxu0 %v43564_v15 }
 0xf9f   :  { %39243 = vmatprep.subr.bf16.mxu0 %v43572_v17 }
 0xfa2   :  { %39245 = vmatpush3.bf16.msra.mxu0 %v43572_v17 }
 0xfa3   :  { %39247 = vmatprep.subr.bf16.mxu0 %v43578_v49 }
 0xfa6   :  { %39249 = vmatpush3.bf16.msra.mxu0 %v43578_v49 }
 0xfa7   :  { %39251 = vmatprep.subr.bf16.mxu0 %v43455_v59 }
 0xfaa   :  { %39253 = vmatpush3.bf16.msra.mxu0 %v43455_v59 }
 0xfab   :  { %39255 = vmatprep.subr.bf16.mxu0 %v43459_v26 }
 0xfae   :  { %39257 = vmatpush3.bf16.msra.mxu0 %v43459_v26 }
 0xfaf   :  { %39259 = vmatprep.subr.bf16.mxu0 %v43463_v23 }
 0xfb2   :  { %39261 = vmatpush3.bf16.msra.mxu0 %v43463_v23 }
 0xfb3   :  { %39263 = vmatprep.subr.bf16.mxu0 %v43467_v53 }
 0xfb6   :  { %39265 = vmatpush3.bf16.msra.mxu0 %v43467_v53 }
 0xfb7   :  { %39267 = vmatprep.subr.bf16.mxu0 %v43261_v34 }
 0xfb9   :  { %35841 = vmatmul.mubr.f32.vlgmr.msra.gmra.mrb[24].mxu0 %v43503_v50  ;;  %v46121_v50 = vand.u32 4294901760, %v43402_v22  ;;  %v46127_v22 = vand.u32 4294901760, %v43433_v57 }
 0xfba   :  { %39269 = vmatpush3.bf16.msra.mxu0 %v43261_v34  ;;  %35875 = vmatprep.mubr.f32.mxu0 %v7858_v32  ;;  %v46108_v32 = vand.u32 4294901760, %v43368_v28  ;;  %v46114_v28 = vand.u32 4294901760, %v43484_v42  ;;  %v46118_v42 = vand.u32 4294901760, %v43393_v36  ;;  %v46124_v36 = vand.u32 4294901760, %v43417_v54  ;;  %v33019_v54 = vld [vmem:[#allocation18] ss:$0 sm:$0xff] }
 0xfbb   :  { %39271 = vmatprep.subr.bf16.mxu0 %v43269_v21  ;;  %v43654_v24 = vpack.c.bf16 %v46122_v51, %v46121_v50  ;;  %v43670_v9 = vpack.c.bf16 %v46128_v31, %v46127_v22  ;;  %v32977_v31 = vld [vmem:[%s45741_s5 + $0x30] sm:$0xff] }
 0xfbc   :  { %v43611_v11 = vpack.c.bf16 %v46108_v32, %v46107_v33  ;;  %v43630_v20 = vpack.c.bf16 %v46115_v1, %v46114_v28  ;;  %v43646_v0 = vpack.c.bf16 %v46119_v39, %v46118_v42  ;;  %v43662_v61 = vpack.c.bf16 %v46125_v47, %v46124_v36  ;;  %v32976_v36 = vld [vmem:[%s45741_s5 + $0x28] sm:$0xff] }
 0xfbd   :  { %46123 = vst [vmem:[#allocation85_spill] sm:$0xff] %v43654_v24  ;;  %46129 = vst [vmem:[#allocation87_spill] sm:$0xff] %v43670_v9  ;;  %v8513_v22 = vand.u32 4294901760, %v32976_v36 }
 0xfbe   :  { %39273 = vmatpush3.bf16.msra.mxu0 %v43269_v21  ;;  %46109 = vst [vmem:[#allocation80_spill] sm:$0xff] %v43611_v11  ;;  %46116 = vst [vmem:[#allocation82_spill] sm:$0xff] %v43630_v20 }
 0xfbf   :  { %39275 = vmatprep.subr.bf16.mxu0 %v43288_v38  ;;  %46120 = vst [vmem:[#allocation84_spill] sm:$0xff] %v43646_v0  ;;  %46126 = vst [vmem:[#allocation86_spill] sm:$0xff] %v43662_v61 }
 0xfc2   :  { %39277 = vmatpush3.bf16.msra.mxu0 %v43288_v38 }
 0xfc3   :  { %39279 = vmatprep.subr.bf16.mxu0 %v43298_v62 }
 0xfc6   :  { %39281 = vmatpush3.bf16.msra.mxu0 %v43298_v62 }
 0xfc7   :  { %39283 = vmatprep.subr.bf16.mxu0 %v43338_v3 }
 0xfca   :  { %39285 = vmatpush3.bf16.msra.mxu0 %v43338_v3 }
 0xfcb   :  { %39287 = vmatprep.subr.bf16.mxu0 %v43348_v35 }
 0xfce   :  { %39289 = vmatpush3.bf16.msra.mxu0 %v43348_v35 }
 0xfcf   :  { %39291 = vmatprep.subr.bf16.mxu0 %v43358_v12 }
 0xfd2   :  { %39293 = vmatpush3.bf16.msra.mxu0 %v43358_v12 }
 0xfd3   :  { %39295 = vmatprep.subr.bf16.mxu0 %v43380_v63 }
 0xfd6   :  { %39297 = vmatpush3.bf16.msra.mxu0 %v43380_v63 }
 0xfd7   :  { %39299 = vmatprep.subr.bf16.mxu0 %v43611_v11 }
 0xfd9   :  { %35876 = vmatmul.mubr.f32.vlgmr.msra.gmra.mrb[24].mxu0 %v46113_v2 }
 0xfda   :  { %39301 = vmatpush3.bf16.msra.mxu0 %v43611_v11  ;;  %35910 = vmatprep.mubr.f32.mxu0 %v43493_v18 }
 0xfdb   :  { %39303 = vmatprep.subr.bf16.mxu0 %v43619_v55 }
 0xfde   :  { %39305 = vmatpush3.bf16.msra.mxu0 %v43619_v55 }
 0xfdf   :  { %39307 = vmatprep.subr.bf16.mxu0 %v43630_v20 }
 0xfe2   :  { %39309 = vmatpush3.bf16.msra.mxu0 %v43630_v20 }
 0xfe3   :  { %39311 = vmatprep.subr.bf16.mxu0 %v43638_v27 }
 0xfe6   :  { %39313 = vmatpush3.bf16.msra.mxu0 %v43638_v27 }
 0xfe7   :  { %39315 = vmatprep.subr.bf16.mxu0 %v43646_v0 }
 0xfea   :  { %39317 = vmatpush3.bf16.msra.mxu0 %v43646_v0 }
 0xfeb   :  { %39319 = vmatprep.subr.bf16.mxu0 %v43654_v24 }
 0xfee   :  { %39321 = vmatpush3.bf16.msra.mxu0 %v43654_v24 }
 0xfef   :  { %39323 = vmatprep.subr.bf16.mxu0 %v43662_v61 }
 0xff2   :  { %39325 = vmatpush3.bf16.msra.mxu0 %v43662_v61 }
 0xff3   :  { %39327 = vmatprep.subr.bf16.mxu0 %v43670_v9 }
 0xff6   :  { %39329 = vmatpush3.bf16.msra.mxu0 %v43670_v9 }
 0xff7   :  { %39331 = vmatprep.subr.bf16.mxu0 %v43261_v34 }
 0xff9   :  { %35911 = vmatmul.mubr.f32.vlgmr.msra.gmra.mrb[24].mxu0 %v43491_v37 }
 0xffa   :  { %39333 = vmatpush3.bf16.msra.mxu0 %v43261_v34  ;;  %35945 = vmatprep.mubr.f32.mxu0 %v43493_v18 }
 0xffb   :  { %39335 = vmatprep.subr.bf16.mxu0 %v43269_v21 }
 0xffe   :  { %39337 = vmatpush3.bf16.msra.mxu0 %v43269_v21 }
 0xfff   :  { %39339 = vmatprep.subr.bf16.mxu0 %v43288_v38 }
0x1002   :  { %39341 = vmatpush3.bf16.msra.mxu0 %v43288_v38 }
0x1003   :  { %39343 = vmatprep.subr.bf16.mxu0 %v43298_v62 }
0x1006   :  { %39345 = vmatpush3.bf16.msra.mxu0 %v43298_v62 }
0x1007   :  { %39347 = vmatprep.subr.bf16.mxu0 %v43338_v3 }
0x100a   :  { %39349 = vmatpush3.bf16.msra.mxu0 %v43338_v3 }
0x100b   :  { %39351 = vmatprep.subr.bf16.mxu0 %v43348_v35 }
0x100e   :  { %39353 = vmatpush3.bf16.msra.mxu0 %v43348_v35 }
0x100f   :  { %39355 = vmatprep.subr.bf16.mxu0 %v43358_v12 }
0x1012   :  { %39357 = vmatpush3.bf16.msra.mxu0 %v43358_v12 }
0x1013   :  { %39359 = vmatprep.subr.bf16.mxu0 %v43380_v63 }
0x1016   :  { %39361 = vmatpush3.bf16.msra.mxu0 %v43380_v63 }
0x1019   :  { %35946 = vmatmul.mubr.f32.vlgmr.msra.gmra.mrb[24].mxu0 %v43491_v37 }
0x10ec   :  { %v35947_v41 = vpop.f32.mrb[24].mxu0 }
0x10ed   :  { %v41320_v57 = vadd.f32 %v35947_v41, %v33019_v54  ;;  %v8449_v4 = vpop.f32.mrb[25].mxu0 }
0x10ee   :  { %v41321_v18 = vadd.f32 %v33019_v54, %v8449_v4  ;;  %v32978_v54 = vld [vmem:[%s45741_s5 + $0x38] sm:$0xff] }
0x10ef   :  { %v8460_v30 = vadd.f32 %v41320_v57, %v43309_v7  ;;  %v8516_v57 = vand.u32 4294901760, %v32977_v31  ;;  %v8519_v4 = vand.u32 4294901760, %v32978_v54 }
0x10f0   :  { %v8459_v33 = vadd.f32 %v41321_v18, %v43305_v29  ;;  %v32975_v29 = vld [vmem:[%s45741_s5 + $0x20] sm:$0xff] }
0x10f1   :  { %v8464_v32 = vsel %vm768_vm3, %v8460_v30, 0.0  ;;  %v8510_v47 = vand.u32 4294901760, %v32975_v29 }
0x10f2   :  { %8465 = vadd.xlane.f32.xlu0 %v8464_v32  ;;  %v8461_v16 = vsel %vm772_vm4, %v8459_v33, 0.0 }
0x10f3   :  { %8462 = vadd.xlane.f32.xlu1 %v8461_v16  ;;  %v43712_v41 = vpack.c.bf16 %v8513_v22, %v8510_v47  ;;  %v8600_v18 = vsub.f32 %v32975_v29, %v8510_v47 }
0x10f5   :  { %39363 = vmatprep.subr.bf16.mxu1 %v43712_v41  ;;  %v8601_v32 = vand.u32 4294901760, %v8600_v18 }
0x10f6   :  { %39365 = vmatpush3.bf16.msra.mxu1 %v43712_v41 }
0x117f   :  { %v8466_v56 = vpop.xlane.xlu0 %8465 }
0x1180   :  { %v8468_v2 = vmul.f32 0.03125, %v8466_v56  ;;  %v8463_v28 = vpop.xlane.xlu1 %8462  ;;  %v8602_v56 = vsub.f32 %v8600_v18, %v8601_v32 }
0x1181   :  { %v8467_v1 = vmul.f32 0.03125, %v8463_v28  ;;  %v8614_v28 = vsub.f32 %v32977_v31, %v8516_v57 }
0x1182   :  { %v8470_v37 = vsub.f32 %v8460_v30, %v8468_v2  ;;  %v8607_v30 = vsub.f32 %v32976_v36, %v8513_v22 }
0x1183   :  { %v8469_v42 = vsub.f32 %v8459_v33, %v8467_v1  ;;  %v43715_v33 = vpack.c.bf16 %v8519_v4, %v8516_v57  ;;  %v8621_v1 = vsub.f32 %v32978_v54, %v8519_v4 }
0x1184   :  { %v8472_v39 = vmul.f32 %v8470_v37, %v8470_v37  ;;  %v8608_v16 = vand.u32 4294901760, %v8607_v30  ;;  %v43725_v24 = vpack.c.bf16 %v8607_v30, %v8600_v18  ;;  %v33021_v18 = vld [vmem:[#allocation15] ss:$0 sm:$0xff] }
0x1185   :  { %v8471_v50 = vmul.f32 %v8469_v42, %v8469_v42  ;;  %39367 = vmatprep.subr.bf16.mxu1 %v43715_v33  ;;  %v43727_v31 = vpack.c.bf16 %v8621_v1, %v8614_v28 }
0x1186   :  { %v8476_v51 = vsel %vm768_vm3, %v8472_v39, 0.0  ;;  %v8609_v2 = vsub.f32 %v8607_v30, %v8608_v16  ;;  %v8603_v39 = vand.u32 4294901760, %v8602_v56  ;;  %39369 = vmatpush3.bf16.msra.mxu1 %v43715_v33  ;;  %46132 = vst [vmem:[#allocation90_spill] sm:$0xff] %v43725_v24  ;;  %v43729_v54 = vpack.c.bf16 %v8608_v16, %v8601_v32 }
0x1187   :  { %8477 = vadd.xlane.f32.xlu0 %v8476_v51  ;;  %v8473_v7 = vsel %vm772_vm4, %v8471_v50, 0.0  ;;  %v8615_v51 = vand.u32 4294901760, %v8614_v28  ;;  %46133 = vst [vmem:[#allocation91_spill] sm:$0xff] %v43727_v31 }
0x1188   :  { %8474 = vadd.xlane.f32.xlu1 %v8473_v7  ;;  %v8610_v50 = vand.u32 4294901760, %v8609_v2  ;;  %v8622_v7 = vand.u32 4294901760, %v8621_v1  ;;  %46134 = vst [vmem:[#allocation92_spill] sm:$0xff] %v43729_v54 }
0x1189   :  { %v8616_v36 = vsub.f32 %v8614_v28, %v8615_v51 }
0x118a   :  { %v43720_v29 = vpack.c.bf16 %v8610_v50, %v8603_v39  ;;  %v8623_v47 = vsub.f32 %v8621_v1, %v8622_v7  ;;  %v43731_v57 = vpack.c.bf16 %v8622_v7, %v8615_v51 }
0x118b   :  { %v8617_v22 = vand.u32 4294901760, %v8616_v36 }
0x118c   :  { %46130 = vst [vmem:[#allocation88_spill] sm:$0xff] %v43720_v29  ;;  %39371 = vmatprep.subr.bf16.mxu1 %v43720_v29  ;;  %v8624_v9 = vand.u32 4294901760, %v8623_v47  ;;  %46135 = vst [vmem:[#allocation93_spill] sm:$0xff] %v43731_v57  ;;  %v33020_v47 = vld [vmem:[#allocation13] ss:$0 sm:$0xff] }
0x118e   :  { %v43723_v61 = vpack.c.bf16 %v8624_v9, %v8617_v22 }
0x1190   :  { %46131 = vst [vmem:[#allocation89_spill] sm:$0xff] %v43723_v61 }
0x1214   :  { %v8478_v4 = vpop.xlane.xlu0 %8477 }
0x1215   :  { %v8480_v56 = vmul.f32 0.03125, %v8478_v4  ;;  %v8475_v2 = vpop.xlane.xlu1 %8474 }
0x1216   :  { %v8479_v39 = vmul.f32 0.03125, %v8475_v2 }
0x1217   :  { %v8482_v50 = vadd.f32 1e-06, %v8480_v56 }
0x1218   :  { %v8481_v0 = vadd.f32 1e-06, %v8479_v39 }
0x1219   :  { %41980 = vrsqrt.f32 %v8482_v50 }
0x121a   :  { %41982 = vrsqrt.f32 %v8481_v0 }
0x1223   :  { %v41981_v36 = vpop.eup %41980 }
0x1224   :  { %v41983_v9 = vpop.eup %41982  ;;  %v8486_v22 = vmul.f32 %v41981_v36, %v8470_v37 }
0x1225   :  { %v8485_v30 = vmul.f32 %v41983_v9, %v8469_v42  ;;  %v32979_v9 = vld [vmem:[%s45742_s6 + $0x20] sm:$0xff] }
0x1226   :  { %v8494_v28 = vmul.f32 %v33020_v47, %v8486_v22  ;;  %v32980_v22 = vld [vmem:[%s45742_s6 + $0x28] sm:$0xff] }
0x1227   :  { %v8493_v1 = vmul.f32 %v33020_v47, %v8485_v30  ;;  %v9041_v30 = vand.u32 4294901760, %v32980_v22 }
0x1228   :  { %v43733_v32 = vadd.f32 %v33021_v18, %v8494_v28  ;;  %v32981_v28 = vld [vmem:[%s45742_s6 + $0x30] sm:$0xff] }
0x1229   :  { %v43735_v16 = vadd.f32 %v33021_v18, %v8493_v1  ;;  %v9038_v18 = vand.u32 4294901760, %v32979_v9  ;;  %v32982_v1 = vld [vmem:[%s45742_s6 + $0x38] sm:$0xff] }
0x122a   :  { %v8507_v51 = vsel %vm772_vm4, %v43733_v32, 0 }
0x122b   :  { %v43739_v7 = vand.u32 4294901760, %v8507_v51  ;;  %v8504_v0 = vsel %vm772_vm4, %v43735_v16, 0 }
0x122c   :  { %v43743_v4 = vand.u32 4294901760, %v8504_v0 }
0x122d   :  { %v43746_v37 = vsub.f32 %v8507_v51, %v43739_v7  ;;  %v9044_v51 = vand.u32 4294901760, %v32981_v28 }
0x122e   :  { %v43749_v42 = vsub.f32 %v8504_v0, %v43743_v4  ;;  %v9047_v0 = vand.u32 4294901760, %v32982_v1 }
0x122f   :  { %v43752_v56 = vand.u32 4294901760, %v43746_v37 }
0x1230   :  { %v43755_v2 = vand.u32 4294901760, %v43749_v42  ;;  %v9149_v27 = vsub.f32 %v32982_v1, %v9047_v0  ;;  %v43809_v55 = vpack.c.bf16 %v9047_v0, %v9044_v51 }
0x1231   :  { %v8591_v39 = vsub.f32 %v43746_v37, %v43752_v56 }
0x1232   :  { %v8581_v50 = vsub.f32 %v43749_v42, %v43755_v2  ;;  %46137 = vst [vmem:[#allocation95_spill] sm:$0xff] %v43809_v55 }
0x1233   :  { %v43763_v47 = vand.u32 4294901760, %v8591_v39  ;;  %v9128_v39 = vsub.f32 %v32979_v9, %v9038_v18 }
0x1234   :  { %v43761_v36 = vand.u32 4294901760, %v8581_v50  ;;  %v9135_v50 = vsub.f32 %v32980_v22, %v9041_v30 }
0x1236   :  { %35956 = vmatprep.mubr.f32.mxu1 %v43761_v36  ;;  %v43826_v0 = vpack.c.bf16 %v9135_v50, %v9128_v39 }
0x1237   :  { %35957 = vmatmul.mubr.f32.vlgmr.msra.gmra.mrb[16].mxu1 %v43763_v47 }
0x1238   :  { %39373 = vmatpush3.bf16.msra.mxu1 %v43720_v29  ;;  %35967 = vmatprep.mubr.f32.mxu1 %v43743_v4  ;;  %46140 = vst [vmem:[#allocation98_spill] sm:$0xff] %v43826_v0 }
0x1239   :  { %39375 = vmatprep.subr.bf16.mxu1 %v43723_v61 }
0x123c   :  { %39377 = vmatpush3.bf16.msra.mxu1 %v43723_v61  ;;  %v9142_v61 = vsub.f32 %v32981_v28, %v9044_v51 }
0x123d   :  { %39379 = vmatprep.subr.bf16.mxu1 %v43725_v24 }
0x123e   :  { %v9143_v20 = vand.u32 4294901760, %v9142_v61 }
0x123f   :  { %35968 = vmatmul.mubr.f32.vlgmr.msra.gmra.mrb[16].mxu1 %v43739_v7 }
0x1240   :  { %39381 = vmatpush3.bf16.msra.mxu1 %v43725_v24  ;;  %35978 = vmatprep.mubr.f32.mxu1 %v43749_v42  ;;  %v9136_v24 = vand.u32 4294901760, %v9135_v50  ;;  %v9144_v11 = vsub.f32 %v9142_v61, %v9143_v20 }
0x1241   :  { %39383 = vmatprep.subr.bf16.mxu1 %v43727_v31 }
0x1242   :  { %v9137_v22 = vsub.f32 %v9135_v50, %v9136_v24 }
0x1244   :  { %39385 = vmatpush3.bf16.msra.mxu1 %v43727_v31  ;;  %v9129_v31 = vand.u32 4294901760, %v9128_v39  ;;  %v9138_v1 = vand.u32 4294901760, %v9137_v22 }
0x1245   :  { %39387 = vmatprep.subr.bf16.mxu1 %v43712_v41 }
0x1246   :  { %v9130_v9 = vsub.f32 %v9128_v39, %v9129_v31 }
0x1247   :  { %35979 = vmatmul.mubr.f32.vlgmr.msra.gmra.mrb[16].mxu1 %v43746_v37 }
0x1248   :  { %39389 = vmatpush3.bf16.msra.mxu1 %v43712_v41  ;;  %35989 = vmatprep.mubr.f32.mxu1 %v43755_v2  ;;  %v9131_v28 = vand.u32 4294901760, %v9130_v9 }
0x1249   :  { %39391 = vmatprep.subr.bf16.mxu1 %v43715_v33 }
0x124c   :  { %39393 = vmatpush3.bf16.msra.mxu1 %v43715_v33 }
0x124d   :  { %39395 = vmatprep.subr.bf16.mxu1 %v43729_v54 }
0x124f   :  { %35990 = vmatmul.mubr.f32.vlgmr.msra.gmra.mrb[16].mxu1 %v43752_v56 }
0x1250   :  { %39397 = vmatpush3.bf16.msra.mxu1 %v43729_v54  ;;  %36000 = vmatprep.mubr.f32.mxu1 %v43743_v4  ;;  %v43805_v54 = vpack.c.bf16 %v9041_v30, %v9038_v18  ;;  %v43816_v18 = vpack.c.bf16 %v9138_v1, %v9131_v28  ;;  %v9145_v30 = vand.u32 4294901760, %v9144_v11  ;;  %v32983_v11 = vld [vmem:[%s45743_s7 + $0x20] sm:$0xff] }
0x1251   :  { %39399 = vmatprep.subr.bf16.mxu1 %v43731_v57  ;;  %v9566_v39 = vand.u32 4294901760, %v32983_v11 }
0x1252   :  { %46136 = vst [vmem:[#allocation94_spill] sm:$0xff] %v43805_v54  ;;  %46138 = vst [vmem:[#allocation96_spill] sm:$0xff] %v43816_v18 }
0x1253   :  { %v9656_v9 = vsub.f32 %v32983_v11, %v9566_v39 }
0x1254   :  { %39401 = vmatpush3.bf16.msra.mxu1 %v43731_v57  ;;  %v9150_v57 = vand.u32 4294901760, %v9149_v27 }
0x1255   :  { %39403 = vmatprep.subr.bf16.mxu1 %v43712_v41  ;;  %v9657_v28 = vand.u32 4294901760, %v9656_v9 }
0x1256   :  { %v9151_v53 = vsub.f32 %v9149_v27, %v9150_v57 }
0x1257   :  { %36001 = vmatmul.mubr.f32.vlgmr.msra.gmra.mrb[16].mxu1 %v43739_v7  ;;  %v9658_v11 = vsub.f32 %v9656_v9, %v9657_v28 }
0x1258   :  { %39405 = vmatpush3.bf16.msra.mxu1 %v43712_v41  ;;  %36011 = vmatprep.mubr.f32.mxu1 %v43743_v4  ;;  %v9152_v23 = vand.u32 4294901760, %v9151_v53  ;;  %v43830_v53 = vpack.c.bf16 %v9149_v27, %v9142_v61  ;;  %v32984_v27 = vld [vmem:[%s45743_s7 + $0x28] sm:$0xff]  ;;  %v43852_v61 = vpack.c.bf16 %v9150_v57, %v9143_v20 }
0x1259   :  { %39407 = vmatprep.subr.bf16.mxu1 %v43715_v33  ;;  %v9569_v50 = vand.u32 4294901760, %v32984_v27 }
0x125a   :  { %v43820_v51 = vpack.c.bf16 %v9152_v23, %v9145_v30  ;;  %46141 = vst [vmem:[#allocation99_spill] sm:$0xff] %v43830_v53  ;;  %v43842_v23 = vpack.c.bf16 %v9136_v24, %v9129_v31  ;;  %46143 = vst [vmem:[#allocation101_spill] sm:$0xff] %v43852_v61  ;;  %v32985_v24 = vld [vmem:[%s45743_s7 + $0x30] sm:$0xff]  ;;  %v32986_v31 = vld [vmem:[%s45743_s7 + $0x38] sm:$0xff] }
0x125b   :  { %v9572_v20 = vand.u32 4294901760, %v32985_v24  ;;  %v9575_v57 = vand.u32 4294901760, %v32986_v31  ;;  %v9663_v22 = vsub.f32 %v32984_v27, %v9569_v50 }
0x125c   :  { %39409 = vmatpush3.bf16.msra.mxu1 %v43715_v33  ;;  %46139 = vst [vmem:[#allocation97_spill] sm:$0xff] %v43820_v51  ;;  %46142 = vst [vmem:[#allocation100_spill] sm:$0xff] %v43842_v23 }
0x125d   :  { %39411 = vmatprep.subr.bf16.mxu1 %v43805_v54  ;;  %v9664_v1 = vand.u32 4294901760, %v9663_v22  ;;  %v9670_v30 = vsub.f32 %v32985_v24, %v9572_v20  ;;  %v9659_v24 = vand.u32 4294901760, %v9658_v11 }
0x125f   :  { %36012 = vmatmul.mubr.f32.vlgmr.msra.gmra.mrb[16].mxu1 %v43739_v7  ;;  %v9665_v27 = vsub.f32 %v9663_v22, %v9664_v1 }
0x1260   :  { %39413 = vmatpush3.bf16.msra.mxu1 %v43805_v54  ;;  %36022 = vmatprep.mubr.f32.mxu1 %v43761_v36 }
0x1261   :  { %39415 = vmatprep.subr.bf16.mxu1 %v43809_v55 }
0x1264   :  { %39417 = vmatpush3.bf16.msra.mxu1 %v43809_v55 }
0x1265   :  { %39419 = vmatprep.subr.bf16.mxu1 %v43816_v18 }
0x1267   :  { %36023 = vmatmul.mubr.f32.vlgmr.msra.gmra.mrb[18].mxu1 %v43763_v47 }
0x1268   :  { %39421 = vmatpush3.bf16.msra.mxu1 %v43816_v18  ;;  %36033 = vmatprep.mubr.f32.mxu1 %v43743_v4 }
0x1269   :  { %39423 = vmatprep.subr.bf16.mxu1 %v43820_v51 }
0x126c   :  { %39425 = vmatpush3.bf16.msra.mxu1 %v43820_v51  ;;  %v43873_v51 = vpack.c.bf16 %v9575_v57, %v9572_v20 }
0x126d   :  { %39427 = vmatprep.subr.bf16.mxu1 %v43826_v0 }
0x126e   :  { %46145 = vst [vmem:[#allocation103_spill] sm:$0xff] %v43873_v51 }
0x126f   :  { %36034 = vmatmul.mubr.f32.vlgmr.msra.gmra.mrb[18].mxu1 %v43739_v7 }
0x1270   :  { %39429 = vmatpush3.bf16.msra.mxu1 %v43826_v0  ;;  %36044 = vmatprep.mubr.f32.mxu1 %v43749_v42  ;;  %v9671_v0 = vand.u32 4294901760, %v9670_v30 }
0x1271   :  { %39431 = vmatprep.subr.bf16.mxu1 %v43830_v53 }
0x1272   :  { %v9672_v18 = vsub.f32 %v9670_v30, %v9671_v0 }
0x1274   :  { %39433 = vmatpush3.bf16.msra.mxu1 %v43830_v53  ;;  %v9677_v53 = vsub.f32 %v32986_v31, %v9575_v57  ;;  %v9666_v31 = vand.u32 4294901760, %v9665_v27 }
0x1275   :  { %39435 = vmatprep.subr.bf16.mxu1 %v43805_v54 }
0x1277   :  { %36045 = vmatmul.mubr.f32.vlgmr.msra.gmra.mrb[18].mxu1 %v43746_v37 }
0x1278   :  { %39437 = vmatpush3.bf16.msra.mxu1 %v43805_v54  ;;  %36055 = vmatprep.mubr.f32.mxu1 %v43755_v2 }
0x1279   :  { %39439 = vmatprep.subr.bf16.mxu1 %v43809_v55 }
0x127c   :  { %39441 = vmatpush3.bf16.msra.mxu1 %v43809_v55 }
0x127d   :  { %39443 = vmatprep.subr.bf16.mxu1 %v43842_v23 }
0x127f   :  { %36056 = vmatmul.mubr.f32.vlgmr.msra.gmra.mrb[18].mxu1 %v43752_v56 }
0x1280   :  { %39445 = vmatpush3.bf16.msra.mxu1 %v43842_v23  ;;  %36066 = vmatprep.mubr.f32.mxu1 %v43743_v4  ;;  %v43869_v23 = vpack.c.bf16 %v9569_v50, %v9566_v39  ;;  %v43880_v39 = vpack.c.bf16 %v9666_v31, %v9659_v24  ;;  %v9673_v50 = vand.u32 4294901760, %v9672_v18 }
0x1281   :  { %39447 = vmatprep.subr.bf16.mxu1 %v43852_v61 }
0x1282   :  { %46144 = vst [vmem:[#allocation102_spill] sm:$0xff] %v43869_v23  ;;  %46146 = vst [vmem:[#allocation104_spill] sm:$0xff] %v43880_v39 }
0x1284   :  { %39449 = vmatpush3.bf16.msra.mxu1 %v43852_v61  ;;  %v9678_v61 = vand.u32 4294901760, %v9677_v53 }
0x1285   :  { %39451 = vmatprep.subr.bf16.mxu1 %v43805_v54 }
0x1287   :  { %36067 = vmatmul.mubr.f32.vlgmr.msra.gmra.mrb[18].mxu1 %v43739_v7 }
0x1288   :  { %39453 = vmatpush3.bf16.msra.mxu1 %v43805_v54  ;;  %36077 = vmatprep.mubr.f32.mxu1 %v43743_v4  ;;  %v9679_v54 = vsub.f32 %v9677_v53, %v9678_v61 }
0x1289   :  { %39455 = vmatprep.subr.bf16.mxu1 %v43809_v55 }
0x128c   :  { %39457 = vmatpush3.bf16.msra.mxu1 %v43809_v55  ;;  %v9680_v55 = vand.u32 4294901760, %v9679_v54  ;;  %v43894_v54 = vpack.c.bf16 %v9677_v53, %v9670_v30 }
0x128d   :  { %39459 = vmatprep.subr.bf16.mxu1 %v43869_v23 }
0x128e   :  { %v43884_v20 = vpack.c.bf16 %v9680_v55, %v9673_v50  ;;  %46149 = vst [vmem:[#allocation107_spill] sm:$0xff] %v43894_v54  ;;  %v43906_v55 = vpack.c.bf16 %v9664_v1, %v9657_v28 }
0x128f   :  { %36078 = vmatmul.mubr.f32.vlgmr.msra.gmra.mrb[18].mxu1 %v43739_v7 }
0x1290   :  { %39461 = vmatpush3.bf16.msra.mxu1 %v43869_v23  ;;  %36088 = vmatprep.mubr.f32.mxu1 %v43761_v36  ;;  %46147 = vst [vmem:[#allocation105_spill] sm:$0xff] %v43884_v20  ;;  %v43890_v36 = vpack.c.bf16 %v9663_v22, %v9656_v9  ;;  %46150 = vst [vmem:[#allocation108_spill] sm:$0xff] %v43906_v55 }
0x1291   :  { %39463 = vmatprep.subr.bf16.mxu1 %v43873_v51 }
0x1292   :  { %46148 = vst [vmem:[#allocation106_spill] sm:$0xff] %v43890_v36 }
0x1294   :  { %39465 = vmatpush3.bf16.msra.mxu1 %v43873_v51 }
0x1295   :  { %39467 = vmatprep.subr.bf16.mxu1 %v43880_v39 }
0x1297   :  { %36089 = vmatmul.mubr.f32.vlgmr.msra.gmra.mrb[20].mxu1 %v43763_v47 }
0x1298   :  { %39469 = vmatpush3.bf16.msra.mxu1 %v43880_v39  ;;  %36099 = vmatprep.mubr.f32.mxu1 %v43743_v4 }
0x1299   :  { %39471 = vmatprep.subr.bf16.mxu1 %v43884_v20 }
0x129c   :  { %39473 = vmatpush3.bf16.msra.mxu1 %v43884_v20 }
0x129d   :  { %39475 = vmatprep.subr.bf16.mxu1 %v43890_v36 }
0x129f   :  { %36100 = vmatmul.mubr.f32.vlgmr.msra.gmra.mrb[20].mxu1 %v43739_v7 }
0x12a0   :  { %39477 = vmatpush3.bf16.msra.mxu1 %v43890_v36  ;;  %36110 = vmatprep.mubr.f32.mxu1 %v43749_v42  ;;  %v43910_v42 = vpack.c.bf16 %v9678_v61, %v9671_v0 }
0x12a1   :  { %39479 = vmatprep.subr.bf16.mxu1 %v43894_v54 }
0x12a2   :  { %46151 = vst [vmem:[#allocation109_spill] sm:$0xff] %v43910_v42 }
0x12a4   :  { %39481 = vmatpush3.bf16.msra.mxu1 %v43894_v54 }
0x12a5   :  { %39483 = vmatprep.subr.bf16.mxu1 %v43869_v23 }
0x12a7   :  { %36111 = vmatmul.mubr.f32.vlgmr.msra.gmra.mrb[20].mxu1 %v43746_v37 }
0x12a8   :  { %39485 = vmatpush3.bf16.msra.mxu1 %v43869_v23  ;;  %36121 = vmatprep.mubr.f32.mxu1 %v43755_v2 }
0x12a9   :  { %39487 = vmatprep.subr.bf16.mxu1 %v43873_v51 }
0x12ac   :  { %39489 = vmatpush3.bf16.msra.mxu1 %v43873_v51 }
0x12ad   :  { %39491 = vmatprep.subr.bf16.mxu1 %v43906_v55 }
0x12af   :  { %36122 = vmatmul.mubr.f32.vlgmr.msra.gmra.mrb[20].mxu1 %v43752_v56 }
0x12b0   :  { %39493 = vmatpush3.bf16.msra.mxu1 %v43906_v55  ;;  %36132 = vmatprep.mubr.f32.mxu1 %v43743_v4 }
0x12b1   :  { %39495 = vmatprep.subr.bf16.mxu1 %v43910_v42 }
0x12b4   :  { %39497 = vmatpush3.bf16.msra.mxu1 %v43910_v42 }
0x12b5   :  { %39499 = vmatprep.subr.bf16.mxu1 %v43869_v23 }
0x12b7   :  { %36133 = vmatmul.mubr.f32.vlgmr.msra.gmra.mrb[20].mxu1 %v43739_v7 }
0x12b8   :  { %39501 = vmatpush3.bf16.msra.mxu1 %v43869_v23  ;;  %36143 = vmatprep.mubr.f32.mxu1 %v43743_v4 }
0x12b9   :  { %39503 = vmatprep.subr.bf16.mxu1 %v43873_v51 }
0x12bc   :  { %39505 = vmatpush3.bf16.msra.mxu1 %v43873_v51 }
0x12bf   :  { %36144 = vmatmul.mubr.f32.vlgmr.msra.gmra.mrb[20].mxu1 %v43739_v7 }
0x1332   :  { %v43924_v37 = vpop.f32.mrb[16].mxu1 }
0x1333   :  { %v43926_v56 = vpop.f32.mrb[17].mxu1  ;;  %v10097_v61 = vsel %vm2373_vm5, %v43924_v37, 0 }
0x1334   :  { %v10094_v2 = vsel %vm2373_vm5, %v43926_v56, 0  ;;  %11144 = vrot.lane.b32.xlu1 %v43926_v56, %s42393_s17  ;;  %v10182_v7 = vand.u32 4294901760, %v10097_v61 }
0x1335   :  { %v10172_v47 = vand.u32 4294901760, %v10094_v2 }
0x1336   :  { %v10183_v9 = vsub.f32 %v10097_v61, %v10182_v7 }
0x1337   :  { %v10173_v18 = vsub.f32 %v10094_v2, %v10172_v47 }
0x1338   :  { %v10184_v50 = vand.u32 4294901760, %v10183_v9 }
0x1339   :  { %v10174_v0 = vand.u32 4294901760, %v10173_v18 }
0x133a   :  { %v10185_v42 = vsub.f32 %v10183_v9, %v10184_v50 }
0x133b   :  { %v10175_v4 = vsub.f32 %v10173_v18, %v10174_v0 }
0x133c   :  { %v10186_v39 = vand.u32 4294901760, %v10185_v42 }
0x133d   :  { %v10176_v53 = vand.u32 4294901760, %v10175_v4 }
0x133f   :  { %36150 = vmatprep.mubr.f32.mxu1 %v10176_v53 }
0x1362   :  { %v43934_v57 = vpop.f32.mrb[18].mxu1 }
0x1363   :  { %v10103_v22 = vsel %vm2373_vm5, %v43934_v57, 0  ;;  %11150 = vrot.lane.b32.xlu0 %v43934_v57, %s42393_s17  ;;  %v43940_v28 = vpop.f32.mrb[19].mxu1 }
0x1364   :  { %v10109_v1 = vand.u32 4294901760, %v10103_v22  ;;  %v10100_v30 = vsel %vm2373_vm5, %v43940_v28, 0  ;;  %11148 = vrot.lane.b32.xlu1 %v43940_v28, %s42393_s17 }
0x1365   :  { %v10106_v11 = vand.u32 4294901760, %v10100_v30 }
0x1366   :  { %v10201_v27 = vsub.f32 %v10103_v22, %v10109_v1 }
0x1367   :  { %v39506_v24 = vpack.c.bf16 %v10109_v1, %v10106_v11  ;;  %v10194_v31 = vsub.f32 %v10100_v30, %v10106_v11 }
0x1368   :  { %11146 = vrot.lane.b32.xlu1 %v43924_v37, %s42393_s17  ;;  %v10202_v2 = vand.u32 4294901760, %v10201_v27 }
0x1369   :  { %39507 = vmatprep.subr.bf16.mxu1 %v39506_v24  ;;  %v10195_v4 = vand.u32 4294901760, %v10194_v31  ;;  %v39514_v53 = vpack.c.bf16 %v10201_v27, %v10194_v31 }
0x136a   :  { %39509 = vmatpush3.bf16.xpose.msra.mxu1 %v39506_v24  ;;  %v10203_v61 = vsub.f32 %v10201_v27, %v10202_v2 }
0x136b   :  { %v10196_v55 = vsub.f32 %v10194_v31, %v10195_v4  ;;  %v39522_v54 = vpack.c.bf16 %v10202_v2, %v10195_v4 }
0x136c   :  { %v10204_v36 = vand.u32 4294901760, %v10203_v61 }
0x136d   :  { %v10197_v20 = vand.u32 4294901760, %v10196_v55 }
0x136f   :  { %v39510_v51 = vpack.c.bf16 %v10204_v36, %v10197_v20 }
0x1371   :  { %36151 = vmatmul.mubr.f32.vlgmr.msra.gmra.mrb[22].mxu1 %v10186_v39  ;;  %39511 = vmatprep.subr.bf16.mxu1 %v39510_v51 }
0x1372   :  { %39513 = vmatpush3.bf16.xpose.msra.mxu1 %v39510_v51  ;;  %36157 = vmatprep.mubr.f32.mxu1 %v10172_v47 }
0x1373   :  { %39515 = vmatprep.subr.bf16.mxu1 %v39514_v53 }
0x1379   :  { %36158 = vmatmul.mubr.f32.vlgmr.msra.gmra.mrb[22].mxu1 %v10182_v7 }
0x137a   :  { %39517 = vmatpush3.bf16.xpose.msra.mxu1 %v39514_v53  ;;  %36164 = vmatprep.mubr.f32.mxu1 %v10173_v18 }
0x137b   :  { %39519 = vmatprep.subr.bf16.mxu1 %v39506_v24 }
0x1381   :  { %36165 = vmatmul.mubr.f32.vlgmr.msra.gmra.mrb[22].mxu1 %v10183_v9 }
0x1382   :  { %39521 = vmatpush3.bf16.xpose.msra.mxu1 %v39506_v24  ;;  %36171 = vmatprep.mubr.f32.mxu1 %v10174_v0 }
0x1383   :  { %39523 = vmatprep.subr.bf16.mxu1 %v39522_v54 }
0x1389   :  { %36172 = vmatmul.mubr.f32.vlgmr.msra.gmra.mrb[22].mxu1 %v10184_v50 }
0x138a   :  { %39525 = vmatpush3.bf16.xpose.msra.mxu1 %v39522_v54  ;;  %36178 = vmatprep.mubr.f32.mxu1 %v10172_v47 }
0x138b   :  { %39527 = vmatprep.subr.bf16.mxu1 %v39506_v24 }
0x1391   :  { %36179 = vmatmul.mubr.f32.vlgmr.msra.gmra.mrb[22].mxu1 %v10182_v7 }
0x1392   :  { %v43948_v55 = vpop.f32.mrb[20].mxu1  ;;  %39529 = vmatpush3.bf16.xpose.msra.mxu1 %v39506_v24  ;;  %36185 = vmatprep.mubr.f32.mxu1 %v10172_v47 }
0x1393   :  { %v10638_v51 = vsel %vm317_vm1, %v43948_v55, 0  ;;  %v43952_v39 = vpop.f32.mrb[21].mxu1 }
0x1394   :  { %v10644_v20 = vand.u32 4294901760, %v10638_v51  ;;  %v10641_v36 = vand.u32 4294901760, %v43952_v39 }
0x1396   :  { %v10736_v42 = vsub.f32 %v10638_v51, %v10644_v20  ;;  %v43955_v18 = vpack.c.bf16 %v10644_v20, %v10641_v36  ;;  %v10729_v54 = vsub.f32 %v43952_v39, %v10641_v36 }
0x1398   :  { %39531 = vmatprep.subr.bf16.mxu0 %v43955_v18  ;;  %v10730_v0 = vand.u32 4294901760, %v10729_v54  ;;  %v10737_v9 = vand.u32 4294901760, %v10736_v42  ;;  %v43959_v22 = vpack.c.bf16 %v10736_v42, %v10729_v54 }
0x1399   :  { %36186 = vmatmul.mubr.f32.vlgmr.msra.gmra.mrb[22].mxu1 %v10182_v7  ;;  %39533 = vmatpush3.bf16.msra.mxu0 %v43955_v18 }
0x139a   :  { %v10731_v47 = vsub.f32 %v10729_v54, %v10730_v0  ;;  %v10738_v1 = vsub.f32 %v10736_v42, %v10737_v9  ;;  %v43962_v30 = vpack.c.bf16 %v10737_v9, %v10730_v0 }
0x139c   :  { %v10732_v11 = vand.u32 4294901760, %v10731_v47  ;;  %v10739_v27 = vand.u32 4294901760, %v10738_v1 }
0x139e   :  { %v43964_v24 = vpack.c.bf16 %v10739_v27, %v10732_v11 }
0x13a0   :  { %39535 = vmatprep.subr.bf16.mxu0 %v43964_v24 }
0x13a6   :  { %v11145_v31 = vpop.permute.xlu1 %11144 }
0x13a7   :  { %v11152_v50 = vsel %vm2373_vm5, %v11145_v31, 0 }
0x13a8   :  { %v11227_v2 = vand.u32 4294901760, %v11152_v50 }
0x13aa   :  { %v11228_v4 = vsub.f32 %v11152_v50, %v11227_v2 }
0x13ac   :  { %v11229_v53 = vand.u32 4294901760, %v11228_v4 }
0x13ae   :  { %v11230_v61 = vsub.f32 %v11228_v4, %v11229_v53 }
0x13b0   :  { %v11231_v7 = vand.u32 4294901760, %v11230_v61 }
0x13b2   :  { %36234 = vmatprep.mubr.f32.mxu1 %v11231_v7 }
0x13d5   :  { %v11151_v51 = vpop.permute.xlu0 %11150 }
0x13d6   :  { %v11158_v20 = vsel %vm2373_vm5, %v11151_v51, 0  ;;  %v11149_v36 = vpop.permute.xlu1 %11148 }
0x13d7   :  { %v11164_v42 = vand.u32 4294901760, %v11158_v20  ;;  %v11156_v54 = vsel %vm2373_vm5, %v11149_v36, 0 }
0x13d8   :  { %v11161_v0 = vand.u32 4294901760, %v11156_v54 }
0x13d9   :  { %v11256_v9 = vsub.f32 %v11158_v20, %v11164_v42 }
0x13da   :  { %v39554_v47 = vpack.c.bf16 %v11164_v42, %v11161_v0  ;;  %v11249_v1 = vsub.f32 %v11156_v54, %v11161_v0  ;;  %v11147_v11 = vpop.permute.xlu1 %11146 }
0x13db   :  { %v11257_v27 = vand.u32 4294901760, %v11256_v9  ;;  %v11154_v31 = vsel %vm2373_vm5, %v11147_v11, 0 }
0x13dc   :  { %v11250_v50 = vand.u32 4294901760, %v11249_v1  ;;  %v11237_v23 = vand.u32 4294901760, %v11154_v31  ;;  %39555 = vmatprep.subr.bf16.mxu1 %v39554_v47  ;;  %v39562_v42 = vpack.c.bf16 %v11256_v9, %v11249_v1 }
0x13dd   :  { %39557 = vmatpush3.bf16.xpose.msra.mxu1 %v39554_v47  ;;  %v11258_v61 = vsub.f32 %v11256_v9, %v11257_v27 }
0x13de   :  { %v11238_v7 = vsub.f32 %v11154_v31, %v11237_v23  ;;  %v11251_v26 = vsub.f32 %v11249_v1, %v11250_v50  ;;  %v39570_v54 = vpack.c.bf16 %v11257_v27, %v11250_v50 }
0x13df   :  { %v11259_v51 = vand.u32 4294901760, %v11258_v61 }
0x13e0   :  { %v11239_v59 = vand.u32 4294901760, %v11238_v7  ;;  %v11252_v49 = vand.u32 4294901760, %v11251_v26 }
0x13e2   :  { %v11240_v17 = vsub.f32 %v11238_v7, %v11239_v59  ;;  %v39558_v36 = vpack.c.bf16 %v11259_v51, %v11252_v49 }
0x13e4   :  { %39559 = vmatprep.subr.bf16.mxu1 %v39558_v36  ;;  %v11241_v20 = vand.u32 4294901760, %v11240_v17  ;;  %v43971_v17 = vld [vmem:[#allocation4] ss:$0 sm:$0xff] }
0x13e6   :  { %36235 = vmatmul.mubr.f32.vlgmr.msra.gmra.mrb[24].mxu1 %v11241_v20 }
0x13e7   :  { %39561 = vmatpush3.bf16.xpose.msra.mxu1 %v39558_v36  ;;  %36241 = vmatprep.mubr.f32.mxu1 %v11227_v2 }
0x13e8   :  { %39563 = vmatprep.subr.bf16.mxu1 %v39562_v42 }
0x13ee   :  { %36242 = vmatmul.mubr.f32.vlgmr.msra.gmra.mrb[24].mxu1 %v11237_v23 }
0x13ef   :  { %39565 = vmatpush3.bf16.xpose.msra.mxu1 %v39562_v42  ;;  %36248 = vmatprep.mubr.f32.mxu1 %v11228_v4 }
0x13f0   :  { %39567 = vmatprep.subr.bf16.mxu1 %v39554_v47 }
0x13f6   :  { %36249 = vmatmul.mubr.f32.vlgmr.msra.gmra.mrb[24].mxu1 %v11238_v7 }
0x13f7   :  { %39569 = vmatpush3.bf16.xpose.msra.mxu1 %v39554_v47  ;;  %36255 = vmatprep.mubr.f32.mxu1 %v11229_v53 }
0x13f8   :  { %39571 = vmatprep.subr.bf16.mxu1 %v39570_v54 }
0x13fe   :  { %36256 = vmatmul.mubr.f32.vlgmr.msra.gmra.mrb[24].mxu1 %v11239_v59 }
0x13ff   :  { %39573 = vmatpush3.bf16.xpose.msra.mxu1 %v39570_v54  ;;  %36262 = vmatprep.mubr.f32.mxu1 %v11227_v2 }
0x1400   :  { %39575 = vmatprep.subr.bf16.mxu1 %v39554_v47 }
0x1406   :  { %36263 = vmatmul.mubr.f32.vlgmr.msra.gmra.mrb[24].mxu1 %v11237_v23 }
0x1407   :  { %39577 = vmatpush3.bf16.xpose.msra.mxu1 %v39554_v47  ;;  %36269 = vmatprep.mubr.f32.mxu1 %v11227_v2 }
0x140e   :  { %36270 = vmatmul.mubr.f32.vlgmr.msra.gmra.mrb[24].mxu1 %v11237_v23 }
0x146c   :  { %v36187_v26 = vpop.f32.mrb[22].mxu1 }
0x146d   :  { %v41322_v49 = vadd.f32 %v43971_v17, %v36187_v26  ;;  %v10597_v4 = vpop.f32.mrb[23].mxu1 }
0x146e   :  { %v41323_v0 = vadd.f32 %v43971_v17, %v10597_v4 }
0x146f   :  { %v10608_v9 = vmul.f32 0.17677669, %v41322_v49 }
0x1470   :  { %v10607_v1 = vmul.f32 0.17677669, %v41323_v0 }
0x1471   :  { %v10612_v53 = vsel %vm2894_vm6, %v10608_v9, -inf }
0x1472   :  { %10613 = vmax.xlane.f32.xlu1 %v10612_v53  ;;  %v10609_v59 = vsel %vm2890_vm7, %v10607_v1, -inf }
0x1473   :  { %10610 = vmax.xlane.f32.xlu0 %v10609_v59 }
0x14e1   :  { %v36271_v11 = vpop.f32.mrb[24].mxu1 }
0x14e2   :  { %v11652_v47 = vpop.f32.mrb[25].mxu1  ;;  %v41324_v23 = vadd.f32 %v43971_v17, %v36271_v11 }
0x14e3   :  { %v41325_v2 = vadd.f32 %v43971_v17, %v11652_v47 }
0x14e4   :  { %v11663_v31 = vmul.f32 0.17677669, %v41324_v23 }
0x14e5   :  { %v11662_v27 = vmul.f32 0.17677669, %v41325_v2 }
0x14e6   :  { %v11667_v61 = vsel %vm2894_vm6, %v11663_v31, -inf }
0x14e7   :  { %v11664_v50 = vsel %vm2890_vm7, %v11662_v27, -inf }
0x14e8   :  { %11665 = vmax.xlane.f32.xlu0 %v11664_v50 }
0x14ec   :  { %11668 = vmax.xlane.f32.xlu0 %v11667_v61 }
0x14ff   :  { %v10614_v7 = vpop.xlane.xlu1 %10613 }
0x1500   :  { %v10616_v51 = vsub.f32 %v10608_v9, %v10614_v7  ;;  %v10611_v36 = vpop.xlane.xlu0 %10610 }
0x1501   :  { %v10615_v20 = vsub.f32 %v10607_v1, %v10611_v36 }
0x1502   :  { %v10619_v42 = vmul.f32 1.442695, %v10616_v51 }
0x1503   :  { %v10617_v54 = vmul.f32 1.442695, %v10615_v20 }
0x1504   :  { %41984 = vpow2.f32 %v10619_v42 }
0x1505   :  { %41986 = vpow2.f32 %v10617_v54 }
0x150e   :  { %v41985_v26 = vpop.eup %41984 }
0x150f   :  { %v41987_v49 = vpop.eup %41986  ;;  %v10624_v4 = vsel %vm2894_vm6, %v41985_v26, 0.0 }
0x1510   :  { %10625 = vadd.xlane.f32.xlu0 %v10624_v4  ;;  %v10621_v0 = vsel %vm2890_vm7, %v41987_v49, 0.0 }
0x1511   :  { %10622 = vadd.xlane.f32.xlu1 %v10621_v0 }
0x1575   :  { %v11666_v53 = vpop.xlane.xlu0 %11665 }
0x1576   :  { %v11670_v59 = vsub.f32 %v11662_v27, %v11666_v53 }
0x1578   :  { %v11672_v11 = vmul.f32 1.442695, %v11670_v59 }
0x1579   :  { %v11669_v47 = vpop.xlane.xlu0 %11668 }
0x157a   :  { %41988 = vpow2.f32 %v11672_v11  ;;  %v11671_v9 = vsub.f32 %v11663_v31, %v11669_v47 }
0x157c   :  { %v11674_v23 = vmul.f32 1.442695, %v11671_v9 }
0x157e   :  { %41990 = vpow2.f32 %v11674_v23 }
0x1584   :  { %v43983_v1 = vpop.eup %41988 }
0x1585   :  { %v11676_v2 = vsel %vm2890_vm7, %v43983_v1, 0.0 }
0x1586   :  { %11677 = vadd.xlane.f32.xlu1 %v11676_v2 }
0x1588   :  { %v43987_v50 = vpop.eup %41990 }
0x1589   :  { %v11679_v61 = vsel %vm2894_vm6, %v43987_v50, 0.0 }
0x158a   :  { %11680 = vadd.xlane.f32.xlu0 %v11679_v61 }
0x1597   :  { %11689 = vrot.lane.b32.xlu1 %v43948_v55, %s42393_s17 }
0x159b   :  { %12216 = vrot.lane.b32.xlu1 %v43940_v28, %s42394_s23 }
0x159d   :  { %v10626_v27 = vpop.xlane.xlu0 %10625 }
0x159e   :  { %41992 = vrcp.f32 %v10626_v27  ;;  %v10623_v31 = vpop.xlane.xlu1 %10622 }
0x159f   :  { %41994 = vrcp.f32 %v10623_v31  ;;  %12218 = vrot.lane.b32.xlu1 %v43934_v57, %s42394_s23 }
0x15a0   :  { %11687 = vrot.lane.b32.xlu0 %v43952_v39, %s42393_s17 }
0x15a3   :  { %12214 = vrot.lane.b32.xlu1 %v43924_v37, %s42394_s23 }
0x15a4   :  { %12212 = vrot.lane.b32.xlu0 %v43926_v56, %s42394_s23 }
0x15a8   :  { %v41993_v7 = vpop.eup %41992 }
0x15a9   :  { %v41995_v51 = vpop.eup %41994  ;;  %v10630_v36 = vmul.f32 %v41993_v7, %v41985_v26 }
0x15aa   :  { %v10629_v20 = vmul.f32 %v41995_v51, %v41987_v49 }
0x15ab   :  { %v10635_v42 = vsel %vm2890_vm7, %v10630_v36, 0 }
0x15ac   :  { %v10632_v54 = vsel %vm2890_vm7, %v10629_v20, 0  ;;  %v10717_v4 = vand.u32 4294901760, %v10635_v42 }
0x15ad   :  { %v10707_v0 = vand.u32 4294901760, %v10632_v54 }
0x15ae   :  { %v10718_v53 = vsub.f32 %v10635_v42, %v10717_v4 }
0x15af   :  { %v10708_v59 = vsub.f32 %v10632_v54, %v10707_v0 }
0x15b0   :  { %v10719_v11 = vand.u32 4294901760, %v10718_v53 }
0x15b1   :  { %v10709_v47 = vand.u32 4294901760, %v10708_v59 }
0x15b2   :  { %v10720_v9 = vsub.f32 %v10718_v53, %v10719_v11 }
0x15b3   :  { %v10710_v23 = vsub.f32 %v10708_v59, %v10709_v47 }
0x15b4   :  { %v10721_v61 = vand.u32 4294901760, %v10720_v9 }
0x15b5   :  { %v10711_v2 = vand.u32 4294901760, %v10710_v23 }
0x15b7   :  { %36192 = vmatprep.mubr.f32.mxu0 %v10711_v2 }
0x15b8   :  { %36193 = vmatmul.mubr.f32.vlgmr.msra.gmra.mrb[26].mxu0 %v10721_v61 }
0x15b9   :  { %39537 = vmatpush3.bf16.msra.mxu0 %v43964_v24  ;;  %36199 = vmatprep.mubr.f32.mxu0 %v10707_v0 }
0x15ba   :  { %39539 = vmatprep.subr.bf16.mxu0 %v43959_v22 }
0x15c0   :  { %36200 = vmatmul.mubr.f32.vlgmr.msra.gmra.mrb[26].mxu0 %v10717_v4 }
0x15c1   :  { %39541 = vmatpush3.bf16.msra.mxu0 %v43959_v22  ;;  %36206 = vmatprep.mubr.f32.mxu0 %v10708_v59 }
0x15c2   :  { %39543 = vmatprep.subr.bf16.mxu0 %v43955_v18 }
0x15c8   :  { %36207 = vmatmul.mubr.f32.vlgmr.msra.gmra.mrb[26].mxu0 %v10718_v53 }
0x15c9   :  { %39545 = vmatpush3.bf16.msra.mxu0 %v43955_v18  ;;  %36213 = vmatprep.mubr.f32.mxu0 %v10709_v47 }
0x15ca   :  { %39547 = vmatprep.subr.bf16.mxu0 %v43962_v30 }
0x15d0   :  { %36214 = vmatmul.mubr.f32.vlgmr.msra.gmra.mrb[26].mxu0 %v10719_v11 }
0x15d1   :  { %39549 = vmatpush3.bf16.msra.mxu0 %v43962_v30  ;;  %36220 = vmatprep.mubr.f32.mxu0 %v10707_v0 }
0x15d2   :  { %39551 = vmatprep.subr.bf16.mxu0 %v43955_v18 }
0x15d8   :  { %36221 = vmatmul.mubr.f32.vlgmr.msra.gmra.mrb[26].mxu0 %v10717_v4 }
0x15d9   :  { %39553 = vmatpush3.bf16.msra.mxu0 %v43955_v18  ;;  %36227 = vmatprep.mubr.f32.mxu0 %v10707_v0 }
0x15e0   :  { %36228 = vmatmul.mubr.f32.vlgmr.msra.gmra.mrb[26].mxu0 %v10717_v4 }
0x1613   :  { %v11678_v22 = vpop.xlane.xlu1 %11677 }
0x1614   :  { %41996 = vrcp.f32 %v11678_v22 }
0x1617   :  { %v11690_v24 = vpop.permute.xlu1 %11689  ;;  %v11681_v26 = vpop.xlane.xlu0 %11680 }
0x1618   :  { %v11698_v49 = vsel %vm317_vm1, %v11690_v24, 0  ;;  %41998 = vrcp.f32 %v11681_v26 }
0x1619   :  { %v11704_v27 = vand.u32 4294901760, %v11698_v49 }
0x161b   :  { %v11796_v31 = vsub.f32 %v11698_v49, %v11704_v27  ;;  %v11688_v7 = vpop.permute.xlu0 %11687 }
0x161c   :  { %v11701_v51 = vand.u32 4294901760, %v11688_v7 }
0x161d   :  { %v11797_v30 = vand.u32 4294901760, %v11796_v31 }
0x161e   :  { %v41997_v36 = vpop.eup %41996  ;;  %v44015_v20 = vpack.c.bf16 %v11704_v27, %v11701_v51  ;;  %v11789_v42 = vsub.f32 %v11688_v7, %v11701_v51 }
0x161f   :  { %v11684_v18 = vmul.f32 %v41997_v36, %v43983_v1  ;;  %v11798_v4 = vsub.f32 %v11796_v31, %v11797_v30 }
0x1620   :  { %v11790_v54 = vand.u32 4294901760, %v11789_v42  ;;  %39579 = vmatprep.subr.bf16.mxu0 %v44015_v20 }
0x1621   :  { %39581 = vmatpush3.bf16.msra.mxu0 %v44015_v20  ;;  %v11693_v59 = vsel %vm2890_vm7, %v11684_v18, 0  ;;  %v11799_v9 = vand.u32 4294901760, %v11798_v4  ;;  %v39586_v18 = vpack.c.bf16 %v11796_v31, %v11789_v42 }
0x1622   :  { %v41999_v0 = vpop.eup %41998  ;;  %v11791_v53 = vsub.f32 %v11789_v42, %v11790_v54  ;;  %v11767_v23 = vand.u32 4294901760, %v11693_v59 }
0x1623   :  { %v11685_v11 = vmul.f32 %v41999_v0, %v43987_v50  ;;  %v12217_v50 = vpop.permute.xlu1 %12216  ;;  %v39594_v0 = vpack.c.bf16 %v11797_v30, %v11790_v54 }
0x1624   :  { %v11792_v47 = vand.u32 4294901760, %v11791_v53  ;;  %v11768_v22 = vsub.f32 %v11693_v59, %v11767_v23  ;;  %v12213_v53 = vpop.permute.xlu0 %12212  ;;  %v12224_v31 = vsel %vm2373_vm5, %v12217_v50, 0 }
0x1625   :  { %v11696_v2 = vsel %vm2890_vm7, %v11685_v11, 0  ;;  %v12220_v42 = vsel %vm2373_vm5, %v12213_v53, 0 }
0x1626   :  { %v39582_v61 = vpack.c.bf16 %v11799_v9, %v11792_v47  ;;  %v11777_v1 = vand.u32 4294901760, %v11696_v2  ;;  %v11769_v24 = vand.u32 4294901760, %v11768_v22  ;;  %v12229_v47 = vand.u32 4294901760, %v12224_v31 }
0x1627   :  { %v12219_v4 = vpop.permute.xlu1 %12218  ;;  %v12295_v9 = vand.u32 4294901760, %v12220_v42 }
0x1628   :  { %39583 = vmatprep.subr.bf16.mxu0 %v39582_v61  ;;  %v11778_v26 = vsub.f32 %v11696_v2, %v11777_v1  ;;  %v11770_v49 = vsub.f32 %v11768_v22, %v11769_v24  ;;  %v12226_v59 = vsel %vm2373_vm5, %v12219_v4, 0  ;;  %v12317_v30 = vsub.f32 %v12224_v31, %v12229_v47 }
0x1629   :  { %v12232_v11 = vand.u32 4294901760, %v12226_v59  ;;  %v12296_v54 = vsub.f32 %v12220_v42, %v12295_v9 }
0x162a   :  { %v11779_v27 = vand.u32 4294901760, %v11778_v26  ;;  %v11771_v7 = vand.u32 4294901760, %v11770_v49 }
0x162b   :  { %v12324_v2 = vsub.f32 %v12226_v59, %v12232_v11 }
0x162c   :  { %v11780_v51 = vsub.f32 %v11778_v26, %v11779_v27  ;;  %36276 = vmatprep.mubr.f32.mxu0 %v11771_v7  ;;  %v12297_v7 = vand.u32 4294901760, %v12296_v54 }
0x162e   :  { %v11781_v36 = vand.u32 4294901760, %v11780_v51  ;;  %v39602_v51 = vpack.c.bf16 %v12232_v11, %v12229_v47  ;;  %v39610_v47 = vpack.c.bf16 %v12324_v2, %v12317_v30 }
0x1630   :  { %36277 = vmatmul.mubr.f32.vlgmr.msra.gmra.mrb[28].mxu0 %v11781_v36 }
0x1631   :  { %39585 = vmatpush3.bf16.msra.mxu0 %v39582_v61  ;;  %36283 = vmatprep.mubr.f32.mxu0 %v11767_v23  ;;  %v12215_v61 = vpop.permute.xlu1 %12214 }
0x1632   :  { %39587 = vmatprep.subr.bf16.mxu0 %v39586_v18 }
0x1638   :  { %36284 = vmatmul.mubr.f32.vlgmr.msra.gmra.mrb[28].mxu0 %v11777_v1 }
0x1639   :  { %39589 = vmatpush3.bf16.msra.mxu0 %v39586_v18  ;;  %36290 = vmatprep.mubr.f32.mxu0 %v11768_v22  ;;  %v12222_v22 = vsel %vm2373_vm5, %v12215_v61, 0  ;;  %v12298_v18 = vsub.f32 %v12296_v54, %v12297_v7 }
0x163a   :  { %39591 = vmatprep.subr.bf16.mxu0 %v44015_v20  ;;  %v12305_v49 = vand.u32 4294901760, %v12222_v22 }
0x163b   :  { %v12299_v53 = vand.u32 4294901760, %v12298_v18 }
0x163c   :  { %v12306_v36 = vsub.f32 %v12222_v22, %v12305_v49 }
0x1640   :  { %36291 = vmatmul.mubr.f32.vlgmr.msra.gmra.mrb[28].mxu0 %v11778_v26  ;;  %v12318_v26 = vand.u32 4294901760, %v12317_v30 }
0x1641   :  { %39593 = vmatpush3.bf16.msra.mxu0 %v44015_v20  ;;  %36297 = vmatprep.mubr.f32.mxu0 %v11769_v24  ;;  %v12325_v24 = vand.u32 4294901760, %v12324_v2 }
0x1642   :  { %39595 = vmatprep.subr.bf16.mxu0 %v39594_v0  ;;  %v12319_v50 = vsub.f32 %v12317_v30, %v12318_v26 }
0x1644   :  { %v12320_v59 = vand.u32 4294901760, %v12319_v50 }
0x1648   :  { %36298 = vmatmul.mubr.f32.vlgmr.msra.gmra.mrb[28].mxu0 %v11779_v27  ;;  %v12326_v27 = vsub.f32 %v12324_v2, %v12325_v24 }
0x1649   :  { %39597 = vmatpush3.bf16.msra.mxu0 %v39594_v0  ;;  %36304 = vmatprep.mubr.f32.mxu0 %v11767_v23  ;;  %v12307_v0 = vand.u32 4294901760, %v12306_v36 }
0x164a   :  { %39599 = vmatprep.subr.bf16.mxu0 %v44015_v20  ;;  %v12327_v4 = vand.u32 4294901760, %v12326_v27 }
0x164b   :  { %v12308_v42 = vsub.f32 %v12306_v36, %v12307_v0 }
0x164c   :  { %v39606_v31 = vpack.c.bf16 %v12327_v4, %v12320_v59 }
0x164d   :  { %v12309_v11 = vand.u32 4294901760, %v12308_v42 }
0x1650   :  { %36305 = vmatmul.mubr.f32.vlgmr.msra.gmra.mrb[28].mxu0 %v11777_v1 }
0x1651   :  { %39601 = vmatpush3.bf16.msra.mxu0 %v44015_v20  ;;  %36311 = vmatprep.mubr.f32.mxu0 %v11767_v23  ;;  %v39618_v20 = vpack.c.bf16 %v12325_v24, %v12318_v26 }
0x1652   :  { %39603 = vmatprep.subr.bf16.mxu0 %v39602_v51 }
0x1658   :  { %36312 = vmatmul.mubr.f32.vlgmr.msra.gmra.mrb[28].mxu0 %v11777_v1 }
0x1659   :  { %36318 = vmatprep.mubr.f32.mxu0 %v12299_v53 }
0x165a   :  { %39605 = vmatpush3.bf16.xpose.msra.mxu0 %v39602_v51 }
0x165b   :  { %39607 = vmatprep.subr.bf16.mxu0 %v39606_v31 }
0x1661   :  { %36319 = vmatmul.mubr.f32.vlgmr.msra.gmra.mrb[30].mxu0 %v12309_v11 }
0x1662   :  { %39609 = vmatpush3.bf16.xpose.msra.mxu0 %v39606_v31  ;;  %36325 = vmatprep.mubr.f32.mxu0 %v12295_v9 }
0x1663   :  { %39611 = vmatprep.subr.bf16.mxu0 %v39610_v47 }
0x1669   :  { %36326 = vmatmul.mubr.f32.vlgmr.msra.gmra.mrb[30].mxu0 %v12305_v49 }
0x166a   :  { %39613 = vmatpush3.bf16.xpose.msra.mxu0 %v39610_v47  ;;  %36332 = vmatprep.mubr.f32.mxu0 %v12296_v54 }
0x166b   :  { %39615 = vmatprep.subr.bf16.mxu0 %v39602_v51 }
0x1671   :  { %36333 = vmatmul.mubr.f32.vlgmr.msra.gmra.mrb[30].mxu0 %v12306_v36 }
0x1672   :  { %39617 = vmatpush3.bf16.xpose.msra.mxu0 %v39602_v51  ;;  %36339 = vmatprep.mubr.f32.mxu0 %v12297_v7 }
0x1673   :  { %39619 = vmatprep.subr.bf16.mxu0 %v39618_v20 }
0x1679   :  { %36340 = vmatmul.mubr.f32.vlgmr.msra.gmra.mrb[30].mxu0 %v12307_v0 }
0x167a   :  { %39621 = vmatpush3.bf16.xpose.msra.mxu0 %v39618_v20  ;;  %36346 = vmatprep.mubr.f32.mxu0 %v12295_v9 }
0x167b   :  { %39623 = vmatprep.subr.bf16.mxu0 %v39602_v51 }
0x1681   :  { %36347 = vmatmul.mubr.f32.vlgmr.msra.gmra.mrb[30].mxu0 %v12305_v49 }
0x1682   :  { %39625 = vmatpush3.bf16.xpose.msra.mxu0 %v39602_v51  ;;  %36353 = vmatprep.mubr.f32.mxu0 %v12295_v9 }
0x1689   :  { %36354 = vmatmul.mubr.f32.vlgmr.msra.gmra.mrb[30].mxu0 %v12305_v49 }
0x16b3   :  { %v36229_v23 = vpop.f32.mrb[26].mxu0 }
0x16b4   :  { %11143 = vst.msk [vmem:[#allocation3 + $0x8] sm:$0xf] %vm3426_vm8, %v36229_v23  ;;  %v11132_v1 = vpop.f32.mrb[27].mxu0 }
0x16b5   :  { %11142 = vst.msk [vmem:[#allocation3] sm:$0xff] %vm2373_vm5, %v11132_v1 }
0x172b   :  { %v44033_v2 = vpop.f32.mrb[28].mxu0 }
0x172c   :  { %v44035_v61 = vpop.f32.mrb[29].mxu0 }
0x175c   :  { %v36355_v30 = vpop.f32.mrb[30].mxu0 }
0x175d   :  { %v41326_v54 = vadd.f32 %v43971_v17, %v36355_v30  ;;  %v12720_v22 = vpop.f32.mrb[31].mxu0 }
0x175e   :  { %v41327_v24 = vadd.f32 %v43971_v17, %v12720_v22 }
0x175f   :  { %v12731_v26 = vmul.f32 0.17677669, %v41326_v54 }
0x1760   :  { %v12730_v7 = vmul.f32 0.17677669, %v41327_v24 }
0x1761   :  { %v12735_v9 = vsel %vm2894_vm6, %v12731_v26, -inf }
0x1762   :  { %12736 = vmax.xlane.f32.xlu1 %v12735_v9  ;;  %v12732_v49 = vsel %vm2890_vm7, %v12730_v7, -inf }
0x1763   :  { %12733 = vmax.xlane.f32.xlu0 %v12732_v49 }
0x1773   :  { %12756 = vrot.lane.b32.xlu1 %v43948_v55, %s42394_s23 }
0x1777   :  { %13283 = vrot.lane.b32.xlu1 %v43940_v28, %s42395_s9 }
0x177b   :  { %13285 = vrot.lane.b32.xlu1 %v43934_v57, %s42395_s9 }
0x177f   :  { %13281 = vrot.lane.b32.xlu1 %v43924_v37, %s42395_s9 }
0x17ef   :  { %v12737_v51 = vpop.xlane.xlu1 %12736 }
0x17f0   :  { %v12739_v27 = vsub.f32 %v12731_v26, %v12737_v51  ;;  %v12734_v36 = vpop.xlane.xlu0 %12733 }
0x17f1   :  { %v12738_v18 = vsub.f32 %v12730_v7, %v12734_v36 }
0x17f2   :  { %v12742_v50 = vmul.f32 1.442695, %v12739_v27 }
0x17f3   :  { %v12740_v4 = vmul.f32 1.442695, %v12738_v18  ;;  %v12757_v37 = vpop.permute.xlu1 %12756 }
0x17f4   :  { %42000 = vpow2.f32 %v12742_v50  ;;  %v12765_v57 = vsel %vm317_vm1, %v12757_v37, 0 }
0x17f5   :  { %42002 = vpow2.f32 %v12740_v4  ;;  %v12771_v42 = vand.u32 4294901760, %v12765_v57 }
0x17f7   :  { %v12863_v47 = vsub.f32 %v12765_v57, %v12771_v42 }
0x17f9   :  { %v12864_v23 = vand.u32 4294901760, %v12863_v47 }
0x17fe   :  { %v42001_v0 = vpop.eup %42000 }
0x17ff   :  { %v12747_v53 = vsel %vm2894_vm6, %v42001_v0, 0.0  ;;  %v42003_v59 = vpop.eup %42002 }
0x1800   :  { %12748 = vadd.xlane.f32.xlu0 %v12747_v53  ;;  %v12744_v28 = vsel %vm2890_vm7, %v42003_v59, 0.0 }
0x1804   :  { %12745 = vadd.xlane.f32.xlu0 %v12744_v28 }
0x181a   :  { %12754 = vrot.lane.b32.xlu0 %v43952_v39, %s42394_s23 }
0x181e   :  { %13279 = vrot.lane.b32.xlu0 %v43926_v56, %s42395_s9  ;;  %v12865_v56 = vsub.f32 %v12863_v47, %v12864_v23 }
0x1820   :  { %v12866_v18 = vand.u32 4294901760, %v12865_v56 }
0x188d   :  { %v12749_v31 = vpop.xlane.xlu0 %12748 }
0x188e   :  { %42004 = vrcp.f32 %v12749_v31 }
0x1891   :  { %v12746_v11 = vpop.xlane.xlu0 %12745 }
0x1892   :  { %42006 = vrcp.f32 %v12746_v11 }
0x1895   :  { %v12755_v20 = vpop.permute.xlu0 %12754 }
0x1896   :  { %v12768_v1 = vand.u32 4294901760, %v12755_v20 }
0x1898   :  { %v42005_v30 = vpop.eup %42004  ;;  %v44056_v54 = vpack.c.bf16 %v12771_v42, %v12768_v1  ;;  %v12856_v22 = vsub.f32 %v12755_v20, %v12768_v1 }
0x1899   :  { %v12753_v24 = vmul.f32 %v42005_v30, %v42001_v0  ;;  %v13280_v56 = vpop.permute.xlu0 %13279 }
0x189a   :  { %v12857_v26 = vand.u32 4294901760, %v12856_v22  ;;  %39627 = vmatprep.subr.bf16.mxu1 %v44056_v54  ;;  %v39634_v1 = vpack.c.bf16 %v12863_v47, %v12856_v22 }
0x189b   :  { %39629 = vmatpush3.bf16.msra.mxu1 %v44056_v54  ;;  %v12763_v7 = vsel %vm2890_vm7, %v12753_v24, 0 }
0x189c   :  { %v42007_v9 = vpop.eup %42006  ;;  %v12858_v49 = vsub.f32 %v12856_v22, %v12857_v26  ;;  %v44061_v51 = vand.u32 4294901760, %v12763_v7  ;;  %v39642_v24 = vpack.c.bf16 %v12864_v23, %v12857_v26  ;;  %v13287_v22 = vsel %vm2373_vm5, %v13280_v56, 0 }
0x189d   :  { %v12752_v27 = vmul.f32 %v42007_v9, %v42003_v59  ;;  %v13284_v59 = vpop.permute.xlu1 %13283 }
0x189e   :  { %v12859_v36 = vand.u32 4294901760, %v12858_v49  ;;  %v12845_v50 = vsub.f32 %v12763_v7, %v44061_v51  ;;  %v13291_v47 = vsel %vm2373_vm5, %v13284_v59, 0 }
0x189f   :  { %v12760_v4 = vsel %vm2890_vm7, %v12752_v27, 0  ;;  %v13296_v49 = vand.u32 4294901760, %v13291_v47  ;;  %v13362_v27 = vand.u32 4294901760, %v13287_v22 }
0x18a0   :  { %v39630_v0 = vpack.c.bf16 %v12866_v18, %v12859_v36  ;;  %v12834_v53 = vand.u32 4294901760, %v12760_v4  ;;  %v12846_v28 = vand.u32 4294901760, %v12845_v50 }
0x18a1   :  { %v13286_v30 = vpop.permute.xlu1 %13285  ;;  %v13384_v23 = vsub.f32 %v13291_v47, %v13296_v49  ;;  %v13363_v26 = vsub.f32 %v13287_v22, %v13362_v27 }
0x18a2   :  { %39631 = vmatprep.subr.bf16.mxu1 %v39630_v0  ;;  %v12835_v37 = vsub.f32 %v12760_v4, %v12834_v53  ;;  %v12847_v31 = vsub.f32 %v12845_v50, %v12846_v28  ;;  %v13293_v7 = vsel %vm2373_vm5, %v13286_v30, 0 }
0x18a3   :  { %v13299_v9 = vand.u32 4294901760, %v13293_v7 }
0x18a4   :  { %v12836_v57 = vand.u32 4294901760, %v12835_v37  ;;  %v12848_v20 = vand.u32 4294901760, %v12847_v31 }
0x18a5   :  { %v13391_v36 = vsub.f32 %v13293_v7, %v13299_v9  ;;  %v13282_v18 = vpop.permute.xlu1 %13281  ;;  %v39650_v31 = vpack.c.bf16 %v13299_v9, %v13296_v49 }
0x18a6   :  { %v12837_v42 = vsub.f32 %v12835_v37, %v12836_v57 }
0x18a7   :  { %v13392_v4 = vand.u32 4294901760, %v13391_v36 }
0x18a8   :  { %v12838_v11 = vand.u32 4294901760, %v12837_v42 }
0x18aa   :  { %36360 = vmatprep.mubr.f32.mxu1 %v12838_v11 }
0x18ab   :  { %36361 = vmatmul.mubr.f32.vlgmr.msra.gmra.mrb[26].mxu1 %v12848_v20 }
0x18ac   :  { %39633 = vmatpush3.bf16.msra.mxu1 %v39630_v0  ;;  %36367 = vmatprep.mubr.f32.mxu1 %v12834_v53  ;;  %v13385_v0 = vand.u32 4294901760, %v13384_v23 }
0x18ad   :  { %39635 = vmatprep.subr.bf16.mxu1 %v39634_v1 }
0x18ae   :  { %v13386_v20 = vsub.f32 %v13384_v23, %v13385_v0 }
0x18b3   :  { %36368 = vmatmul.mubr.f32.vlgmr.msra.gmra.mrb[26].mxu1 %v44061_v51 }
0x18b4   :  { %39637 = vmatpush3.bf16.msra.mxu1 %v39634_v1  ;;  %36374 = vmatprep.mubr.f32.mxu1 %v12835_v37 }
0x18b5   :  { %39639 = vmatprep.subr.bf16.mxu1 %v44056_v54 }
0x18bb   :  { %36375 = vmatmul.mubr.f32.vlgmr.msra.gmra.mrb[26].mxu1 %v12845_v50  ;;  %v13289_v50 = vsel %vm2373_vm5, %v13282_v18, 0 }
0x18bc   :  { %39641 = vmatpush3.bf16.msra.mxu1 %v44056_v54  ;;  %36381 = vmatprep.mubr.f32.mxu1 %v12836_v57  ;;  %v13372_v37 = vand.u32 4294901760, %v13289_v50  ;;  %v13364_v57 = vand.u32 4294901760, %v13363_v26 }
0x18bd   :  { %39643 = vmatprep.subr.bf16.mxu1 %v39642_v24 }
0x18be   :  { %v13373_v42 = vsub.f32 %v13289_v50, %v13372_v37  ;;  %v13365_v11 = vsub.f32 %v13363_v26, %v13364_v57 }
0x18c0   :  { %v13374_v59 = vand.u32 4294901760, %v13373_v42  ;;  %v13366_v30 = vand.u32 4294901760, %v13365_v11 }
0x18c2   :  { %v13375_v7 = vsub.f32 %v13373_v42, %v13374_v59 }
0x18c3   :  { %36382 = vmatmul.mubr.f32.vlgmr.msra.gmra.mrb[26].mxu1 %v12846_v28  ;;  %v13393_v28 = vsub.f32 %v13391_v36, %v13392_v4 }
0x18c4   :  { %39645 = vmatpush3.bf16.msra.mxu1 %v39642_v24  ;;  %36388 = vmatprep.mubr.f32.mxu1 %v12834_v53  ;;  %v13387_v24 = vand.u32 4294901760, %v13386_v20  ;;  %v13376_v47 = vand.u32 4294901760, %v13375_v7 }
0x18c5   :  { %39647 = vmatprep.subr.bf16.mxu1 %v44056_v54  ;;  %v13394_v1 = vand.u32 4294901760, %v13393_v28 }
0x18c7   :  { %v39654_v56 = vpack.c.bf16 %v13394_v1, %v13387_v24 }
0x18cb   :  { %36389 = vmatmul.mubr.f32.vlgmr.msra.gmra.mrb[26].mxu1 %v44061_v51 }
0x18cc   :  { %39649 = vmatpush3.bf16.msra.mxu1 %v44056_v54  ;;  %36395 = vmatprep.mubr.f32.mxu1 %v12834_v53  ;;  %v39658_v54 = vpack.c.bf16 %v13391_v36, %v13384_v23  ;;  %v39666_v53 = vpack.c.bf16 %v13392_v4, %v13385_v0 }
0x18cd   :  { %39651 = vmatprep.subr.bf16.mxu1 %v39650_v31 }
0x18d3   :  { %36396 = vmatmul.mubr.f32.vlgmr.msra.gmra.mrb[26].mxu1 %v44061_v51 }
0x18d4   :  { %36402 = vmatprep.mubr.f32.mxu1 %v13366_v30 }
0x18d5   :  { %39653 = vmatpush3.bf16.xpose.msra.mxu1 %v39650_v31 }
0x18d6   :  { %39655 = vmatprep.subr.bf16.mxu1 %v39654_v56 }
0x18dc   :  { %36403 = vmatmul.mubr.f32.vlgmr.msra.gmra.mrb[28].mxu1 %v13376_v47 }
0x18dd   :  { %39657 = vmatpush3.bf16.xpose.msra.mxu1 %v39654_v56  ;;  %36409 = vmatprep.mubr.f32.mxu1 %v13362_v27 }
0x18de   :  { %39659 = vmatprep.subr.bf16.mxu1 %v39658_v54 }
0x18e4   :  { %36410 = vmatmul.mubr.f32.vlgmr.msra.gmra.mrb[28].mxu1 %v13372_v37 }
0x18e5   :  { %39661 = vmatpush3.bf16.xpose.msra.mxu1 %v39658_v54  ;;  %36416 = vmatprep.mubr.f32.mxu1 %v13363_v26 }
0x18e6   :  { %39663 = vmatprep.subr.bf16.mxu1 %v39650_v31 }
0x18ec   :  { %36417 = vmatmul.mubr.f32.vlgmr.msra.gmra.mrb[28].mxu1 %v13373_v42 }
0x18ed   :  { %39665 = vmatpush3.bf16.xpose.msra.mxu1 %v39650_v31  ;;  %36423 = vmatprep.mubr.f32.mxu1 %v13364_v57 }
0x18ee   :  { %39667 = vmatprep.subr.bf16.mxu1 %v39666_v53 }
0x18f4   :  { %36424 = vmatmul.mubr.f32.vlgmr.msra.gmra.mrb[28].mxu1 %v13374_v59 }
0x18f5   :  { %39669 = vmatpush3.bf16.xpose.msra.mxu1 %v39666_v53  ;;  %36430 = vmatprep.mubr.f32.mxu1 %v13362_v27 }
0x18f6   :  { %39671 = vmatprep.subr.bf16.mxu1 %v39650_v31 }
0x18fc   :  { %36431 = vmatmul.mubr.f32.vlgmr.msra.gmra.mrb[28].mxu1 %v13372_v37 }
0x18fd   :  { %39673 = vmatpush3.bf16.xpose.msra.mxu1 %v39650_v31  ;;  %36437 = vmatprep.mubr.f32.mxu1 %v13362_v27 }
0x1904   :  { %36438 = vmatmul.mubr.f32.vlgmr.msra.gmra.mrb[28].mxu1 %v13372_v37 }
0x19a6   :  { %v36397_v51 = vpop.f32.mrb[26].mxu1 }
0x19a7   :  { %v13259_v22 = vpop.f32.mrb[27].mxu1 }
0x19d7   :  { %v36439_v9 = vpop.f32.mrb[28].mxu1 }
0x19d8   :  { %v41328_v49 = vadd.f32 %v43971_v17, %v36439_v9  ;;  %v13787_v36 = vpop.f32.mrb[29].mxu1 }
0x19d9   :  { %v41329_v18 = vadd.f32 %v43971_v17, %v13787_v36 }
0x19da   :  { %v13798_v23 = vmul.f32 0.17677669, %v41328_v49 }
0x19db   :  { %v13797_v26 = vmul.f32 0.17677669, %v41329_v18 }
0x19dc   :  { %v13802_v50 = vsel %vm2894_vm6, %v13798_v23, -inf }
0x19dd   :  { %13803 = vmax.xlane.f32.xlu1 %v13802_v50  ;;  %v13799_v4 = vsel %vm2890_vm7, %v13797_v26, -inf }
0x19de   :  { %13800 = vmax.xlane.f32.xlu0 %v13799_v4 }
0x19ee   :  { %13823 = vrot.lane.b32.xlu1 %v43948_v55, %s42395_s9 }
0x19f2   :  { %12204 = vrot.lane.b32.xlu1 %v44035_v61, %s42390_s30 }
0x19f6   :  { %12206 = vrot.lane.b32.xlu1 %v44033_v2, %s42390_s30 }
0x19fa   :  { %13273 = vrot.lane.b32.xlu1 %v36397_v51, %s42380_s2 }
0x1a6a   :  { %v13804_v17 = vpop.xlane.xlu1 %13803 }
0x1a6b   :  { %v13806_v27 = vsub.f32 %v13798_v23, %v13804_v17  ;;  %v13801_v0 = vpop.xlane.xlu0 %13800 }
0x1a6c   :  { %v13805_v37 = vsub.f32 %v13797_v26, %v13801_v0 }
0x1a6d   :  { %v13809_v57 = vmul.f32 1.442695, %v13806_v27 }
0x1a6e   :  { %v13807_v31 = vmul.f32 1.442695, %v13805_v37  ;;  %v13824_v28 = vpop.permute.xlu1 %13823 }
0x1a6f   :  { %42008 = vpow2.f32 %v13809_v57  ;;  %v13832_v59 = vsel %vm317_vm1, %v13824_v28, 0 }
0x1a70   :  { %42010 = vpow2.f32 %v13807_v31  ;;  %v13838_v24 = vand.u32 4294901760, %v13832_v59 }
0x1a72   :  { %v12205_v42 = vpop.permute.xlu1 %12204  ;;  %v13930_v7 = vsub.f32 %v13832_v59, %v13838_v24 }
0x1a73   :  { %12210 = vst.msk [vmem:[#allocation3] sm:$0xff] %vm4494_vm9, %v12205_v42 }
0x1a74   :  { %v13931_v54 = vand.u32 4294901760, %v13930_v7 }
0x1a76   :  { %v12207_v55 = vpop.permute.xlu1 %12206 }
0x1a77   :  { %12211 = vst.msk [vmem:[#allocation3 + $0x8] sm:$0xf] %vm4496_vm10, %v12207_v55 }
0x1a79   :  { %v42009_v61 = vpop.eup %42008 }
0x1a7a   :  { %v13274_v11 = vpop.permute.xlu1 %13273  ;;  %v13814_v2 = vsel %vm2894_vm6, %v42009_v61, 0.0  ;;  %v42011_v20 = vpop.eup %42010 }
0x1a7b   :  { %13278 = vst.msk [vmem:[#allocation3 + $0x8] sm:$0xf] %vm5565_vm11, %v13274_v11  ;;  %13815 = vadd.xlane.f32.xlu0 %v13814_v2  ;;  %v13811_v1 = vsel %vm2890_vm7, %v42011_v20, 0.0 }
0x1a7f   :  { %13812 = vadd.xlane.f32.xlu0 %v13811_v1 }
0x1a95   :  { %13821 = vrot.lane.b32.xlu0 %v43952_v39, %s42395_s9  ;;  %v13932_v39 = vsub.f32 %v13930_v7, %v13931_v54 }
0x1a97   :  { %v13933_v0 = vand.u32 4294901760, %v13932_v39 }
0x1a99   :  { %13271 = vrot.lane.b32.xlu0 %v13259_v22, %s42380_s2 }
0x1b08   :  { %v13816_v30 = vpop.xlane.xlu0 %13815 }
0x1b09   :  { %42012 = vrcp.f32 %v13816_v30 }
0x1b0c   :  { %v13813_v56 = vpop.xlane.xlu0 %13812 }
0x1b0d   :  { %42014 = vrcp.f32 %v13813_v56  ;;  %v32988_v56 = vld [vmem:[%s45744_s8 + $0x28] sm:$0xff] }
0x1b10   :  { %v13822_v47 = vpop.permute.xlu0 %13821 }
0x1b11   :  { %v13835_v53 = vand.u32 4294901760, %v13822_v47 }
0x1b13   :  { %v42013_v51 = vpop.eup %42012  ;;  %v39674_v9 = vpack.c.bf16 %v13838_v24, %v13835_v53  ;;  %v13923_v49 = vsub.f32 %v13822_v47, %v13835_v53  ;;  %v32987_v24 = vld [vmem:[%s45744_s8 + $0x20] sm:$0xff]  ;;  %v32990_v53 = vld [vmem:[%s45744_s8 + $0x38] sm:$0xff] }
0x1b14   :  { %v13820_v36 = vmul.f32 %v42013_v51, %v42009_v61  ;;  %v13272_v18 = vpop.permute.xlu0 %13271  ;;  %v14361_v47 = vand.u32 4294901760, %v32987_v24 }
0x1b15   :  { %v13924_v23 = vand.u32 4294901760, %v13923_v49  ;;  %13277 = vst.msk [vmem:[#allocation3] sm:$0xff] %vm5563_vm12, %v13272_v18  ;;  %39675 = vmatprep.subr.bf16.mxu0 %v39674_v9  ;;  %v39682_v30 = vpack.c.bf16 %v13930_v7, %v13923_v49  ;;  %v32989_v7 = vld [vmem:[%s45744_s8 + $0x30] sm:$0xff] }
0x1b16   :  { %39677 = vmatpush3.bf16.msra.mxu0 %v39674_v9  ;;  %v13830_v22 = vsel %vm2890_vm7, %v13820_v36, 0  ;;  %v14367_v51 = vand.u32 4294901760, %v32989_v7 }
0x1b17   :  { %v42015_v26 = vpop.eup %42014  ;;  %v13925_v50 = vsub.f32 %v13923_v49, %v13924_v23  ;;  %v13911_v4 = vand.u32 4294901760, %v13830_v22 }
0x1b18   :  { %v13819_v17 = vmul.f32 %v42015_v26, %v42011_v20  ;;  %v39690_v20 = vpack.c.bf16 %v13931_v54, %v13924_v23  ;;  %v14364_v54 = vand.u32 4294901760, %v32988_v56  ;;  %v14451_v23 = vsub.f32 %v32987_v24, %v14361_v47 }
0x1b19   :  { %v13926_v27 = vand.u32 4294901760, %v13925_v50  ;;  %v13912_v37 = vsub.f32 %v13830_v22, %v13911_v4 }
0x1b1a   :  { %v13827_v57 = vsel %vm2890_vm7, %v13819_v17, 0  ;;  %v44111_v49 = vpack.c.bf16 %v14364_v54, %v14361_v47  ;;  %v14458_v39 = vsub.f32 %v32988_v56, %v14364_v54  ;;  %v14452_v26 = vand.u32 4294901760, %v14451_v23 }
0x1b1b   :  { %v39678_v31 = vpack.c.bf16 %v13933_v0, %v13926_v27  ;;  %v13901_v28 = vand.u32 4294901760, %v13827_v57  ;;  %v13913_v42 = vand.u32 4294901760, %v13912_v37  ;;  %v14465_v27 = vsub.f32 %v32989_v7, %v14367_v51 }
0x1b1c   :  { %46152 = vst [vmem:[#allocation110_spill] sm:$0xff] %v44111_v49  ;;  %v14459_v50 = vand.u32 4294901760, %v14458_v39 }
0x1b1d   :  { %39679 = vmatprep.subr.bf16.mxu0 %v39678_v31  ;;  %v13902_v55 = vsub.f32 %v13827_v57, %v13901_v28  ;;  %v13914_v11 = vsub.f32 %v13912_v37, %v13913_v42 }
0x1b1e   :  { %v14460_v17 = vsub.f32 %v14458_v39, %v14459_v50 }
0x1b1f   :  { %v13903_v61 = vand.u32 4294901760, %v13902_v55  ;;  %v13915_v59 = vand.u32 4294901760, %v13914_v11 }
0x1b20   :  { %v14461_v57 = vand.u32 4294901760, %v14460_v17 }
0x1b21   :  { %v13904_v2 = vsub.f32 %v13902_v55, %v13903_v61 }
0x1b23   :  { %v13905_v1 = vand.u32 4294901760, %v13904_v2 }
0x1b25   :  { %36444 = vmatprep.mubr.f32.mxu0 %v13905_v1 }
0x1b26   :  { %36445 = vmatmul.mubr.f32.vlgmr.msra.gmra.mrb[32].mxu0 %v13915_v59  ;;  %v44126_v59 = vpack.c.bf16 %v14458_v39, %v14451_v23 }
0x1b27   :  { %39681 = vmatpush3.bf16.msra.mxu0 %v39678_v31  ;;  %36451 = vmatprep.mubr.f32.mxu0 %v13901_v28  ;;  %v14466_v31 = vand.u32 4294901760, %v14465_v27 }
0x1b28   :  { %39683 = vmatprep.subr.bf16.mxu0 %v39682_v30  ;;  %46156 = vst [vmem:[#allocation114_spill] sm:$0xff] %v44126_v59 }
0x1b2e   :  { %36452 = vmatmul.mubr.f32.vlgmr.msra.gmra.mrb[32].mxu0 %v13911_v4 }
0x1b2f   :  { %39685 = vmatpush3.bf16.msra.mxu0 %v39682_v30  ;;  %36458 = vmatprep.mubr.f32.mxu0 %v13902_v55  ;;  %v14467_v55 = vsub.f32 %v14465_v27, %v14466_v31 }
0x1b30   :  { %39687 = vmatprep.subr.bf16.mxu0 %v39674_v9 }
0x1b31   :  { %v14468_v11 = vand.u32 4294901760, %v14467_v55 }
0x1b36   :  { %36459 = vmatmul.mubr.f32.vlgmr.msra.gmra.mrb[32].mxu0 %v13912_v37 }
0x1b37   :  { %39689 = vmatpush3.bf16.msra.mxu0 %v39674_v9  ;;  %36465 = vmatprep.mubr.f32.mxu0 %v13903_v61 }
0x1b38   :  { %39691 = vmatprep.subr.bf16.mxu0 %v39690_v20 }
0x1b3e   :  { %36466 = vmatmul.mubr.f32.vlgmr.msra.gmra.mrb[32].mxu0 %v13913_v42 }
0x1b3f   :  { %39693 = vmatpush3.bf16.msra.mxu0 %v39690_v20  ;;  %36472 = vmatprep.mubr.f32.mxu0 %v13901_v28  ;;  %v44130_v20 = vpack.c.bf16 %v14459_v50, %v14452_v26 }
0x1b40   :  { %39695 = vmatprep.subr.bf16.mxu0 %v39674_v9 }
0x1b41   :  { %46158 = vst [vmem:[#allocation116_spill] sm:$0xff] %v44130_v20 }
0x1b46   :  { %36473 = vmatmul.mubr.f32.vlgmr.msra.gmra.mrb[32].mxu0 %v13911_v4 }
0x1b47   :  { %39697 = vmatpush3.bf16.msra.mxu0 %v39674_v9  ;;  %36479 = vmatprep.mubr.f32.mxu0 %v13901_v28  ;;  %v14370_v9 = vand.u32 4294901760, %v32990_v53 }
0x1b48   :  { %39699 = vmatprep.subr.bf16.mxu0 %v44111_v49 }
0x1b49   :  { %v44113_v36 = vpack.c.bf16 %v14370_v9, %v14367_v51  ;;  %v14472_v0 = vsub.f32 %v32990_v53, %v14370_v9 }
0x1b4b   :  { %46153 = vst [vmem:[#allocation111_spill] sm:$0xff] %v44113_v36  ;;  %v14473_v28 = vand.u32 4294901760, %v14472_v0  ;;  %v44128_v30 = vpack.c.bf16 %v14472_v0, %v14465_v27 }
0x1b4d   :  { %v14474_v61 = vsub.f32 %v14472_v0, %v14473_v28  ;;  %46157 = vst [vmem:[#allocation115_spill] sm:$0xff] %v44128_v30  ;;  %v44132_v24 = vpack.c.bf16 %v14473_v28, %v14466_v31  ;;  %v33022_v0 = vld [vmem:[#allocation9 + $0x1] ss:$0 sm:$0xff] }
0x1b4e   :  { %36480 = vmatmul.mubr.f32.vlgmr.msra.gmra.mrb[32].mxu0 %v13911_v4  ;;  %v14453_v4 = vsub.f32 %v14451_v23, %v14452_v26 }
0x1b4f   :  { %39701 = vmatpush3.bf16.msra.mxu0 %v44111_v49  ;;  %v14475_v2 = vand.u32 4294901760, %v14474_v61  ;;  %46159 = vst [vmem:[#allocation117_spill] sm:$0xff] %v44132_v24 }
0x1b50   :  { %39703 = vmatprep.subr.bf16.mxu0 %v44113_v36  ;;  %v14454_v37 = vand.u32 4294901760, %v14453_v4 }
0x1b51   :  { %v44124_v1 = vpack.c.bf16 %v14475_v2, %v14468_v11 }
0x1b52   :  { %v44121_v42 = vpack.c.bf16 %v14461_v57, %v14454_v37 }
0x1b53   :  { %39705 = vmatpush3.bf16.msra.mxu0 %v44113_v36  ;;  %46155 = vst [vmem:[#allocation113_spill] sm:$0xff] %v44124_v1 }
0x1b54   :  { %46154 = vst [vmem:[#allocation112_spill] sm:$0xff] %v44121_v42  ;;  %39707 = vmatprep.subr.bf16.mxu0 %v44121_v42 }
0x1c21   :  { %v36481_v18 = vpop.f32.mrb[32].mxu0 }
0x1c22   :  { %14340 = vrot.lane.b32.xlu1 %v36481_v18, %s42396_s0  ;;  %v14326_v22 = vpop.f32.mrb[33].mxu0 }
0x1c23   :  { %14338 = vrot.lane.b32.xlu0 %v14326_v22, %s42396_s0 }
0x1c94   :  { %v14341_v56 = vpop.permute.xlu1 %14340 }
0x1c95   :  { %14345 = vst.msk [vmem:[#allocation3 + $0x8] sm:$0xf] %vm6634_vm13, %v14341_v56  ;;  %v14339_v7 = vpop.permute.xlu0 %14338 }
0x1c96   :  { %14344 = vst.msk [vmem:[#allocation3] sm:$0xff] %vm6632_vm14, %v14339_v7 }
0x1c9c   :  { %v14347_v47 = vld [vmem:[#allocation3 + $0x8] sm:$0xf] }
0x1c9d   :  { %v14346_v54 = vld [vmem:[#allocation3] sm:$0xff]  ;;  %v14358_v53 = vsel %vm772_vm4, %v14347_v47, 0 }
0x1c9e   :  { %v14355_v51 = vsel %vm772_vm4, %v14346_v54, 0  ;;  %v14439_v9 = vand.u32 4294901760, %v14358_v53 }
0x1c9f   :  { %v14429_v18 = vand.u32 4294901760, %v14355_v51 }
0x1ca0   :  { %v14440_v23 = vsub.f32 %v14358_v53, %v14439_v9 }
0x1ca1   :  { %v14430_v39 = vsub.f32 %v14355_v51, %v14429_v18 }
0x1ca2   :  { %v14441_v22 = vand.u32 4294901760, %v14440_v23 }
0x1ca3   :  { %v14431_v26 = vand.u32 4294901760, %v14430_v39 }
0x1ca4   :  { %v14442_v50 = vsub.f32 %v14440_v23, %v14441_v22 }
0x1ca5   :  { %v14432_v4 = vsub.f32 %v14430_v39, %v14431_v26 }
0x1ca6   :  { %v14443_v27 = vand.u32 4294901760, %v14442_v50  ;;  %v32993_v50 = vld [vmem:[%s45750_s14 + $0x30] sm:$0xff] }
0x1ca7   :  { %v14433_v17 = vand.u32 4294901760, %v14432_v4 }
0x1ca9   :  { %36490 = vmatprep.mubr.f32.mxu0 %v14433_v17 }
0x1caa   :  { %36491 = vmatmul.mubr.f32.vlgmr.msra.gmra.mrb[34].mxu0 %v14443_v27  ;;  %v32994_v27 = vld [vmem:[%s45750_s14 + $0x38] sm:$0xff] }
0x1cab   :  { %39709 = vmatpush3.bf16.msra.mxu0 %v44121_v42  ;;  %36501 = vmatprep.mubr.f32.mxu0 %v14429_v18 }
0x1cac   :  { %39711 = vmatprep.subr.bf16.mxu0 %v44124_v1 }
0x1caf   :  { %39713 = vmatpush3.bf16.msra.mxu0 %v44124_v1 }
0x1cb0   :  { %39715 = vmatprep.subr.bf16.mxu0 %v44126_v59 }
0x1cb2   :  { %36502 = vmatmul.mubr.f32.vlgmr.msra.gmra.mrb[34].mxu0 %v14439_v9 }
0x1cb3   :  { %39717 = vmatpush3.bf16.msra.mxu0 %v44126_v59  ;;  %36512 = vmatprep.mubr.f32.mxu0 %v14430_v39  ;;  %v33006_v59 = vld [vmem:[%s45752_s16 + $0xd8] sm:$0xff] }
0x1cb4   :  { %39719 = vmatprep.subr.bf16.mxu0 %v44128_v30  ;;  %v15518_v42 = vand.u32 4294901760, %v33006_v59 }
0x1cb7   :  { %39721 = vmatpush3.bf16.msra.mxu0 %v44128_v30 }
0x1cb8   :  { %39723 = vmatprep.subr.bf16.mxu0 %v44111_v49 }
0x1cba   :  { %36513 = vmatmul.mubr.f32.vlgmr.msra.gmra.mrb[34].mxu0 %v14440_v23 }
0x1cbb   :  { %39725 = vmatpush3.bf16.msra.mxu0 %v44111_v49  ;;  %36523 = vmatprep.mubr.f32.mxu0 %v14431_v26  ;;  %v32992_v26 = vld [vmem:[%s45750_s14 + $0x28] sm:$0xff] }
0x1cbc   :  { %39727 = vmatprep.subr.bf16.mxu0 %v44113_v36  ;;  %v14952_v17 = vand.u32 4294901760, %v32992_v26 }
0x1cbf   :  { %39729 = vmatpush3.bf16.msra.mxu0 %v44113_v36 }
0x1cc0   :  { %39731 = vmatprep.subr.bf16.mxu0 %v44130_v20 }
0x1cc2   :  { %36524 = vmatmul.mubr.f32.vlgmr.msra.gmra.mrb[34].mxu0 %v14441_v22  ;;  %v32991_v22 = vld [vmem:[%s45750_s14 + $0x20] sm:$0xff] }
0x1cc3   :  { %39733 = vmatpush3.bf16.msra.mxu0 %v44130_v20  ;;  %36534 = vmatprep.mubr.f32.mxu0 %v14429_v18  ;;  %v14949_v4 = vand.u32 4294901760, %v32991_v22 }
0x1cc4   :  { %39735 = vmatprep.subr.bf16.mxu0 %v44132_v24 }
0x1cc7   :  { %39737 = vmatpush3.bf16.msra.mxu0 %v44132_v24 }
0x1cc8   :  { %39739 = vmatprep.subr.bf16.mxu0 %v44111_v49 }
0x1cca   :  { %36535 = vmatmul.mubr.f32.vlgmr.msra.gmra.mrb[34].mxu0 %v14439_v9 }
0x1ccb   :  { %39741 = vmatpush3.bf16.msra.mxu0 %v44111_v49  ;;  %36545 = vmatprep.mubr.f32.mxu0 %v14429_v18 }
0x1ccc   :  { %39743 = vmatprep.subr.bf16.mxu0 %v44113_v36 }
0x1ccf   :  { %39745 = vmatpush3.bf16.msra.mxu0 %v44113_v36 }
0x1cd2   :  { %36546 = vmatmul.mubr.f32.vlgmr.msra.gmra.mrb[34].mxu0 %v14439_v9 }
0x1da5   :  { %v36547_v37 = vpop.f32.mrb[34].mxu0 }
0x1da6   :  { %v41330_v57 = vadd.f32 %v36547_v37, %v33022_v0  ;;  %v14878_v31 = vpop.f32.mrb[35].mxu0  ;;  %v14958_v37 = vand.u32 4294901760, %v32994_v27 }
0x1da7   :  { %v41331_v28 = vadd.f32 %v33022_v0, %v14878_v31  ;;  %v14955_v0 = vand.u32 4294901760, %v32993_v50 }
0x1da8   :  { %v14889_v55 = vadd.f32 %v41330_v57, %v43733_v32  ;;  %v44183_v57 = vpack.c.bf16 %v14952_v17, %v14949_v4 }
0x1da9   :  { %v14888_v61 = vadd.f32 %v41331_v28, %v43735_v16  ;;  %v44185_v31 = vpack.c.bf16 %v14958_v37, %v14955_v0  ;;  %v15039_v28 = vsub.f32 %v32991_v22, %v14949_v4 }
0x1daa   :  { %v33024_v11 = vclamps-f32 %v14889_v55, 1000000.0  ;;  %39747 = vmatprep.subr.bf16.mxu1 %v44183_v57  ;;  %v15046_v55 = vsub.f32 %v32992_v26, %v14952_v17 }
0x1dab   :  { %v33023_v2 = vclamps-f32 %v14888_v61, 1000000.0  ;;  %39749 = vmatpush3.bf16.msra.mxu1 %v44183_v57  ;;  %v15040_v61 = vand.u32 4294901760, %v15039_v28 }
0x1dac   :  { %v14897_v56 = vsel %vm768_vm3, %v33024_v11, 0.0  ;;  %39751 = vmatprep.subr.bf16.mxu1 %v44185_v31  ;;  %v44196_v17 = vpack.c.bf16 %v15046_v55, %v15039_v28 }
0x1dad   :  { %14898 = vadd.xlane.f32.xlu1 %v14897_v56  ;;  %v14894_v7 = vsel %vm772_vm4, %v33023_v2, 0.0 }
0x1dae   :  { %14895 = vadd.xlane.f32.xlu0 %v14894_v7  ;;  %v15053_v7 = vsub.f32 %v32993_v50, %v14955_v0  ;;  %46161 = vst [vmem:[#allocation119_spill] sm:$0xff] %v44196_v17  ;;  %v32995_v0 = vld [vmem:[%s45752_s16 + $0x80] sm:$0xff] }
0x1daf   :  { %39753 = vmatpush3.bf16.msra.mxu1 %v44185_v31 }
0x1e3a   :  { %v14899_v47 = vpop.xlane.xlu1 %14898 }
0x1e3b   :  { %v14901_v54 = vmul.f32 0.03125, %v14899_v47  ;;  %v14896_v53 = vpop.xlane.xlu0 %14895  ;;  %v15060_v47 = vsub.f32 %v32994_v27, %v14958_v37  ;;  %v32996_v37 = vld [vmem:[%s45752_s16 + $0x88] sm:$0xff] }
0x1e3c   :  { %v14900_v51 = vmul.f32 0.03125, %v14896_v53 }
0x1e3d   :  { %v44161_v9 = vsub.f32 %v33024_v11, %v14901_v54  ;;  %v15047_v11 = vand.u32 4294901760, %v15046_v55  ;;  %v44198_v24 = vpack.c.bf16 %v15060_v47, %v15053_v7 }
0x1e3e   :  { %v44163_v18 = vsub.f32 %v33023_v2, %v14900_v51  ;;  %v15041_v2 = vsub.f32 %v15039_v28, %v15040_v61  ;;  %v15054_v51 = vand.u32 4294901760, %v15053_v7  ;;  %v32997_v28 = vld [vmem:[%s45752_s16 + $0x90] sm:$0xff] }
0x1e3f   :  { %v14905_v23 = vmul.f32 %v44161_v9, %v44161_v9  ;;  %v15048_v56 = vsub.f32 %v15046_v55, %v15047_v11  ;;  %46162 = vst [vmem:[#allocation120_spill] sm:$0xff] %v44198_v24  ;;  %v44200_v50 = vpack.c.bf16 %v15047_v11, %v15040_v61  ;;  %v32998_v55 = vld [vmem:[%s45752_s16 + $0x98] sm:$0xff]  ;;  %v15491_v61 = vand.u32 4294901760, %v32997_v28 }
0x1e40   :  { %v14904_v32 = vmul.f32 %v44163_v18, %v44163_v18  ;;  %v15042_v54 = vand.u32 4294901760, %v15041_v2  ;;  %v15485_v2 = vand.u32 4294901760, %v32995_v0  ;;  %v15494_v11 = vand.u32 4294901760, %v32998_v55 }
0x1e41   :  { %v14909_v39 = vsel %vm768_vm3, %v14905_v23, 0.0  ;;  %v15049_v53 = vand.u32 4294901760, %v15048_v56  ;;  %v15055_v23 = vsub.f32 %v15053_v7, %v15054_v51  ;;  %46163 = vst [vmem:[#allocation121_spill] sm:$0xff] %v44200_v50  ;;  %v15488_v56 = vand.u32 4294901760, %v32996_v37 }
0x1e42   :  { %v14906_v16 = vsel %vm772_vm4, %v14904_v32, 0.0  ;;  %v15061_v32 = vand.u32 4294901760, %v15060_v47 }
0x1e43   :  { %14907 = vadd.xlane.f32.xlu0 %v14906_v16  ;;  %v44191_v16 = vpack.c.bf16 %v15049_v53, %v15042_v54  ;;  %v15056_v22 = vand.u32 4294901760, %v15055_v23  ;;  %v44216_v7 = vpack.c.bf16 %v15488_v56, %v15485_v2  ;;  %v44220_v54 = vsub.f32 %v32996_v37, %v15488_v56  ;;  %v32999_v23 = vld [vmem:[%s45752_s16 + $0xa0] sm:$0xff]  ;;  %v33001_v56 = vld [vmem:[%s45752_s16 + $0xb0] sm:$0xff] }
0x1e44   :  { %v44202_v27 = vpack.c.bf16 %v15061_v32, %v15054_v51  ;;  %v44222_v53 = vpack.c.bf16 %v15494_v11, %v15491_v61  ;;  %v44224_v51 = vsub.f32 %v32997_v28, %v15491_v61  ;;  %v33002_v28 = vld [vmem:[%s45752_s16 + $0xb8] sm:$0xff] }
0x1e45   :  { %39755 = vmatprep.subr.bf16.mxu1 %v44191_v16  ;;  %39795 = vmatprep.subr.bf16.mxu0 %v44216_v7  ;;  %v15506_v61 = vand.u32 4294901760, %v33002_v28 }
0x1e46   :  { %46164 = vst [vmem:[#allocation122_spill] sm:$0xff] %v44202_v27  ;;  %39797 = vmatpush3.bf16.msra.mxu0 %v44216_v7 }
0x1e47   :  { %14910 = vadd.xlane.f32.xlu0 %v14909_v39  ;;  %v15062_v39 = vsub.f32 %v15060_v47, %v15061_v32  ;;  %v44218_v47 = vsub.f32 %v32995_v0, %v15485_v2  ;;  %v44226_v32 = vsub.f32 %v32998_v55, %v15494_v11  ;;  %39799 = vmatprep.subr.bf16.mxu0 %v44222_v53  ;;  %v15503_v55 = vand.u32 4294901760, %v33001_v56 }
0x1e49   :  { %v15063_v26 = vand.u32 4294901760, %v15062_v39  ;;  %v33000_v39 = vld [vmem:[%s45752_s16 + $0xa8] sm:$0xff]  ;;  %v44251_v11 = vsub.f32 %v33001_v56, %v15503_v55 }
0x1e4a   :  { %39801 = vmatpush3.bf16.msra.mxu0 %v44222_v53 }
0x1e4b   :  { %v44194_v4 = vpack.c.bf16 %v15063_v26, %v15056_v22  ;;  %v15497_v22 = vand.u32 4294901760, %v32999_v23  ;;  %v15500_v26 = vand.u32 4294901760, %v33000_v39 }
0x1e4d   :  { %46160 = vst [vmem:[#allocation118_spill] sm:$0xff] %v44194_v4  ;;  %v44237_v0 = vpack.c.bf16 %v15500_v26, %v15497_v22  ;;  %v44239_v37 = vsub.f32 %v32999_v23, %v15497_v22  ;;  %v44241_v2 = vsub.f32 %v33000_v39, %v15500_v26  ;;  %v44253_v23 = vpack.c.bf16 %v15506_v61, %v15503_v55  ;;  %v33003_v22 = vld [vmem:[%s45752_s16 + $0xc0] sm:$0xff]  ;;  %v33004_v26 = vld [vmem:[%s45752_s16 + $0xc8] sm:$0xff] }
0x1e4e   :  { %v44255_v39 = vsub.f32 %v33002_v28, %v15506_v61  ;;  %v15509_v20 = vand.u32 4294901760, %v33003_v22  ;;  %v15512_v30 = vand.u32 4294901760, %v33004_v26  ;;  %v33005_v61 = vld [vmem:[%s45752_s16 + $0xd0] sm:$0xff] }
0x1e4f   :  { %39803 = vmatprep.subr.bf16.mxu0 %v44237_v0  ;;  %v15515_v1 = vand.u32 4294901760, %v33005_v61 }
0x1e50   :  { %39805 = vmatpush3.bf16.msra.mxu0 %v44237_v0  ;;  %v44265_v56 = vpack.c.bf16 %v15512_v30, %v15509_v20  ;;  %v44267_v55 = vsub.f32 %v33003_v22, %v15509_v20  ;;  %v44269_v28 = vsub.f32 %v33004_v26, %v15512_v30  ;;  %v44283_v30 = vsub.f32 %v33006_v59, %v15518_v42 }
0x1e51   :  { %39807 = vmatprep.subr.bf16.mxu0 %v44253_v23  ;;  %v44279_v36 = vsub.f32 %v33005_v61, %v15515_v1  ;;  %v44281_v20 = vpack.c.bf16 %v15518_v42, %v15515_v1  ;;  %v33026_v42 = vld [vmem:[#allocation12 + $0x1] ss:$0 sm:$0xff] }
0x1e54   :  { %39809 = vmatpush3.bf16.msra.mxu0 %v44253_v23 }
0x1e55   :  { %39811 = vmatprep.subr.bf16.mxu0 %v44265_v56 }
0x1e58   :  { %39813 = vmatpush3.bf16.msra.mxu0 %v44265_v56 }
0x1e59   :  { %39815 = vmatprep.subr.bf16.mxu0 %v44281_v20 }
0x1e5c   :  { %39817 = vmatpush3.bf16.msra.mxu0 %v44281_v20 }
0x1ed0   :  { %v14908_v22 = vpop.xlane.xlu0 %14907 }
0x1ed1   :  { %v14912_v26 = vmul.f32 0.03125, %v14908_v22 }
0x1ed3   :  { %v14914_v49 = vadd.f32 1e-06, %v14912_v26 }
0x1ed4   :  { %v14911_v15 = vpop.xlane.xlu0 %14910 }
0x1ed5   :  { %42016 = vrsqrt.f32 %v14914_v49  ;;  %v14913_v40 = vmul.f32 0.03125, %v14911_v15 }
0x1ed7   :  { %v14915_v45 = vadd.f32 1e-06, %v14913_v40 }
0x1ed9   :  { %42018 = vrsqrt.f32 %v14915_v45 }
0x1edf   :  { %v42017_v61 = vpop.eup %42016 }
0x1ee0   :  { %v14918_v1 = vmul.f32 %v42017_v61, %v44163_v18 }
0x1ee2   :  { %v14926_v59 = vmul.f32 %v33025_v46, %v14918_v1 }
0x1ee3   :  { %v42019_v52 = vpop.eup %42018 }
0x1ee4   :  { %v14919_v60 = vmul.f32 %v42019_v52, %v44161_v9  ;;  %v44290_v25 = vadd.f32 %v33026_v42, %v14926_v59  ;;  %v45963_v59 = vand.u32 4294901760, %v44224_v51 }
0x1ee6   :  { %v14927_v19 = vmul.f32 %v33025_v46, %v14919_v60  ;;  %v14943_v22 = vsel %vm772_vm4, %v44290_v25, 0  ;;  %v45973_v60 = vand.u32 4294901760, %v44218_v47  ;;  %v45966_v46 = vand.u32 4294901760, %v44220_v54 }
0x1ee7   :  { %v15017_v26 = vand.u32 4294901760, %v14943_v22 }
0x1ee8   :  { %v14935_v49 = vadd.f32 %v33026_v42, %v14927_v19  ;;  %v15588_v19 = vsub.f32 %v44218_v47, %v45973_v60  ;;  %v15595_v42 = vsub.f32 %v44220_v54, %v45966_v46 }
0x1ee9   :  { %v15018_v15 = vsub.f32 %v14943_v22, %v15017_v26  ;;  %v45962_v22 = vand.u32 4294901760, %v44226_v32 }
0x1eea   :  { %v14946_v45 = vsel %vm772_vm4, %v14935_v49, 0  ;;  %v45965_v49 = vand.u32 4294901760, %v44241_v2 }
0x1eeb   :  { %v15019_v40 = vand.u32 4294901760, %v15018_v15  ;;  %v44295_v44 = vand.u32 4294901760, %v14946_v45 }
0x1eed   :  { %v15020_v18 = vsub.f32 %v15018_v15, %v15019_v40  ;;  %v15028_v61 = vsub.f32 %v14946_v45, %v44295_v44  ;;  %v15596_v45 = vand.u32 4294901760, %v15595_v42 }
0x1eef   :  { %v15021_v1 = vand.u32 4294901760, %v15020_v18  ;;  %v15029_v29 = vand.u32 4294901760, %v15028_v61  ;;  %v15609_v18 = vsub.f32 %v44226_v32, %v45962_v22 }
0x1ef1   :  { %36556 = vmatprep.mubr.f32.mxu1 %v15021_v1  ;;  %v15030_v52 = vsub.f32 %v15028_v61, %v15029_v29  ;;  %v15623_v1 = vsub.f32 %v44241_v2, %v45965_v49  ;;  %v15610_v22 = vand.u32 4294901760, %v15609_v18 }
0x1ef3   :  { %v15031_v9 = vand.u32 4294901760, %v15030_v52  ;;  %v45972_v52 = vand.u32 4294901760, %v44251_v11 }
0x1ef5   :  { %36557 = vmatmul.mubr.f32.vlgmr.msra.gmra.mrb[30].mxu1 %v15031_v9  ;;  %v45971_v9 = vand.u32 4294901760, %v44255_v39 }
0x1ef6   :  { %39757 = vmatpush3.bf16.msra.mxu1 %v44191_v16  ;;  %36567 = vmatprep.mubr.f32.mxu1 %v15017_v26 }
0x1ef7   :  { %39759 = vmatprep.subr.bf16.mxu1 %v44194_v4  ;;  %v15637_v49 = vsub.f32 %v44255_v39, %v45971_v9 }
0x1efa   :  { %39761 = vmatpush3.bf16.msra.mxu1 %v44194_v4 }
0x1efb   :  { %39763 = vmatprep.subr.bf16.mxu1 %v44196_v17 }
0x1efd   :  { %36568 = vmatmul.mubr.f32.vlgmr.msra.gmra.mrb[30].mxu1 %v44295_v44 }
0x1efe   :  { %39765 = vmatpush3.bf16.msra.mxu1 %v44196_v17  ;;  %36578 = vmatprep.mubr.f32.mxu1 %v15018_v15  ;;  %v15589_v15 = vand.u32 4294901760, %v15588_v19 }
0x1eff   :  { %39767 = vmatprep.subr.bf16.mxu1 %v44198_v24 }
0x1f00   :  { %v44344_v19 = vpack.c.bf16 %v15596_v45, %v15589_v15  ;;  %v45968_v15 = vand.u32 4294901760, %v44267_v55  ;;  %v45967_v45 = vand.u32 4294901760, %v44269_v28 }
0x1f02   :  { %39769 = vmatpush3.bf16.msra.mxu1 %v44198_v24  ;;  %46165 = vst [vmem:[#allocation123_spill] sm:$0xff] %v44344_v19 }
0x1f03   :  { %39771 = vmatprep.subr.bf16.mxu1 %v44183_v57 }
0x1f05   :  { %36579 = vmatmul.mubr.f32.vlgmr.msra.gmra.mrb[30].mxu1 %v15028_v61 }
0x1f06   :  { %39773 = vmatpush3.bf16.msra.mxu1 %v44183_v57  ;;  %36589 = vmatprep.mubr.f32.mxu1 %v15019_v40  ;;  %v15602_v40 = vsub.f32 %v44224_v51, %v45963_v59  ;;  %v15624_v59 = vand.u32 4294901760, %v15623_v1  ;;  %v15644_v1 = vsub.f32 %v44267_v55, %v45968_v15 }
0x1f07   :  { %39775 = vmatprep.subr.bf16.mxu1 %v44185_v31 }
0x1f08   :  { %v15603_v42 = vand.u32 4294901760, %v15602_v40 }
0x1f0a   :  { %39777 = vmatpush3.bf16.msra.mxu1 %v44185_v31  ;;  %v44354_v46 = vpack.c.bf16 %v15610_v22, %v15603_v42  ;;  %v15651_v22 = vsub.f32 %v44269_v28, %v45967_v45  ;;  %v45970_v42 = vand.u32 4294901760, %v44279_v36 }
0x1f0b   :  { %39779 = vmatprep.subr.bf16.mxu1 %v44200_v50 }
0x1f0c   :  { %46166 = vst [vmem:[#allocation124_spill] sm:$0xff] %v44354_v46 }
0x1f0d   :  { %36590 = vmatmul.mubr.f32.vlgmr.msra.gmra.mrb[30].mxu1 %v15029_v29  ;;  %v45964_v29 = vand.u32 4294901760, %v44239_v37 }
0x1f0e   :  { %39781 = vmatpush3.bf16.msra.mxu1 %v44200_v50  ;;  %36600 = vmatprep.mubr.f32.mxu1 %v15017_v26 }
0x1f0f   :  { %39783 = vmatprep.subr.bf16.mxu1 %v44202_v27  ;;  %v15616_v61 = vsub.f32 %v44239_v37, %v45964_v29  ;;  %v15630_v29 = vsub.f32 %v44251_v11, %v45972_v52 }
0x1f11   :  { %v15631_v18 = vand.u32 4294901760, %v15630_v29  ;;  %v15645_v29 = vand.u32 4294901760, %v15644_v1 }
0x1f12   :  { %39785 = vmatpush3.bf16.msra.mxu1 %v44202_v27 }
0x1f13   :  { %39787 = vmatprep.subr.bf16.mxu1 %v44183_v57 }
0x1f15   :  { %36601 = vmatmul.mubr.f32.vlgmr.msra.gmra.mrb[30].mxu1 %v44295_v44 }
0x1f16   :  { %39789 = vmatpush3.bf16.msra.mxu1 %v44183_v57  ;;  %36611 = vmatprep.mubr.f32.mxu1 %v15017_v26  ;;  %v15617_v26 = vand.u32 4294901760, %v15616_v61  ;;  %v15638_v61 = vand.u32 4294901760, %v15637_v49  ;;  %v15652_v49 = vand.u32 4294901760, %v15651_v22  ;;  %v33007_v22 = vld [vmem:[%s45752_s16 + $0xe0] sm:$0xff] }
0x1f17   :  { %39791 = vmatprep.subr.bf16.mxu1 %v44185_v31 }
0x1f18   :  { %v44360_v40 = vpack.c.bf16 %v15624_v59, %v15617_v26  ;;  %v44372_v59 = vpack.c.bf16 %v15638_v61, %v15631_v18  ;;  %v15658_v26 = vsub.f32 %v44279_v36, %v45970_v42  ;;  %v44383_v15 = vpack.c.bf16 %v15652_v49, %v15645_v29 }
0x1f19   :  { %v15521_v29 = vand.u32 4294901760, %v33007_v22 }
0x1f1a   :  { %39793 = vmatpush3.bf16.msra.mxu1 %v44185_v31  ;;  %46167 = vst [vmem:[#allocation125_spill] sm:$0xff] %v44360_v40  ;;  %46168 = vst [vmem:[#allocation126_spill] sm:$0xff] %v44372_v59  ;;  %v15659_v18 = vand.u32 4294901760, %v15658_v26 }
0x1f1b   :  { %39827 = vmatprep.subr.bf16.mxu1 %v44344_v19  ;;  %46169 = vst [vmem:[#allocation127_spill] sm:$0xff] %v44383_v15  ;;  %v44398_v26 = vsub.f32 %v33007_v22, %v15521_v29 }
0x1f1d   :  { %36612 = vmatmul.mubr.f32.vlgmr.msra.gmra.mrb[30].mxu1 %v44295_v44  ;;  %v45969_v44 = vand.u32 4294901760, %v44283_v30  ;;  %v45988_v42 = vand.u32 4294901760, %v44398_v26 }
0x1f1e   :  { %39829 = vmatpush3.bf16.msra.mxu1 %v44344_v19 }
0x1f1f   :  { %39831 = vmatprep.subr.bf16.mxu1 %v44354_v46  ;;  %v15665_v45 = vsub.f32 %v44283_v30, %v45969_v44  ;;  %v33010_v44 = vld [vmem:[%s45752_s16 + $0xf8] sm:$0xff]  ;;  %v15672_v22 = vsub.f32 %v44398_v26, %v45988_v42 }
0x1f20   :  { %v15530_v60 = vand.u32 4294901760, %v33010_v44 }
0x1f21   :  { %v15666_v61 = vand.u32 4294901760, %v15665_v45  ;;  %v33008_v45 = vld [vmem:[%s45752_s16 + $0xe8] sm:$0xff] }
0x1f22   :  { %39833 = vmatpush3.bf16.msra.mxu1 %v44354_v46  ;;  %v15524_v49 = vand.u32 4294901760, %v33008_v45 }
0x1f23   :  { %39835 = vmatprep.subr.bf16.mxu1 %v44360_v40  ;;  %v44387_v1 = vpack.c.bf16 %v15666_v61, %v15659_v18  ;;  %v33009_v61 = vld [vmem:[%s45752_s16 + $0xf0] sm:$0xff] }
0x1f24   :  { %v44400_v18 = vsub.f32 %v33008_v45, %v15524_v49  ;;  %v15527_v52 = vand.u32 4294901760, %v33009_v61 }
0x1f25   :  { %46170 = vst [vmem:[#allocation128_spill] sm:$0xff] %v44387_v1 }
0x1f26   :  { %39837 = vmatpush3.bf16.msra.mxu1 %v44360_v40  ;;  %v45989_v9 = vand.u32 4294901760, %v44400_v18 }
0x1f27   :  { %39839 = vmatprep.subr.bf16.mxu1 %v44372_v59 }
0x1f28   :  { %v15679_v45 = vsub.f32 %v44400_v18, %v45989_v9 }
0x1f2a   :  { %39841 = vmatpush3.bf16.msra.mxu1 %v44372_v59  ;;  %v15673_v59 = vand.u32 4294901760, %v15672_v22  ;;  %v15680_v40 = vand.u32 4294901760, %v15679_v45 }
0x1f2b   :  { %39843 = vmatprep.subr.bf16.mxu1 %v44383_v15 }
0x1f2c   :  { %v44422_v27 = vpack.c.bf16 %v15680_v40, %v15673_v59  ;;  %v44436_v40 = vpack.c.bf16 %v15524_v49, %v15521_v29  ;;  %v44441_v59 = vpack.c.bf16 %v15530_v60, %v15527_v52 }
0x1f2e   :  { %39845 = vmatpush3.bf16.msra.mxu1 %v44383_v15  ;;  %v44418_v15 = vsub.f32 %v33010_v44, %v15530_v60  ;;  %46171 = vst [vmem:[#allocation129_spill] sm:$0xff] %v44422_v27  ;;  %39819 = vmatprep.subr.bf16.mxu0 %v44436_v40  ;;  %v33027_v60 = vld [vmem:[#allocation16 + $0x1] ss:$0 sm:$0xff] }
0x1f2f   :  { %39847 = vmatprep.subr.bf16.mxu1 %v44387_v1  ;;  %39821 = vmatpush3.bf16.msra.mxu0 %v44436_v40 }
0x1f30   :  { %v45990_v19 = vand.u32 4294901760, %v44418_v15  ;;  %39823 = vmatprep.subr.bf16.mxu0 %v44441_v59 }
0x1f32   :  { %39849 = vmatpush3.bf16.msra.mxu1 %v44387_v1  ;;  %v44416_v1 = vsub.f32 %v33009_v61, %v15527_v52  ;;  %v15693_v9 = vsub.f32 %v44418_v15, %v45990_v19 }
0x1f33   :  { %39851 = vmatprep.subr.bf16.mxu1 %v44422_v27  ;;  %39825 = vmatpush3.bf16.msra.mxu0 %v44441_v59 }
0x1f34   :  { %v45991_v46 = vand.u32 4294901760, %v44416_v1  ;;  %v15694_v61 = vand.u32 4294901760, %v15693_v9  ;;  %v44447_v9 = vpack.c.bf16 %v44220_v54, %v44218_v47  ;;  %v44456_v29 = vpack.c.bf16 %v44418_v15, %v44416_v1 }
0x1f36   :  { %v15686_v42 = vsub.f32 %v44416_v1, %v45991_v46  ;;  %39853 = vmatpush3.bf16.msra.mxu1 %v44422_v27  ;;  %39859 = vmatprep.subr.bf16.mxu0 %v44447_v9  ;;  %46174 = vst [vmem:[#allocation132_spill] sm:$0xff] %v44456_v29 }
0x1f38   :  { %v15687_v44 = vand.u32 4294901760, %v15686_v42  ;;  %v44452_v42 = vpack.c.bf16 %v44400_v18, %v44398_v26 }
0x1f3a   :  { %v44432_v22 = vpack.c.bf16 %v15694_v61, %v15687_v44  ;;  %46173 = vst [vmem:[#allocation131_spill] sm:$0xff] %v44452_v42 }
0x1f3c   :  { %46172 = vst [vmem:[#allocation130_spill] sm:$0xff] %v44432_v22  ;;  %39855 = vmatprep.subr.bf16.mxu1 %v44432_v22 }
0x1f3d   :  { %39857 = vmatpush3.bf16.msra.mxu1 %v44432_v22 }
0x1f3e   :  { %39891 = vmatprep.subr.bf16.mxu1 %v44216_v7 }
0x1ff0   :  { %v36613_v52 = vpop.f32.mrb[30].mxu1 }
0x1ff1   :  { %v41332_v49 = vadd.f32 %v36613_v52, %v33027_v60  ;;  %v15466_v45 = vpop.f32.mrb[31].mxu1 }
0x1ff2   :  { %v41333_v44 = vadd.f32 %v33027_v60, %v15466_v45  ;;  %v44500_v45 = vpack.c.bf16 %v44283_v30, %v44279_v36 }
0x1ff3   :  { %v15477_v61 = vmax.f32 %v41332_v49, 0.0 }
0x1ff4   :  { %v15476_v19 = vmax.f32 %v41333_v44, 0.0  ;;  %v46175_v44 = vand.u32 4294901760, %v44218_v47  ;;  %v46181_v47 = vand.u32 4294901760, %v44239_v37 }
0x1ff5   :  { %v44458_v46 = vand.u32 4294901760, %v15477_v61 }
0x1ff6   :  { %v15565_v22 = vand.u32 4294901760, %v15476_v19 }
0x1ff7   :  { %v15576_v27 = vsub.f32 %v15477_v61, %v44458_v46  ;;  %v46176_v61 = vand.u32 4294901760, %v44220_v54  ;;  %v46182_v54 = vand.u32 4294901760, %v44241_v2 }
0x1ff8   :  { %v15566_v50 = vsub.f32 %v15476_v19, %v15565_v22  ;;  %36681 = vmatprep.mubr.f32.mxu1 %v15565_v22  ;;  %v44468_v19 = vpack.c.bf16 %v44226_v32, %v44224_v51 }
0x1ff9   :  { %v15577_v24 = vand.u32 4294901760, %v15576_v27  ;;  %36682 = vmatmul.mubr.f32.vlgmr.msra.gmra.mrb[32].mxu1 %v44458_v46 }
0x1ffa   :  { %39893 = vmatpush3.bf16.msra.mxu1 %v44216_v7  ;;  %v15567_v17 = vand.u32 4294901760, %v15566_v50 }
0x1ffb   :  { %v15578_v4 = vsub.f32 %v15576_v27, %v15577_v24  ;;  %39895 = vmatprep.subr.bf16.mxu1 %v44222_v53 }
0x1ffc   :  { %36751 = vmatprep.mubr.f32.mxu1 %v15567_v17  ;;  %v15568_v60 = vsub.f32 %v15566_v50, %v15567_v17  ;;  %v44475_v17 = vpack.c.bf16 %v44241_v2, %v44239_v37  ;;  %v46187_v37 = vand.u32 4294901760, %v44267_v55  ;;  %v46188_v2 = vand.u32 4294901760, %v44269_v28 }
0x1ffd   :  { %v15579_v49 = vand.u32 4294901760, %v15578_v4  ;;  %v44484_v4 = vpack.c.bf16 %v44255_v39, %v44251_v11 }
0x1ffe   :  { %39897 = vmatpush3.bf16.msra.mxu1 %v44222_v53  ;;  %v15569_v52 = vand.u32 4294901760, %v15568_v60  ;;  %v44517_v60 = vpack.c.bf16 %v46176_v61, %v46175_v44  ;;  %v44537_v44 = vpack.c.bf16 %v46182_v54, %v46181_v47  ;;  %v46199_v47 = vmov 0.0  }
0x1fff   :  { %39899 = vmatprep.subr.bf16.mxu1 %v44237_v0 }
0x2000   :  { %36646 = vmatprep.mubr.f32.mxu0 %v15569_v52  ;;  %46177 = vst [vmem:[#allocation133_spill] sm:$0xff] %v44517_v60  ;;  %v46179_v52 = vand.u32 4294901760, %v44226_v32  ;;  %46183 = vst [vmem:[#allocation135_spill] sm:$0xff] %v44537_v44 }
0x2001   :  { %36647 = vmatmul.mubr.f32.vlgmr.msra.gmra.mrb[36].mxu0 %v15579_v49 }
0x2002   :  { %39861 = vmatpush3.bf16.msra.mxu0 %v44447_v9  ;;  %39901 = vmatpush3.bf16.msra.mxu1 %v44237_v0 }
0x2003   :  { %36716 = vmatprep.mubr.f32.mxu0 %v15566_v50  ;;  %39863 = vmatprep.subr.bf16.mxu0 %v44468_v19  ;;  %v44492_v50 = vpack.c.bf16 %v44269_v28, %v44267_v55  ;;  %v46193_v55 = vand.u32 4294901760, %v44398_v26  ;;  %v46194_v28 = vand.u32 4294901760, %v44400_v18 }
0x2004   :  { %39903 = vmatprep.subr.bf16.mxu1 %v44253_v23 }
0x2006   :  { %39865 = vmatpush3.bf16.msra.mxu0 %v44468_v19  ;;  %39905 = vmatpush3.bf16.msra.mxu1 %v44253_v23 }
0x2007   :  { %39867 = vmatprep.subr.bf16.mxu0 %v44475_v17  ;;  %39907 = vmatprep.subr.bf16.mxu1 %v44265_v56 }
0x200a   :  { %39869 = vmatpush3.bf16.msra.mxu0 %v44475_v17  ;;  %39909 = vmatpush3.bf16.msra.mxu1 %v44265_v56 }
0x200b   :  { %39871 = vmatprep.subr.bf16.mxu0 %v44484_v4  ;;  %39911 = vmatprep.subr.bf16.mxu1 %v44281_v20 }
0x200e   :  { %39873 = vmatpush3.bf16.msra.mxu0 %v44484_v4  ;;  %39913 = vmatpush3.bf16.msra.mxu1 %v44281_v20 }
0x200f   :  { %39875 = vmatprep.subr.bf16.mxu0 %v44492_v50  ;;  %39915 = vmatprep.subr.bf16.mxu1 %v44436_v40 }
0x2012   :  { %39877 = vmatpush3.bf16.msra.mxu0 %v44492_v50  ;;  %39917 = vmatpush3.bf16.msra.mxu1 %v44436_v40 }
0x2013   :  { %39879 = vmatprep.subr.bf16.mxu0 %v44500_v45  ;;  %39919 = vmatprep.subr.bf16.mxu1 %v44441_v59 }
0x2016   :  { %39881 = vmatpush3.bf16.msra.mxu0 %v44500_v45  ;;  %39921 = vmatpush3.bf16.msra.mxu1 %v44441_v59 }
0x2017   :  { %39883 = vmatprep.subr.bf16.mxu0 %v44452_v42  ;;  %39955 = vmatprep.subr.bf16.mxu1 %v44216_v7 }
0x2019   :  { %36752 = vmatmul.mubr.f32.vlgmr.msra.gmra.mrb[34].mxu1 %v15577_v24  ;;  %v46178_v24 = vand.u32 4294901760, %v44224_v51  ;;  %v46185_v51 = vand.u32 4294901760, %v44255_v39  ;;  %v46191_v39 = vand.u32 4294901760, %v44283_v30  ;;  %v46197_v30 = vand.u32 4294901760, %v44418_v15  ;;  %v33032_v15 = vld [vmem:[%s46044_s4 + $0x8] sm:$0xff] }
0x201a   :  { %39885 = vmatpush3.bf16.msra.mxu0 %v44452_v42  ;;  %39957 = vmatpush3.bf16.msra.mxu1 %v44216_v7 }
0x201b   :  { %36821 = vmatprep.mubr.f32.mxu1 %v15565_v22  ;;  %39887 = vmatprep.subr.bf16.mxu0 %v44456_v29  ;;  %v44528_v49 = vpack.c.bf16 %v46179_v52, %v46178_v24  ;;  %v44577_v24 = vpack.c.bf16 %v46194_v28, %v46193_v55 }
0x201c   :  { %39959 = vmatprep.subr.bf16.mxu1 %v44222_v53 }
0x201d   :  { %46180 = vst [vmem:[#allocation134_spill] sm:$0xff] %v44528_v49  ;;  %46195 = vst [vmem:[#allocation139_spill] sm:$0xff] %v44577_v24 }
0x201e   :  { %39889 = vmatpush3.bf16.msra.mxu0 %v44456_v29  ;;  %39961 = vmatpush3.bf16.msra.mxu1 %v44222_v53 }
0x201f   :  { %39923 = vmatprep.subr.bf16.mxu0 %v44517_v60  ;;  %39963 = vmatprep.subr.bf16.mxu1 %v44237_v0 }
0x2021   :  { %36717 = vmatmul.mubr.f32.vlgmr.msra.gmra.mrb[38].mxu0 %v15576_v27  ;;  %v46184_v27 = vand.u32 4294901760, %v44251_v11  ;;  %v46190_v11 = vand.u32 4294901760, %v44279_v36  ;;  %v46196_v36 = vand.u32 4294901760, %v44416_v1  ;;  %v16688_v1 = vsel %vm313_vm2, %v33032_v15, 0 }
0x2022   :  { %39925 = vmatpush3.bf16.msra.mxu0 %v44517_v60  ;;  %36786 = vmatprep.mubr.f32.mxu0 %v15565_v22  ;;  %v44557_v22 = vpack.c.bf16 %v46188_v2, %v46187_v37  ;;  %v16756_v26 = vand.u32 4294901760, %v16688_v1 }
0x2023   :  { %39965 = vmatpush3.bf16.msra.mxu1 %v44237_v0  ;;  %39927 = vmatprep.subr.bf16.mxu0 %v44528_v49  ;;  %v44547_v32 = vpack.c.bf16 %v46185_v51, %v46184_v27  ;;  %v44567_v61 = vpack.c.bf16 %v46191_v39, %v46190_v11  ;;  %v44587_v52 = vpack.c.bf16 %v46197_v30, %v46196_v36 }
0x2024   :  { %39967 = vmatprep.subr.bf16.mxu1 %v44253_v23  ;;  %46189 = vst [vmem:[#allocation137_spill] sm:$0xff] %v44557_v22  ;;  %v16757_v18 = vsub.f32 %v16688_v1, %v16756_v26 }
0x2025   :  { %46186 = vst [vmem:[#allocation136_spill] sm:$0xff] %v44547_v32  ;;  %46192 = vst [vmem:[#allocation138_spill] sm:$0xff] %v44567_v61 }
0x2026   :  { %39929 = vmatpush3.bf16.msra.mxu0 %v44528_v49  ;;  %46198 = vst [vmem:[#allocation140_spill] sm:$0xff] %v44587_v52  ;;  %v16758_v54 = vand.u32 4294901760, %v16757_v18 }
0x2027   :  { %39969 = vmatpush3.bf16.msra.mxu1 %v44253_v23  ;;  %39931 = vmatprep.subr.bf16.mxu0 %v44537_v44 }
0x2028   :  { %39971 = vmatprep.subr.bf16.mxu1 %v44265_v56  ;;  %v16759_v27 = vsub.f32 %v16757_v18, %v16758_v54 }
0x202a   :  { %39933 = vmatpush3.bf16.msra.mxu0 %v44537_v44  ;;  %v16760_v51 = vand.u32 4294901760, %v16759_v27 }
0x202b   :  { %39973 = vmatpush3.bf16.msra.mxu1 %v44265_v56  ;;  %39935 = vmatprep.subr.bf16.mxu0 %v44547_v32 }
0x202c   :  { %39975 = vmatprep.subr.bf16.mxu1 %v44281_v20 }
0x202e   :  { %39937 = vmatpush3.bf16.msra.mxu0 %v44547_v32 }
0x202f   :  { %39977 = vmatpush3.bf16.msra.mxu1 %v44281_v20  ;;  %39939 = vmatprep.subr.bf16.mxu0 %v44557_v22 }
0x2030   :  { %39979 = vmatprep.subr.bf16.mxu1 %v44436_v40 }
0x2032   :  { %39941 = vmatpush3.bf16.msra.mxu0 %v44557_v22 }
0x2033   :  { %39981 = vmatpush3.bf16.msra.mxu1 %v44436_v40  ;;  %39943 = vmatprep.subr.bf16.mxu0 %v44567_v61 }
0x2034   :  { %39983 = vmatprep.subr.bf16.mxu1 %v44441_v59 }
0x2036   :  { %39945 = vmatpush3.bf16.msra.mxu0 %v44567_v61 }
0x2037   :  { %39985 = vmatpush3.bf16.msra.mxu1 %v44441_v59  ;;  %39947 = vmatprep.subr.bf16.mxu0 %v44577_v24 }
0x2038   :  { %36890 = vmatprep.subr.mxu1 %v46199_v47 }
0x203a   :  { %36822 = vmatmul.mubr.f32.vlgmr.msra.gmra.mrb[36].mxu1 %v44458_v46  ;;  %39949 = vmatpush3.bf16.msra.mxu0 %v44577_v24 }
0x203b   :  { %39951 = vmatprep.subr.bf16.mxu0 %v44587_v52  ;;  %36891 = vmatpush3.msra.mxu1 %v42665_v5 }
0x203c   :  { %36892 = vmatprep.mubr.msk.f32.mxu1 %vm42392_vm0, %v46199_v47  ;;  %36895 = vmatprep.subr.mxu1 %v46199_v47 }
0x203e   :  { %39953 = vmatpush3.bf16.msra.mxu0 %v44587_v52  ;;  %36893 = vmatmul.mubr.f32.vlgmr.msra.gmra.mrb[38].mxu1 %v16760_v51  ;;  %v46211_v52 = vmov 0.0|0.0  }
0x203f   :  { %36896 = vmatpush3.msra.mxu1 %v42682_v14  ;;  %36897 = vmatprep.mubr.msk.f32.mxu1 %vm42392_vm0, %v46199_v47  ;;  %v33028_v14 = vld [vmem:[#allocation18 + $0x1] ss:$0 sm:$0xff] }
0x2040   :  { %36900 = vmatprep.subr.mxu1 %v46199_v47 }
0x2041   :  { %36787 = vmatmul.mubr.f32.vlgmr.msra.gmra.mrb[40].mxu0 %v44458_v46 }
0x2042   :  { %36832 = vmatprep.mubr.msk.f32.mxu0 %vm42392_vm0, %v46199_v47  ;;  %36898 = vmatmul.mubr.f32.vlgmr.msra.gmra.mrb[40].mxu1 %v16756_v26 }
0x2043   :  { %36901 = vmatpush3.msra.mxu1 %v42669_v8  ;;  %36902 = vmatprep.mubr.msk.f32.mxu1 %vm42392_vm0, %v46199_v47 }
0x2044   :  { %36905 = vmatprep.subr.mxu1 %v46199_v47 }
0x2046   :  { %36903 = vmatmul.mubr.f32.vlgmr.msra.gmra.mrb[42].mxu1 %v16757_v18 }
0x2047   :  { %36906 = vmatpush3.msra.mxu1 %v42665_v5  ;;  %36907 = vmatprep.mubr.msk.f32.mxu1 %vm42392_vm0, %v46199_v47 }
0x2048   :  { %36910 = vmatprep.subr.mxu1 %v46199_v47 }
0x204a   :  { %36908 = vmatmul.mubr.f32.vlgmr.msra.gmra.mrb[44].mxu1 %v16758_v54 }
0x204b   :  { %36911 = vmatpush3.msra.mxu1 %v42675_v10  ;;  %36912 = vmatprep.mubr.msk.f32.mxu1 %vm42392_vm0, %v46199_v47 }
0x204c   :  { %36915 = vmatprep.subr.mxu1 %v46199_v47 }
0x204e   :  { %36913 = vmatmul.mubr.f32.vlgmr.msra.gmra.mrb[46].mxu1 %v16756_v26 }
0x204f   :  { %36916 = vmatpush3.msra.mxu1 %v42665_v5  ;;  %36917 = vmatprep.mubr.msk.f32.mxu1 %vm42392_vm0, %v46199_v47 }
0x2050   :  { %40023 = vmatprep.subr.bf16.mxu1 %v42736_v48 }
0x2052   :  { %36918 = vmatmul.mubr.f32.vlgmr.msra.gmra.mrb[48].mxu1 %v16756_v26 }
0x2053   :  { %40025 = vmatpush3.bf16.msra.mxu1 %v42736_v48 }
0x2054   :  { %40027 = vmatprep.subr.bf16.mxu1 %v42752_v58 }
0x2057   :  { %40029 = vmatpush3.bf16.msra.mxu1 %v42752_v58 }
0x2058   :  { %40031 = vmatprep.subr.bf16.mxu1 %v42758_v6 }
0x20cc   :  { %v36683_v8 = vpop.f32.mrb[32].mxu1 }
0x20cd   :  { %v15731_v10 = vpop.f32.mrb[33].mxu1 }
0x20d4   :  { %v36648_v46 = vpop.f32.mrb[36].mxu0 }
0x20d5   :  { %v15571_v37 = vpop.f32.mrb[37].mxu0 }
0x20d6   :  { %v15572_v5 = vadd.f32 %v33028_v14, %v15571_v37  ;;  %v42102_v14 = vld [vmem:[#allocation7] ss:$0 sm:$0xff] }
0x20d8   :  { %v15732_v2 = vadd.f32 %v15731_v10, %v15572_v5 }
0x20ec   :  { %v36753_v11 = vpop.f32.mrb[34].mxu1 }
0x20ed   :  { %v15935_v39 = vpop.f32.mrb[35].mxu1 }
0x20f4   :  { %v36718_v55 = vpop.f32.mrb[38].mxu0 }
0x20f5   :  { %v15840_v28 = vpop.f32.mrb[39].mxu0 }
0x20f6   :  { %v15841_v36 = vadd.f32 %v15840_v28, %v15732_v2 }
0x20f8   :  { %v15936_v30 = vadd.f32 %v15935_v39, %v15841_v36 }
0x210d   :  { %v36823_v15 = vpop.f32.mrb[36].mxu1 }
0x210e   :  { %v16153_v1 = vpop.f32.mrb[37].mxu1 }
0x2111   :  { %v16762_v46 = vpop.f32.mrb[38].mxu1 }
0x2112   :  { %v16763_v10 = vadd.f32 %v42102_v14, %v16762_v46  ;;  %v36894_v37 = vpop.f32.mrb[39].mxu1 }
0x2114   :  { %v36788_v26 = vpop.f32.mrb[40].mxu0 }
0x2115   :  { %v16061_v18 = vpop.f32.mrb[41].mxu0  ;;  %v16838_v5 = vpop.f32.mrb[40].mxu1 }
0x2116   :  { %v16062_v54 = vadd.f32 %v16061_v18, %v15936_v30  ;;  %v16839_v11 = vadd.f32 %v16838_v5, %v16763_v10  ;;  %v36899_v55 = vpop.f32.mrb[41].mxu1 }
0x2118   :  { %v16154_v27 = vadd.f32 %v16153_v1, %v16062_v54  ;;  %v17138_v54 = vld [vmem:[%s46045_s25 + $0x4] sm:$0xff] }
0x2119   :  { %v16912_v2 = vpop.f32.mrb[42].mxu1 }
0x211a   :  { %v16162_v51 = vadd.f32 %v16154_v27, %v44290_v25  ;;  %v16913_v39 = vadd.f32 %v16912_v2, %v16839_v11  ;;  %v36904_v28 = vpop.f32.mrb[43].mxu1 }
0x211c   :  { %v16163_v8 = vsel %vm772_vm4, %v16162_v51, 0.0 }
0x211d   :  { %16164 = vadd.xlane.f32.xlu1 %v16163_v8  ;;  %v16986_v36 = vpop.f32.mrb[44].mxu1 }
0x211e   :  { %v16987_v15 = vadd.f32 %v16986_v36, %v16913_v39  ;;  %v36909_v26 = vpop.f32.mrb[45].mxu1 }
0x2121   :  { %v17060_v30 = vpop.f32.mrb[46].mxu1 }
0x2122   :  { %v17061_v1 = vadd.f32 %v17060_v30, %v16987_v15  ;;  %v36914_v18 = vpop.f32.mrb[47].mxu1 }
0x2123   :  { %v46200_v18 = vld [vmem:[#allocation35_spill] sm:$0xff] }
0x2125   :  { %v17132_v25 = vpop.f32.mrb[48].mxu1 }
0x2126   :  { %v17133_v27 = vadd.f32 %v17132_v25, %v17061_v1  ;;  %v36919_v8 = vpop.f32.mrb[49].mxu1  ;;  %v46201_v25 = vld [vmem:[#allocation37_spill] sm:$0xff] }
0x2128   :  { %v17139_v46 = vadd.f32 %v17138_v54, %v17133_v27 }
0x212a   :  { %17140 = vst.msk [vmem:[#allocation2 + $0x4] sm:$0xff] %vm772_vm4, %v17139_v46  ;;  %v46202_v46 = vld [vmem:[#allocation39_spill] sm:$0xff] }
0x2131   :  { %v17141_v14 = vld [vmem:[#allocation2] sm:$0xff]  ;;  %v17142_v10 = vld [vmem:[#allocation2 + $0x8] sm:$0xf] }
0x2132   :  { %v17146_v37 = vsel %vm772_vm4, %v17141_v14, 0  ;;  %v17149_v5 = vsel %vm772_vm4, %v17142_v10, 0  ;;  %v46204_v14 = vld [vmem:[#allocation41_spill] sm:$0xff]  ;;  %v46205_v10 = vld [vmem:[#allocation42_spill] sm:$0xff] }
0x2133   :  { %v44637_v11 = vand.u32 4294901760, %v17146_v37  ;;  %v44639_v55 = vand.u32 4294901760, %v17149_v5 }
0x2135   :  { %v44642_v2 = vsub.f32 %v17146_v37, %v44637_v11  ;;  %v44645_v39 = vsub.f32 %v17149_v5, %v44639_v55  ;;  %v46206_v37 = vld [vmem:[#allocation43_spill] sm:$0xff]  ;;  %v203_v5 = vld [vmem:[#allocation19 + $0x8] sm:$0xff] }
0x2137   :  { %v44648_v28 = vand.u32 4294901760, %v44642_v2  ;;  %v44651_v36 = vand.u32 4294901760, %v44645_v39 }
0x2139   :  { %v17223_v15 = vsub.f32 %v44642_v2, %v44648_v28  ;;  %v17233_v26 = vsub.f32 %v44645_v39, %v44651_v36 }
0x213b   :  { %v44657_v30 = vand.u32 4294901760, %v17223_v15  ;;  %v44659_v1 = vand.u32 4294901760, %v17233_v26  ;;  %v204_v15 = vld [vmem:[#allocation19 + $0x10] sm:$0xff]  ;;  %v46004_v26 = vmov 0.0|0.0  }
0x213c   :  { %39986 = vmatprep.subr.bf16.mxu0 %v46004_v26 }
0x213d   :  { %36928 = vmatprep.mubr.f32.mxu1 %v44657_v30 }
0x213e   :  { %36929 = vmatmul.mubr.f32.vlgmr.msra.gmra.mrb[50].mxu1 %v44659_v1 }
0x213f   :  { %40033 = vmatpush3.bf16.msra.mxu1 %v42758_v6  ;;  %36939 = vmatprep.mubr.f32.mxu1 %v44637_v11 }
0x2140   :  { %40035 = vmatprep.subr.bf16.mxu1 %v42761_v13 }
0x2143   :  { %40037 = vmatpush3.bf16.msra.mxu1 %v42761_v13 }
0x2144   :  { %40039 = vmatprep.subr.bf16.mxu1 %v46200_v18 }
0x2146   :  { %36940 = vmatmul.mubr.f32.vlgmr.msra.gmra.mrb[50].mxu1 %v44639_v55 }
0x2147   :  { %40041 = vmatpush3.bf16.msra.mxu1 %v46200_v18  ;;  %36950 = vmatprep.mubr.f32.mxu1 %v44642_v2 }
0x2148   :  { %40043 = vmatprep.subr.bf16.mxu1 %v46201_v25 }
0x214b   :  { %40045 = vmatpush3.bf16.msra.mxu1 %v46201_v25  ;;  %v16203_v25 = vand.u32 4294901760, %v203_v5 }
0x214c   :  { %40047 = vmatprep.subr.bf16.mxu1 %v42736_v48 }
0x214d   :  { %v16287_v26 = vsub.f32 %v203_v5, %v16203_v25 }
0x214e   :  { %36951 = vmatmul.mubr.f32.vlgmr.msra.gmra.mrb[50].mxu1 %v44645_v39 }
0x214f   :  { %40049 = vmatpush3.bf16.msra.mxu1 %v42736_v48  ;;  %36961 = vmatprep.mubr.f32.mxu1 %v44648_v28  ;;  %v16288_v61 = vand.u32 4294901760, %v16287_v26 }
0x2150   :  { %40051 = vmatprep.subr.bf16.mxu1 %v42752_v58 }
0x2151   :  { %v16289_v22 = vsub.f32 %v16287_v26, %v16288_v61 }
0x2153   :  { %40053 = vmatpush3.bf16.msra.mxu1 %v42752_v58  ;;  %v16290_v5 = vand.u32 4294901760, %v16289_v22  ;;  %v46215_v22 = vld [vmem:[#allocation48_spill] sm:$0xff] }
0x2154   :  { %40055 = vmatprep.subr.bf16.mxu1 %v46202_v46 }
0x2156   :  { %36962 = vmatmul.mubr.f32.vlgmr.msra.gmra.mrb[50].mxu1 %v44651_v36 }
0x2157   :  { %40057 = vmatpush3.bf16.msra.mxu1 %v46202_v46  ;;  %36972 = vmatprep.mubr.f32.mxu1 %v44637_v11 }
0x21aa   :  { %v16165_v54 = vpop.xlane.xlu1 %16164 }
0x21ab   :  { %v16166_v6 = vmul.f32 0.03125, %v16165_v54  ;;  %v205_v54 = vld [vmem:[#allocation19 + $0x18] sm:$0xff] }
0x21ad   :  { %v44674_v27 = vsub.f32 %v16162_v51, %v16166_v6  ;;  %v46203_v51 = vld [vmem:[#allocation40_spill] sm:$0xff]  ;;  %v16206_v6 = vand.u32 4294901760, %v204_v15 }
0x21ae   :  { %40059 = vmatprep.subr.bf16.mxu1 %v46203_v51 }
0x21af   :  { %v16168_v13 = vmul.f32 %v44674_v27, %v44674_v27  ;;  %40061 = vmatpush3.bf16.msra.mxu1 %v46203_v51  ;;  %v16294_v32 = vsub.f32 %v204_v15, %v16206_v6 }
0x21b0   :  { %40063 = vmatprep.subr.bf16.mxu1 %v42736_v48 }
0x21b1   :  { %v16169_v8 = vsel %vm772_vm4, %v16168_v13, 0.0  ;;  %v46208_v13 = vld [vmem:[#allocation45_spill] sm:$0xff] }
0x21b2   :  { %16170 = vadd.xlane.f32.xlu0 %v16169_v8  ;;  %36973 = vmatmul.mubr.f32.vlgmr.msra.gmra.mrb[50].mxu1 %v44639_v55  ;;  %v16209_v8 = vand.u32 4294901760, %v205_v54 }
0x21b3   :  { %40065 = vmatpush3.bf16.msra.mxu1 %v42736_v48  ;;  %36983 = vmatprep.mubr.f32.mxu1 %v44637_v11  ;;  %v46207_v48 = vld [vmem:[#allocation44_spill] sm:$0xff] }
0x21b4   :  { %40067 = vmatprep.subr.bf16.mxu1 %v42752_v58  ;;  %v44715_v51 = vpack.c.bf16 %v16209_v8, %v16206_v6  ;;  %v16301_v44 = vsub.f32 %v205_v54, %v16209_v8  ;;  %v46213_v54 = vld [vmem:[#allocation47_spill] sm:$0xff] }
0x21b6   :  { %46209 = vst [vmem:[#allocation35_spill] sm:$0xff] %v44715_v51 }
0x21b7   :  { %40069 = vmatpush3.bf16.msra.mxu1 %v42752_v58  ;;  %v202_v58 = vld [vmem:[#allocation19] sm:$0xff] }
0x21b8   :  { %40119 = vmatprep.subr.bf16.mxu1 %v46204_v14  ;;  %v16200_v18 = vand.u32 4294901760, %v202_v58 }
0x21ba   :  { %36984 = vmatmul.mubr.f32.vlgmr.msra.gmra.mrb[50].mxu1 %v44639_v55  ;;  %v44710_v46 = vpack.c.bf16 %v16203_v25, %v16200_v18  ;;  %v16302_v25 = vand.u32 4294901760, %v16301_v44 }
0x21bb   :  { %40121 = vmatpush3.bf16.msra.mxu1 %v46204_v14  ;;  %37060 = vmatprep.mubr.f32.mxu1 %v44657_v30 }
0x21bc   :  { %40123 = vmatprep.subr.bf16.mxu1 %v46205_v10  ;;  %39988 = vmatpush3.bf16.msra.mxu0 %v44710_v46  ;;  %v16303_v60 = vsub.f32 %v16301_v44, %v16302_v25 }
0x21bd   :  { %39989 = vmatprep.subr.bf16.mxu0 %v46211_v52 }
0x21be   :  { %v16304_v15 = vand.u32 4294901760, %v16303_v60 }
0x21bf   :  { %40125 = vmatpush3.bf16.msra.mxu1 %v46205_v10 }
0x21c0   :  { %40127 = vmatprep.subr.bf16.mxu1 %v46206_v37  ;;  %39991 = vmatpush3.bf16.msra.mxu0 %v44715_v51 }
0x21c1   :  { %39992 = vmatprep.subr.bf16.mxu0 %v46211_v52 }
0x21c2   :  { %37061 = vmatmul.mubr.f32.vlgmr.msra.gmra.mrb[52].mxu1 %v44659_v1 }
0x21c3   :  { %40129 = vmatpush3.bf16.msra.mxu1 %v46206_v37  ;;  %37071 = vmatprep.mubr.f32.mxu1 %v44637_v11  ;;  %v46210_v37 = vld [vmem:[#allocation46_spill] sm:$0xff] }
0x21c4   :  { %40131 = vmatprep.subr.bf16.mxu1 %v46207_v48 }
0x21c7   :  { %40133 = vmatpush3.bf16.msra.mxu1 %v46207_v48  ;;  %v16280_v48 = vsub.f32 %v202_v58, %v16200_v18  ;;  %v16295_v18 = vand.u32 4294901760, %v16294_v32 }
0x21c8   :  { %40135 = vmatprep.subr.bf16.mxu1 %v46208_v13 }
0x21c9   :  { %v16281_v24 = vand.u32 4294901760, %v16280_v48  ;;  %v16296_v49 = vsub.f32 %v16294_v32, %v16295_v18  ;;  %v44738_v8 = vpack.c.bf16 %v16287_v26, %v16280_v48  ;;  %v44752_v60 = vpack.c.bf16 %v16302_v25, %v16295_v18  ;;  %v46222_v18 = vld [vmem:[#allocation29_spill] sm:$0xff]  ;;  %v46223_v25 = vld [vmem:[#allocation30_spill] sm:$0xff] }
0x21ca   :  { %37072 = vmatmul.mubr.f32.vlgmr.msra.gmra.mrb[52].mxu1 %v44639_v55 }
0x21cb   :  { %40137 = vmatpush3.bf16.msra.mxu1 %v46208_v13  ;;  %37082 = vmatprep.mubr.f32.mxu1 %v44642_v2  ;;  %v16282_v13 = vsub.f32 %v16280_v48, %v16281_v24  ;;  %v16297_v29 = vand.u32 4294901760, %v16296_v49  ;;  %46216 = vst [vmem:[#allocation40_spill] sm:$0xff] %v44738_v8  ;;  %v44741_v49 = vpack.c.bf16 %v16301_v44, %v16294_v32  ;;  %46219 = vst [vmem:[#allocation43_spill] sm:$0xff] %v44752_v60 }
0x21cc   :  { %40139 = vmatprep.subr.bf16.mxu1 %v46210_v37 }
0x21cd   :  { %v16283_v58 = vand.u32 4294901760, %v16282_v13  ;;  %v44732_v6 = vpack.c.bf16 %v16304_v15, %v16297_v29  ;;  %46217 = vst [vmem:[#allocation41_spill] sm:$0xff] %v44741_v49  ;;  %v44750_v29 = vpack.c.bf16 %v16288_v61, %v16281_v24  ;;  %v33029_v13 = vld [vmem:[#allocation13 + $0x1] ss:$0 sm:$0xff] }
0x21cf   :  { %40141 = vmatpush3.bf16.msra.mxu1 %v46210_v37  ;;  %v44728_v37 = vpack.c.bf16 %v16290_v5, %v16283_v58  ;;  %46214 = vst [vmem:[#allocation39_spill] sm:$0xff] %v44732_v6  ;;  %46218 = vst [vmem:[#allocation42_spill] sm:$0xff] %v44750_v29  ;;  %v33030_v58 = vld [vmem:[#allocation15 + $0x1] ss:$0 sm:$0xff] }
0x21d0   :  { %40143 = vmatprep.subr.bf16.mxu1 %v46204_v14 }
0x21d1   :  { %46212 = vst [vmem:[#allocation37_spill] sm:$0xff] %v44728_v37 }
0x21d2   :  { %37083 = vmatmul.mubr.f32.vlgmr.msra.gmra.mrb[52].mxu1 %v44645_v39 }
0x21d3   :  { %40145 = vmatpush3.bf16.msra.mxu1 %v46204_v14  ;;  %37093 = vmatprep.mubr.f32.mxu1 %v44648_v28 }
0x21d4   :  { %40147 = vmatprep.subr.bf16.mxu1 %v46205_v10 }
0x21d7   :  { %40149 = vmatpush3.bf16.msra.mxu1 %v46205_v10 }
0x21d8   :  { %40151 = vmatprep.subr.bf16.mxu1 %v46213_v54 }
0x21da   :  { %37094 = vmatmul.mubr.f32.vlgmr.msra.gmra.mrb[52].mxu1 %v44651_v36 }
0x21db   :  { %40153 = vmatpush3.bf16.msra.mxu1 %v46213_v54  ;;  %37104 = vmatprep.mubr.f32.mxu1 %v44637_v11 }
0x21dc   :  { %40155 = vmatprep.subr.bf16.mxu1 %v46215_v22 }
0x21df   :  { %40157 = vmatpush3.bf16.msra.mxu1 %v46215_v22 }
0x21e0   :  { %40159 = vmatprep.subr.bf16.mxu1 %v46204_v14 }
0x21e2   :  { %37105 = vmatmul.mubr.f32.vlgmr.msra.gmra.mrb[52].mxu1 %v44639_v55 }
0x21e3   :  { %40161 = vmatpush3.bf16.msra.mxu1 %v46204_v14  ;;  %37115 = vmatprep.mubr.f32.mxu1 %v44637_v11 }
0x21e4   :  { %40163 = vmatprep.subr.bf16.mxu1 %v46205_v10 }
0x21e7   :  { %40165 = vmatpush3.bf16.msra.mxu1 %v46205_v10 }
0x21ea   :  { %37116 = vmatmul.mubr.f32.vlgmr.msra.gmra.mrb[52].mxu1 %v44639_v55 }
0x223f   :  { %v16171_v44 = vpop.xlane.xlu0 %16170 }
0x2240   :  { %v16172_v32 = vmul.f32 0.03125, %v16171_v44  ;;  %v46224_v44 = vld [vmem:[#allocation33_spill] sm:$0xff] }
0x2242   :  { %v16173_v26 = vadd.f32 1e-06, %v16172_v32 }
0x2244   :  { %42020 = vrsqrt.f32 %v16173_v26 }
0x224e   :  { %v42021_v48 = vpop.eup %42020 }
0x224f   :  { %v16175_v14 = vmul.f32 %v42021_v48, %v44674_v27  ;;  %v46221_v27 = vld [vmem:[#allocation32_spill] sm:$0xff] }
0x2250   :  { %v46226_v48 = vld [vmem:[#allocation36_spill] sm:$0xff] }
0x2251   :  { %v16182_v5 = vmul.f32 %v33029_v13, %v16175_v14 }
0x2253   :  { %v16189_v15 = vadd.f32 %v33030_v58, %v16182_v5 }
0x2255   :  { %v16197_v54 = vsel %vm772_vm4, %v16189_v15, 0 }
0x2256   :  { %v16268_v10 = vand.u32 4294901760, %v16197_v54 }
0x2258   :  { %v16269_v22 = vsub.f32 %v16197_v54, %v16268_v10 }
0x225a   :  { %v16270_v42 = vand.u32 4294901760, %v16269_v22 }
0x225c   :  { %v16271_v61 = vsub.f32 %v16269_v22, %v16270_v42 }
0x225e   :  { %v16272_v24 = vand.u32 4294901760, %v16271_v61 }
0x2260   :  { %36833 = vmatmul.mubr.f32.vlgmr.msra.gmra.mrb[42].mxu0 %v16272_v24 }
0x2261   :  { %39994 = vmatpush3.bf16.msra.mxu0 %v44728_v37  ;;  %36843 = vmatprep.mubr.msk.f32.mxu0 %vm42392_vm0, %v46199_v47 }
0x2262   :  { %39995 = vmatprep.subr.bf16.mxu0 %v46211_v52 }
0x2265   :  { %39997 = vmatpush3.bf16.msra.mxu0 %v44732_v6 }
0x2266   :  { %39998 = vmatprep.subr.bf16.mxu0 %v46211_v52 }
0x2268   :  { %36844 = vmatmul.mubr.f32.vlgmr.msra.gmra.mrb[42].mxu0 %v16268_v10 }
0x2269   :  { %40000 = vmatpush3.bf16.msra.mxu0 %v44738_v8  ;;  %36854 = vmatprep.mubr.msk.f32.mxu0 %vm42392_vm0, %v46199_v47 }
0x226a   :  { %40001 = vmatprep.subr.bf16.mxu0 %v46211_v52 }
0x226d   :  { %40003 = vmatpush3.bf16.msra.mxu0 %v44741_v49 }
0x226e   :  { %40004 = vmatprep.subr.bf16.mxu0 %v46211_v52 }
0x2270   :  { %36855 = vmatmul.mubr.f32.vlgmr.msra.gmra.mrb[42].mxu0 %v16269_v22 }
0x2271   :  { %40006 = vmatpush3.bf16.msra.mxu0 %v44710_v46  ;;  %36865 = vmatprep.mubr.msk.f32.mxu0 %vm42392_vm0, %v46199_v47 }
0x2272   :  { %40007 = vmatprep.subr.bf16.mxu0 %v46211_v52 }
0x2275   :  { %40009 = vmatpush3.bf16.msra.mxu0 %v44715_v51 }
0x2276   :  { %40010 = vmatprep.subr.bf16.mxu0 %v46211_v52 }
0x2278   :  { %36866 = vmatmul.mubr.f32.vlgmr.msra.gmra.mrb[42].mxu0 %v16270_v42  ;;  %v46220_v42 = vld [vmem:[#allocation31_spill] sm:$0xff] }
0x2279   :  { %40012 = vmatpush3.bf16.msra.mxu0 %v44750_v29  ;;  %36876 = vmatprep.mubr.msk.f32.mxu0 %vm42392_vm0, %v46199_v47 }
0x227a   :  { %40013 = vmatprep.subr.bf16.mxu0 %v46211_v52 }
0x227d   :  { %40015 = vmatpush3.bf16.msra.mxu0 %v44752_v60 }
0x227e   :  { %40016 = vmatprep.subr.bf16.mxu0 %v46211_v52 }
0x2280   :  { %36877 = vmatmul.mubr.f32.vlgmr.msra.gmra.mrb[42].mxu0 %v16268_v10 }
0x2281   :  { %40018 = vmatpush3.bf16.msra.mxu0 %v44710_v46  ;;  %36887 = vmatprep.mubr.msk.f32.mxu0 %vm42392_vm0, %v46199_v47 }
0x2282   :  { %40019 = vmatprep.subr.bf16.mxu0 %v46211_v52 }
0x2285   :  { %40021 = vmatpush3.bf16.msra.mxu0 %v44715_v51 }
0x2286   :  { %40071 = vmatprep.subr.bf16.mxu0 %v46220_v42 }
0x2288   :  { %36888 = vmatmul.mubr.f32.vlgmr.msra.gmra.mrb[42].mxu0 %v16268_v10 }
0x2289   :  { %40073 = vmatpush3.bf16.msra.mxu0 %v46220_v42  ;;  %36994 = vmatprep.mubr.f32.mxu0 %v44657_v30 }
0x228a   :  { %40075 = vmatprep.subr.bf16.mxu0 %v46221_v27 }
0x228d   :  { %40077 = vmatpush3.bf16.msra.mxu0 %v46221_v27  ;;  %v44798_v30 = vpop.f32.mrb[50].mxu1 }
0x228e   :  { %40079 = vmatprep.subr.bf16.mxu0 %v46222_v18  ;;  %v44802_v32 = vpop.f32.mrb[51].mxu1 }
0x228f   :  { %19792 = vrot.lane.b32.xlu1 %v44802_v32, %s42393_s17 }
0x2290   :  { %36995 = vmatmul.mubr.f32.vlgmr.msra.gmra.mrb[44].mxu0 %v44659_v1  ;;  %v46225_v1 = vld [vmem:[#allocation34_spill] sm:$0xff] }
0x2291   :  { %40081 = vmatpush3.bf16.msra.mxu0 %v46222_v18  ;;  %37005 = vmatprep.mubr.f32.mxu0 %v44637_v11 }
0x2292   :  { %40083 = vmatprep.subr.bf16.mxu0 %v46223_v25 }
0x2295   :  { %40085 = vmatpush3.bf16.msra.mxu0 %v46223_v25 }
0x2296   :  { %40087 = vmatprep.subr.bf16.mxu0 %v46224_v44 }
0x2298   :  { %37006 = vmatmul.mubr.f32.vlgmr.msra.gmra.mrb[44].mxu0 %v44639_v55 }
0x2299   :  { %40089 = vmatpush3.bf16.msra.mxu0 %v46224_v44  ;;  %37016 = vmatprep.mubr.f32.mxu0 %v44642_v2  ;;  %v18742_v2 = vsel %vm2373_vm5, %v44802_v32, 0 }
0x229a   :  { %40091 = vmatprep.subr.bf16.mxu0 %v46225_v1  ;;  %v44816_v26 = vand.u32 4294901760, %v18742_v2 }
0x229d   :  { %40093 = vmatpush3.bf16.msra.mxu0 %v46225_v1 }
0x229e   :  { %40095 = vmatprep.subr.bf16.mxu0 %v46220_v42 }
0x22a0   :  { %37017 = vmatmul.mubr.f32.vlgmr.msra.gmra.mrb[44].mxu0 %v44645_v39  ;;  %v44823_v39 = vsub.f32 %v18742_v2, %v44816_v26 }
0x22a1   :  { %40097 = vmatpush3.bf16.msra.mxu0 %v46220_v42  ;;  %37027 = vmatprep.mubr.f32.mxu0 %v44648_v28  ;;  %v46227_v28 = vld [vmem:[#allocation38_spill] sm:$0xff] }
0x22a2   :  { %40099 = vmatprep.subr.bf16.mxu0 %v46221_v27  ;;  %v46026_v13 = vand.u32 4294901760, %v44823_v39 }
0x22a5   :  { %40101 = vmatpush3.bf16.msra.mxu0 %v46221_v27 }
0x22a6   :  { %40103 = vmatprep.subr.bf16.mxu0 %v46226_v48 }
0x22a8   :  { %37028 = vmatmul.mubr.f32.vlgmr.msra.gmra.mrb[44].mxu0 %v44651_v36  ;;  %v18823_v36 = vsub.f32 %v44823_v39, %v46026_v13 }
0x22a9   :  { %40105 = vmatpush3.bf16.msra.mxu0 %v46226_v48  ;;  %37038 = vmatprep.mubr.f32.mxu0 %v44637_v11  ;;  %v33031_v48 = vld [vmem:[%s45755_s19] ss:$0 sm:$0xff] }
0x22aa   :  { %40107 = vmatprep.subr.bf16.mxu0 %v46227_v28  ;;  %v18824_v14 = vand.u32 4294901760, %v18823_v36 }
0x22ad   :  { %40109 = vmatpush3.bf16.msra.mxu0 %v46227_v28 }
0x22ae   :  { %40111 = vmatprep.subr.bf16.mxu0 %v46220_v42 }
0x22b0   :  { %37039 = vmatmul.mubr.f32.vlgmr.msra.gmra.mrb[44].mxu0 %v44639_v55 }
0x22b1   :  { %40113 = vmatpush3.bf16.msra.mxu0 %v46220_v42  ;;  %37049 = vmatprep.mubr.f32.mxu0 %v44637_v11 }
0x22b2   :  { %40115 = vmatprep.subr.bf16.mxu0 %v46221_v27 }
0x22b5   :  { %40117 = vmatpush3.bf16.msra.mxu0 %v46221_v27 }
0x22b8   :  { %37050 = vmatmul.mubr.f32.vlgmr.msra.gmra.mrb[44].mxu0 %v44639_v55 }
0x22b9   :  { %37122 = vmatprep.mubr.f32.mxu0 %v18824_v14 }
0x22bd   :  { %v44838_v58 = vpop.f32.mrb[52].mxu1 }
0x22be   :  { %v19286_v5 = vsel %vm317_vm1, %v44838_v58, 0  ;;  %v44842_v15 = vpop.f32.mrb[53].mxu1 }
0x22bf   :  { %v19292_v11 = vand.u32 4294901760, %v19286_v5  ;;  %v19289_v54 = vand.u32 4294901760, %v44842_v15 }
0x22c1   :  { %v19384_v10 = vsub.f32 %v19286_v5, %v19292_v11  ;;  %v44845_v22 = vpack.c.bf16 %v19292_v11, %v19289_v54  ;;  %v19377_v61 = vsub.f32 %v44842_v15, %v19289_v54  ;;  %v18745_v5 = vsel %vm2373_vm5, %v44798_v30, 0 }
0x22c2   :  { %v18830_v11 = vand.u32 4294901760, %v18745_v5 }
0x22c3   :  { %40191 = vmatprep.subr.bf16.mxu1 %v44845_v22  ;;  %v19378_v24 = vand.u32 4294901760, %v19377_v61  ;;  %v19385_v55 = vand.u32 4294901760, %v19384_v10  ;;  %v44850_v18 = vpack.c.bf16 %v19384_v10, %v19377_v61 }
0x22c4   :  { %40193 = vmatpush3.bf16.msra.mxu1 %v44845_v22 }
0x22c5   :  { %v19379_v42 = vsub.f32 %v19377_v61, %v19378_v24  ;;  %v19386_v27 = vsub.f32 %v19384_v10, %v19385_v55  ;;  %v44852_v1 = vpack.c.bf16 %v19385_v55, %v19378_v24  ;;  %v18831_v10 = vsub.f32 %v18745_v5, %v18830_v11 }
0x22c7   :  { %v19380_v25 = vand.u32 4294901760, %v19379_v42  ;;  %v19387_v44 = vand.u32 4294901760, %v19386_v27 }
0x22c9   :  { %v44854_v2 = vpack.c.bf16 %v19387_v44, %v19380_v25 }
0x22cb   :  { %40195 = vmatprep.subr.bf16.mxu1 %v44854_v2 }
0x235b   :  { %v16680_v28 = vpop.f32.mrb[42].mxu0 }
0x235c   :  { %v41334_v36 = vadd.f32 %v33031_v48, %v16680_v28  ;;  %v36889_v14 = vpop.f32.mrb[43].mxu0  ;;  %v18832_v28 = vand.u32 4294901760, %v18831_v10 }
0x235e   :  { %16684 = vst [vmem:[#allocation21] sm:$0xf] %v41334_v36  ;;  %v18833_v60 = vsub.f32 %v18831_v10, %v18832_v28 }
0x2360   :  { %v18834_v37 = vand.u32 4294901760, %v18833_v60 }
0x238b   :  { %v44862_v54 = vpop.f32.mrb[44].mxu0 }
0x238c   :  { %v18751_v61 = vsel %vm2373_vm5, %v44862_v54, 0  ;;  %19798 = vrot.lane.b32.xlu0 %v44862_v54, %s42393_s17  ;;  %v44868_v24 = vpop.f32.mrb[45].mxu0 }
0x238d   :  { %v18757_v55 = vand.u32 4294901760, %v18751_v61  ;;  %v18748_v42 = vsel %vm2373_vm5, %v44868_v24, 0  ;;  %19796 = vrot.lane.b32.xlu1 %v44868_v24, %s42393_s17 }
0x238e   :  { %v18754_v27 = vand.u32 4294901760, %v18748_v42 }
0x238f   :  { %v18849_v25 = vsub.f32 %v18751_v61, %v18757_v55  ;;  %v19793_v61 = vpop.permute.xlu1 %19792 }
0x2390   :  { %v40166_v44 = vpack.c.bf16 %v18757_v55, %v18754_v27  ;;  %v18842_v48 = vsub.f32 %v18748_v42, %v18754_v27  ;;  %v46228_v55 = vand.u32 4294901760, %v44823_v39 }
0x2391   :  { %19794 = vrot.lane.b32.xlu1 %v44798_v30, %s42393_s17  ;;  %v18850_v36 = vand.u32 4294901760, %v18849_v25 }
0x2392   :  { %40167 = vmatprep.subr.bf16.mxu0 %v40166_v44  ;;  %v18843_v14 = vand.u32 4294901760, %v18842_v48  ;;  %v40174_v5 = vpack.c.bf16 %v18849_v25, %v18842_v48 }
0x2393   :  { %40169 = vmatpush3.bf16.xpose.msra.mxu0 %v40166_v44  ;;  %v18851_v13 = vsub.f32 %v18849_v25, %v18850_v36 }
0x2394   :  { %v18844_v29 = vsub.f32 %v18842_v48, %v18843_v14  ;;  %v40182_v49 = vpack.c.bf16 %v18850_v36, %v18843_v14 }
0x2395   :  { %v18852_v8 = vand.u32 4294901760, %v18851_v13 }
0x2396   :  { %v18845_v6 = vand.u32 4294901760, %v18844_v29 }
0x2398   :  { %v40170_v51 = vpack.c.bf16 %v18852_v8, %v18845_v6  ;;  %v19800_v6 = vsel %vm2373_vm5, %v19793_v61, 0 }
0x239a   :  { %37123 = vmatmul.mubr.f32.vlgmr.msra.gmra.mrb[46].mxu0 %v18834_v37  ;;  %40171 = vmatprep.subr.bf16.mxu0 %v40170_v51  ;;  %v19875_v37 = vand.u32 4294901760, %v19800_v6 }
0x239b   :  { %40173 = vmatpush3.bf16.xpose.msra.mxu0 %v40170_v51  ;;  %37129 = vmatprep.mubr.f32.mxu0 %v44816_v26 }
0x239c   :  { %40175 = vmatprep.subr.bf16.mxu0 %v40174_v5  ;;  %v19876_v51 = vsub.f32 %v19800_v6, %v19875_v37 }
0x239e   :  { %v19877_v8 = vand.u32 4294901760, %v19876_v51 }
0x23a0   :  { %v19878_v29 = vsub.f32 %v19876_v51, %v19877_v8 }
0x23a2   :  { %37130 = vmatmul.mubr.f32.vlgmr.msra.gmra.mrb[46].mxu0 %v18830_v11  ;;  %v19879_v60 = vand.u32 4294901760, %v19878_v29 }
0x23a3   :  { %40177 = vmatpush3.bf16.xpose.msra.mxu0 %v40174_v5  ;;  %37136 = vmatprep.mubr.f32.mxu0 %v44823_v39 }
0x23a4   :  { %40179 = vmatprep.subr.bf16.mxu0 %v40166_v44 }
0x23aa   :  { %37137 = vmatmul.mubr.f32.vlgmr.msra.gmra.mrb[46].mxu0 %v18831_v10 }
0x23ab   :  { %40181 = vmatpush3.bf16.xpose.msra.mxu0 %v40166_v44  ;;  %37143 = vmatprep.mubr.f32.mxu0 %v46228_v55 }
0x23ac   :  { %40183 = vmatprep.subr.bf16.mxu0 %v40182_v49 }
0x23b2   :  { %37144 = vmatmul.mubr.f32.vlgmr.msra.gmra.mrb[46].mxu0 %v18832_v28 }
0x23b3   :  { %40185 = vmatpush3.bf16.xpose.msra.mxu0 %v40182_v49  ;;  %37150 = vmatprep.mubr.f32.mxu0 %v44816_v26 }
0x23b4   :  { %40187 = vmatprep.subr.bf16.mxu0 %v40166_v44 }
0x23ba   :  { %37151 = vmatmul.mubr.f32.vlgmr.msra.gmra.mrb[46].mxu0 %v18830_v11 }
0x23bb   :  { %40189 = vmatpush3.bf16.xpose.msra.mxu0 %v40166_v44  ;;  %37157 = vmatprep.mubr.f32.mxu0 %v44816_v26 }
0x23c2   :  { %37158 = vmatmul.mubr.f32.vlgmr.msra.gmra.mrb[46].mxu0 %v18830_v11 }
0x23c3   :  { %37206 = vmatprep.mubr.f32.mxu0 %v19879_v60 }
0x23fe   :  { %v19799_v39 = vpop.permute.xlu0 %19798 }
0x23ff   :  { %v19806_v13 = vsel %vm2373_vm5, %v19799_v39, 0  ;;  %v19797_v10 = vpop.permute.xlu1 %19796 }
0x2400   :  { %v19812_v42 = vand.u32 4294901760, %v19806_v13  ;;  %v19804_v49 = vsel %vm2373_vm5, %v19797_v10, 0 }
0x2401   :  { %v19809_v27 = vand.u32 4294901760, %v19804_v49 }
0x2402   :  { %v19904_v25 = vsub.f32 %v19806_v13, %v19812_v42 }
0x2403   :  { %v40214_v48 = vpack.c.bf16 %v19812_v42, %v19809_v27  ;;  %v19897_v28 = vsub.f32 %v19804_v49, %v19809_v27  ;;  %v19795_v36 = vpop.permute.xlu1 %19794 }
0x2404   :  { %v19905_v14 = vand.u32 4294901760, %v19904_v25  ;;  %v19802_v44 = vsel %vm2373_vm5, %v19795_v36, 0 }
0x2405   :  { %v19898_v26 = vand.u32 4294901760, %v19897_v28  ;;  %v19885_v5 = vand.u32 4294901760, %v19802_v44  ;;  %40215 = vmatprep.subr.bf16.mxu0 %v40214_v48  ;;  %v40222_v13 = vpack.c.bf16 %v19904_v25, %v19897_v28 }
0x2406   :  { %v19906_v11 = vsub.f32 %v19904_v25, %v19905_v14  ;;  %40217 = vmatpush3.bf16.xpose.msra.mxu0 %v40214_v48 }
0x2407   :  { %v19899_v61 = vsub.f32 %v19897_v28, %v19898_v26  ;;  %v19886_v55 = vsub.f32 %v19802_v44, %v19885_v5  ;;  %v40230_v42 = vpack.c.bf16 %v19905_v14, %v19898_v26 }
0x2408   :  { %v19907_v6 = vand.u32 4294901760, %v19906_v11 }
0x2409   :  { %v19887_v29 = vand.u32 4294901760, %v19886_v55  ;;  %v19900_v60 = vand.u32 4294901760, %v19899_v61 }
0x240b   :  { %v19888_v39 = vsub.f32 %v19886_v55, %v19887_v29  ;;  %v40218_v10 = vpack.c.bf16 %v19907_v6, %v19900_v60 }
0x240d   :  { %v19889_v47 = vand.u32 4294901760, %v19888_v39  ;;  %40219 = vmatprep.subr.bf16.mxu0 %v40218_v10 }
0x240f   :  { %37207 = vmatmul.mubr.f32.vlgmr.msra.gmra.mrb[48].mxu0 %v19889_v47  ;;  %v44886_v47 = vld [vmem:[#allocation4 + $0x1] ss:$0 sm:$0xff] }
0x2410   :  { %40221 = vmatpush3.bf16.xpose.msra.mxu0 %v40218_v10  ;;  %37213 = vmatprep.mubr.f32.mxu0 %v19875_v37 }
0x2411   :  { %40223 = vmatprep.subr.bf16.mxu0 %v40222_v13 }
0x2417   :  { %37214 = vmatmul.mubr.f32.vlgmr.msra.gmra.mrb[48].mxu0 %v19885_v5 }
0x2418   :  { %40225 = vmatpush3.bf16.xpose.msra.mxu0 %v40222_v13  ;;  %37220 = vmatprep.mubr.f32.mxu0 %v19876_v51 }
0x2419   :  { %40227 = vmatprep.subr.bf16.mxu0 %v40214_v48 }
0x241f   :  { %37221 = vmatmul.mubr.f32.vlgmr.msra.gmra.mrb[48].mxu0 %v19886_v55 }
0x2420   :  { %40229 = vmatpush3.bf16.xpose.msra.mxu0 %v40214_v48  ;;  %37227 = vmatprep.mubr.f32.mxu0 %v19877_v8 }
0x2421   :  { %40231 = vmatprep.subr.bf16.mxu0 %v40230_v42 }
0x2427   :  { %37228 = vmatmul.mubr.f32.vlgmr.msra.gmra.mrb[48].mxu0 %v19887_v29 }
0x2428   :  { %40233 = vmatpush3.bf16.xpose.msra.mxu0 %v40230_v42  ;;  %37234 = vmatprep.mubr.f32.mxu0 %v19875_v37 }
0x2429   :  { %40235 = vmatprep.subr.bf16.mxu0 %v40214_v48 }
0x242f   :  { %37235 = vmatmul.mubr.f32.vlgmr.msra.gmra.mrb[48].mxu0 %v19885_v5 }
0x2430   :  { %40237 = vmatpush3.bf16.xpose.msra.mxu0 %v40214_v48  ;;  %37241 = vmatprep.mubr.f32.mxu0 %v19875_v37 }
0x2437   :  { %37242 = vmatmul.mubr.f32.vlgmr.msra.gmra.mrb[48].mxu0 %v19885_v5 }
0x2495   :  { %v37159_v49 = vpop.f32.mrb[46].mxu0 }
0x2496   :  { %v41335_v27 = vadd.f32 %v37159_v49, %v44886_v47  ;;  %v19245_v51 = vpop.f32.mrb[47].mxu0 }
0x2497   :  { %v41336_v25 = vadd.f32 %v44886_v47, %v19245_v51 }
0x2498   :  { %v19256_v28 = vmul.f32 0.17677669, %v41335_v27 }
0x2499   :  { %v19255_v36 = vmul.f32 0.17677669, %v41336_v25 }
0x249a   :  { %v19260_v8 = vsel %vm2894_vm6, %v19256_v28, -inf }
0x249b   :  { %19261 = vmax.xlane.f32.xlu1 %v19260_v8  ;;  %v19257_v14 = vsel %vm2890_vm7, %v19255_v36, -inf }
0x249c   :  { %19258 = vmax.xlane.f32.xlu0 %v19257_v14 }
0x250a   :  { %v37243_v44 = vpop.f32.mrb[48].mxu0 }
0x250b   :  { %v20300_v48 = vpop.f32.mrb[49].mxu0  ;;  %v41337_v37 = vadd.f32 %v37243_v44, %v44886_v47 }
0x250c   :  { %v41338_v26 = vadd.f32 %v44886_v47, %v20300_v48 }
0x250d   :  { %v20311_v11 = vmul.f32 0.17677669, %v41337_v37 }
0x250e   :  { %v20310_v5 = vmul.f32 0.17677669, %v41338_v26 }
0x250f   :  { %v20315_v55 = vsel %vm2894_vm6, %v20311_v11, -inf }
0x2510   :  { %v20312_v61 = vsel %vm2890_vm7, %v20310_v5, -inf }
0x2511   :  { %20313 = vmax.xlane.f32.xlu0 %v20312_v61 }
0x2515   :  { %20316 = vmax.xlane.f32.xlu0 %v20315_v55 }
0x2528   :  { %v19262_v6 = vpop.xlane.xlu1 %19261 }
0x2529   :  { %v19264_v29 = vsub.f32 %v19256_v28, %v19262_v6  ;;  %v19259_v60 = vpop.xlane.xlu0 %19258 }
0x252a   :  { %v19263_v39 = vsub.f32 %v19255_v36, %v19259_v60 }
0x252b   :  { %v19267_v10 = vmul.f32 1.442695, %v19264_v29 }
0x252c   :  { %v19265_v13 = vmul.f32 1.442695, %v19263_v39 }
0x252d   :  { %42022 = vpow2.f32 %v19267_v10 }
0x252e   :  { %42024 = vpow2.f32 %v19265_v13 }
0x2537   :  { %v42023_v42 = vpop.eup %42022 }
0x2538   :  { %v42025_v49 = vpop.eup %42024  ;;  %v19272_v27 = vsel %vm2894_vm6, %v42023_v42, 0.0 }
0x2539   :  { %19273 = vadd.xlane.f32.xlu0 %v19272_v27  ;;  %v19269_v51 = vsel %vm2890_vm7, %v42025_v49, 0.0 }
0x253a   :  { %19270 = vadd.xlane.f32.xlu1 %v19269_v51 }
0x259e   :  { %v20314_v25 = vpop.xlane.xlu0 %20313 }
0x259f   :  { %v20318_v8 = vsub.f32 %v20310_v5, %v20314_v25 }
0x25a1   :  { %v20320_v14 = vmul.f32 1.442695, %v20318_v8 }
0x25a2   :  { %v20317_v44 = vpop.xlane.xlu0 %20316 }
0x25a3   :  { %42026 = vpow2.f32 %v20320_v14  ;;  %v20319_v28 = vsub.f32 %v20311_v11, %v20317_v44 }
0x25a5   :  { %v20322_v48 = vmul.f32 1.442695, %v20319_v28 }
0x25a7   :  { %42028 = vpow2.f32 %v20322_v48 }
0x25ad   :  { %v44898_v36 = vpop.eup %42026 }
0x25ae   :  { %v20324_v37 = vsel %vm2890_vm7, %v44898_v36, 0.0 }
0x25af   :  { %20325 = vadd.xlane.f32.xlu1 %v20324_v37 }
0x25b1   :  { %v44902_v26 = vpop.eup %42028 }
0x25b2   :  { %v20327_v61 = vsel %vm2894_vm6, %v44902_v26, 0.0 }
0x25b3   :  { %20328 = vadd.xlane.f32.xlu0 %v20327_v61 }
0x25c0   :  { %20337 = vrot.lane.b32.xlu1 %v44838_v58, %s42393_s17 }
0x25c4   :  { %20864 = vrot.lane.b32.xlu1 %v44868_v24, %s42394_s23 }
0x25c6   :  { %v19274_v5 = vpop.xlane.xlu0 %19273 }
0x25c7   :  { %42030 = vrcp.f32 %v19274_v5  ;;  %v19271_v11 = vpop.xlane.xlu1 %19270 }
0x25c8   :  { %42032 = vrcp.f32 %v19271_v11  ;;  %20866 = vrot.lane.b32.xlu1 %v44862_v54, %s42394_s23 }
0x25c9   :  { %20335 = vrot.lane.b32.xlu0 %v44842_v15, %s42393_s17 }
0x25cc   :  { %20862 = vrot.lane.b32.xlu1 %v44798_v30, %s42394_s23 }
0x25cd   :  { %20860 = vrot.lane.b32.xlu0 %v44802_v32, %s42394_s23 }
0x25d1   :  { %v42031_v55 = vpop.eup %42030 }
0x25d2   :  { %v42033_v6 = vpop.eup %42032  ;;  %v19278_v29 = vmul.f32 %v42031_v55, %v42023_v42 }
0x25d3   :  { %v19277_v60 = vmul.f32 %v42033_v6, %v42025_v49 }
0x25d4   :  { %v19283_v39 = vsel %vm2890_vm7, %v19278_v29, 0 }
0x25d5   :  { %v19280_v10 = vsel %vm2890_vm7, %v19277_v60, 0  ;;  %v19365_v13 = vand.u32 4294901760, %v19283_v39 }
0x25d6   :  { %v19355_v27 = vand.u32 4294901760, %v19280_v10 }
0x25d7   :  { %v19366_v51 = vsub.f32 %v19283_v39, %v19365_v13 }
0x25d8   :  { %v19356_v25 = vsub.f32 %v19280_v10, %v19355_v27 }
0x25d9   :  { %v19367_v8 = vand.u32 4294901760, %v19366_v51 }
0x25da   :  { %v19357_v14 = vand.u32 4294901760, %v19356_v25 }
0x25db   :  { %v19368_v44 = vsub.f32 %v19366_v51, %v19367_v8 }
0x25dc   :  { %v19358_v28 = vsub.f32 %v19356_v25, %v19357_v14 }
0x25dd   :  { %v19369_v37 = vand.u32 4294901760, %v19368_v44 }
0x25de   :  { %v19359_v48 = vand.u32 4294901760, %v19358_v28 }
0x25e0   :  { %37164 = vmatprep.mubr.f32.mxu1 %v19359_v48 }
0x25e1   :  { %37165 = vmatmul.mubr.f32.vlgmr.msra.gmra.mrb[54].mxu1 %v19369_v37 }
0x25e2   :  { %40197 = vmatpush3.bf16.msra.mxu1 %v44854_v2  ;;  %37171 = vmatprep.mubr.f32.mxu1 %v19355_v27 }
0x25e3   :  { %40199 = vmatprep.subr.bf16.mxu1 %v44850_v18 }
0x25e9   :  { %37172 = vmatmul.mubr.f32.vlgmr.msra.gmra.mrb[54].mxu1 %v19365_v13 }
0x25ea   :  { %40201 = vmatpush3.bf16.msra.mxu1 %v44850_v18  ;;  %37178 = vmatprep.mubr.f32.mxu1 %v19356_v25 }
0x25eb   :  { %40203 = vmatprep.subr.bf16.mxu1 %v44845_v22 }
0x25f1   :  { %37179 = vmatmul.mubr.f32.vlgmr.msra.gmra.mrb[54].mxu1 %v19366_v51 }
0x25f2   :  { %40205 = vmatpush3.bf16.msra.mxu1 %v44845_v22  ;;  %37185 = vmatprep.mubr.f32.mxu1 %v19357_v14 }
0x25f3   :  { %40207 = vmatprep.subr.bf16.mxu1 %v44852_v1 }
0x25f9   :  { %37186 = vmatmul.mubr.f32.vlgmr.msra.gmra.mrb[54].mxu1 %v19367_v8 }
0x25fa   :  { %40209 = vmatpush3.bf16.msra.mxu1 %v44852_v1  ;;  %37192 = vmatprep.mubr.f32.mxu1 %v19355_v27 }
0x25fb   :  { %40211 = vmatprep.subr.bf16.mxu1 %v44845_v22 }
0x2601   :  { %37193 = vmatmul.mubr.f32.vlgmr.msra.gmra.mrb[54].mxu1 %v19365_v13 }
0x2602   :  { %40213 = vmatpush3.bf16.msra.mxu1 %v44845_v22  ;;  %37199 = vmatprep.mubr.f32.mxu1 %v19355_v27 }
0x2609   :  { %37200 = vmatmul.mubr.f32.vlgmr.msra.gmra.mrb[54].mxu1 %v19365_v13 }
0x263c   :  { %v20326_v18 = vpop.xlane.xlu1 %20325 }
0x263d   :  { %42034 = vrcp.f32 %v20326_v18 }
0x2640   :  { %v20329_v2 = vpop.xlane.xlu0 %20328  ;;  %v20338_v42 = vpop.permute.xlu1 %20337 }
0x2641   :  { %42036 = vrcp.f32 %v20329_v2  ;;  %v20346_v49 = vsel %vm317_vm1, %v20338_v42, 0 }
0x2642   :  { %v20352_v61 = vand.u32 4294901760, %v20346_v49 }
0x2644   :  { %v20444_v5 = vsub.f32 %v20346_v49, %v20352_v61  ;;  %v20336_v11 = vpop.permute.xlu0 %20335 }
0x2645   :  { %v20349_v55 = vand.u32 4294901760, %v20336_v11 }
0x2646   :  { %v20445_v1 = vand.u32 4294901760, %v20444_v5 }
0x2647   :  { %v42035_v6 = vpop.eup %42034  ;;  %v44930_v29 = vpack.c.bf16 %v20352_v61, %v20349_v55  ;;  %v20437_v60 = vsub.f32 %v20336_v11, %v20349_v55 }
0x2648   :  { %v20332_v22 = vmul.f32 %v42035_v6, %v44898_v36  ;;  %v20446_v39 = vsub.f32 %v20444_v5, %v20445_v1 }
0x2649   :  { %v20438_v10 = vand.u32 4294901760, %v20437_v60  ;;  %40239 = vmatprep.subr.bf16.mxu1 %v44930_v29  ;;  %v40246_v6 = vpack.c.bf16 %v20444_v5, %v20437_v60 }
0x264a   :  { %40241 = vmatpush3.bf16.msra.mxu1 %v44930_v29  ;;  %v20341_v51 = vsel %vm2890_vm7, %v20332_v22, 0  ;;  %v20447_v14 = vand.u32 4294901760, %v20446_v39 }
0x264b   :  { %v42037_v13 = vpop.eup %42036  ;;  %v20439_v27 = vsub.f32 %v20437_v60, %v20438_v10  ;;  %v20415_v44 = vand.u32 4294901760, %v20341_v51  ;;  %v40254_v39 = vpack.c.bf16 %v20445_v1, %v20438_v10 }
0x264c   :  { %v20333_v25 = vmul.f32 %v42037_v13, %v44902_v26  ;;  %v20865_v26 = vpop.permute.xlu1 %20864  ;;  %v20861_v13 = vpop.permute.xlu0 %20860 }
0x264d   :  { %v20440_v8 = vand.u32 4294901760, %v20439_v27  ;;  %v20416_v37 = vsub.f32 %v20341_v51, %v20415_v44  ;;  %v20872_v5 = vsel %vm2373_vm5, %v20865_v26, 0  ;;  %v20868_v60 = vsel %vm2373_vm5, %v20861_v13, 0 }
0x264e   :  { %v20344_v28 = vsel %vm2890_vm7, %v20333_v25, 0  ;;  %v20877_v25 = vand.u32 4294901760, %v20872_v5 }
0x264f   :  { %v40242_v48 = vpack.c.bf16 %v20447_v14, %v20440_v8  ;;  %v20425_v36 = vand.u32 4294901760, %v20344_v28  ;;  %v20417_v18 = vand.u32 4294901760, %v20416_v37  ;;  %v20943_v8 = vand.u32 4294901760, %v20868_v60 }
0x2650   :  { %v20867_v22 = vpop.permute.xlu1 %20866  ;;  %v20965_v1 = vsub.f32 %v20872_v5, %v20877_v25 }
0x2651   :  { %40243 = vmatprep.subr.bf16.mxu1 %v40242_v48  ;;  %v20426_v2 = vsub.f32 %v20344_v28, %v20425_v36  ;;  %v20418_v42 = vsub.f32 %v20416_v37, %v20417_v18  ;;  %v20874_v27 = vsel %vm2373_vm5, %v20867_v22, 0  ;;  %v20944_v10 = vsub.f32 %v20868_v60, %v20943_v8 }
0x2652   :  { %v20880_v51 = vand.u32 4294901760, %v20874_v27 }
0x2653   :  { %v20427_v49 = vand.u32 4294901760, %v20426_v2  ;;  %v20419_v61 = vand.u32 4294901760, %v20418_v42 }
0x2654   :  { %v20972_v14 = vsub.f32 %v20874_v27, %v20880_v51  ;;  %v20863_v28 = vpop.permute.xlu1 %20862 }
0x2655   :  { %v20428_v11 = vsub.f32 %v20426_v2, %v20427_v49  ;;  %37248 = vmatprep.mubr.f32.mxu1 %v20419_v61  ;;  %v40262_v61 = vpack.c.bf16 %v20880_v51, %v20877_v25 }
0x2656   :  { %v40270_v51 = vpack.c.bf16 %v20972_v14, %v20965_v1 }
0x2657   :  { %v20429_v55 = vand.u32 4294901760, %v20428_v11 }
0x2659   :  { %37249 = vmatmul.mubr.f32.vlgmr.msra.gmra.mrb[56].mxu1 %v20429_v55 }
0x265a   :  { %40245 = vmatpush3.bf16.msra.mxu1 %v40242_v48  ;;  %37255 = vmatprep.mubr.f32.mxu1 %v20415_v44  ;;  %v20870_v48 = vsel %vm2373_vm5, %v20863_v28, 0 }
0x265b   :  { %40247 = vmatprep.subr.bf16.mxu1 %v40246_v6  ;;  %v20953_v42 = vand.u32 4294901760, %v20870_v48 }
0x265d   :  { %v20954_v55 = vsub.f32 %v20870_v48, %v20953_v42 }
0x265f   :  { %v20955_v22 = vand.u32 4294901760, %v20954_v55 }
0x2661   :  { %37256 = vmatmul.mubr.f32.vlgmr.msra.gmra.mrb[56].mxu1 %v20425_v36  ;;  %v20956_v5 = vsub.f32 %v20954_v55, %v20955_v22 }
0x2662   :  { %40249 = vmatpush3.bf16.msra.mxu1 %v40246_v6  ;;  %37262 = vmatprep.mubr.f32.mxu1 %v20416_v37  ;;  %v20973_v37 = vand.u32 4294901760, %v20972_v14 }
0x2663   :  { %40251 = vmatprep.subr.bf16.mxu1 %v44930_v29  ;;  %v20957_v60 = vand.u32 4294901760, %v20956_v5 }
0x2664   :  { %v20974_v11 = vsub.f32 %v20972_v14, %v20973_v37 }
0x2666   :  { %v20975_v26 = vand.u32 4294901760, %v20974_v11 }
0x2669   :  { %37263 = vmatmul.mubr.f32.vlgmr.msra.gmra.mrb[56].mxu1 %v20426_v2  ;;  %v20945_v2 = vand.u32 4294901760, %v20944_v10 }
0x266a   :  { %40253 = vmatpush3.bf16.msra.mxu1 %v44930_v29  ;;  %37269 = vmatprep.mubr.f32.mxu1 %v20417_v18  ;;  %v20966_v18 = vand.u32 4294901760, %v20965_v1 }
0x266b   :  { %40255 = vmatprep.subr.bf16.mxu1 %v40254_v39  ;;  %v20946_v6 = vsub.f32 %v20944_v10, %v20945_v2 }
0x2671   :  { %37270 = vmatmul.mubr.f32.vlgmr.msra.gmra.mrb[56].mxu1 %v20427_v49  ;;  %v20967_v49 = vsub.f32 %v20965_v1, %v20966_v18 }
0x2672   :  { %40257 = vmatpush3.bf16.msra.mxu1 %v40254_v39  ;;  %37276 = vmatprep.mubr.f32.mxu1 %v20415_v44  ;;  %v20947_v39 = vand.u32 4294901760, %v20946_v6 }
0x2673   :  { %40259 = vmatprep.subr.bf16.mxu1 %v44930_v29  ;;  %v20968_v13 = vand.u32 4294901760, %v20967_v49 }
0x2675   :  { %v40266_v27 = vpack.c.bf16 %v20975_v26, %v20968_v13 }
0x2679   :  { %37277 = vmatmul.mubr.f32.vlgmr.msra.gmra.mrb[56].mxu1 %v20425_v36 }
0x267a   :  { %40261 = vmatpush3.bf16.msra.mxu1 %v44930_v29  ;;  %37283 = vmatprep.mubr.f32.mxu1 %v20415_v44  ;;  %v40278_v29 = vpack.c.bf16 %v20973_v37, %v20966_v18 }
0x267b   :  { %40263 = vmatprep.subr.bf16.mxu1 %v40262_v61 }
0x2681   :  { %37284 = vmatmul.mubr.f32.vlgmr.msra.gmra.mrb[56].mxu1 %v20425_v36 }
0x2682   :  { %37290 = vmatprep.mubr.f32.mxu1 %v20947_v39 }
0x2683   :  { %40265 = vmatpush3.bf16.xpose.msra.mxu1 %v40262_v61 }
0x2684   :  { %40267 = vmatprep.subr.bf16.mxu1 %v40266_v27 }
0x268a   :  { %37291 = vmatmul.mubr.f32.vlgmr.msra.gmra.mrb[58].mxu1 %v20957_v60 }
0x268b   :  { %40269 = vmatpush3.bf16.xpose.msra.mxu1 %v40266_v27  ;;  %37297 = vmatprep.mubr.f32.mxu1 %v20943_v8 }
0x268c   :  { %40271 = vmatprep.subr.bf16.mxu1 %v40270_v51 }
0x2692   :  { %37298 = vmatmul.mubr.f32.vlgmr.msra.gmra.mrb[58].mxu1 %v20953_v42 }
0x2693   :  { %40273 = vmatpush3.bf16.xpose.msra.mxu1 %v40270_v51  ;;  %37304 = vmatprep.mubr.f32.mxu1 %v20944_v10 }
0x2694   :  { %40275 = vmatprep.subr.bf16.mxu1 %v40262_v61 }
0x269a   :  { %37305 = vmatmul.mubr.f32.vlgmr.msra.gmra.mrb[58].mxu1 %v20954_v55 }
0x269b   :  { %40277 = vmatpush3.bf16.xpose.msra.mxu1 %v40262_v61  ;;  %37311 = vmatprep.mubr.f32.mxu1 %v20945_v2 }
0x269c   :  { %40279 = vmatprep.subr.bf16.mxu1 %v40278_v29 }
0x26a2   :  { %37312 = vmatmul.mubr.f32.vlgmr.msra.gmra.mrb[58].mxu1 %v20955_v22 }
0x26a3   :  { %40281 = vmatpush3.bf16.xpose.msra.mxu1 %v40278_v29  ;;  %37318 = vmatprep.mubr.f32.mxu1 %v20943_v8 }
0x26a4   :  { %40283 = vmatprep.subr.bf16.mxu1 %v40262_v61 }
0x26aa   :  { %37319 = vmatmul.mubr.f32.vlgmr.msra.gmra.mrb[58].mxu1 %v20953_v42 }
0x26ab   :  { %40285 = vmatpush3.bf16.xpose.msra.mxu1 %v40262_v61  ;;  %37325 = vmatprep.mubr.f32.mxu1 %v20943_v8 }
0x26b2   :  { %37326 = vmatmul.mubr.f32.vlgmr.msra.gmra.mrb[58].mxu1 %v20953_v42 }
0x26dc   :  { %v37201_v44 = vpop.f32.mrb[54].mxu1 }
0x26dd   :  { %19791 = vst.msk [vmem:[#allocation3 + $0x8] sm:$0xf] %vm3426_vm8, %v37201_v44  ;;  %v19780_v36 = vpop.f32.mrb[55].mxu1 }
0x26de   :  { %19790 = vst.msk [vmem:[#allocation3] sm:$0xff] %vm2373_vm5, %v19780_v36 }
0x2754   :  { %v44948_v25 = vpop.f32.mrb[56].mxu1 }
0x2755   :  { %v44950_v14 = vpop.f32.mrb[57].mxu1 }
0x2785   :  { %v37327_v28 = vpop.f32.mrb[58].mxu1 }
0x2786   :  { %v41339_v1 = vadd.f32 %v37327_v28, %v44886_v47  ;;  %v21368_v10 = vpop.f32.mrb[59].mxu1 }
0x2787   :  { %v41340_v48 = vadd.f32 %v44886_v47, %v21368_v10 }
0x2788   :  { %v21379_v37 = vmul.f32 0.17677669, %v41339_v1 }
0x2789   :  { %v21378_v18 = vmul.f32 0.17677669, %v41340_v48 }
0x278a   :  { %v21383_v8 = vsel %vm2894_vm6, %v21379_v37, -inf }
0x278b   :  { %21384 = vmax.xlane.f32.xlu1 %v21383_v8  ;;  %v21380_v2 = vsel %vm2890_vm7, %v21378_v18, -inf }
0x278c   :  { %21381 = vmax.xlane.f32.xlu0 %v21380_v2 }
0x279c   :  { %21404 = vrot.lane.b32.xlu1 %v44838_v58, %s42394_s23 }
0x27a0   :  { %21931 = vrot.lane.b32.xlu1 %v44868_v24, %s42395_s9 }
0x27a4   :  { %21933 = vrot.lane.b32.xlu1 %v44862_v54, %s42395_s9 }
0x27a8   :  { %21929 = vrot.lane.b32.xlu1 %v44798_v30, %s42395_s9 }
0x2818   :  { %v21385_v42 = vpop.xlane.xlu1 %21384 }
0x2819   :  { %v21387_v61 = vsub.f32 %v21379_v37, %v21385_v42  ;;  %v21382_v11 = vpop.xlane.xlu0 %21381 }
0x281a   :  { %v21386_v49 = vsub.f32 %v21378_v18, %v21382_v11 }
0x281b   :  { %v21390_v55 = vmul.f32 1.442695, %v21387_v61 }
0x281c   :  { %v21388_v6 = vmul.f32 1.442695, %v21386_v49  ;;  %v21405_v30 = vpop.permute.xlu1 %21404 }
0x281d   :  { %42038 = vpow2.f32 %v21390_v55  ;;  %v21413_v54 = vsel %vm317_vm1, %v21405_v30, 0 }
0x281e   :  { %42040 = vpow2.f32 %v21388_v6  ;;  %v21419_v27 = vand.u32 4294901760, %v21413_v54 }
0x2820   :  { %v21511_v60 = vsub.f32 %v21413_v54, %v21419_v27 }
0x2822   :  { %v21512_v29 = vand.u32 4294901760, %v21511_v60 }
0x2824   :  { %v21513_v48 = vsub.f32 %v21511_v60, %v21512_v29 }
0x2826   :  { %v21514_v11 = vand.u32 4294901760, %v21513_v48 }
0x2827   :  { %v42039_v26 = vpop.eup %42038 }
0x2828   :  { %v21395_v22 = vsel %vm2894_vm6, %v42039_v26, 0.0  ;;  %v42041_v39 = vpop.eup %42040 }
0x2829   :  { %21396 = vadd.xlane.f32.xlu0 %v21395_v22  ;;  %v21392_v24 = vsel %vm2890_vm7, %v42041_v39, 0.0 }
0x282d   :  { %21393 = vadd.xlane.f32.xlu0 %v21392_v24 }
0x2843   :  { %21402 = vrot.lane.b32.xlu0 %v44842_v15, %s42394_s23 }
0x2847   :  { %21927 = vrot.lane.b32.xlu0 %v44802_v32, %s42395_s9 }
0x28b6   :  { %v21397_v13 = vpop.xlane.xlu0 %21396 }
0x28b7   :  { %42042 = vrcp.f32 %v21397_v13 }
0x28ba   :  { %v21394_v5 = vpop.xlane.xlu0 %21393 }
0x28bb   :  { %42044 = vrcp.f32 %v21394_v5 }
0x28be   :  { %v21403_v51 = vpop.permute.xlu0 %21402 }
0x28bf   :  { %v21416_v44 = vand.u32 4294901760, %v21403_v51 }
0x28c1   :  { %v42043_v36 = vpop.eup %42042  ;;  %v44971_v28 = vpack.c.bf16 %v21419_v27, %v21416_v44  ;;  %v21504_v1 = vsub.f32 %v21403_v51, %v21416_v44 }
0x28c2   :  { %v21401_v10 = vmul.f32 %v42043_v36, %v42039_v26 }
0x28c3   :  { %v21505_v37 = vand.u32 4294901760, %v21504_v1  ;;  %40287 = vmatprep.subr.bf16.mxu0 %v44971_v28  ;;  %v40294_v51 = vpack.c.bf16 %v21511_v60, %v21504_v1 }
0x28c4   :  { %40289 = vmatpush3.bf16.msra.mxu0 %v44971_v28  ;;  %v21411_v32 = vsel %vm2890_vm7, %v21401_v10, 0  ;;  %v21928_v10 = vpop.permute.xlu0 %21927 }
0x28c5   :  { %v42045_v18 = vpop.eup %42044  ;;  %v21506_v8 = vsub.f32 %v21504_v1, %v21505_v37  ;;  %v44976_v2 = vand.u32 4294901760, %v21411_v32  ;;  %v40302_v36 = vpack.c.bf16 %v21512_v29, %v21505_v37  ;;  %v21935_v1 = vsel %vm2373_vm5, %v21928_v10, 0 }
0x28c6   :  { %v21400_v42 = vmul.f32 %v42045_v18, %v42041_v39  ;;  %v21932_v39 = vpop.permute.xlu1 %21931 }
0x28c7   :  { %v21507_v61 = vand.u32 4294901760, %v21506_v8  ;;  %v21493_v49 = vsub.f32 %v21411_v32, %v44976_v2  ;;  %v21939_v60 = vsel %vm2373_vm5, %v21932_v39, 0  ;;  %v22010_v8 = vand.u32 4294901760, %v21935_v1 }
0x28c8   :  { %v21408_v55 = vsel %vm2890_vm7, %v21400_v42, 0  ;;  %v21944_v18 = vand.u32 4294901760, %v21939_v60 }
0x28c9   :  { %v40290_v6 = vpack.c.bf16 %v21514_v11, %v21507_v61  ;;  %v21482_v26 = vand.u32 4294901760, %v21408_v55  ;;  %v21494_v22 = vand.u32 4294901760, %v21493_v49  ;;  %v22011_v37 = vsub.f32 %v21935_v1, %v22010_v8  ;;  %v46231_v1 = vld [vmem:[#allocation59_spill] sm:$0xff] }
0x28ca   :  { %v21934_v44 = vpop.permute.xlu1 %21933  ;;  %v22032_v29 = vsub.f32 %v21939_v60, %v21944_v18 }
0x28cb   :  { %40291 = vmatprep.subr.bf16.mxu0 %v40290_v6  ;;  %v21483_v24 = vsub.f32 %v21408_v55, %v21482_v26  ;;  %v21495_v54 = vsub.f32 %v21493_v49, %v21494_v22  ;;  %v21941_v48 = vsel %vm2373_vm5, %v21934_v44, 0 }
0x28cc   :  { %v21947_v32 = vand.u32 4294901760, %v21941_v48  ;;  %v22033_v55 = vand.u32 4294901760, %v22032_v29 }
0x28cd   :  { %v21484_v30 = vand.u32 4294901760, %v21483_v24  ;;  %v21496_v5 = vand.u32 4294901760, %v21495_v54 }
0x28ce   :  { %v22039_v42 = vsub.f32 %v21941_v48, %v21947_v32  ;;  %v21930_v61 = vpop.permute.xlu1 %21929 }
0x28cf   :  { %v21485_v13 = vsub.f32 %v21483_v24, %v21484_v30  ;;  %v21937_v11 = vsel %vm2373_vm5, %v21930_v61, 0 }
0x28d0   :  { %v40318_v60 = vpack.c.bf16 %v22039_v42, %v22032_v29 }
0x28d1   :  { %v21486_v27 = vand.u32 4294901760, %v21485_v13 }
0x28d3   :  { %37332 = vmatprep.mubr.f32.mxu0 %v21486_v27 }
0x28d4   :  { %37333 = vmatmul.mubr.f32.vlgmr.msra.gmra.mrb[50].mxu0 %v21496_v5 }
0x28d5   :  { %40293 = vmatpush3.bf16.msra.mxu0 %v40290_v6  ;;  %37339 = vmatprep.mubr.f32.mxu0 %v21482_v26  ;;  %v22020_v6 = vand.u32 4294901760, %v21937_v11 }
0x28d6   :  { %40295 = vmatprep.subr.bf16.mxu0 %v40294_v51 }
0x28d7   :  { %v22021_v13 = vsub.f32 %v21937_v11, %v22020_v6 }
0x28dc   :  { %37340 = vmatmul.mubr.f32.vlgmr.msra.gmra.mrb[50].mxu0 %v44976_v2 }
0x28dd   :  { %40297 = vmatpush3.bf16.msra.mxu0 %v40294_v51  ;;  %37346 = vmatprep.mubr.f32.mxu0 %v21483_v24  ;;  %v22012_v24 = vand.u32 4294901760, %v22011_v37  ;;  %v22022_v51 = vand.u32 4294901760, %v22021_v13 }
0x28de   :  { %40299 = vmatprep.subr.bf16.mxu0 %v44971_v28 }
0x28df   :  { %v22013_v27 = vsub.f32 %v22011_v37, %v22012_v24  ;;  %v22023_v10 = vsub.f32 %v22021_v13, %v22022_v51 }
0x28e1   :  { %v22014_v39 = vand.u32 4294901760, %v22013_v27  ;;  %v22024_v48 = vand.u32 4294901760, %v22023_v10 }
0x28e4   :  { %37347 = vmatmul.mubr.f32.vlgmr.msra.gmra.mrb[50].mxu0 %v21493_v49  ;;  %v22040_v49 = vand.u32 4294901760, %v22039_v42 }
0x28e5   :  { %40301 = vmatpush3.bf16.msra.mxu0 %v44971_v28  ;;  %37353 = vmatprep.mubr.f32.mxu0 %v21484_v30  ;;  %v40310_v30 = vpack.c.bf16 %v21947_v32, %v21944_v18 }
0x28e6   :  { %40303 = vmatprep.subr.bf16.mxu0 %v40302_v36  ;;  %v22041_v54 = vsub.f32 %v22039_v42, %v22040_v49 }
0x28e8   :  { %v22042_v5 = vand.u32 4294901760, %v22041_v54 }
0x28ec   :  { %37354 = vmatmul.mubr.f32.vlgmr.msra.gmra.mrb[50].mxu0 %v21494_v22  ;;  %v22034_v22 = vsub.f32 %v22032_v29, %v22033_v55 }
0x28ed   :  { %40305 = vmatpush3.bf16.msra.mxu0 %v40302_v36  ;;  %37360 = vmatprep.mubr.f32.mxu0 %v21482_v26 }
0x28ee   :  { %40307 = vmatprep.subr.bf16.mxu0 %v44971_v28  ;;  %v22035_v44 = vand.u32 4294901760, %v22034_v22 }
0x28f0   :  { %v40314_v36 = vpack.c.bf16 %v22042_v5, %v22035_v44 }
0x28f4   :  { %37361 = vmatmul.mubr.f32.vlgmr.msra.gmra.mrb[50].mxu0 %v44976_v2 }
0x28f5   :  { %40309 = vmatpush3.bf16.msra.mxu0 %v44971_v28  ;;  %37367 = vmatprep.mubr.f32.mxu0 %v21482_v26  ;;  %v40326_v28 = vpack.c.bf16 %v22040_v49, %v22033_v55  ;;  %v46230_v26 = vld [vmem:[#allocation58_spill] sm:$0xff] }
0x28f6   :  { %40311 = vmatprep.subr.bf16.mxu0 %v40310_v30 }
0x28fc   :  { %37368 = vmatmul.mubr.f32.vlgmr.msra.gmra.mrb[50].mxu0 %v44976_v2  ;;  %v46229_v2 = vld [vmem:[#allocation57_spill] sm:$0xff] }
0x28fd   :  { %37374 = vmatprep.mubr.f32.mxu0 %v22014_v39 }
0x28fe   :  { %40313 = vmatpush3.bf16.xpose.msra.mxu0 %v40310_v30 }
0x28ff   :  { %40315 = vmatprep.subr.bf16.mxu0 %v40314_v36 }
0x2905   :  { %37375 = vmatmul.mubr.f32.vlgmr.msra.gmra.mrb[52].mxu0 %v22024_v48 }
0x2906   :  { %40317 = vmatpush3.bf16.xpose.msra.mxu0 %v40314_v36  ;;  %37381 = vmatprep.mubr.f32.mxu0 %v22010_v8 }
0x2907   :  { %40319 = vmatprep.subr.bf16.mxu0 %v40318_v60 }
0x290d   :  { %37382 = vmatmul.mubr.f32.vlgmr.msra.gmra.mrb[52].mxu0 %v22020_v6 }
0x290e   :  { %40321 = vmatpush3.bf16.xpose.msra.mxu0 %v40318_v60  ;;  %37388 = vmatprep.mubr.f32.mxu0 %v22011_v37 }
0x290f   :  { %40323 = vmatprep.subr.bf16.mxu0 %v40310_v30 }
0x2915   :  { %37389 = vmatmul.mubr.f32.vlgmr.msra.gmra.mrb[52].mxu0 %v22021_v13 }
0x2916   :  { %40325 = vmatpush3.bf16.xpose.msra.mxu0 %v40310_v30  ;;  %37395 = vmatprep.mubr.f32.mxu0 %v22012_v24 }
0x2917   :  { %40327 = vmatprep.subr.bf16.mxu0 %v40326_v28 }
0x291d   :  { %37396 = vmatmul.mubr.f32.vlgmr.msra.gmra.mrb[52].mxu0 %v22022_v51 }
0x291e   :  { %40329 = vmatpush3.bf16.xpose.msra.mxu0 %v40326_v28  ;;  %37402 = vmatprep.mubr.f32.mxu0 %v22010_v8 }
0x291f   :  { %40331 = vmatprep.subr.bf16.mxu0 %v40310_v30 }
0x2925   :  { %37403 = vmatmul.mubr.f32.vlgmr.msra.gmra.mrb[52].mxu0 %v22020_v6 }
0x2926   :  { %40333 = vmatpush3.bf16.xpose.msra.mxu0 %v40310_v30  ;;  %37409 = vmatprep.mubr.f32.mxu0 %v22010_v8 }
0x2927   :  { %40407 = vmatprep.subr.bf16.mxu0 %v46229_v2 }
0x292d   :  { %37410 = vmatmul.mubr.f32.vlgmr.msra.gmra.mrb[52].mxu0 %v22020_v6 }
0x292e   :  { %40409 = vmatpush3.bf16.msra.mxu0 %v46229_v2 }
0x292f   :  { %40411 = vmatprep.subr.bf16.mxu0 %v46230_v26 }
0x2932   :  { %40413 = vmatpush3.bf16.msra.mxu0 %v46230_v26 }
0x2933   :  { %40415 = vmatprep.subr.bf16.mxu0 %v46231_v1 }
0x29cf   :  { %v37369_v32 = vpop.f32.mrb[50].mxu0 }
0x29d0   :  { %v21907_v18 = vpop.f32.mrb[51].mxu0 }
0x2a00   :  { %v37411_v42 = vpop.f32.mrb[52].mxu0 }
0x2a01   :  { %v41341_v61 = vadd.f32 %v37411_v42, %v44886_v47  ;;  %v22435_v29 = vpop.f32.mrb[53].mxu0 }
0x2a02   :  { %v41342_v37 = vadd.f32 %v44886_v47, %v22435_v29 }
0x2a03   :  { %v22446_v8 = vmul.f32 0.17677669, %v41341_v61 }
0x2a04   :  { %v22445_v11 = vmul.f32 0.17677669, %v41342_v37 }
0x2a05   :  { %v22450_v49 = vsel %vm2894_vm6, %v22446_v8, -inf }
0x2a06   :  { %22451 = vmax.xlane.f32.xlu1 %v22450_v49  ;;  %v22447_v55 = vsel %vm2890_vm7, %v22445_v11, -inf }
0x2a07   :  { %22448 = vmax.xlane.f32.xlu0 %v22447_v55 }
0x2a17   :  { %22471 = vrot.lane.b32.xlu1 %v44838_v58, %s42395_s9 }
0x2a1b   :  { %20852 = vrot.lane.b32.xlu1 %v44950_v14, %s42390_s30 }
0x2a1f   :  { %20854 = vrot.lane.b32.xlu1 %v44948_v25, %s42390_s30 }
0x2a23   :  { %21921 = vrot.lane.b32.xlu1 %v37369_v32, %s42380_s2 }
0x2a93   :  { %v22452_v47 = vpop.xlane.xlu1 %22451 }
0x2a94   :  { %v22454_v6 = vsub.f32 %v22446_v8, %v22452_v47  ;;  %v22449_v24 = vpop.xlane.xlu0 %22448 }
0x2a95   :  { %v22453_v30 = vsub.f32 %v22445_v11, %v22449_v24 }
0x2a96   :  { %v22457_v54 = vmul.f32 1.442695, %v22454_v6 }
0x2a97   :  { %v22455_v22 = vmul.f32 1.442695, %v22453_v30  ;;  %v22472_v13 = vpop.permute.xlu1 %22471 }
0x2a98   :  { %42046 = vpow2.f32 %v22457_v54  ;;  %v22480_v44 = vsel %vm317_vm1, %v22472_v13, 0 }
0x2a99   :  { %42048 = vpow2.f32 %v22455_v22  ;;  %v22486_v10 = vand.u32 4294901760, %v22480_v44 }
0x2a9b   :  { %v20853_v27 = vpop.permute.xlu1 %20852  ;;  %v22578_v60 = vsub.f32 %v22480_v44, %v22486_v10 }
0x2a9c   :  { %20858 = vst.msk [vmem:[#allocation3] sm:$0xff] %vm4494_vm9, %v20853_v27 }
0x2a9d   :  { %v22579_v32 = vand.u32 4294901760, %v22578_v60 }
0x2a9f   :  { %v20855_v58 = vpop.permute.xlu1 %20854  ;;  %v22580_v49 = vsub.f32 %v22578_v60, %v22579_v32 }
0x2aa0   :  { %20859 = vst.msk [vmem:[#allocation3 + $0x8] sm:$0xf] %vm4496_vm10, %v20855_v58 }
0x2aa1   :  { %v22581_v54 = vand.u32 4294901760, %v22580_v49 }
0x2aa2   :  { %v42047_v14 = vpop.eup %42046 }
0x2aa3   :  { %v21922_v5 = vpop.permute.xlu1 %21921  ;;  %v22462_v25 = vsel %vm2894_vm6, %v42047_v14, 0.0  ;;  %v42049_v51 = vpop.eup %42048 }
0x2aa4   :  { %21926 = vst.msk [vmem:[#allocation3 + $0x8] sm:$0xf] %vm5565_vm11, %v21922_v5  ;;  %22463 = vadd.xlane.f32.xlu0 %v22462_v25  ;;  %v22459_v39 = vsel %vm2890_vm7, %v42049_v51, 0.0 }
0x2aa8   :  { %22460 = vadd.xlane.f32.xlu0 %v22459_v39 }
0x2abe   :  { %22469 = vrot.lane.b32.xlu0 %v44842_v15, %s42395_s9 }
0x2ac2   :  { %21919 = vrot.lane.b32.xlu0 %v21907_v18, %s42380_s2 }
0x2b31   :  { %v22464_v36 = vpop.xlane.xlu0 %22463 }
0x2b32   :  { %42050 = vrcp.f32 %v22464_v36 }
0x2b35   :  { %v22461_v48 = vpop.xlane.xlu0 %22460 }
0x2b36   :  { %42052 = vrcp.f32 %v22461_v48 }
0x2b39   :  { %v22470_v28 = vpop.permute.xlu0 %22469 }
0x2b3a   :  { %v22483_v42 = vand.u32 4294901760, %v22470_v28 }
0x2b3c   :  { %v42051_v61 = vpop.eup %42050  ;;  %v40334_v29 = vpack.c.bf16 %v22486_v10, %v22483_v42  ;;  %v22571_v37 = vsub.f32 %v22470_v28, %v22483_v42  ;;  %v46233_v28 = vld [vmem:[#allocation50_spill] sm:$0xff] }
0x2b3d   :  { %v22468_v8 = vmul.f32 %v42051_v61, %v42047_v14  ;;  %v21920_v11 = vpop.permute.xlu0 %21919 }
0x2b3e   :  { %v22572_v15 = vand.u32 4294901760, %v22571_v37  ;;  %21925 = vst.msk [vmem:[#allocation3] sm:$0xff] %vm5563_vm12, %v21920_v11  ;;  %40335 = vmatprep.subr.bf16.mxu1 %v40334_v29  ;;  %v40342_v48 = vpack.c.bf16 %v22578_v60, %v22571_v37  ;;  %v46232_v60 = vld [vmem:[#allocation49_spill] sm:$0xff] }
0x2b3f   :  { %40337 = vmatpush3.bf16.msra.mxu1 %v40334_v29  ;;  %v22478_v18 = vsel %vm2890_vm7, %v22468_v8, 0 }
0x2b40   :  { %v42053_v55 = vpop.eup %42052  ;;  %v22573_v47 = vsub.f32 %v22571_v37, %v22572_v15  ;;  %v22559_v6 = vand.u32 4294901760, %v22478_v18 }
0x2b41   :  { %v22467_v24 = vmul.f32 %v42053_v55, %v42049_v51  ;;  %v40350_v51 = vpack.c.bf16 %v22579_v32, %v22572_v15  ;;  %v46234_v32 = vld [vmem:[#allocation51_spill] sm:$0xff] }
0x2b42   :  { %v22574_v30 = vand.u32 4294901760, %v22573_v47  ;;  %v22560_v22 = vsub.f32 %v22478_v18, %v22559_v6 }
0x2b43   :  { %v22475_v13 = vsel %vm2890_vm7, %v22467_v24, 0 }
0x2b44   :  { %v40338_v27 = vpack.c.bf16 %v22581_v54, %v22574_v30  ;;  %v22549_v58 = vand.u32 4294901760, %v22475_v13  ;;  %v22561_v14 = vand.u32 4294901760, %v22560_v22 }
0x2b46   :  { %40339 = vmatprep.subr.bf16.mxu1 %v40338_v27  ;;  %v22550_v5 = vsub.f32 %v22475_v13, %v22549_v58  ;;  %v22562_v39 = vsub.f32 %v22560_v22, %v22561_v14 }
0x2b48   :  { %v22551_v25 = vand.u32 4294901760, %v22550_v5  ;;  %v22563_v10 = vand.u32 4294901760, %v22562_v39  ;;  %v46239_v39 = vld [vmem:[#allocation56_spill] sm:$0xff] }
0x2b4a   :  { %v22552_v44 = vsub.f32 %v22550_v5, %v22551_v25 }
0x2b4c   :  { %v22553_v36 = vand.u32 4294901760, %v22552_v44 }
0x2b4e   :  { %37416 = vmatprep.mubr.f32.mxu1 %v22553_v36  ;;  %v42103_v36 = vld [vmem:[#allocation9] ss:$0 sm:$0xff] }
0x2b4f   :  { %37417 = vmatmul.mubr.f32.vlgmr.msra.gmra.mrb[60].mxu1 %v22563_v10 }
0x2b50   :  { %40341 = vmatpush3.bf16.msra.mxu1 %v40338_v27  ;;  %37423 = vmatprep.mubr.f32.mxu1 %v22549_v58 }
0x2b51   :  { %40343 = vmatprep.subr.bf16.mxu1 %v40342_v48 }
0x2b57   :  { %37424 = vmatmul.mubr.f32.vlgmr.msra.gmra.mrb[60].mxu1 %v22559_v6 }
0x2b58   :  { %40345 = vmatpush3.bf16.msra.mxu1 %v40342_v48  ;;  %37430 = vmatprep.mubr.f32.mxu1 %v22550_v5  ;;  %v46237_v5 = vld [vmem:[#allocation54_spill] sm:$0xff] }
0x2b59   :  { %40347 = vmatprep.subr.bf16.mxu1 %v40334_v29 }
0x2b5f   :  { %37431 = vmatmul.mubr.f32.vlgmr.msra.gmra.mrb[60].mxu1 %v22560_v22 }
0x2b60   :  { %40349 = vmatpush3.bf16.msra.mxu1 %v40334_v29  ;;  %37437 = vmatprep.mubr.f32.mxu1 %v22551_v25  ;;  %v46238_v25 = vld [vmem:[#allocation55_spill] sm:$0xff] }
0x2b61   :  { %40351 = vmatprep.subr.bf16.mxu1 %v40350_v51 }
0x2b67   :  { %37438 = vmatmul.mubr.f32.vlgmr.msra.gmra.mrb[60].mxu1 %v22561_v14  ;;  %v46236_v14 = vld [vmem:[#allocation53_spill] sm:$0xff] }
0x2b68   :  { %40353 = vmatpush3.bf16.msra.mxu1 %v40350_v51  ;;  %37444 = vmatprep.mubr.f32.mxu1 %v22549_v58 }
0x2b69   :  { %40355 = vmatprep.subr.bf16.mxu1 %v40334_v29 }
0x2b6f   :  { %37445 = vmatmul.mubr.f32.vlgmr.msra.gmra.mrb[60].mxu1 %v22559_v6 }
0x2b70   :  { %40357 = vmatpush3.bf16.msra.mxu1 %v40334_v29  ;;  %37451 = vmatprep.mubr.f32.mxu1 %v22549_v58  ;;  %v46235_v58 = vld [vmem:[#allocation52_spill] sm:$0xff] }
0x2b71   :  { %40359 = vmatprep.subr.bf16.mxu1 %v46232_v60 }
0x2b77   :  { %37452 = vmatmul.mubr.f32.vlgmr.msra.gmra.mrb[60].mxu1 %v22559_v6 }
0x2b78   :  { %40361 = vmatpush3.bf16.msra.mxu1 %v46232_v60 }
0x2b79   :  { %40363 = vmatprep.subr.bf16.mxu1 %v46233_v28 }
0x2b7c   :  { %40365 = vmatpush3.bf16.msra.mxu1 %v46233_v28 }
0x2b7d   :  { %40367 = vmatprep.subr.bf16.mxu1 %v46234_v32 }
0x2c4a   :  { %v37453_v42 = vpop.f32.mrb[60].mxu1 }
0x2c4b   :  { %22988 = vrot.lane.b32.xlu1 %v37453_v42, %s42396_s0  ;;  %v22974_v61 = vpop.f32.mrb[61].mxu1 }
0x2c4c   :  { %22986 = vrot.lane.b32.xlu0 %v22974_v61, %s42396_s0 }
0x2cbd   :  { %v22989_v37 = vpop.permute.xlu1 %22988 }
0x2cbe   :  { %22993 = vst.msk [vmem:[#allocation3 + $0x8] sm:$0xf] %vm6634_vm13, %v22989_v37  ;;  %v22987_v29 = vpop.permute.xlu0 %22986 }
0x2cbf   :  { %22992 = vst.msk [vmem:[#allocation3] sm:$0xff] %vm6632_vm14, %v22987_v29 }
0x2cc5   :  { %v22995_v8 = vld [vmem:[#allocation3 + $0x8] sm:$0xf] }
0x2cc6   :  { %v22994_v11 = vld [vmem:[#allocation3] sm:$0xff]  ;;  %v23000_v49 = vsel %vm772_vm4, %v22995_v8, 0 }
0x2cc7   :  { %v22997_v15 = vsel %vm772_vm4, %v22994_v11, 0  ;;  %v23081_v18 = vand.u32 4294901760, %v23000_v49 }
0x2cc8   :  { %v23071_v55 = vand.u32 4294901760, %v22997_v15 }
0x2cc9   :  { %v23082_v47 = vsub.f32 %v23000_v49, %v23081_v18 }
0x2cca   :  { %v23072_v6 = vsub.f32 %v22997_v15, %v23071_v55 }
0x2ccb   :  { %v23083_v24 = vand.u32 4294901760, %v23082_v47 }
0x2ccc   :  { %v23073_v30 = vand.u32 4294901760, %v23072_v6 }
0x2ccd   :  { %v23084_v54 = vsub.f32 %v23082_v47, %v23083_v24 }
0x2cce   :  { %v23074_v22 = vsub.f32 %v23072_v6, %v23073_v30 }
0x2ccf   :  { %v23085_v27 = vand.u32 4294901760, %v23084_v54 }
0x2cd0   :  { %v23075_v13 = vand.u32 4294901760, %v23074_v22 }
0x2cd2   :  { %37462 = vmatprep.mubr.f32.mxu1 %v23075_v13 }
0x2cd3   :  { %37463 = vmatmul.mubr.f32.vlgmr.msra.gmra.mrb[62].mxu1 %v23085_v27 }
0x2cd4   :  { %40369 = vmatpush3.bf16.msra.mxu1 %v46234_v32  ;;  %37473 = vmatprep.mubr.f32.mxu1 %v23071_v55  ;;  %v42105_v32 = vld [vmem:[#allocation2] sm:$0xff] }
0x2cd5   :  { %40371 = vmatprep.subr.bf16.mxu1 %v46235_v58 }
0x2cd8   :  { %40373 = vmatpush3.bf16.msra.mxu1 %v46235_v58 }
0x2cd9   :  { %40375 = vmatprep.subr.bf16.mxu1 %v46236_v14 }
0x2cdb   :  { %37474 = vmatmul.mubr.f32.vlgmr.msra.gmra.mrb[62].mxu1 %v23081_v18 }
0x2cdc   :  { %40377 = vmatpush3.bf16.msra.mxu1 %v46236_v14  ;;  %37484 = vmatprep.mubr.f32.mxu1 %v23072_v6 }
0x2cdd   :  { %40379 = vmatprep.subr.bf16.mxu1 %v46237_v5 }
0x2ce0   :  { %40381 = vmatpush3.bf16.msra.mxu1 %v46237_v5 }
0x2ce1   :  { %40383 = vmatprep.subr.bf16.mxu1 %v46232_v60 }
0x2ce3   :  { %37485 = vmatmul.mubr.f32.vlgmr.msra.gmra.mrb[62].mxu1 %v23082_v47 }
0x2ce4   :  { %40385 = vmatpush3.bf16.msra.mxu1 %v46232_v60  ;;  %37495 = vmatprep.mubr.f32.mxu1 %v23073_v30 }
0x2ce5   :  { %40387 = vmatprep.subr.bf16.mxu1 %v46233_v28 }
0x2ce8   :  { %40389 = vmatpush3.bf16.msra.mxu1 %v46233_v28 }
0x2ce9   :  { %40391 = vmatprep.subr.bf16.mxu1 %v46238_v25 }
0x2ceb   :  { %37496 = vmatmul.mubr.f32.vlgmr.msra.gmra.mrb[62].mxu1 %v23083_v24 }
0x2cec   :  { %40393 = vmatpush3.bf16.msra.mxu1 %v46238_v25  ;;  %37506 = vmatprep.mubr.f32.mxu1 %v23071_v55 }
0x2ced   :  { %40395 = vmatprep.subr.bf16.mxu1 %v46239_v39 }
0x2cf0   :  { %40397 = vmatpush3.bf16.msra.mxu1 %v46239_v39 }
0x2cf1   :  { %40399 = vmatprep.subr.bf16.mxu1 %v46232_v60 }
0x2cf3   :  { %37507 = vmatmul.mubr.f32.vlgmr.msra.gmra.mrb[62].mxu1 %v23081_v18 }
0x2cf4   :  { %40401 = vmatpush3.bf16.msra.mxu1 %v46232_v60  ;;  %37517 = vmatprep.mubr.f32.mxu1 %v23071_v55  ;;  %v42104_v60 = vld [vmem:[#allocation2 + $0x8] sm:$0xf] }
0x2cf5   :  { %40403 = vmatprep.subr.bf16.mxu1 %v46233_v28 }
0x2cf8   :  { %40405 = vmatpush3.bf16.msra.mxu1 %v46233_v28 }
0x2cf9   :  { %40455 = vmatprep.subr.bf16.mxu1 %v43261_v34 }
0x2cfb   :  { %37518 = vmatmul.mubr.f32.vlgmr.msra.gmra.mrb[62].mxu1 %v23081_v18 }
0x2cfc   :  { %40457 = vmatpush3.bf16.msra.mxu1 %v43261_v34 }
0x2cfd   :  { %40459 = vmatprep.subr.bf16.mxu1 %v43269_v21 }
0x2d00   :  { %40461 = vmatpush3.bf16.msra.mxu1 %v43269_v21 }
0x2d01   :  { %40463 = vmatprep.subr.bf16.mxu1 %v43288_v38 }
0x2d04   :  { %40465 = vmatpush3.bf16.msra.mxu1 %v43288_v38 }
0x2d05   :  { %40467 = vmatprep.subr.bf16.mxu1 %v43298_v62 }
0x2d08   :  { %40469 = vmatpush3.bf16.msra.mxu1 %v43298_v62 }
0x2d09   :  { %40471 = vmatprep.subr.bf16.mxu1 %v43338_v3 }
0x2d0c   :  { %40473 = vmatpush3.bf16.msra.mxu1 %v43338_v3 }
0x2d0d   :  { %40475 = vmatprep.subr.bf16.mxu1 %v43348_v35 }
0x2d10   :  { %40477 = vmatpush3.bf16.msra.mxu1 %v43348_v35 }
0x2d11   :  { %40479 = vmatprep.subr.bf16.mxu1 %v43358_v12 }
0x2d14   :  { %40481 = vmatpush3.bf16.msra.mxu1 %v43358_v12 }
0x2d15   :  { %40483 = vmatprep.subr.bf16.mxu1 %v43380_v63 }
0x2d18   :  { %40485 = vmatpush3.bf16.msra.mxu1 %v43380_v63 }
0x2d19   :  { %40487 = vmatprep.subr.bf16.mxu1 %v43390_v43 }
0x2dce   :  { %v37519_v44 = vpop.f32.mrb[62].mxu1 }
0x2dcf   :  { %v41343_v10 = vadd.f32 %v42103_v36, %v37519_v44  ;;  %v23520_v48 = vpop.f32.mrb[63].mxu1  ;;  %v42106_v44 = vld [vmem:[#allocation10] ss:$0 sm:$0xff] }
0x2dd0   :  { %v41344_v51 = vadd.f32 %v42103_v36, %v23520_v48 }
0x2dd1   :  { %v23531_v28 = vadd.f32 %v42104_v60, %v41343_v10 }
0x2dd2   :  { %v23530_v42 = vadd.f32 %v42105_v32, %v41344_v51  ;;  %v42107_v51 = vld [vmem:[#allocation12] ss:$0 sm:$0xff] }
0x2dd3   :  { %v33035_v61 = vclamps-f32 %v23531_v28, 1000000.0 }
0x2dd4   :  { %v33034_v37 = vclamps-f32 %v23530_v42, 1000000.0 }
0x2dd5   :  { %v23539_v29 = vsel %vm768_vm3, %v33035_v61, 0.0 }
0x2dd6   :  { %23540 = vadd.xlane.f32.xlu1 %v23539_v29  ;;  %v23536_v8 = vsel %vm772_vm4, %v33034_v37, 0.0 }
0x2dd7   :  { %23537 = vadd.xlane.f32.xlu0 %v23536_v8 }
0x2e63   :  { %v23541_v11 = vpop.xlane.xlu1 %23540 }
0x2e64   :  { %v23543_v49 = vmul.f32 0.03125, %v23541_v11  ;;  %v23538_v15 = vpop.xlane.xlu0 %23537 }
0x2e65   :  { %v23542_v18 = vmul.f32 0.03125, %v23538_v15 }
0x2e66   :  { %v23545_v55 = vsub.f32 %v33035_v61, %v23543_v49 }
0x2e67   :  { %v23544_v47 = vsub.f32 %v33034_v37, %v23542_v18 }
0x2e68   :  { %v23547_v30 = vmul.f32 %v23545_v55, %v23545_v55 }
0x2e69   :  { %v23546_v6 = vmul.f32 %v23544_v47, %v23544_v47 }
0x2e6a   :  { %v23551_v54 = vsel %vm768_vm3, %v23547_v30, 0.0  ;;  %v46241_v30 = vld [vmem:[#allocation61_spill] sm:$0xff] }
0x2e6b   :  { %v23548_v24 = vsel %vm772_vm4, %v23546_v6, 0.0 }
0x2e6c   :  { %23549 = vadd.xlane.f32.xlu0 %v23548_v24  ;;  %v46240_v24 = vld [vmem:[#allocation60_spill] sm:$0xff] }
0x2e70   :  { %23552 = vadd.xlane.f32.xlu0 %v23551_v54  ;;  %v46242_v54 = vld [vmem:[#allocation62_spill] sm:$0xff] }
0x2ef9   :  { %v23550_v22 = vpop.xlane.xlu0 %23549 }
0x2efa   :  { %v23554_v13 = vmul.f32 0.03125, %v23550_v22  ;;  %v46244_v22 = vld [vmem:[#allocation64_spill] sm:$0xff] }
0x2efc   :  { %v23556_v27 = vadd.f32 1e-06, %v23554_v13  ;;  %v46245_v13 = vld [vmem:[#allocation88_spill] sm:$0xff] }
0x2efd   :  { %v23553_v58 = vpop.xlane.xlu0 %23552 }
0x2efe   :  { %42054 = vrsqrt.f32 %v23556_v27  ;;  %v23555_v14 = vmul.f32 0.03125, %v23553_v58  ;;  %v42108_v58 = vld [vmem:[#allocation16] ss:$0 sm:$0xff] }
0x2f00   :  { %v23557_v5 = vadd.f32 1e-06, %v23555_v14 }
0x2f02   :  { %42056 = vrsqrt.f32 %v23557_v5 }
0x2f08   :  { %v42055_v25 = vpop.eup %42054 }
0x2f09   :  { %v23560_v39 = vmul.f32 %v42055_v25, %v23544_v47 }
0x2f0b   :  { %v23562_v36 = vmul.f32 %v42106_v44, %v23560_v39 }
0x2f0c   :  { %v42057_v10 = vpop.eup %42056 }
0x2f0d   :  { %v23561_v48 = vmul.f32 %v42057_v10, %v23545_v55  ;;  %v45070_v60 = vadd.f32 %v42107_v51, %v23562_v36 }
0x2f0f   :  { %v23563_v28 = vmul.f32 %v42106_v44, %v23561_v48  ;;  %v23567_v32 = vsel %vm772_vm4, %v45070_v60, 0 }
0x2f10   :  { %v23641_v42 = vand.u32 4294901760, %v23567_v32 }
0x2f11   :  { %v45074_v61 = vadd.f32 %v42107_v51, %v23563_v28 }
0x2f12   :  { %v23642_v37 = vsub.f32 %v23567_v32, %v23641_v42 }
0x2f13   :  { %v23570_v29 = vsel %vm772_vm4, %v45074_v61, 0 }
0x2f14   :  { %v23643_v8 = vand.u32 4294901760, %v23642_v37  ;;  %v23651_v11 = vand.u32 4294901760, %v23570_v29 }
0x2f16   :  { %v23644_v49 = vsub.f32 %v23642_v37, %v23643_v8  ;;  %v23652_v15 = vsub.f32 %v23570_v29, %v23651_v11  ;;  %v46246_v29 = vld [vmem:[#allocation74_spill] sm:$0xff] }
0x2f18   :  { %v23645_v18 = vand.u32 4294901760, %v23644_v49  ;;  %v23653_v55 = vand.u32 4294901760, %v23652_v15  ;;  %v46249_v49 = vld [vmem:[#allocation65_spill] sm:$0xff] }
0x2f1a   :  { %37528 = vmatprep.mubr.f32.mxu0 %v23645_v18  ;;  %v23654_v47 = vsub.f32 %v23652_v15, %v23653_v55  ;;  %v46252_v18 = vld [vmem:[#allocation68_spill] sm:$0xff] }
0x2f1c   :  { %v23655_v6 = vand.u32 4294901760, %v23654_v47  ;;  %v46254_v47 = vld [vmem:[#allocation77_spill] sm:$0xff] }
0x2f1e   :  { %37529 = vmatmul.mubr.f32.vlgmr.msra.gmra.mrb[54].mxu0 %v23655_v6  ;;  %v46255_v6 = vld [vmem:[#allocation78_spill] sm:$0xff] }
0x2f1f   :  { %40417 = vmatpush3.bf16.msra.mxu0 %v46231_v1  ;;  %37539 = vmatprep.mubr.f32.mxu0 %v23641_v42  ;;  %v46243_v1 = vld [vmem:[#allocation63_spill] sm:$0xff] }
0x2f20   :  { %40419 = vmatprep.subr.bf16.mxu0 %v46240_v24 }
0x2f23   :  { %40421 = vmatpush3.bf16.msra.mxu0 %v46240_v24  ;;  %v46256_v24 = vld [vmem:[#allocation79_spill] sm:$0xff] }
0x2f24   :  { %40423 = vmatprep.subr.bf16.mxu0 %v46241_v30 }
0x2f26   :  { %37540 = vmatmul.mubr.f32.vlgmr.msra.gmra.mrb[54].mxu0 %v23651_v11 }
0x2f27   :  { %40425 = vmatpush3.bf16.msra.mxu0 %v46241_v30  ;;  %37550 = vmatprep.mubr.f32.mxu0 %v23642_v37  ;;  %v46257_v30 = vld [vmem:[#allocation70_spill] sm:$0xff] }
0x2f28   :  { %40427 = vmatprep.subr.bf16.mxu0 %v46242_v54 }
0x2f2b   :  { %40429 = vmatpush3.bf16.msra.mxu0 %v46242_v54  ;;  %v46258_v54 = vld [vmem:[#allocation71_spill] sm:$0xff] }
0x2f2c   :  { %40431 = vmatprep.subr.bf16.mxu0 %v46229_v2 }
0x2f2e   :  { %37551 = vmatmul.mubr.f32.vlgmr.msra.gmra.mrb[54].mxu0 %v23652_v15  ;;  %v46250_v15 = vld [vmem:[#allocation66_spill] sm:$0xff] }
0x2f2f   :  { %40433 = vmatpush3.bf16.msra.mxu0 %v46229_v2  ;;  %37561 = vmatprep.mubr.f32.mxu0 %v23643_v8  ;;  %v46247_v8 = vld [vmem:[#allocation75_spill] sm:$0xff] }
0x2f30   :  { %40435 = vmatprep.subr.bf16.mxu0 %v46230_v26 }
0x2f33   :  { %40437 = vmatpush3.bf16.msra.mxu0 %v46230_v26 }
0x2f34   :  { %40439 = vmatprep.subr.bf16.mxu0 %v46243_v1 }
0x2f36   :  { %37562 = vmatmul.mubr.f32.vlgmr.msra.gmra.mrb[54].mxu0 %v23653_v55  ;;  %v46253_v55 = vld [vmem:[#allocation69_spill] sm:$0xff] }
0x2f37   :  { %40441 = vmatpush3.bf16.msra.mxu0 %v46243_v1  ;;  %37572 = vmatprep.mubr.f32.mxu0 %v23641_v42  ;;  %v46259_v1 = vld [vmem:[#allocation72_spill] sm:$0xff] }
0x2f38   :  { %40443 = vmatprep.subr.bf16.mxu0 %v46244_v22 }
0x2f3b   :  { %40445 = vmatpush3.bf16.msra.mxu0 %v46244_v22  ;;  %v46260_v22 = vld [vmem:[#allocation73_spill] sm:$0xff] }
0x2f3c   :  { %40447 = vmatprep.subr.bf16.mxu0 %v46229_v2 }
0x2f3e   :  { %37573 = vmatmul.mubr.f32.vlgmr.msra.gmra.mrb[54].mxu0 %v23651_v11 }
0x2f3f   :  { %40449 = vmatpush3.bf16.msra.mxu0 %v46229_v2  ;;  %37583 = vmatprep.mubr.f32.mxu0 %v23641_v42 }
0x2f40   :  { %40451 = vmatprep.subr.bf16.mxu0 %v46230_v26 }
0x2f43   :  { %40453 = vmatpush3.bf16.msra.mxu0 %v46230_v26 }
0x2f44   :  { %40647 = vmatprep.subr.bf16.mxu0 %v43712_v41 }
0x2f46   :  { %37584 = vmatmul.mubr.f32.vlgmr.msra.gmra.mrb[54].mxu0 %v23651_v11  ;;  %v46248_v11 = vld [vmem:[#allocation76_spill] sm:$0xff] }
0x2f47   :  { %40649 = vmatpush3.bf16.msra.mxu0 %v43712_v41 }
0x2f48   :  { %40651 = vmatprep.subr.bf16.mxu0 %v43715_v33 }
0x2f4b   :  { %40653 = vmatpush3.bf16.msra.mxu0 %v43715_v33 }
0x2f4c   :  { %40655 = vmatprep.subr.bf16.mxu0 %v46245_v13 }
0x3019   :  { %v37585_v27 = vpop.f32.mrb[54].mxu0 }
0x301a   :  { %v41345_v14 = vadd.f32 %v42108_v58, %v37585_v27  ;;  %v24090_v2 = vpop.f32.mrb[55].mxu0  ;;  %v46261_v27 = vld [vmem:[#allocation80_spill] sm:$0xff] }
0x301b   :  { %v41346_v5 = vadd.f32 %v42108_v58, %v24090_v2  ;;  %v46262_v58 = vld [vmem:[#allocation81_spill] sm:$0xff]  ;;  %v46264_v2 = vld [vmem:[#allocation83_spill] sm:$0xff] }
0x301c   :  { %v24101_v25 = vmax.f32 %v41345_v14, 0.0  ;;  %v46263_v14 = vld [vmem:[#allocation82_spill] sm:$0xff] }
0x301d   :  { %v24100_v39 = vmax.f32 %v41346_v5, 0.0  ;;  %v46265_v5 = vld [vmem:[#allocation84_spill] sm:$0xff] }
0x301e   :  { %v45102_v44 = vand.u32 4294901760, %v24101_v25 }
0x301f   :  { %v45104_v26 = vand.u32 4294901760, %v24100_v39 }
0x3020   :  { %v45107_v36 = vsub.f32 %v24101_v25, %v45102_v44  ;;  %v46266_v25 = vld [vmem:[#allocation85_spill] sm:$0xff] }
0x3021   :  { %v24184_v10 = vsub.f32 %v24100_v39, %v45104_v26  ;;  %v46267_v39 = vld [vmem:[#allocation86_spill] sm:$0xff] }
0x3022   :  { %v24195_v48 = vand.u32 4294901760, %v45107_v36 }
0x3023   :  { %v24185_v51 = vand.u32 4294901760, %v24184_v10 }
0x3024   :  { %v24196_v28 = vsub.f32 %v45107_v36, %v24195_v48 }
0x3025   :  { %v24186_v32 = vsub.f32 %v24184_v10, %v24185_v51 }
0x3026   :  { %v24197_v37 = vand.u32 4294901760, %v24196_v28 }
0x3027   :  { %v24187_v42 = vand.u32 4294901760, %v24186_v32 }
0x3029   :  { %37618 = vmatprep.mubr.f32.mxu1 %v24187_v42 }
0x302a   :  { %37619 = vmatmul.mubr.f32.vlgmr.msra.gmra.mrb[64].mxu1 %v24197_v37 }
0x302b   :  { %40489 = vmatpush3.bf16.msra.mxu1 %v43390_v43  ;;  %37653 = vmatprep.mubr.f32.mxu1 %v45104_v26  ;;  %v46251_v43 = vld [vmem:[#allocation67_spill] sm:$0xff] }
0x302c   :  { %40491 = vmatprep.subr.bf16.mxu1 %v46246_v29 }
0x302f   :  { %40493 = vmatpush3.bf16.msra.mxu1 %v46246_v29 }
0x3030   :  { %40495 = vmatprep.subr.bf16.mxu1 %v46247_v8 }
0x3033   :  { %40497 = vmatpush3.bf16.msra.mxu1 %v46247_v8 }
0x3034   :  { %40499 = vmatprep.subr.bf16.mxu1 %v46248_v11 }
0x3037   :  { %40501 = vmatpush3.bf16.msra.mxu1 %v46248_v11 }
0x3038   :  { %40503 = vmatprep.subr.bf16.mxu1 %v46249_v49 }
0x303b   :  { %40505 = vmatpush3.bf16.msra.mxu1 %v46249_v49 }
0x303c   :  { %40507 = vmatprep.subr.bf16.mxu1 %v46250_v15 }
0x303f   :  { %40509 = vmatpush3.bf16.msra.mxu1 %v46250_v15 }
0x3040   :  { %40511 = vmatprep.subr.bf16.mxu1 %v46251_v43 }
0x3043   :  { %40513 = vmatpush3.bf16.msra.mxu1 %v46251_v43 }
0x3044   :  { %40515 = vmatprep.subr.bf16.mxu1 %v46252_v18 }
0x3047   :  { %40517 = vmatpush3.bf16.msra.mxu1 %v46252_v18 }
0x3048   :  { %40519 = vmatprep.subr.bf16.mxu1 %v46253_v55 }
0x304a   :  { %37654 = vmatmul.mubr.f32.vlgmr.msra.gmra.mrb[64].mxu1 %v45102_v44 }
0x304b   :  { %40521 = vmatpush3.bf16.msra.mxu1 %v46253_v55  ;;  %37688 = vmatprep.mubr.f32.mxu1 %v24184_v10 }
0x304c   :  { %40523 = vmatprep.subr.bf16.mxu1 %v46254_v47 }
0x304f   :  { %40525 = vmatpush3.bf16.msra.mxu1 %v46254_v47 }
0x3050   :  { %40527 = vmatprep.subr.bf16.mxu1 %v46255_v6 }
0x3053   :  { %40529 = vmatpush3.bf16.msra.mxu1 %v46255_v6 }
0x3054   :  { %40531 = vmatprep.subr.bf16.mxu1 %v46256_v24 }
0x3057   :  { %40533 = vmatpush3.bf16.msra.mxu1 %v46256_v24  ;;  %v42110_v24 = vld [vmem:[#allocation13] ss:$0 sm:$0xff] }
0x3058   :  { %40535 = vmatprep.subr.bf16.mxu1 %v46257_v30 }
0x305b   :  { %40537 = vmatpush3.bf16.msra.mxu1 %v46257_v30 }
0x305c   :  { %40539 = vmatprep.subr.bf16.mxu1 %v46258_v54 }
0x305f   :  { %40541 = vmatpush3.bf16.msra.mxu1 %v46258_v54 }
0x3060   :  { %40543 = vmatprep.subr.bf16.mxu1 %v46259_v1 }
0x3063   :  { %40545 = vmatpush3.bf16.msra.mxu1 %v46259_v1  ;;  %v42111_v1 = vld [vmem:[#allocation15] ss:$0 sm:$0xff] }
0x3064   :  { %40547 = vmatprep.subr.bf16.mxu1 %v46260_v22 }
0x3067   :  { %40549 = vmatpush3.bf16.msra.mxu1 %v46260_v22 }
0x3068   :  { %40551 = vmatprep.subr.bf16.mxu1 %v43261_v34 }
0x306a   :  { %37689 = vmatmul.mubr.f32.vlgmr.msra.gmra.mrb[64].mxu1 %v45107_v36  ;;  %v46268_v36 = vld [vmem:[#allocation87_spill] sm:$0xff] }
0x306b   :  { %40553 = vmatpush3.bf16.msra.mxu1 %v43261_v34  ;;  %37723 = vmatprep.mubr.f32.mxu1 %v24185_v51 }
0x306c   :  { %40555 = vmatprep.subr.bf16.mxu1 %v43269_v21 }
0x306f   :  { %40557 = vmatpush3.bf16.msra.mxu1 %v43269_v21 }
0x3070   :  { %40559 = vmatprep.subr.bf16.mxu1 %v43288_v38 }
0x3073   :  { %40561 = vmatpush3.bf16.msra.mxu1 %v43288_v38 }
0x3074   :  { %40563 = vmatprep.subr.bf16.mxu1 %v43298_v62 }
0x3077   :  { %40565 = vmatpush3.bf16.msra.mxu1 %v43298_v62 }
0x3078   :  { %40567 = vmatprep.subr.bf16.mxu1 %v43338_v3 }
0x307b   :  { %40569 = vmatpush3.bf16.msra.mxu1 %v43338_v3 }
0x307c   :  { %40571 = vmatprep.subr.bf16.mxu1 %v43348_v35 }
0x307f   :  { %40573 = vmatpush3.bf16.msra.mxu1 %v43348_v35 }
0x3080   :  { %40575 = vmatprep.subr.bf16.mxu1 %v43358_v12 }
0x3083   :  { %40577 = vmatpush3.bf16.msra.mxu1 %v43358_v12 }
0x3084   :  { %40579 = vmatprep.subr.bf16.mxu1 %v43380_v63 }
0x3087   :  { %40581 = vmatpush3.bf16.msra.mxu1 %v43380_v63 }
0x3088   :  { %40583 = vmatprep.subr.bf16.mxu1 %v46261_v27 }
0x308a   :  { %37724 = vmatmul.mubr.f32.vlgmr.msra.gmra.mrb[64].mxu1 %v24195_v48 }
0x308b   :  { %40585 = vmatpush3.bf16.msra.mxu1 %v46261_v27  ;;  %37758 = vmatprep.mubr.f32.mxu1 %v45104_v26 }
0x308c   :  { %40587 = vmatprep.subr.bf16.mxu1 %v46262_v58 }
0x308f   :  { %40589 = vmatpush3.bf16.msra.mxu1 %v46262_v58 }
0x3090   :  { %40591 = vmatprep.subr.bf16.mxu1 %v46263_v14 }
0x3093   :  { %40593 = vmatpush3.bf16.msra.mxu1 %v46263_v14 }
0x3094   :  { %40595 = vmatprep.subr.bf16.mxu1 %v46264_v2 }
0x3097   :  { %40597 = vmatpush3.bf16.msra.mxu1 %v46264_v2 }
0x3098   :  { %40599 = vmatprep.subr.bf16.mxu1 %v46265_v5 }
0x309b   :  { %40601 = vmatpush3.bf16.msra.mxu1 %v46265_v5 }
0x309c   :  { %40603 = vmatprep.subr.bf16.mxu1 %v46266_v25 }
0x309f   :  { %40605 = vmatpush3.bf16.msra.mxu1 %v46266_v25 }
0x30a0   :  { %40607 = vmatprep.subr.bf16.mxu1 %v46267_v39 }
0x30a3   :  { %40609 = vmatpush3.bf16.msra.mxu1 %v46267_v39 }
0x30a4   :  { %40611 = vmatprep.subr.bf16.mxu1 %v46268_v36 }
0x30a7   :  { %40613 = vmatpush3.bf16.msra.mxu1 %v46268_v36 }
0x30a8   :  { %40615 = vmatprep.subr.bf16.mxu1 %v43261_v34 }
0x30aa   :  { %37759 = vmatmul.mubr.f32.vlgmr.msra.gmra.mrb[64].mxu1 %v45102_v44 }
0x30ab   :  { %40617 = vmatpush3.bf16.msra.mxu1 %v43261_v34  ;;  %37793 = vmatprep.mubr.f32.mxu1 %v45104_v26 }
0x30ac   :  { %40619 = vmatprep.subr.bf16.mxu1 %v43269_v21 }
0x30af   :  { %40621 = vmatpush3.bf16.msra.mxu1 %v43269_v21 }
0x30b0   :  { %40623 = vmatprep.subr.bf16.mxu1 %v43288_v38 }
0x30b3   :  { %40625 = vmatpush3.bf16.msra.mxu1 %v43288_v38 }
0x30b4   :  { %40627 = vmatprep.subr.bf16.mxu1 %v43298_v62 }
0x30b7   :  { %40629 = vmatpush3.bf16.msra.mxu1 %v43298_v62  ;;  %v42109_v62 = vld [vmem:[#allocation18] ss:$0 sm:$0xff] }
0x30b8   :  { %40631 = vmatprep.subr.bf16.mxu1 %v43338_v3 }
0x30bb   :  { %40633 = vmatpush3.bf16.msra.mxu1 %v43338_v3 }
0x30bc   :  { %40635 = vmatprep.subr.bf16.mxu1 %v43348_v35 }
0x30bf   :  { %40637 = vmatpush3.bf16.msra.mxu1 %v43348_v35 }
0x30c0   :  { %40639 = vmatprep.subr.bf16.mxu1 %v43358_v12 }
0x30c3   :  { %40641 = vmatpush3.bf16.msra.mxu1 %v43358_v12 }
0x30c4   :  { %40643 = vmatprep.subr.bf16.mxu1 %v43380_v63 }
0x30c7   :  { %40645 = vmatpush3.bf16.msra.mxu1 %v43380_v63 }
0x30ca   :  { %37794 = vmatmul.mubr.f32.vlgmr.msra.gmra.mrb[64].mxu1 %v45102_v44 }
0x319d   :  { %v37795_v34 = vpop.f32.mrb[64].mxu1 }
0x319e   :  { %v41347_v21 = vadd.f32 %v42109_v62, %v37795_v34  ;;  %v24776_v38 = vpop.f32.mrb[65].mxu1 }
0x319f   :  { %v41348_v26 = vadd.f32 %v42109_v62, %v24776_v38 }
0x31a0   :  { %v24787_v3 = vadd.f32 %v41347_v21, %v45074_v61 }
0x31a1   :  { %v24786_v10 = vadd.f32 %v41348_v26, %v45070_v60 }
0x31a2   :  { %v24791_v35 = vsel %vm768_vm3, %v24787_v3, 0.0 }
0x31a3   :  { %24792 = vadd.xlane.f32.xlu0 %v24791_v35  ;;  %v24788_v12 = vsel %vm772_vm4, %v24786_v10, 0.0  ;;  %v46271_v35 = vld [vmem:[#allocation91_spill] sm:$0xff] }
0x31a4   :  { %24789 = vadd.xlane.f32.xlu1 %v24788_v12  ;;  %v46273_v12 = vld [vmem:[#allocation93_spill] sm:$0xff] }
0x3230   :  { %v24793_v48 = vpop.xlane.xlu0 %24792 }
0x3231   :  { %v24795_v51 = vmul.f32 0.03125, %v24793_v48  ;;  %v24790_v63 = vpop.xlane.xlu1 %24789  ;;  %v46274_v48 = vld [vmem:[#allocation94_spill] sm:$0xff] }
0x3232   :  { %v24794_v28 = vmul.f32 0.03125, %v24790_v63  ;;  %v46276_v63 = vld [vmem:[#allocation96_spill] sm:$0xff] }
0x3233   :  { %v24797_v44 = vsub.f32 %v24787_v3, %v24795_v51  ;;  %v46269_v3 = vld [vmem:[#allocation89_spill] sm:$0xff]  ;;  %v46275_v51 = vld [vmem:[#allocation95_spill] sm:$0xff] }
0x3234   :  { %v24796_v32 = vsub.f32 %v24786_v10, %v24794_v28  ;;  %v46270_v10 = vld [vmem:[#allocation90_spill] sm:$0xff]  ;;  %v46279_v28 = vld [vmem:[#allocation99_spill] sm:$0xff] }
0x3235   :  { %v24799_v42 = vmul.f32 %v24797_v44, %v24797_v44 }
0x3236   :  { %v24798_v37 = vmul.f32 %v24796_v32, %v24796_v32 }
0x3237   :  { %v24803_v29 = vsel %vm768_vm3, %v24799_v42, 0.0  ;;  %v46282_v42 = vld [vmem:[#allocation102_spill] sm:$0xff] }
0x3238   :  { %24804 = vadd.xlane.f32.xlu0 %v24803_v29  ;;  %v24800_v61 = vsel %vm772_vm4, %v24798_v37, 0.0  ;;  %v46283_v37 = vld [vmem:[#allocation103_spill] sm:$0xff]  ;;  %v46284_v29 = vld [vmem:[#allocation104_spill] sm:$0xff] }
0x3239   :  { %24801 = vadd.xlane.f32.xlu1 %v24800_v61  ;;  %v46285_v61 = vld [vmem:[#allocation105_spill] sm:$0xff] }
0x32c5   :  { %v24805_v60 = vpop.xlane.xlu0 %24804 }
0x32c6   :  { %v24807_v8 = vmul.f32 0.03125, %v24805_v60  ;;  %v24802_v11 = vpop.xlane.xlu1 %24801  ;;  %v46286_v60 = vld [vmem:[#allocation106_spill] sm:$0xff] }
0x32c7   :  { %v24806_v49 = vmul.f32 0.03125, %v24802_v11  ;;  %v46288_v11 = vld [vmem:[#allocation108_spill] sm:$0xff] }
0x32c8   :  { %v24809_v15 = vadd.f32 1e-06, %v24807_v8  ;;  %v46287_v8 = vld [vmem:[#allocation107_spill] sm:$0xff] }
0x32c9   :  { %v24808_v43 = vadd.f32 1e-06, %v24806_v49  ;;  %v46289_v49 = vld [vmem:[#allocation109_spill] sm:$0xff] }
0x32ca   :  { %42058 = vrsqrt.f32 %v24809_v15 }
0x32cb   :  { %42060 = vrsqrt.f32 %v24808_v43 }
0x32d4   :  { %v42059_v18 = vpop.eup %42058 }
0x32d5   :  { %v42061_v55 = vpop.eup %42060  ;;  %v24813_v47 = vmul.f32 %v42059_v18, %v24797_v44  ;;  %v46280_v44 = vld [vmem:[#allocation100_spill] sm:$0xff] }
0x32d6   :  { %v24812_v6 = vmul.f32 %v42061_v55, %v24796_v32  ;;  %v46281_v32 = vld [vmem:[#allocation101_spill] sm:$0xff] }
0x32d7   :  { %v24815_v30 = vmul.f32 %v42110_v24, %v24813_v47 }
0x32d8   :  { %v24814_v54 = vmul.f32 %v42110_v24, %v24812_v6 }
0x32d9   :  { %v45204_v22 = vadd.f32 %v42111_v1, %v24815_v30 }
0x32da   :  { %v45206_v27 = vadd.f32 %v42111_v1, %v24814_v54 }
0x32db   :  { %v24822_v58 = vsel %vm772_vm4, %v45204_v22, 0 }
0x32dc   :  { %v45210_v14 = vand.u32 4294901760, %v24822_v58  ;;  %v24819_v2 = vsel %vm772_vm4, %v45206_v27, 0 }
0x32dd   :  { %v45214_v5 = vand.u32 4294901760, %v24819_v2 }
0x32de   :  { %v45217_v25 = vsub.f32 %v24822_v58, %v45210_v14 }
0x32df   :  { %v45220_v39 = vsub.f32 %v24819_v2, %v45214_v5 }
0x32e0   :  { %v45223_v36 = vand.u32 4294901760, %v45217_v25 }
0x32e1   :  { %v45226_v34 = vand.u32 4294901760, %v45220_v39 }
0x32e2   :  { %v24906_v62 = vsub.f32 %v45217_v25, %v45223_v36 }
0x32e3   :  { %v24896_v21 = vsub.f32 %v45220_v39, %v45226_v34 }
0x32e4   :  { %v45234_v26 = vand.u32 4294901760, %v24906_v62 }
0x32e5   :  { %v45232_v38 = vand.u32 4294901760, %v24896_v21 }
0x32e7   :  { %37804 = vmatprep.mubr.f32.mxu0 %v45232_v38 }
0x32e8   :  { %37805 = vmatmul.mubr.f32.vlgmr.msra.gmra.mrb[56].mxu0 %v45234_v26 }
0x32e9   :  { %40657 = vmatpush3.bf16.msra.mxu0 %v46245_v13  ;;  %37815 = vmatprep.mubr.f32.mxu0 %v45214_v5  ;;  %v46272_v13 = vld [vmem:[#allocation92_spill] sm:$0xff] }
0x32ea   :  { %40659 = vmatprep.subr.bf16.mxu0 %v46269_v3 }
0x32ed   :  { %40661 = vmatpush3.bf16.msra.mxu0 %v46269_v3 }
0x32ee   :  { %40663 = vmatprep.subr.bf16.mxu0 %v46270_v10 }
0x32f0   :  { %37816 = vmatmul.mubr.f32.vlgmr.msra.gmra.mrb[56].mxu0 %v45210_v14 }
0x32f1   :  { %40665 = vmatpush3.bf16.msra.mxu0 %v46270_v10  ;;  %37826 = vmatprep.mubr.f32.mxu0 %v45220_v39 }
0x32f2   :  { %40667 = vmatprep.subr.bf16.mxu0 %v46271_v35 }
0x32f5   :  { %40669 = vmatpush3.bf16.msra.mxu0 %v46271_v35 }
0x32f6   :  { %40671 = vmatprep.subr.bf16.mxu0 %v43712_v41 }
0x32f8   :  { %37827 = vmatmul.mubr.f32.vlgmr.msra.gmra.mrb[56].mxu0 %v45217_v25 }
0x32f9   :  { %40673 = vmatpush3.bf16.msra.mxu0 %v43712_v41  ;;  %37837 = vmatprep.mubr.f32.mxu0 %v45226_v34 }
0x32fa   :  { %40675 = vmatprep.subr.bf16.mxu0 %v43715_v33 }
0x32fd   :  { %40677 = vmatpush3.bf16.msra.mxu0 %v43715_v33 }
0x32fe   :  { %40679 = vmatprep.subr.bf16.mxu0 %v46272_v13 }
0x3300   :  { %37838 = vmatmul.mubr.f32.vlgmr.msra.gmra.mrb[56].mxu0 %v45223_v36 }
0x3301   :  { %40681 = vmatpush3.bf16.msra.mxu0 %v46272_v13  ;;  %37848 = vmatprep.mubr.f32.mxu0 %v45214_v5 }
0x3302   :  { %40683 = vmatprep.subr.bf16.mxu0 %v46273_v12 }
0x3305   :  { %40685 = vmatpush3.bf16.msra.mxu0 %v46273_v12 }
0x3306   :  { %40687 = vmatprep.subr.bf16.mxu0 %v43712_v41 }
0x3308   :  { %37849 = vmatmul.mubr.f32.vlgmr.msra.gmra.mrb[56].mxu0 %v45210_v14 }
0x3309   :  { %40689 = vmatpush3.bf16.msra.mxu0 %v43712_v41  ;;  %37859 = vmatprep.mubr.f32.mxu0 %v45214_v5  ;;  %v46277_v41 = vld [vmem:[#allocation97_spill] sm:$0xff] }
0x330a   :  { %40691 = vmatprep.subr.bf16.mxu0 %v43715_v33 }
0x330d   :  { %40693 = vmatpush3.bf16.msra.mxu0 %v43715_v33  ;;  %v46278_v33 = vld [vmem:[#allocation98_spill] sm:$0xff] }
0x330e   :  { %40695 = vmatprep.subr.bf16.mxu0 %v46274_v48 }
0x3310   :  { %37860 = vmatmul.mubr.f32.vlgmr.msra.gmra.mrb[56].mxu0 %v45210_v14 }
0x3311   :  { %40697 = vmatpush3.bf16.msra.mxu0 %v46274_v48  ;;  %37870 = vmatprep.mubr.f32.mxu0 %v45232_v38 }
0x3312   :  { %40699 = vmatprep.subr.bf16.mxu0 %v46275_v51 }
0x3315   :  { %40701 = vmatpush3.bf16.msra.mxu0 %v46275_v51 }
0x3316   :  { %40703 = vmatprep.subr.bf16.mxu0 %v46276_v63 }
0x3318   :  { %37871 = vmatmul.mubr.f32.vlgmr.msra.gmra.mrb[58].mxu0 %v45234_v26 }
0x3319   :  { %40705 = vmatpush3.bf16.msra.mxu0 %v46276_v63  ;;  %37881 = vmatprep.mubr.f32.mxu0 %v45214_v5 }
0x331a   :  { %40707 = vmatprep.subr.bf16.mxu0 %v46277_v41 }
0x331d   :  { %40709 = vmatpush3.bf16.msra.mxu0 %v46277_v41 }
0x331e   :  { %40711 = vmatprep.subr.bf16.mxu0 %v46278_v33 }
0x3320   :  { %37882 = vmatmul.mubr.f32.vlgmr.msra.gmra.mrb[58].mxu0 %v45210_v14 }
0x3321   :  { %40713 = vmatpush3.bf16.msra.mxu0 %v46278_v33  ;;  %37892 = vmatprep.mubr.f32.mxu0 %v45220_v39 }
0x3322   :  { %40715 = vmatprep.subr.bf16.mxu0 %v46279_v28 }
0x3325   :  { %40717 = vmatpush3.bf16.msra.mxu0 %v46279_v28 }
0x3326   :  { %40719 = vmatprep.subr.bf16.mxu0 %v46274_v48 }
0x3328   :  { %37893 = vmatmul.mubr.f32.vlgmr.msra.gmra.mrb[58].mxu0 %v45217_v25 }
0x3329   :  { %40721 = vmatpush3.bf16.msra.mxu0 %v46274_v48  ;;  %37903 = vmatprep.mubr.f32.mxu0 %v45226_v34 }
0x332a   :  { %40723 = vmatprep.subr.bf16.mxu0 %v46275_v51 }
0x332d   :  { %40725 = vmatpush3.bf16.msra.mxu0 %v46275_v51 }
0x332e   :  { %40727 = vmatprep.subr.bf16.mxu0 %v46280_v44 }
0x3330   :  { %37904 = vmatmul.mubr.f32.vlgmr.msra.gmra.mrb[58].mxu0 %v45223_v36 }
0x3331   :  { %40729 = vmatpush3.bf16.msra.mxu0 %v46280_v44  ;;  %37914 = vmatprep.mubr.f32.mxu0 %v45214_v5 }
0x3332   :  { %40731 = vmatprep.subr.bf16.mxu0 %v46281_v32 }
0x3335   :  { %40733 = vmatpush3.bf16.msra.mxu0 %v46281_v32 }
0x3336   :  { %40735 = vmatprep.subr.bf16.mxu0 %v46274_v48 }
0x3338   :  { %37915 = vmatmul.mubr.f32.vlgmr.msra.gmra.mrb[58].mxu0 %v45210_v14 }
0x3339   :  { %40737 = vmatpush3.bf16.msra.mxu0 %v46274_v48  ;;  %37925 = vmatprep.mubr.f32.mxu0 %v45214_v5 }
0x333a   :  { %40739 = vmatprep.subr.bf16.mxu0 %v46275_v51 }
0x333d   :  { %40741 = vmatpush3.bf16.msra.mxu0 %v46275_v51 }
0x333e   :  { %40743 = vmatprep.subr.bf16.mxu0 %v46282_v42 }
0x3340   :  { %37926 = vmatmul.mubr.f32.vlgmr.msra.gmra.mrb[58].mxu0 %v45210_v14 }
0x3341   :  { %40745 = vmatpush3.bf16.msra.mxu0 %v46282_v42  ;;  %37936 = vmatprep.mubr.f32.mxu0 %v45232_v38 }
0x3342   :  { %40747 = vmatprep.subr.bf16.mxu0 %v46283_v37 }
0x3345   :  { %40749 = vmatpush3.bf16.msra.mxu0 %v46283_v37 }
0x3346   :  { %40751 = vmatprep.subr.bf16.mxu0 %v46284_v29 }
0x3348   :  { %37937 = vmatmul.mubr.f32.vlgmr.msra.gmra.mrb[60].mxu0 %v45234_v26 }
0x3349   :  { %40753 = vmatpush3.bf16.msra.mxu0 %v46284_v29  ;;  %37947 = vmatprep.mubr.f32.mxu0 %v45214_v5 }
0x334a   :  { %40755 = vmatprep.subr.bf16.mxu0 %v46285_v61 }
0x334d   :  { %40757 = vmatpush3.bf16.msra.mxu0 %v46285_v61 }
0x334e   :  { %40759 = vmatprep.subr.bf16.mxu0 %v46286_v60 }
0x3350   :  { %37948 = vmatmul.mubr.f32.vlgmr.msra.gmra.mrb[60].mxu0 %v45210_v14 }
0x3351   :  { %40761 = vmatpush3.bf16.msra.mxu0 %v46286_v60  ;;  %37958 = vmatprep.mubr.f32.mxu0 %v45220_v39 }
0x3352   :  { %40763 = vmatprep.subr.bf16.mxu0 %v46287_v8 }
0x3355   :  { %40765 = vmatpush3.bf16.msra.mxu0 %v46287_v8 }
0x3356   :  { %40767 = vmatprep.subr.bf16.mxu0 %v46282_v42 }
0x3358   :  { %37959 = vmatmul.mubr.f32.vlgmr.msra.gmra.mrb[60].mxu0 %v45217_v25 }
0x3359   :  { %40769 = vmatpush3.bf16.msra.mxu0 %v46282_v42  ;;  %37969 = vmatprep.mubr.f32.mxu0 %v45226_v34 }
0x335a   :  { %40771 = vmatprep.subr.bf16.mxu0 %v46283_v37 }
0x335d   :  { %40773 = vmatpush3.bf16.msra.mxu0 %v46283_v37 }
0x335e   :  { %40775 = vmatprep.subr.bf16.mxu0 %v46288_v11 }
0x3360   :  { %37970 = vmatmul.mubr.f32.vlgmr.msra.gmra.mrb[60].mxu0 %v45223_v36 }
0x3361   :  { %40777 = vmatpush3.bf16.msra.mxu0 %v46288_v11  ;;  %37980 = vmatprep.mubr.f32.mxu0 %v45214_v5 }
0x3362   :  { %40779 = vmatprep.subr.bf16.mxu0 %v46289_v49 }
0x3365   :  { %40781 = vmatpush3.bf16.msra.mxu0 %v46289_v49 }
0x3366   :  { %40783 = vmatprep.subr.bf16.mxu0 %v46282_v42 }
0x3368   :  { %37981 = vmatmul.mubr.f32.vlgmr.msra.gmra.mrb[60].mxu0 %v45210_v14 }
0x3369   :  { %40785 = vmatpush3.bf16.msra.mxu0 %v46282_v42  ;;  %37991 = vmatprep.mubr.f32.mxu0 %v45214_v5 }
0x336a   :  { %40787 = vmatprep.subr.bf16.mxu0 %v46283_v37 }
0x336d   :  { %40789 = vmatpush3.bf16.msra.mxu0 %v46283_v37 }
0x3370   :  { %37992 = vmatmul.mubr.f32.vlgmr.msra.gmra.mrb[60].mxu0 %v45210_v14 }
0x33e3   :  { %v45339_v15 = vpop.f32.mrb[56].mxu0 }
0x33e4   :  { %v45341_v43 = vpop.f32.mrb[57].mxu0  ;;  %v26412_v54 = vsel %vm2373_vm5, %v45339_v15, 0 }
0x33e5   :  { %v26409_v18 = vsel %vm2373_vm5, %v45341_v43, 0  ;;  %27459 = vrot.lane.b32.xlu1 %v45341_v43, %s42393_s17  ;;  %v26497_v1 = vand.u32 4294901760, %v26412_v54 }
0x33e6   :  { %v26487_v55 = vand.u32 4294901760, %v26409_v18 }
0x33e7   :  { %v26498_v14 = vsub.f32 %v26412_v54, %v26497_v1 }
0x33e8   :  { %v26488_v47 = vsub.f32 %v26409_v18, %v26487_v55 }
0x33e9   :  { %v26499_v38 = vand.u32 4294901760, %v26498_v14 }
0x33ea   :  { %v26489_v6 = vand.u32 4294901760, %v26488_v47 }
0x33eb   :  { %v26500_v13 = vsub.f32 %v26498_v14, %v26499_v38 }
0x33ec   :  { %v26490_v24 = vsub.f32 %v26488_v47, %v26489_v6 }
0x33ed   :  { %v26501_v41 = vand.u32 4294901760, %v26500_v13 }
0x33ee   :  { %v26491_v30 = vand.u32 4294901760, %v26490_v24 }
0x33f0   :  { %37998 = vmatprep.mubr.f32.mxu0 %v26491_v30 }
0x3413   :  { %v45349_v58 = vpop.f32.mrb[58].mxu0 }
0x3414   :  { %v26418_v2 = vsel %vm2373_vm5, %v45349_v58, 0  ;;  %27465 = vrot.lane.b32.xlu0 %v45349_v58, %s42393_s17  ;;  %v45355_v5 = vpop.f32.mrb[59].mxu0 }
0x3415   :  { %v26424_v25 = vand.u32 4294901760, %v26418_v2  ;;  %v26415_v39 = vsel %vm2373_vm5, %v45355_v5, 0  ;;  %27463 = vrot.lane.b32.xlu1 %v45355_v5, %s42393_s17 }
0x3416   :  { %v26421_v36 = vand.u32 4294901760, %v26415_v39 }
0x3417   :  { %v26516_v34 = vsub.f32 %v26418_v2, %v26424_v25 }
0x3418   :  { %v40790_v62 = vpack.c.bf16 %v26424_v25, %v26421_v36  ;;  %v26509_v21 = vsub.f32 %v26415_v39, %v26421_v36 }
0x3419   :  { %27461 = vrot.lane.b32.xlu1 %v45339_v15, %s42393_s17  ;;  %v26517_v26 = vand.u32 4294901760, %v26516_v34 }
0x341a   :  { %40791 = vmatprep.subr.bf16.mxu0 %v40790_v62  ;;  %v26510_v3 = vand.u32 4294901760, %v26509_v21  ;;  %v40798_v10 = vpack.c.bf16 %v26516_v34, %v26509_v21 }
0x341b   :  { %40793 = vmatpush3.bf16.xpose.msra.mxu0 %v40790_v62  ;;  %v26518_v35 = vsub.f32 %v26516_v34, %v26517_v26 }
0x341c   :  { %v26511_v12 = vsub.f32 %v26509_v21, %v26510_v3  ;;  %v40806_v48 = vpack.c.bf16 %v26517_v26, %v26510_v3 }
0x341d   :  { %v26519_v51 = vand.u32 4294901760, %v26518_v35 }
0x341e   :  { %v26512_v63 = vand.u32 4294901760, %v26511_v12 }
0x3420   :  { %v40794_v33 = vpack.c.bf16 %v26519_v51, %v26512_v63 }
0x3422   :  { %37999 = vmatmul.mubr.f32.vlgmr.msra.gmra.mrb[62].mxu0 %v26501_v41  ;;  %40795 = vmatprep.subr.bf16.mxu0 %v40794_v33 }
0x3423   :  { %40797 = vmatpush3.bf16.xpose.msra.mxu0 %v40794_v33  ;;  %38005 = vmatprep.mubr.f32.mxu0 %v26487_v55 }
0x3424   :  { %40799 = vmatprep.subr.bf16.mxu0 %v40798_v10 }
0x342a   :  { %38006 = vmatmul.mubr.f32.vlgmr.msra.gmra.mrb[62].mxu0 %v26497_v1 }
0x342b   :  { %40801 = vmatpush3.bf16.xpose.msra.mxu0 %v40798_v10  ;;  %38012 = vmatprep.mubr.f32.mxu0 %v26488_v47 }
0x342c   :  { %40803 = vmatprep.subr.bf16.mxu0 %v40790_v62 }
0x3432   :  { %38013 = vmatmul.mubr.f32.vlgmr.msra.gmra.mrb[62].mxu0 %v26498_v14 }
0x3433   :  { %40805 = vmatpush3.bf16.xpose.msra.mxu0 %v40790_v62  ;;  %38019 = vmatprep.mubr.f32.mxu0 %v26489_v6 }
0x3434   :  { %40807 = vmatprep.subr.bf16.mxu0 %v40806_v48 }
0x343a   :  { %38020 = vmatmul.mubr.f32.vlgmr.msra.gmra.mrb[62].mxu0 %v26499_v38 }
0x343b   :  { %40809 = vmatpush3.bf16.xpose.msra.mxu0 %v40806_v48  ;;  %38026 = vmatprep.mubr.f32.mxu0 %v26487_v55 }
0x343c   :  { %40811 = vmatprep.subr.bf16.mxu0 %v40790_v62 }
0x3442   :  { %38027 = vmatmul.mubr.f32.vlgmr.msra.gmra.mrb[62].mxu0 %v26497_v1 }
0x3443   :  { %v45363_v28 = vpop.f32.mrb[60].mxu0  ;;  %40813 = vmatpush3.bf16.xpose.msra.mxu0 %v40790_v62  ;;  %38033 = vmatprep.mubr.f32.mxu0 %v26487_v55 }
0x3444   :  { %v26953_v44 = vsel %vm317_vm1, %v45363_v28, 0  ;;  %v45367_v32 = vpop.f32.mrb[61].mxu0 }
0x3445   :  { %v26959_v42 = vand.u32 4294901760, %v26953_v44  ;;  %v26956_v37 = vand.u32 4294901760, %v45367_v32 }
0x3447   :  { %v27051_v29 = vsub.f32 %v26953_v44, %v26959_v42  ;;  %v45370_v61 = vpack.c.bf16 %v26959_v42, %v26956_v37  ;;  %v27044_v60 = vsub.f32 %v45367_v32, %v26956_v37 }
0x3449   :  { %40815 = vmatprep.subr.bf16.mxu1 %v45370_v61  ;;  %v27045_v8 = vand.u32 4294901760, %v27044_v60  ;;  %v27052_v11 = vand.u32 4294901760, %v27051_v29  ;;  %v45374_v49 = vpack.c.bf16 %v27051_v29, %v27044_v60 }
0x344a   :  { %38034 = vmatmul.mubr.f32.vlgmr.msra.gmra.mrb[62].mxu0 %v26497_v1  ;;  %40817 = vmatpush3.bf16.msra.mxu1 %v45370_v61 }
0x344b   :  { %v27046_v18 = vsub.f32 %v27044_v60, %v27045_v8  ;;  %v27053_v55 = vsub.f32 %v27051_v29, %v27052_v11  ;;  %v45377_v47 = vpack.c.bf16 %v27052_v11, %v27045_v8 }
0x344d   :  { %v27047_v6 = vand.u32 4294901760, %v27046_v18  ;;  %v27054_v24 = vand.u32 4294901760, %v27053_v55 }
0x344f   :  { %v45379_v30 = vpack.c.bf16 %v27054_v24, %v27047_v6 }
0x3451   :  { %40819 = vmatprep.subr.bf16.mxu1 %v45379_v30 }
0x3457   :  { %v27460_v54 = vpop.permute.xlu1 %27459 }
0x3458   :  { %v27467_v14 = vsel %vm2373_vm5, %v27460_v54, 0  ;;  %v45386_v54 = vld [vmem:[#allocation4 + $0x1] ss:$0 sm:$0xff] }
0x3459   :  { %v27542_v2 = vand.u32 4294901760, %v27467_v14 }
0x345b   :  { %v27543_v25 = vsub.f32 %v27467_v14, %v27542_v2 }
0x345d   :  { %v27544_v39 = vand.u32 4294901760, %v27543_v25 }
0x345f   :  { %v27545_v36 = vsub.f32 %v27543_v25, %v27544_v39 }
0x3461   :  { %v27546_v1 = vand.u32 4294901760, %v27545_v36 }
0x3463   :  { %38082 = vmatprep.mubr.f32.mxu0 %v27546_v1 }
0x3486   :  { %v27466_v34 = vpop.permute.xlu0 %27465 }
0x3487   :  { %v27473_v62 = vsel %vm2373_vm5, %v27466_v34, 0  ;;  %v27464_v21 = vpop.permute.xlu1 %27463 }
0x3488   :  { %v27479_v38 = vand.u32 4294901760, %v27473_v62  ;;  %v27471_v26 = vsel %vm2373_vm5, %v27464_v21, 0 }
0x3489   :  { %v27476_v3 = vand.u32 4294901760, %v27471_v26 }
0x348a   :  { %v27571_v10 = vsub.f32 %v27473_v62, %v27479_v38 }
0x348b   :  { %v40838_v35 = vpack.c.bf16 %v27479_v38, %v27476_v3  ;;  %v27564_v13 = vsub.f32 %v27471_v26, %v27476_v3  ;;  %v27462_v12 = vpop.permute.xlu1 %27461 }
0x348c   :  { %v27572_v48 = vand.u32 4294901760, %v27571_v10  ;;  %v27469_v51 = vsel %vm2373_vm5, %v27462_v12, 0 }
0x348d   :  { %v27565_v63 = vand.u32 4294901760, %v27564_v13  ;;  %v27552_v41 = vand.u32 4294901760, %v27469_v51  ;;  %40839 = vmatprep.subr.bf16.mxu0 %v40838_v35  ;;  %v40846_v55 = vpack.c.bf16 %v27571_v10, %v27564_v13 }
0x348e   :  { %v27573_v33 = vsub.f32 %v27571_v10, %v27572_v48  ;;  %40841 = vmatpush3.bf16.xpose.msra.mxu0 %v40838_v35 }
0x348f   :  { %v27566_v44 = vsub.f32 %v27564_v13, %v27565_v63  ;;  %v27553_v42 = vsub.f32 %v27469_v51, %v27552_v41  ;;  %v40854_v6 = vpack.c.bf16 %v27572_v48, %v27565_v63 }
0x3490   :  { %v27574_v37 = vand.u32 4294901760, %v27573_v33 }
0x3491   :  { %v27554_v29 = vand.u32 4294901760, %v27553_v42  ;;  %v27567_v60 = vand.u32 4294901760, %v27566_v44 }
0x3493   :  { %v27555_v8 = vsub.f32 %v27553_v42, %v27554_v29  ;;  %v40842_v11 = vpack.c.bf16 %v27574_v37, %v27567_v60 }
0x3495   :  { %v27556_v18 = vand.u32 4294901760, %v27555_v8  ;;  %40843 = vmatprep.subr.bf16.mxu0 %v40842_v11 }
0x3497   :  { %38083 = vmatmul.mubr.f32.vlgmr.msra.gmra.mrb[64].mxu0 %v27556_v18 }
0x3498   :  { %40845 = vmatpush3.bf16.xpose.msra.mxu0 %v40842_v11  ;;  %38089 = vmatprep.mubr.f32.mxu0 %v27542_v2 }
0x3499   :  { %40847 = vmatprep.subr.bf16.mxu0 %v40846_v55 }
0x349f   :  { %38090 = vmatmul.mubr.f32.vlgmr.msra.gmra.mrb[64].mxu0 %v27552_v41 }
0x34a0   :  { %40849 = vmatpush3.bf16.xpose.msra.mxu0 %v40846_v55  ;;  %38096 = vmatprep.mubr.f32.mxu0 %v27543_v25 }
0x34a1   :  { %40851 = vmatprep.subr.bf16.mxu0 %v40838_v35 }
0x34a7   :  { %38097 = vmatmul.mubr.f32.vlgmr.msra.gmra.mrb[64].mxu0 %v27553_v42 }
0x34a8   :  { %40853 = vmatpush3.bf16.xpose.msra.mxu0 %v40838_v35  ;;  %38103 = vmatprep.mubr.f32.mxu0 %v27544_v39 }
0x34a9   :  { %40855 = vmatprep.subr.bf16.mxu0 %v40854_v6 }
0x34af   :  { %38104 = vmatmul.mubr.f32.vlgmr.msra.gmra.mrb[64].mxu0 %v27554_v29 }
0x34b0   :  { %40857 = vmatpush3.bf16.xpose.msra.mxu0 %v40854_v6  ;;  %38110 = vmatprep.mubr.f32.mxu0 %v27542_v2 }
0x34b1   :  { %40859 = vmatprep.subr.bf16.mxu0 %v40838_v35 }
0x34b7   :  { %38111 = vmatmul.mubr.f32.vlgmr.msra.gmra.mrb[64].mxu0 %v27552_v41 }
0x34b8   :  { %40861 = vmatpush3.bf16.xpose.msra.mxu0 %v40838_v35  ;;  %38117 = vmatprep.mubr.f32.mxu0 %v27542_v2 }
0x34bf   :  { %38118 = vmatmul.mubr.f32.vlgmr.msra.gmra.mrb[64].mxu0 %v27552_v41 }
0x351d   :  { %v38035_v24 = vpop.f32.mrb[62].mxu0 }
0x351e   :  { %v41349_v14 = vadd.f32 %v45386_v54, %v38035_v24  ;;  %v26912_v25 = vpop.f32.mrb[63].mxu0 }
0x351f   :  { %v41350_v36 = vadd.f32 %v45386_v54, %v26912_v25 }
0x3520   :  { %v26923_v1 = vmul.f32 0.17677669, %v41349_v14 }
0x3521   :  { %v26922_v34 = vmul.f32 0.17677669, %v41350_v36 }
0x3522   :  { %v26927_v39 = vsel %vm2894_vm6, %v26923_v1, -inf }
0x3523   :  { %26928 = vmax.xlane.f32.xlu1 %v26927_v39  ;;  %v26924_v62 = vsel %vm2890_vm7, %v26922_v34, -inf }
0x3524   :  { %26925 = vmax.xlane.f32.xlu0 %v26924_v62 }
0x3592   :  { %v38119_v21 = vpop.f32.mrb[64].mxu0 }
0x3593   :  { %v27967_v38 = vpop.f32.mrb[65].mxu0  ;;  %v41351_v2 = vadd.f32 %v45386_v54, %v38119_v21 }
0x3594   :  { %v41352_v26 = vadd.f32 %v45386_v54, %v27967_v38 }
0x3595   :  { %v27978_v10 = vmul.f32 0.17677669, %v41351_v2 }
0x3596   :  { %v27977_v3 = vmul.f32 0.17677669, %v41352_v26 }
0x3597   :  { %v27982_v13 = vsel %vm2894_vm6, %v27978_v10, -inf }
0x3598   :  { %v27979_v35 = vsel %vm2890_vm7, %v27977_v3, -inf }
0x3599   :  { %27980 = vmax.xlane.f32.xlu0 %v27979_v35 }
0x359d   :  { %27983 = vmax.xlane.f32.xlu0 %v27982_v13 }
0x35b0   :  { %v26929_v12 = vpop.xlane.xlu1 %26928 }
0x35b1   :  { %v26931_v48 = vsub.f32 %v26923_v1, %v26929_v12  ;;  %v26926_v51 = vpop.xlane.xlu0 %26925 }
0x35b2   :  { %v26930_v63 = vsub.f32 %v26922_v34, %v26926_v51 }
0x35b3   :  { %v26934_v41 = vmul.f32 1.442695, %v26931_v48 }
0x35b4   :  { %v26932_v33 = vmul.f32 1.442695, %v26930_v63 }
0x35b5   :  { %42062 = vpow2.f32 %v26934_v41 }
0x35b6   :  { %42064 = vpow2.f32 %v26932_v33 }
0x35bf   :  { %v42063_v44 = vpop.eup %42062 }
0x35c0   :  { %v42065_v42 = vpop.eup %42064  ;;  %v26939_v37 = vsel %vm2894_vm6, %v42063_v44, 0.0 }
0x35c1   :  { %26940 = vadd.xlane.f32.xlu0 %v26939_v37  ;;  %v26936_v29 = vsel %vm2890_vm7, %v42065_v42, 0.0 }
0x35c2   :  { %26937 = vadd.xlane.f32.xlu1 %v26936_v29 }
0x3626   :  { %v27981_v60 = vpop.xlane.xlu0 %27980 }
0x3627   :  { %v27985_v8 = vsub.f32 %v27977_v3, %v27981_v60 }
0x3629   :  { %v27987_v11 = vmul.f32 1.442695, %v27985_v8 }
0x362a   :  { %v27984_v18 = vpop.xlane.xlu0 %27983 }
0x362b   :  { %42066 = vpow2.f32 %v27987_v11  ;;  %v27986_v55 = vsub.f32 %v27978_v10, %v27984_v18 }
0x362d   :  { %v27989_v6 = vmul.f32 1.442695, %v27986_v55 }
0x362f   :  { %42068 = vpow2.f32 %v27989_v6 }
0x3635   :  { %v45398_v24 = vpop.eup %42066 }
0x3636   :  { %v27991_v14 = vsel %vm2890_vm7, %v45398_v24, 0.0 }
0x3637   :  { %27992 = vadd.xlane.f32.xlu1 %v27991_v14 }
0x3639   :  { %v45402_v25 = vpop.eup %42068 }
0x363a   :  { %v27994_v36 = vsel %vm2894_vm6, %v45402_v25, 0.0 }
0x363b   :  { %27995 = vadd.xlane.f32.xlu0 %v27994_v36 }
0x3648   :  { %28004 = vrot.lane.b32.xlu1 %v45363_v28, %s42393_s17 }
0x364c   :  { %28531 = vrot.lane.b32.xlu1 %v45355_v5, %s42394_s23 }
0x364e   :  { %v26941_v1 = vpop.xlane.xlu0 %26940 }
0x364f   :  { %42070 = vrcp.f32 %v26941_v1  ;;  %v26938_v34 = vpop.xlane.xlu1 %26937 }
0x3650   :  { %42072 = vrcp.f32 %v26938_v34  ;;  %28533 = vrot.lane.b32.xlu1 %v45349_v58, %s42394_s23 }
0x3651   :  { %28002 = vrot.lane.b32.xlu0 %v45367_v32, %s42393_s17 }
0x3654   :  { %28529 = vrot.lane.b32.xlu1 %v45339_v15, %s42394_s23 }
0x3655   :  { %28527 = vrot.lane.b32.xlu0 %v45341_v43, %s42394_s23 }
0x3659   :  { %v42071_v39 = vpop.eup %42070 }
0x365a   :  { %v42073_v62 = vpop.eup %42072  ;;  %v26945_v21 = vmul.f32 %v42071_v39, %v42063_v44 }
0x365b   :  { %v26944_v38 = vmul.f32 %v42073_v62, %v42065_v42 }
0x365c   :  { %v26950_v2 = vsel %vm2890_vm7, %v26945_v21, 0 }
0x365d   :  { %v26947_v26 = vsel %vm2890_vm7, %v26944_v38, 0  ;;  %v27032_v3 = vand.u32 4294901760, %v26950_v2 }
0x365e   :  { %v27022_v10 = vand.u32 4294901760, %v26947_v26 }
0x365f   :  { %v27033_v35 = vsub.f32 %v26950_v2, %v27032_v3 }
0x3660   :  { %v27023_v13 = vsub.f32 %v26947_v26, %v27022_v10 }
0x3661   :  { %v27034_v12 = vand.u32 4294901760, %v27033_v35 }
0x3662   :  { %v27024_v48 = vand.u32 4294901760, %v27023_v13 }
0x3663   :  { %v27035_v51 = vsub.f32 %v27033_v35, %v27034_v12 }
0x3664   :  { %v27025_v63 = vsub.f32 %v27023_v13, %v27024_v48 }
0x3665   :  { %v27036_v33 = vand.u32 4294901760, %v27035_v51 }
0x3666   :  { %v27026_v41 = vand.u32 4294901760, %v27025_v63 }
0x3668   :  { %38040 = vmatprep.mubr.f32.mxu1 %v27026_v41 }
0x3669   :  { %38041 = vmatmul.mubr.f32.vlgmr.msra.gmra.mrb[66].mxu1 %v27036_v33 }
0x366a   :  { %40821 = vmatpush3.bf16.msra.mxu1 %v45379_v30  ;;  %38047 = vmatprep.mubr.f32.mxu1 %v27022_v10 }
0x366b   :  { %40823 = vmatprep.subr.bf16.mxu1 %v45374_v49 }
0x3671   :  { %38048 = vmatmul.mubr.f32.vlgmr.msra.gmra.mrb[66].mxu1 %v27032_v3 }
0x3672   :  { %40825 = vmatpush3.bf16.msra.mxu1 %v45374_v49  ;;  %38054 = vmatprep.mubr.f32.mxu1 %v27023_v13 }
0x3673   :  { %40827 = vmatprep.subr.bf16.mxu1 %v45370_v61 }
0x3679   :  { %38055 = vmatmul.mubr.f32.vlgmr.msra.gmra.mrb[66].mxu1 %v27033_v35 }
0x367a   :  { %40829 = vmatpush3.bf16.msra.mxu1 %v45370_v61  ;;  %38061 = vmatprep.mubr.f32.mxu1 %v27024_v48 }
0x367b   :  { %40831 = vmatprep.subr.bf16.mxu1 %v45377_v47 }
0x3681   :  { %38062 = vmatmul.mubr.f32.vlgmr.msra.gmra.mrb[66].mxu1 %v27034_v12 }
0x3682   :  { %40833 = vmatpush3.bf16.msra.mxu1 %v45377_v47  ;;  %38068 = vmatprep.mubr.f32.mxu1 %v27022_v10 }
0x3683   :  { %40835 = vmatprep.subr.bf16.mxu1 %v45370_v61 }
0x3689   :  { %38069 = vmatmul.mubr.f32.vlgmr.msra.gmra.mrb[66].mxu1 %v27032_v3 }
0x368a   :  { %40837 = vmatpush3.bf16.msra.mxu1 %v45370_v61  ;;  %38075 = vmatprep.mubr.f32.mxu1 %v27022_v10 }
0x3691   :  { %38076 = vmatmul.mubr.f32.vlgmr.msra.gmra.mrb[66].mxu1 %v27032_v3 }
0x36c4   :  { %v27993_v49 = vpop.xlane.xlu1 %27992 }
0x36c5   :  { %42074 = vrcp.f32 %v27993_v49 }
0x36c8   :  { %v28005_v30 = vpop.permute.xlu1 %28004  ;;  %v27996_v44 = vpop.xlane.xlu0 %27995 }
0x36c9   :  { %v28013_v42 = vsel %vm317_vm1, %v28005_v30, 0  ;;  %42076 = vrcp.f32 %v27996_v44 }
0x36ca   :  { %v28019_v37 = vand.u32 4294901760, %v28013_v42 }
0x36cc   :  { %v28111_v29 = vsub.f32 %v28013_v42, %v28019_v37  ;;  %v28003_v60 = vpop.permute.xlu0 %28002 }
0x36cd   :  { %v28016_v8 = vand.u32 4294901760, %v28003_v60 }
0x36ce   :  { %v28112_v47 = vand.u32 4294901760, %v28111_v29 }
0x36cf   :  { %v42075_v11 = vpop.eup %42074  ;;  %v45430_v18 = vpack.c.bf16 %v28019_v37, %v28016_v8  ;;  %v28104_v55 = vsub.f32 %v28003_v60, %v28016_v8 }
0x36d0   :  { %v27999_v61 = vmul.f32 %v42075_v11, %v45398_v24  ;;  %v28113_v6 = vsub.f32 %v28111_v29, %v28112_v47  ;;  %v28528_v30 = vpop.permute.xlu0 %28527 }
0x36d1   :  { %v28105_v14 = vand.u32 4294901760, %v28104_v55  ;;  %40863 = vmatprep.subr.bf16.mxu1 %v45430_v18  ;;  %v40870_v41 = vpack.c.bf16 %v28111_v29, %v28104_v55  ;;  %v28535_v37 = vsel %vm2373_vm5, %v28528_v30, 0 }
0x36d2   :  { %40865 = vmatpush3.bf16.msra.mxu1 %v45430_v18  ;;  %v28008_v34 = vsel %vm2890_vm7, %v27999_v61, 0  ;;  %v28114_v21 = vand.u32 4294901760, %v28113_v6  ;;  %v28610_v8 = vand.u32 4294901760, %v28535_v37 }
0x36d3   :  { %v42077_v36 = vpop.eup %42076  ;;  %v28106_v1 = vsub.f32 %v28104_v55, %v28105_v14  ;;  %v28082_v38 = vand.u32 4294901760, %v28008_v34  ;;  %v40878_v49 = vpack.c.bf16 %v28112_v47, %v28105_v14 }
0x36d4   :  { %v28000_v39 = vmul.f32 %v42077_v36, %v45402_v25  ;;  %v28532_v25 = vpop.permute.xlu1 %28531  ;;  %v28611_v61 = vsub.f32 %v28535_v37, %v28610_v8 }
0x36d5   :  { %v28107_v62 = vand.u32 4294901760, %v28106_v1  ;;  %v28083_v3 = vsub.f32 %v28008_v34, %v28082_v38  ;;  %v28539_v42 = vsel %vm2373_vm5, %v28532_v25, 0 }
0x36d6   :  { %v28011_v2 = vsel %vm2890_vm7, %v28000_v39, 0  ;;  %v28544_v60 = vand.u32 4294901760, %v28539_v42  ;;  %v28612_v1 = vand.u32 4294901760, %v28611_v61 }
0x36d7   :  { %v40866_v26 = vpack.c.bf16 %v28114_v21, %v28107_v62  ;;  %v28092_v24 = vand.u32 4294901760, %v28011_v2  ;;  %v28084_v10 = vand.u32 4294901760, %v28083_v3 }
0x36d8   :  { %v28534_v33 = vpop.permute.xlu1 %28533  ;;  %v28632_v47 = vsub.f32 %v28539_v42, %v28544_v60 }
0x36d9   :  { %40867 = vmatprep.subr.bf16.mxu1 %v40866_v26  ;;  %v28093_v35 = vsub.f32 %v28011_v2, %v28092_v24  ;;  %v28085_v13 = vsub.f32 %v28083_v3, %v28084_v10  ;;  %v28541_v44 = vsel %vm2373_vm5, %v28534_v33, 0 }
0x36da   :  { %v28547_v29 = vand.u32 4294901760, %v28541_v44  ;;  %v28633_v36 = vand.u32 4294901760, %v28632_v47 }
0x36db   :  { %v28094_v12 = vand.u32 4294901760, %v28093_v35  ;;  %v28086_v48 = vand.u32 4294901760, %v28085_v13 }
0x36dc   :  { %v28639_v11 = vsub.f32 %v28541_v44, %v28547_v29  ;;  %v28530_v55 = vpop.permute.xlu1 %28529  ;;  %v40886_v39 = vpack.c.bf16 %v28547_v29, %v28544_v60  ;;  %v28634_v21 = vsub.f32 %v28632_v47, %v28633_v36 }
0x36dd   :  { %v28095_v51 = vsub.f32 %v28093_v35, %v28094_v12  ;;  %38124 = vmatprep.mubr.f32.mxu1 %v28086_v48  ;;  %v28537_v6 = vsel %vm2373_vm5, %v28530_v55, 0 }
0x36de   :  { %v28640_v14 = vand.u32 4294901760, %v28639_v11  ;;  %v28620_v34 = vand.u32 4294901760, %v28537_v6  ;;  %v28635_v13 = vand.u32 4294901760, %v28634_v21 }
0x36df   :  { %v28096_v63 = vand.u32 4294901760, %v28095_v51 }
0x36e0   :  { %v28641_v62 = vsub.f32 %v28639_v11, %v28640_v14  ;;  %v28621_v2 = vsub.f32 %v28537_v6, %v28620_v34 }
0x36e1   :  { %38125 = vmatmul.mubr.f32.vlgmr.msra.gmra.mrb[68].mxu1 %v28096_v63  ;;  %v40894_v63 = vpack.c.bf16 %v28639_v11, %v28632_v47 }
0x36e2   :  { %40869 = vmatpush3.bf16.msra.mxu1 %v40866_v26  ;;  %38131 = vmatprep.mubr.f32.mxu1 %v28082_v38  ;;  %v28613_v26 = vsub.f32 %v28611_v61, %v28612_v1 }
0x36e3   :  { %40871 = vmatprep.subr.bf16.mxu1 %v40870_v41 }
0x36e9   :  { %38132 = vmatmul.mubr.f32.vlgmr.msra.gmra.mrb[68].mxu1 %v28092_v24 }
0x36ea   :  { %40873 = vmatpush3.bf16.msra.mxu1 %v40870_v41  ;;  %38138 = vmatprep.mubr.f32.mxu1 %v28083_v3  ;;  %v28642_v3 = vand.u32 4294901760, %v28641_v62 }
0x36eb   :  { %40875 = vmatprep.subr.bf16.mxu1 %v45430_v18 }
0x36f1   :  { %38139 = vmatmul.mubr.f32.vlgmr.msra.gmra.mrb[68].mxu1 %v28093_v35  ;;  %v28614_v35 = vand.u32 4294901760, %v28613_v26 }
0x36f2   :  { %40877 = vmatpush3.bf16.msra.mxu1 %v45430_v18  ;;  %38145 = vmatprep.mubr.f32.mxu1 %v28084_v10  ;;  %v28622_v10 = vand.u32 4294901760, %v28621_v2 }
0x36f3   :  { %40879 = vmatprep.subr.bf16.mxu1 %v40878_v49 }
0x36f4   :  { %v28623_v48 = vsub.f32 %v28621_v2, %v28622_v10 }
0x36f6   :  { %v28624_v51 = vand.u32 4294901760, %v28623_v48 }
0x36f9   :  { %38146 = vmatmul.mubr.f32.vlgmr.msra.gmra.mrb[68].mxu1 %v28094_v12  ;;  %v40890_v12 = vpack.c.bf16 %v28642_v3, %v28635_v13 }
0x36fa   :  { %40881 = vmatpush3.bf16.msra.mxu1 %v40878_v49  ;;  %38152 = vmatprep.mubr.f32.mxu1 %v28082_v38 }
0x36fb   :  { %40883 = vmatprep.subr.bf16.mxu1 %v45430_v18 }
0x3701   :  { %38153 = vmatmul.mubr.f32.vlgmr.msra.gmra.mrb[68].mxu1 %v28092_v24 }
0x3702   :  { %40885 = vmatpush3.bf16.msra.mxu1 %v45430_v18  ;;  %38159 = vmatprep.mubr.f32.mxu1 %v28082_v38  ;;  %v40902_v18 = vpack.c.bf16 %v28640_v14, %v28633_v36 }
0x3703   :  { %40887 = vmatprep.subr.bf16.mxu1 %v40886_v39 }
0x3709   :  { %38160 = vmatmul.mubr.f32.vlgmr.msra.gmra.mrb[68].mxu1 %v28092_v24 }
0x370a   :  { %38166 = vmatprep.mubr.f32.mxu1 %v28614_v35 }
0x370b   :  { %40889 = vmatpush3.bf16.xpose.msra.mxu1 %v40886_v39 }
0x370c   :  { %40891 = vmatprep.subr.bf16.mxu1 %v40890_v12 }
0x3712   :  { %38167 = vmatmul.mubr.f32.vlgmr.msra.gmra.mrb[70].mxu1 %v28624_v51 }
0x3713   :  { %40893 = vmatpush3.bf16.xpose.msra.mxu1 %v40890_v12  ;;  %38173 = vmatprep.mubr.f32.mxu1 %v28610_v8 }
0x3714   :  { %40895 = vmatprep.subr.bf16.mxu1 %v40894_v63 }
0x371a   :  { %38174 = vmatmul.mubr.f32.vlgmr.msra.gmra.mrb[70].mxu1 %v28620_v34 }
0x371b   :  { %40897 = vmatpush3.bf16.xpose.msra.mxu1 %v40894_v63  ;;  %38180 = vmatprep.mubr.f32.mxu1 %v28611_v61 }
0x371c   :  { %40899 = vmatprep.subr.bf16.mxu1 %v40886_v39 }
0x3722   :  { %38181 = vmatmul.mubr.f32.vlgmr.msra.gmra.mrb[70].mxu1 %v28621_v2 }
0x3723   :  { %40901 = vmatpush3.bf16.xpose.msra.mxu1 %v40886_v39  ;;  %38187 = vmatprep.mubr.f32.mxu1 %v28612_v1 }
0x3724   :  { %40903 = vmatprep.subr.bf16.mxu1 %v40902_v18 }
0x372a   :  { %38188 = vmatmul.mubr.f32.vlgmr.msra.gmra.mrb[70].mxu1 %v28622_v10 }
0x372b   :  { %40905 = vmatpush3.bf16.xpose.msra.mxu1 %v40902_v18  ;;  %38194 = vmatprep.mubr.f32.mxu1 %v28610_v8 }
0x372c   :  { %40907 = vmatprep.subr.bf16.mxu1 %v40886_v39 }
0x3732   :  { %38195 = vmatmul.mubr.f32.vlgmr.msra.gmra.mrb[70].mxu1 %v28620_v34 }
0x3733   :  { %40909 = vmatpush3.bf16.xpose.msra.mxu1 %v40886_v39  ;;  %38201 = vmatprep.mubr.f32.mxu1 %v28610_v8 }
0x373a   :  { %38202 = vmatmul.mubr.f32.vlgmr.msra.gmra.mrb[70].mxu1 %v28620_v34 }
0x3764   :  { %v38077_v38 = vpop.f32.mrb[66].mxu1 }
0x3765   :  { %27458 = vst.msk [vmem:[#allocation3 + $0x8] sm:$0xf] %vm3426_vm8, %v38077_v38  ;;  %v27447_v24 = vpop.f32.mrb[67].mxu1 }
0x3766   :  { %27457 = vst.msk [vmem:[#allocation3] sm:$0xff] %vm2373_vm5, %v27447_v24 }
0x37dc   :  { %v45448_v41 = vpop.f32.mrb[68].mxu1 }
0x37dd   :  { %v45450_v25 = vpop.f32.mrb[69].mxu1 }
0x380d   :  { %v38203_v33 = vpop.f32.mrb[70].mxu1 }
0x380e   :  { %v41353_v49 = vadd.f32 %v45386_v54, %v38203_v33  ;;  %v29035_v30 = vpop.f32.mrb[71].mxu1 }
0x380f   :  { %v41354_v44 = vadd.f32 %v45386_v54, %v29035_v30 }
0x3810   :  { %v29046_v42 = vmul.f32 0.17677669, %v41353_v49 }
0x3811   :  { %v29045_v37 = vmul.f32 0.17677669, %v41354_v44 }
0x3812   :  { %v29050_v29 = vsel %vm2894_vm6, %v29046_v42, -inf }
0x3813   :  { %29051 = vmax.xlane.f32.xlu1 %v29050_v29  ;;  %v29047_v60 = vsel %vm2890_vm7, %v29045_v37, -inf }
0x3814   :  { %29048 = vmax.xlane.f32.xlu0 %v29047_v60 }
0x3824   :  { %29071 = vrot.lane.b32.xlu1 %v45363_v28, %s42394_s23 }
0x3828   :  { %29598 = vrot.lane.b32.xlu1 %v45355_v5, %s42395_s9 }
0x382c   :  { %29600 = vrot.lane.b32.xlu1 %v45349_v58, %s42395_s9 }
0x3830   :  { %29596 = vrot.lane.b32.xlu1 %v45339_v15, %s42395_s9 }
0x38a0   :  { %v29052_v8 = vpop.xlane.xlu1 %29051 }
0x38a1   :  { %v29054_v11 = vsub.f32 %v29046_v42, %v29052_v8  ;;  %v29049_v55 = vpop.xlane.xlu0 %29048 }
0x38a2   :  { %v29053_v47 = vsub.f32 %v29045_v37, %v29049_v55 }
0x38a3   :  { %v29057_v61 = vmul.f32 1.442695, %v29054_v11 }
0x38a4   :  { %v29055_v6 = vmul.f32 1.442695, %v29053_v47  ;;  %v29072_v15 = vpop.permute.xlu1 %29071 }
0x38a5   :  { %42078 = vpow2.f32 %v29057_v61  ;;  %v29080_v58 = vsel %vm317_vm1, %v29072_v15, 0 }
0x38a6   :  { %42080 = vpow2.f32 %v29055_v6  ;;  %v29086_v39 = vand.u32 4294901760, %v29080_v58 }
0x38a8   :  { %v29178_v21 = vsub.f32 %v29080_v58, %v29086_v39 }
0x38aa   :  { %v29179_v26 = vand.u32 4294901760, %v29178_v21 }
0x38ac   :  { %v29180_v48 = vsub.f32 %v29178_v21, %v29179_v26 }
0x38ae   :  { %v29181_v49 = vand.u32 4294901760, %v29180_v48 }
0x38af   :  { %v42079_v14 = vpop.eup %42078 }
0x38b0   :  { %v29062_v36 = vsel %vm2894_vm6, %v42079_v14, 0.0  ;;  %v42081_v1 = vpop.eup %42080 }
0x38b1   :  { %29063 = vadd.xlane.f32.xlu0 %v29062_v36  ;;  %v29059_v5 = vsel %vm2890_vm7, %v42081_v1, 0.0 }
0x38b5   :  { %29060 = vadd.xlane.f32.xlu0 %v29059_v5 }
0x38cb   :  { %29069 = vrot.lane.b32.xlu0 %v45367_v32, %s42394_s23 }
0x38cf   :  { %29594 = vrot.lane.b32.xlu0 %v45341_v43, %s42395_s9 }
0x393e   :  { %v29064_v34 = vpop.xlane.xlu0 %29063 }
0x393f   :  { %42082 = vrcp.f32 %v29064_v34 }
0x3942   :  { %v29061_v62 = vpop.xlane.xlu0 %29060 }
0x3943   :  { %42084 = vrcp.f32 %v29061_v62 }
0x3946   :  { %v29070_v2 = vpop.permute.xlu0 %29069 }
0x3947   :  { %v29083_v3 = vand.u32 4294901760, %v29070_v2 }
0x3949   :  { %v42083_v10 = vpop.eup %42082  ;;  %v45471_v35 = vpack.c.bf16 %v29086_v39, %v29083_v3  ;;  %v29171_v13 = vsub.f32 %v29070_v2, %v29083_v3 }
0x394a   :  { %v29068_v12 = vmul.f32 %v42083_v10, %v42079_v14  ;;  %v29599_v14 = vpop.permute.xlu1 %29598  ;;  %v29595_v5 = vpop.permute.xlu0 %29594 }
0x394b   :  { %v29172_v51 = vand.u32 4294901760, %v29171_v13  ;;  %40911 = vmatprep.subr.bf16.mxu0 %v45471_v35  ;;  %v40918_v6 = vpack.c.bf16 %v29178_v21, %v29171_v13  ;;  %v29606_v58 = vsel %vm2373_vm5, %v29599_v14, 0  ;;  %v29602_v34 = vsel %vm2373_vm5, %v29595_v5, 0 }
0x394c   :  { %40913 = vmatpush3.bf16.msra.mxu0 %v45471_v35  ;;  %v29078_v43 = vsel %vm2890_vm7, %v29068_v12, 0  ;;  %v29611_v62 = vand.u32 4294901760, %v29606_v58  ;;  %v29677_v21 = vand.u32 4294901760, %v29602_v34 }
0x394d   :  { %v42085_v63 = vpop.eup %42084  ;;  %v29173_v18 = vsub.f32 %v29171_v13, %v29172_v51  ;;  %v45476_v38 = vand.u32 4294901760, %v29078_v43 }
0x394e   :  { %v29067_v24 = vmul.f32 %v42085_v63, %v42081_v1  ;;  %v29601_v36 = vpop.permute.xlu1 %29600  ;;  %v40926_v1 = vpack.c.bf16 %v29179_v26, %v29172_v51  ;;  %v29699_v26 = vsub.f32 %v29606_v58, %v29611_v62  ;;  %v29678_v10 = vsub.f32 %v29602_v34, %v29677_v21 }
0x394f   :  { %v29174_v33 = vand.u32 4294901760, %v29173_v18  ;;  %v29160_v30 = vsub.f32 %v29078_v43, %v45476_v38  ;;  %v29608_v15 = vsel %vm2373_vm5, %v29601_v36, 0 }
0x3950   :  { %v29075_v44 = vsel %vm2890_vm7, %v29067_v24, 0  ;;  %v29614_v39 = vand.u32 4294901760, %v29608_v15  ;;  %v29700_v48 = vand.u32 4294901760, %v29699_v26  ;;  %v29679_v43 = vand.u32 4294901760, %v29678_v10 }
0x3951   :  { %v40914_v42 = vpack.c.bf16 %v29181_v49, %v29174_v33  ;;  %v29149_v37 = vand.u32 4294901760, %v29075_v44  ;;  %v29161_v29 = vand.u32 4294901760, %v29160_v30 }
0x3952   :  { %v29706_v2 = vsub.f32 %v29608_v15, %v29614_v39  ;;  %v29597_v3 = vpop.permute.xlu1 %29596  ;;  %v40934_v63 = vpack.c.bf16 %v29614_v39, %v29611_v62  ;;  %v29701_v24 = vsub.f32 %v29699_v26, %v29700_v48  ;;  %v29680_v49 = vsub.f32 %v29678_v10, %v29679_v43 }
0x3953   :  { %40915 = vmatprep.subr.bf16.mxu0 %v40914_v42  ;;  %v29150_v60 = vsub.f32 %v29075_v44, %v29149_v37  ;;  %v29162_v11 = vsub.f32 %v29160_v30, %v29161_v29  ;;  %v29604_v13 = vsel %vm2373_vm5, %v29597_v3, 0 }
0x3954   :  { %v29707_v12 = vand.u32 4294901760, %v29706_v2  ;;  %v29687_v51 = vand.u32 4294901760, %v29604_v13 }
0x3955   :  { %v29151_v8 = vand.u32 4294901760, %v29150_v60  ;;  %v29163_v61 = vand.u32 4294901760, %v29162_v11 }
0x3956   :  { %v29708_v18 = vsub.f32 %v29706_v2, %v29707_v12  ;;  %v29688_v33 = vsub.f32 %v29604_v13, %v29687_v51 }
0x3957   :  { %v29152_v55 = vsub.f32 %v29150_v60, %v29151_v8 }
0x3958   :  { %v29689_v44 = vand.u32 4294901760, %v29688_v33 }
0x3959   :  { %v29153_v47 = vand.u32 4294901760, %v29152_v55  ;;  %v40942_v55 = vpack.c.bf16 %v29706_v2, %v29699_v26 }
0x395b   :  { %38208 = vmatprep.mubr.f32.mxu0 %v29153_v47 }
0x395c   :  { %38209 = vmatmul.mubr.f32.vlgmr.msra.gmra.mrb[66].mxu0 %v29163_v61 }
0x395d   :  { %40917 = vmatpush3.bf16.msra.mxu0 %v40914_v42  ;;  %38215 = vmatprep.mubr.f32.mxu0 %v29149_v37  ;;  %v29681_v42 = vand.u32 4294901760, %v29680_v49 }
0x395e   :  { %40919 = vmatprep.subr.bf16.mxu0 %v40918_v6 }
0x3964   :  { %38216 = vmatmul.mubr.f32.vlgmr.msra.gmra.mrb[66].mxu0 %v45476_v38 }
0x3965   :  { %40921 = vmatpush3.bf16.msra.mxu0 %v40918_v6  ;;  %38222 = vmatprep.mubr.f32.mxu0 %v29150_v60 }
0x3966   :  { %40923 = vmatprep.subr.bf16.mxu0 %v45471_v35 }
0x396c   :  { %38223 = vmatmul.mubr.f32.vlgmr.msra.gmra.mrb[66].mxu0 %v29160_v30  ;;  %v29709_v30 = vand.u32 4294901760, %v29708_v18 }
0x396d   :  { %40925 = vmatpush3.bf16.msra.mxu0 %v45471_v35  ;;  %38229 = vmatprep.mubr.f32.mxu0 %v29151_v8  ;;  %v29690_v8 = vsub.f32 %v29688_v33, %v29689_v44 }
0x396e   :  { %40927 = vmatprep.subr.bf16.mxu0 %v40926_v1 }
0x396f   :  { %v29691_v11 = vand.u32 4294901760, %v29690_v8 }
0x3974   :  { %38230 = vmatmul.mubr.f32.vlgmr.msra.gmra.mrb[66].mxu0 %v29161_v29  ;;  %v29702_v29 = vand.u32 4294901760, %v29701_v24 }
0x3975   :  { %40929 = vmatpush3.bf16.msra.mxu0 %v40926_v1  ;;  %38236 = vmatprep.mubr.f32.mxu0 %v29149_v37 }
0x3976   :  { %40931 = vmatprep.subr.bf16.mxu0 %v45471_v35  ;;  %v40938_v60 = vpack.c.bf16 %v29709_v30, %v29702_v29 }
0x397c   :  { %38237 = vmatmul.mubr.f32.vlgmr.msra.gmra.mrb[66].mxu0 %v45476_v38 }
0x397d   :  { %40933 = vmatpush3.bf16.msra.mxu0 %v45471_v35  ;;  %38243 = vmatprep.mubr.f32.mxu0 %v29149_v37  ;;  %v40950_v35 = vpack.c.bf16 %v29707_v12, %v29700_v48 }
0x397e   :  { %40935 = vmatprep.subr.bf16.mxu0 %v40934_v63 }
0x3984   :  { %38244 = vmatmul.mubr.f32.vlgmr.msra.gmra.mrb[66].mxu0 %v45476_v38 }
0x3985   :  { %38250 = vmatprep.mubr.f32.mxu0 %v29681_v42 }
0x3986   :  { %40937 = vmatpush3.bf16.xpose.msra.mxu0 %v40934_v63 }
0x3987   :  { %40939 = vmatprep.subr.bf16.mxu0 %v40938_v60 }
0x398d   :  { %38251 = vmatmul.mubr.f32.vlgmr.msra.gmra.mrb[68].mxu0 %v29691_v11 }
0x398e   :  { %40941 = vmatpush3.bf16.xpose.msra.mxu0 %v40938_v60  ;;  %38257 = vmatprep.mubr.f32.mxu0 %v29677_v21 }
0x398f   :  { %40943 = vmatprep.subr.bf16.mxu0 %v40942_v55 }
0x3995   :  { %38258 = vmatmul.mubr.f32.vlgmr.msra.gmra.mrb[68].mxu0 %v29687_v51 }
0x3996   :  { %40945 = vmatpush3.bf16.xpose.msra.mxu0 %v40942_v55  ;;  %38264 = vmatprep.mubr.f32.mxu0 %v29678_v10 }
0x3997   :  { %40947 = vmatprep.subr.bf16.mxu0 %v40934_v63 }
0x399d   :  { %38265 = vmatmul.mubr.f32.vlgmr.msra.gmra.mrb[68].mxu0 %v29688_v33 }
0x399e   :  { %40949 = vmatpush3.bf16.xpose.msra.mxu0 %v40934_v63  ;;  %38271 = vmatprep.mubr.f32.mxu0 %v29679_v43 }
0x399f   :  { %40951 = vmatprep.subr.bf16.mxu0 %v40950_v35 }
0x39a5   :  { %38272 = vmatmul.mubr.f32.vlgmr.msra.gmra.mrb[68].mxu0 %v29689_v44 }
0x39a6   :  { %40953 = vmatpush3.bf16.xpose.msra.mxu0 %v40950_v35  ;;  %38278 = vmatprep.mubr.f32.mxu0 %v29677_v21 }
0x39a7   :  { %40955 = vmatprep.subr.bf16.mxu0 %v40934_v63 }
0x39ad   :  { %38279 = vmatmul.mubr.f32.vlgmr.msra.gmra.mrb[68].mxu0 %v29687_v51 }
0x39ae   :  { %40957 = vmatpush3.bf16.xpose.msra.mxu0 %v40934_v63  ;;  %38285 = vmatprep.mubr.f32.mxu0 %v29677_v21 }
0x39af   :  { %41031 = vmatprep.subr.bf16.mxu0 %v44183_v57 }
0x39b5   :  { %38286 = vmatmul.mubr.f32.vlgmr.msra.gmra.mrb[68].mxu0 %v29687_v51 }
0x39b6   :  { %41033 = vmatpush3.bf16.msra.mxu0 %v44183_v57 }
0x39b7   :  { %41035 = vmatprep.subr.bf16.mxu0 %v44185_v31 }
0x39ba   :  { %41037 = vmatpush3.bf16.msra.mxu0 %v44185_v31 }
0x39bb   :  { %41039 = vmatprep.subr.bf16.mxu0 %v44191_v16 }
0x3a57   :  { %v38245_v38 = vpop.f32.mrb[66].mxu0 }
0x3a58   :  { %v29574_v37 = vpop.f32.mrb[67].mxu0 }
0x3a88   :  { %v38287_v47 = vpop.f32.mrb[68].mxu0 }
0x3a89   :  { %v41355_v61 = vadd.f32 %v45386_v54, %v38287_v47  ;;  %v30102_v6 = vpop.f32.mrb[69].mxu0 }
0x3a8a   :  { %v41356_v14 = vadd.f32 %v45386_v54, %v30102_v6 }
0x3a8b   :  { %v30113_v36 = vmul.f32 0.17677669, %v41355_v61 }
0x3a8c   :  { %v30112_v1 = vmul.f32 0.17677669, %v41356_v14 }
0x3a8d   :  { %v30117_v5 = vsel %vm2894_vm6, %v30113_v36, -inf }
0x3a8e   :  { %30118 = vmax.xlane.f32.xlu1 %v30117_v5  ;;  %v30114_v15 = vsel %vm2890_vm7, %v30112_v1, -inf }
0x3a8f   :  { %30115 = vmax.xlane.f32.xlu0 %v30114_v15 }
0x3a9f   :  { %30138 = vrot.lane.b32.xlu1 %v45363_v28, %s42395_s9 }
0x3aa3   :  { %28519 = vrot.lane.b32.xlu1 %v45450_v25, %s42390_s30 }
0x3aa7   :  { %28521 = vrot.lane.b32.xlu1 %v45448_v41, %s42390_s30 }
0x3aab   :  { %29588 = vrot.lane.b32.xlu1 %v38245_v38, %s42380_s2 }
0x3b1b   :  { %v30119_v54 = vpop.xlane.xlu1 %30118 }
0x3b1c   :  { %v30121_v58 = vsub.f32 %v30113_v36, %v30119_v54  ;;  %v30116_v34 = vpop.xlane.xlu0 %30115 }
0x3b1d   :  { %v30120_v39 = vsub.f32 %v30112_v1, %v30116_v34 }
0x3b1e   :  { %v30124_v62 = vmul.f32 1.442695, %v30121_v58 }
0x3b1f   :  { %v30122_v21 = vmul.f32 1.442695, %v30120_v39  ;;  %v30139_v2 = vpop.permute.xlu1 %30138 }
0x3b20   :  { %42086 = vpow2.f32 %v30124_v62  ;;  %v30147_v12 = vsel %vm317_vm1, %v30139_v2, 0  ;;  %v46290_v2 = vld [vmem:[#allocation110_spill] sm:$0xff] }
0x3b21   :  { %42088 = vpow2.f32 %v30122_v21  ;;  %v30153_v51 = vand.u32 4294901760, %v30147_v12 }
0x3b23   :  { %v28520_v3 = vpop.permute.xlu1 %28519  ;;  %v30245_v63 = vsub.f32 %v30147_v12, %v30153_v51 }
0x3b24   :  { %28525 = vst.msk [vmem:[#allocation3] sm:$0xff] %vm4494_vm9, %v28520_v3  ;;  %v46291_v3 = vld [vmem:[#allocation111_spill] sm:$0xff] }
0x3b25   :  { %v30246_v24 = vand.u32 4294901760, %v30245_v63 }
0x3b27   :  { %v28522_v28 = vpop.permute.xlu1 %28521  ;;  %v30247_v60 = vsub.f32 %v30245_v63, %v30246_v24 }
0x3b28   :  { %28526 = vst.msk [vmem:[#allocation3 + $0x8] sm:$0xf] %vm4496_vm10, %v28522_v28  ;;  %v46292_v28 = vld [vmem:[#allocation112_spill] sm:$0xff] }
0x3b29   :  { %v30248_v47 = vand.u32 4294901760, %v30247_v60  ;;  %v46293_v60 = vld [vmem:[#allocation113_spill] sm:$0xff] }
0x3b2a   :  { %v42087_v25 = vpop.eup %42086 }
0x3b2b   :  { %v29589_v26 = vpop.permute.xlu1 %29588  ;;  %v30129_v41 = vsel %vm2894_vm6, %v42087_v25, 0.0  ;;  %v42089_v10 = vpop.eup %42088 }
0x3b2c   :  { %29593 = vst.msk [vmem:[#allocation3 + $0x8] sm:$0xf] %vm5565_vm11, %v29589_v26  ;;  %30130 = vadd.xlane.f32.xlu0 %v30129_v41  ;;  %v30126_v13 = vsel %vm2890_vm7, %v42089_v10, 0.0 }
0x3b30   :  { %30127 = vadd.xlane.f32.xlu0 %v30126_v13 }
0x3b46   :  { %30136 = vrot.lane.b32.xlu0 %v45367_v32, %s42395_s9 }
0x3b4a   :  { %29586 = vrot.lane.b32.xlu0 %v29574_v37, %s42380_s2  ;;  %s42398_s2 = smov [#allocation21]  }
0x3b4b   :  { %s32958_s30 = sshll.u32 %s42398_s2, 4  ;;  %s32959_s30 = int_to_ptr.vmem [resolvable:$true] %s32958_s30 }
0x3b4c   :  { %s42341_s9 = scalar_lea.vmem %s32959_s30, 128  ;;  %p42346_p11 = scmp.lt.s32.totalorder %s32959_s30, %s32959_s30 }
0x3b4d   :  { %p42342_p10 = scmp.ne.s32.totalorder %s32959_s30, %s42341_s9  ;;  %p42347_p12 = scmp.lt.s32.totalorder %s42341_s9, %s42341_s9 }
0x3b4f   :  { %p42348_p13 = por %p42347_p12, %p42346_p11 }
0x3b51   :  { %p42349_p0 = pnand %p42348_p13, %p42342_p10 }
0x3bb9   :  { %v30131_v48 = vpop.xlane.xlu0 %30130 }
0x3bba   :  { %42090 = vrcp.f32 %v30131_v48 }
0x3bbd   :  { %v30128_v43 = vpop.xlane.xlu0 %30127 }
0x3bbe   :  { %42092 = vrcp.f32 %v30128_v43 }
0x3bc1   :  { %v30137_v18 = vpop.permute.xlu0 %30136 }
0x3bc2   :  { %v30150_v33 = vand.u32 4294901760, %v30137_v18 }
0x3bc4   :  { %v42091_v49 = vpop.eup %42090  ;;  %v40958_v30 = vpack.c.bf16 %v30153_v51, %v30150_v33  ;;  %v30238_v44 = vsub.f32 %v30137_v18, %v30150_v33 }
0x3bc5   :  { %v30135_v42 = vmul.f32 %v42091_v49, %v42087_v25  ;;  %v29587_v29 = vpop.permute.xlu0 %29586 }
0x3bc6   :  { %v30239_v32 = vand.u32 4294901760, %v30238_v44  ;;  %29592 = vst.msk [vmem:[#allocation3] sm:$0xff] %vm5563_vm12, %v29587_v29  ;;  %40959 = vmatprep.subr.bf16.mxu1 %v40958_v30  ;;  %v40966_v62 = vpack.c.bf16 %v30245_v63, %v30238_v44 }
0x3bc7   :  { %40961 = vmatpush3.bf16.msra.mxu1 %v40958_v30  ;;  %v30145_v8 = vsel %vm2890_vm7, %v30135_v42, 0 }
0x3bc8   :  { %v42093_v11 = vpop.eup %42092  ;;  %v30240_v55 = vsub.f32 %v30238_v44, %v30239_v32  ;;  %v30226_v35 = vand.u32 4294901760, %v30145_v8  ;;  %v40974_v21 = vpack.c.bf16 %v30246_v24, %v30239_v32  ;;  %v46294_v32 = vld [vmem:[#allocation114_spill] sm:$0xff] }
0x3bc9   :  { %v30134_v38 = vmul.f32 %v42093_v11, %v42089_v10  ;;  %v46296_v11 = vld [vmem:[#allocation116_spill] sm:$0xff] }
0x3bca   :  { %v30241_v37 = vand.u32 4294901760, %v30240_v55  ;;  %v30227_v61 = vsub.f32 %v30145_v8, %v30226_v35  ;;  %v46295_v8 = vld [vmem:[#allocation115_spill] sm:$0xff]  ;;  %v46297_v55 = vld [vmem:[#allocation117_spill] sm:$0xff] }
0x3bcb   :  { %v30142_v6 = vsel %vm2890_vm7, %v30134_v38, 0  ;;  %v42113_v38 = vld [vmem:[#allocation9 + $0x1] ss:$0 sm:$0xff] }
0x3bcc   :  { %v40962_v14 = vpack.c.bf16 %v30248_v47, %v30241_v37  ;;  %v30216_v36 = vand.u32 4294901760, %v30142_v6  ;;  %v30228_v1 = vand.u32 4294901760, %v30227_v61 }
0x3bce   :  { %40963 = vmatprep.subr.bf16.mxu1 %v40962_v14  ;;  %v30217_v5 = vsub.f32 %v30142_v6, %v30216_v36  ;;  %v30229_v54 = vsub.f32 %v30227_v61, %v30228_v1 }
0x3bd0   :  { %v30218_v15 = vand.u32 4294901760, %v30217_v5  ;;  %v30230_v39 = vand.u32 4294901760, %v30229_v54 }
0x3bd2   :  { %v30219_v58 = vsub.f32 %v30217_v5, %v30218_v15 }
0x3bd4   :  { %v30220_v34 = vand.u32 4294901760, %v30219_v58 }
0x3bd6   :  { %38292 = vmatprep.mubr.f32.mxu1 %v30220_v34 }
0x3bd7   :  { %38293 = vmatmul.mubr.f32.vlgmr.msra.gmra.mrb[72].mxu1 %v30230_v39 }
0x3bd8   :  { %40965 = vmatpush3.bf16.msra.mxu1 %v40962_v14  ;;  %38299 = vmatprep.mubr.f32.mxu1 %v30216_v36 }
0x3bd9   :  { %40967 = vmatprep.subr.bf16.mxu1 %v40966_v62 }
0x3bdf   :  { %38300 = vmatmul.mubr.f32.vlgmr.msra.gmra.mrb[72].mxu1 %v30226_v35 }
0x3be0   :  { %40969 = vmatpush3.bf16.msra.mxu1 %v40966_v62  ;;  %38306 = vmatprep.mubr.f32.mxu1 %v30217_v5 }
0x3be1   :  { %40971 = vmatprep.subr.bf16.mxu1 %v40958_v30 }
0x3be7   :  { %38307 = vmatmul.mubr.f32.vlgmr.msra.gmra.mrb[72].mxu1 %v30227_v61 }
0x3be8   :  { %40973 = vmatpush3.bf16.msra.mxu1 %v40958_v30  ;;  %38313 = vmatprep.mubr.f32.mxu1 %v30218_v15 }
0x3be9   :  { %40975 = vmatprep.subr.bf16.mxu1 %v40974_v21 }
0x3bef   :  { %38314 = vmatmul.mubr.f32.vlgmr.msra.gmra.mrb[72].mxu1 %v30228_v1 }
0x3bf0   :  { %40977 = vmatpush3.bf16.msra.mxu1 %v40974_v21  ;;  %38320 = vmatprep.mubr.f32.mxu1 %v30216_v36 }
0x3bf1   :  { %40979 = vmatprep.subr.bf16.mxu1 %v40958_v30 }
0x3bf7   :  { %38321 = vmatmul.mubr.f32.vlgmr.msra.gmra.mrb[72].mxu1 %v30226_v35 }
0x3bf8   :  { %40981 = vmatpush3.bf16.msra.mxu1 %v40958_v30  ;;  %38327 = vmatprep.mubr.f32.mxu1 %v30216_v36 }
0x3bf9   :  { %40983 = vmatprep.subr.bf16.mxu1 %v46290_v2 }
0x3bff   :  { %38328 = vmatmul.mubr.f32.vlgmr.msra.gmra.mrb[72].mxu1 %v30226_v35 }
0x3c00   :  { %40985 = vmatpush3.bf16.msra.mxu1 %v46290_v2 }
0x3c01   :  { %40987 = vmatprep.subr.bf16.mxu1 %v46291_v3 }
0x3c04   :  { %40989 = vmatpush3.bf16.msra.mxu1 %v46291_v3 }
0x3c05   :  { %40991 = vmatprep.subr.bf16.mxu1 %v46292_v28 }
0x3cd2   :  { %v38329_v25 = vpop.f32.mrb[72].mxu1 }
0x3cd3   :  { %30655 = vrot.lane.b32.xlu1 %v38329_v25, %s42396_s0  ;;  %v30641_v26 = vpop.f32.mrb[73].mxu1 }
0x3cd4   :  { %30653 = vrot.lane.b32.xlu0 %v30641_v26, %s42396_s0 }
0x3d45   :  { %v30656_v41 = vpop.permute.xlu1 %30655 }
0x3d46   :  { %30660 = vst.msk [vmem:[#allocation3 + $0x8] sm:$0xf] %vm6634_vm13, %v30656_v41  ;;  %v30654_v10 = vpop.permute.xlu0 %30653 }
0x3d47   :  { %30659 = vst.msk [vmem:[#allocation3] sm:$0xff] %vm6632_vm14, %v30654_v10 }
0x3d4d   :  { %v30662_v13 = vld [vmem:[#allocation3 + $0x8] sm:$0xf] }
0x3d4e   :  { %v30661_v12 = vld [vmem:[#allocation3] sm:$0xff]  ;;  %v30667_v48 = vsel %vm772_vm4, %v30662_v13, 0 }
0x3d4f   :  { %v30664_v51 = vsel %vm772_vm4, %v30661_v12, 0  ;;  %v30748_v43 = vand.u32 4294901760, %v30667_v48 }
0x3d50   :  { %v30738_v63 = vand.u32 4294901760, %v30664_v51 }
0x3d51   :  { %v30749_v18 = vsub.f32 %v30667_v48, %v30748_v43 }
0x3d52   :  { %v30739_v24 = vsub.f32 %v30664_v51, %v30738_v63  ;;  %v42114_v51 = vld [vmem:[#allocation10 + $0x1] ss:$0 sm:$0xff] }
0x3d53   :  { %v30750_v33 = vand.u32 4294901760, %v30749_v18 }
0x3d54   :  { %v30740_v49 = vand.u32 4294901760, %v30739_v24 }
0x3d55   :  { %v30751_v30 = vsub.f32 %v30749_v18, %v30750_v33 }
0x3d56   :  { %v30741_v44 = vsub.f32 %v30739_v24, %v30740_v49 }
0x3d57   :  { %v30752_v29 = vand.u32 4294901760, %v30751_v30 }
0x3d58   :  { %v30742_v42 = vand.u32 4294901760, %v30741_v44 }
0x3d5a   :  { %38338 = vmatprep.mubr.f32.mxu1 %v30742_v42 }
0x3d5b   :  { %38339 = vmatmul.mubr.f32.vlgmr.msra.gmra.mrb[74].mxu1 %v30752_v29 }
0x3d5c   :  { %40993 = vmatpush3.bf16.msra.mxu1 %v46292_v28  ;;  %38349 = vmatprep.mubr.f32.mxu1 %v30738_v63 }
0x3d5d   :  { %40995 = vmatprep.subr.bf16.mxu1 %v46293_v60 }
0x3d60   :  { %40997 = vmatpush3.bf16.msra.mxu1 %v46293_v60 }
0x3d61   :  { %40999 = vmatprep.subr.bf16.mxu1 %v46294_v32 }
0x3d63   :  { %38350 = vmatmul.mubr.f32.vlgmr.msra.gmra.mrb[74].mxu1 %v30748_v43 }
0x3d64   :  { %41001 = vmatpush3.bf16.msra.mxu1 %v46294_v32  ;;  %38360 = vmatprep.mubr.f32.mxu1 %v30739_v24  ;;  %v42115_v24 = vld [vmem:[#allocation12 + $0x1] ss:$0 sm:$0xff] }
0x3d65   :  { %41003 = vmatprep.subr.bf16.mxu1 %v46295_v8 }
0x3d68   :  { %41005 = vmatpush3.bf16.msra.mxu1 %v46295_v8 }
0x3d69   :  { %41007 = vmatprep.subr.bf16.mxu1 %v46290_v2 }
0x3d6b   :  { %38361 = vmatmul.mubr.f32.vlgmr.msra.gmra.mrb[74].mxu1 %v30749_v18 }
0x3d6c   :  { %41009 = vmatpush3.bf16.msra.mxu1 %v46290_v2  ;;  %38371 = vmatprep.mubr.f32.mxu1 %v30740_v49 }
0x3d6d   :  { %41011 = vmatprep.subr.bf16.mxu1 %v46291_v3 }
0x3d70   :  { %41013 = vmatpush3.bf16.msra.mxu1 %v46291_v3 }
0x3d71   :  { %41015 = vmatprep.subr.bf16.mxu1 %v46296_v11 }
0x3d73   :  { %38372 = vmatmul.mubr.f32.vlgmr.msra.gmra.mrb[74].mxu1 %v30750_v33 }
0x3d74   :  { %41017 = vmatpush3.bf16.msra.mxu1 %v46296_v11  ;;  %38382 = vmatprep.mubr.f32.mxu1 %v30738_v63 }
0x3d75   :  { %41019 = vmatprep.subr.bf16.mxu1 %v46297_v55 }
0x3d78   :  { %41021 = vmatpush3.bf16.msra.mxu1 %v46297_v55 }
0x3d79   :  { %41023 = vmatprep.subr.bf16.mxu1 %v46290_v2 }
0x3d7b   :  { %38383 = vmatmul.mubr.f32.vlgmr.msra.gmra.mrb[74].mxu1 %v30748_v43 }
0x3d7c   :  { %41025 = vmatpush3.bf16.msra.mxu1 %v46290_v2  ;;  %38393 = vmatprep.mubr.f32.mxu1 %v30738_v63 }
0x3d7d   :  { %41027 = vmatprep.subr.bf16.mxu1 %v46291_v3 }
0x3d80   :  { %41029 = vmatpush3.bf16.msra.mxu1 %v46291_v3 }
0x3d81   :  { %41079 = vmatprep.subr.bf16.mxu1 %v44216_v7 }
0x3d83   :  { %38394 = vmatmul.mubr.f32.vlgmr.msra.gmra.mrb[74].mxu1 %v30748_v43 }
0x3d84   :  { %41081 = vmatpush3.bf16.msra.mxu1 %v44216_v7 }
0x3d85   :  { %41083 = vmatprep.subr.bf16.mxu1 %v44222_v53 }
0x3d88   :  { %41085 = vmatpush3.bf16.msra.mxu1 %v44222_v53 }
0x3d89   :  { %41087 = vmatprep.subr.bf16.mxu1 %v44237_v0 }
0x3d8c   :  { %41089 = vmatpush3.bf16.msra.mxu1 %v44237_v0 }
0x3d8d   :  { %41091 = vmatprep.subr.bf16.mxu1 %v44253_v23 }
0x3d90   :  { %41093 = vmatpush3.bf16.msra.mxu1 %v44253_v23 }
0x3d91   :  { %41095 = vmatprep.subr.bf16.mxu1 %v44265_v56 }
0x3d94   :  { %41097 = vmatpush3.bf16.msra.mxu1 %v44265_v56 }
0x3d95   :  { %41099 = vmatprep.subr.bf16.mxu1 %v44281_v20 }
0x3d98   :  { %41101 = vmatpush3.bf16.msra.mxu1 %v44281_v20 }
0x3d99   :  { %41103 = vmatprep.subr.bf16.mxu1 %v44436_v40 }
0x3d9c   :  { %41105 = vmatpush3.bf16.msra.mxu1 %v44436_v40 }
0x3d9d   :  { %41107 = vmatprep.subr.bf16.mxu1 %v44441_v59 }
0x3da0   :  { %41109 = vmatpush3.bf16.msra.mxu1 %v44441_v59 }
0x3da1   :  { %41143 = vmatprep.subr.bf16.mxu1 %v44447_v9 }
0x3e56   :  { %v38395_v35 = vpop.f32.mrb[74].mxu1 }
0x3e57   :  { %v41357_v37 = vadd.f32 %v42113_v38, %v38395_v35  ;;  %v31187_v47 = vpop.f32.mrb[75].mxu1 }
0x3e58   :  { %v41358_v61 = vadd.f32 %v42113_v38, %v31187_v47 }
0x3e59   :  { %v31198_v6 = vadd.f32 %v41357_v37, %v45204_v22 }
0x3e5a   :  { %v31197_v14 = vadd.f32 %v41358_v61, %v45206_v27  ;;  %v46298_v61 = vld [vmem:[#allocation118_spill] sm:$0xff] }
0x3e5b   :  { %v33037_v36 = vclamps-f32 %v31198_v6, 1000000.0  ;;  %v46299_v6 = vld [vmem:[#allocation119_spill] sm:$0xff] }
0x3e5c   :  { %v33036_v1 = vclamps-f32 %v31197_v14, 1000000.0  ;;  %v46300_v14 = vld [vmem:[#allocation120_spill] sm:$0xff] }
0x3e5d   :  { %v31206_v5 = vsel %vm768_vm3, %v33037_v36, 0.0 }
0x3e5e   :  { %31207 = vadd.xlane.f32.xlu1 %v31206_v5  ;;  %v31203_v15 = vsel %vm772_vm4, %v33036_v1, 0.0  ;;  %v46304_v5 = vld [vmem:[#allocation124_spill] sm:$0xff] }
0x3e5f   :  { %31204 = vadd.xlane.f32.xlu0 %v31203_v15  ;;  %v46305_v15 = vld [vmem:[#allocation125_spill] sm:$0xff] }
0x3eeb   :  { %v31208_v54 = vpop.xlane.xlu1 %31207 }
0x3eec   :  { %v31210_v58 = vmul.f32 0.03125, %v31208_v54  ;;  %v31205_v34 = vpop.xlane.xlu0 %31204  ;;  %v46306_v54 = vld [vmem:[#allocation126_spill] sm:$0xff] }
0x3eed   :  { %v31209_v39 = vmul.f32 0.03125, %v31205_v34  ;;  %v46310_v34 = vld [vmem:[#allocation130_spill] sm:$0xff] }
0x3eee   :  { %v31212_v62 = vsub.f32 %v33037_v36, %v31210_v58  ;;  %v46302_v36 = vld [vmem:[#allocation122_spill] sm:$0xff]  ;;  %v46309_v58 = vld [vmem:[#allocation129_spill] sm:$0xff] }
0x3eef   :  { %v31211_v21 = vsub.f32 %v33036_v1, %v31209_v39  ;;  %v46303_v1 = vld [vmem:[#allocation123_spill] sm:$0xff] }
0x3ef0   :  { %v31214_v22 = vmul.f32 %v31212_v62, %v31212_v62 }
0x3ef1   :  { %v31213_v2 = vmul.f32 %v31211_v21, %v31211_v21 }
0x3ef2   :  { %v31218_v27 = vsel %vm768_vm3, %v31214_v22, 0.0 }
0x3ef3   :  { %v31215_v3 = vsel %vm772_vm4, %v31213_v2, 0.0 }
0x3ef4   :  { %31216 = vadd.xlane.f32.xlu0 %v31215_v3 }
0x3ef8   :  { %31219 = vadd.xlane.f32.xlu0 %v31218_v27 }
0x3f81   :  { %v31217_v28 = vpop.xlane.xlu0 %31216 }
0x3f82   :  { %v31221_v25 = vmul.f32 0.03125, %v31217_v28 }
0x3f84   :  { %v31223_v26 = vadd.f32 1e-06, %v31221_v25 }
0x3f85   :  { %v31220_v41 = vpop.xlane.xlu0 %31219 }
0x3f86   :  { %42094 = vrsqrt.f32 %v31223_v26  ;;  %v31222_v10 = vmul.f32 0.03125, %v31220_v41 }
0x3f88   :  { %v31224_v13 = vadd.f32 1e-06, %v31222_v10 }
0x3f8a   :  { %42096 = vrsqrt.f32 %v31224_v13 }
0x3f90   :  { %v42095_v12 = vpop.eup %42094 }
0x3f91   :  { %v31227_v48 = vmul.f32 %v42095_v12, %v31211_v21 }
0x3f93   :  { %v31229_v43 = vmul.f32 %v42114_v51, %v31227_v48 }
0x3f94   :  { %v42097_v63 = vpop.eup %42096 }
0x3f95   :  { %v31228_v18 = vmul.f32 %v42097_v63, %v31212_v62  ;;  %v45572_v33 = vadd.f32 %v42115_v24, %v31229_v43  ;;  %v42116_v62 = vld [vmem:[#allocation16 + $0x1] ss:$0 sm:$0xff] }
0x3f97   :  { %v31230_v49 = vmul.f32 %v42114_v51, %v31228_v18  ;;  %v31234_v30 = vsel %vm772_vm4, %v45572_v33, 0 }
0x3f98   :  { %v31308_v44 = vand.u32 4294901760, %v31234_v30 }
0x3f99   :  { %v31232_v42 = vadd.f32 %v42115_v24, %v31230_v49  ;;  %v42117_v24 = vld [vmem:[#allocation18 + $0x1] ss:$0 sm:$0xff] }
0x3f9a   :  { %v31309_v29 = vsub.f32 %v31234_v30, %v31308_v44 }
0x3f9b   :  { %v31237_v60 = vsel %vm772_vm4, %v31232_v42, 0 }
0x3f9c   :  { %v31310_v32 = vand.u32 4294901760, %v31309_v29  ;;  %v31318_v8 = vand.u32 4294901760, %v31237_v60 }
0x3f9e   :  { %v31311_v11 = vsub.f32 %v31309_v29, %v31310_v32  ;;  %v31319_v55 = vsub.f32 %v31237_v60, %v31318_v8 }
0x3fa0   :  { %v31312_v35 = vand.u32 4294901760, %v31311_v11  ;;  %v31320_v38 = vand.u32 4294901760, %v31319_v55 }
0x3fa2   :  { %38404 = vmatprep.mubr.f32.mxu0 %v31312_v35  ;;  %v31321_v37 = vsub.f32 %v31319_v55, %v31320_v38 }
0x3fa4   :  { %v31322_v47 = vand.u32 4294901760, %v31321_v37 }
0x3fa6   :  { %38405 = vmatmul.mubr.f32.vlgmr.msra.gmra.mrb[70].mxu0 %v31322_v47 }
0x3fa7   :  { %41041 = vmatpush3.bf16.msra.mxu0 %v44191_v16  ;;  %38415 = vmatprep.mubr.f32.mxu0 %v31308_v44  ;;  %v46301_v16 = vld [vmem:[#allocation121_spill] sm:$0xff] }
0x3fa8   :  { %41043 = vmatprep.subr.bf16.mxu0 %v46298_v61 }
0x3fab   :  { %41045 = vmatpush3.bf16.msra.mxu0 %v46298_v61 }
0x3fac   :  { %41047 = vmatprep.subr.bf16.mxu0 %v46299_v6 }
0x3fae   :  { %38416 = vmatmul.mubr.f32.vlgmr.msra.gmra.mrb[70].mxu0 %v31318_v8 }
0x3faf   :  { %41049 = vmatpush3.bf16.msra.mxu0 %v46299_v6  ;;  %38426 = vmatprep.mubr.f32.mxu0 %v31309_v29 }
0x3fb0   :  { %41051 = vmatprep.subr.bf16.mxu0 %v46300_v14 }
0x3fb3   :  { %41053 = vmatpush3.bf16.msra.mxu0 %v46300_v14 }
0x3fb4   :  { %41055 = vmatprep.subr.bf16.mxu0 %v44183_v57 }
0x3fb6   :  { %38427 = vmatmul.mubr.f32.vlgmr.msra.gmra.mrb[70].mxu0 %v31319_v55 }
0x3fb7   :  { %41057 = vmatpush3.bf16.msra.mxu0 %v44183_v57  ;;  %38437 = vmatprep.mubr.f32.mxu0 %v31310_v32 }
0x3fb8   :  { %41059 = vmatprep.subr.bf16.mxu0 %v44185_v31 }
0x3fbb   :  { %41061 = vmatpush3.bf16.msra.mxu0 %v44185_v31 }
0x3fbc   :  { %41063 = vmatprep.subr.bf16.mxu0 %v46301_v16 }
0x3fbe   :  { %38438 = vmatmul.mubr.f32.vlgmr.msra.gmra.mrb[70].mxu0 %v31320_v38 }
0x3fbf   :  { %41065 = vmatpush3.bf16.msra.mxu0 %v46301_v16  ;;  %38448 = vmatprep.mubr.f32.mxu0 %v31308_v44 }
0x3fc0   :  { %41067 = vmatprep.subr.bf16.mxu0 %v46302_v36 }
0x3fc3   :  { %41069 = vmatpush3.bf16.msra.mxu0 %v46302_v36 }
0x3fc4   :  { %41071 = vmatprep.subr.bf16.mxu0 %v44183_v57 }
0x3fc6   :  { %38449 = vmatmul.mubr.f32.vlgmr.msra.gmra.mrb[70].mxu0 %v31318_v8 }
0x3fc7   :  { %41073 = vmatpush3.bf16.msra.mxu0 %v44183_v57  ;;  %38459 = vmatprep.mubr.f32.mxu0 %v31308_v44  ;;  %v46307_v57 = vld [vmem:[#allocation127_spill] sm:$0xff] }
0x3fc8   :  { %41075 = vmatprep.subr.bf16.mxu0 %v44185_v31 }
0x3fcb   :  { %41077 = vmatpush3.bf16.msra.mxu0 %v44185_v31  ;;  %v46308_v31 = vld [vmem:[#allocation128_spill] sm:$0xff] }
0x3fcc   :  { %41111 = vmatprep.subr.bf16.mxu0 %v46303_v1 }
0x3fce   :  { %38460 = vmatmul.mubr.f32.vlgmr.msra.gmra.mrb[70].mxu0 %v31318_v8 }
0x3fcf   :  { %41113 = vmatpush3.bf16.msra.mxu0 %v46303_v1 }
0x3fd0   :  { %41115 = vmatprep.subr.bf16.mxu0 %v46304_v5 }
0x3fd3   :  { %41117 = vmatpush3.bf16.msra.mxu0 %v46304_v5 }
0x3fd4   :  { %41119 = vmatprep.subr.bf16.mxu0 %v46305_v15 }
0x3fd7   :  { %41121 = vmatpush3.bf16.msra.mxu0 %v46305_v15 }
0x3fd8   :  { %41123 = vmatprep.subr.bf16.mxu0 %v46306_v54 }
0x3fdb   :  { %41125 = vmatpush3.bf16.msra.mxu0 %v46306_v54 }
0x3fdc   :  { %41127 = vmatprep.subr.bf16.mxu0 %v46307_v57 }
0x3fdf   :  { %41129 = vmatpush3.bf16.msra.mxu0 %v46307_v57 }
0x3fe0   :  { %41131 = vmatprep.subr.bf16.mxu0 %v46308_v31 }
0x3fe3   :  { %41133 = vmatpush3.bf16.msra.mxu0 %v46308_v31 }
0x3fe4   :  { %41135 = vmatprep.subr.bf16.mxu0 %v46309_v58 }
0x3fe7   :  { %41137 = vmatpush3.bf16.msra.mxu0 %v46309_v58 }
0x3fe8   :  { %41139 = vmatprep.subr.bf16.mxu0 %v46310_v34 }
0x3feb   :  { %41141 = vmatpush3.bf16.msra.mxu0 %v46310_v34  ;;  %v42118_v34 = vld [vmem:[#allocation13 + $0x1] ss:$0 sm:$0xff] }
0x3fec   :  { %41175 = vmatprep.subr.bf16.mxu0 %v44216_v7 }
0x40a1   :  { %v38461_v39 = vpop.f32.mrb[70].mxu0 }
0x40a2   :  { %v41359_v21 = vadd.f32 %v42116_v62, %v38461_v39  ;;  %v31757_v2 = vpop.f32.mrb[71].mxu0 }
0x40a3   :  { %v41360_v3 = vadd.f32 %v42116_v62, %v31757_v2  ;;  %v42119_v62 = vld [vmem:[#allocation15 + $0x1] ss:$0 sm:$0xff] }
0x40a4   :  { %v31768_v22 = vmax.f32 %v41359_v21, 0.0 }
0x40a5   :  { %v31767_v27 = vmax.f32 %v41360_v3, 0.0 }
0x40a6   :  { %v45613_v28 = vand.u32 4294901760, %v31768_v22 }
0x40a7   :  { %v31850_v25 = vand.u32 4294901760, %v31767_v27 }
0x40a8   :  { %v31861_v26 = vsub.f32 %v31768_v22, %v45613_v28 }
0x40a9   :  { %v31851_v41 = vsub.f32 %v31767_v27, %v31850_v25  ;;  %38529 = vmatprep.mubr.f32.mxu0 %v31850_v25 }
0x40aa   :  { %v31862_v10 = vand.u32 4294901760, %v31861_v26  ;;  %38530 = vmatmul.mubr.f32.vlgmr.msra.gmra.mrb[72].mxu0 %v45613_v28 }
0x40ab   :  { %41177 = vmatpush3.bf16.msra.mxu0 %v44216_v7  ;;  %v31852_v13 = vand.u32 4294901760, %v31851_v41 }
0x40ac   :  { %v31863_v12 = vsub.f32 %v31861_v26, %v31862_v10  ;;  %41179 = vmatprep.subr.bf16.mxu0 %v44222_v53 }
0x40ad   :  { %38599 = vmatprep.mubr.f32.mxu0 %v31852_v13  ;;  %v31853_v48 = vsub.f32 %v31851_v41, %v31852_v13  ;;  %v46327_v13 = vld [vmem:[#allocation42_spill] sm:$0xff] }
0x40ae   :  { %v31864_v43 = vand.u32 4294901760, %v31863_v12  ;;  %v46328_v12 = vld [vmem:[#allocation43_spill] sm:$0xff] }
0x40af   :  { %41181 = vmatpush3.bf16.msra.mxu0 %v44222_v53  ;;  %v31854_v51 = vand.u32 4294901760, %v31853_v48 }
0x40b0   :  { %41183 = vmatprep.subr.bf16.mxu0 %v44237_v0 }
0x40b1   :  { %38494 = vmatprep.mubr.f32.mxu1 %v31854_v51  ;;  %v42120_v51 = vld [vmem:[%s45755_s19] ss:$0 sm:$0xff] }
0x40b2   :  { %38495 = vmatmul.mubr.f32.vlgmr.msra.gmra.mrb[76].mxu1 %v31864_v43 }
0x40b3   :  { %41145 = vmatpush3.bf16.msra.mxu1 %v44447_v9  ;;  %41185 = vmatpush3.bf16.msra.mxu0 %v44237_v0  ;;  %v46311_v9 = vld [vmem:[#allocation131_spill] sm:$0xff] }
0x40b4   :  { %38564 = vmatprep.mubr.f32.mxu1 %v31851_v41  ;;  %41147 = vmatprep.subr.bf16.mxu1 %v44468_v19  ;;  %v46325_v41 = vld [vmem:[#allocation40_spill] sm:$0xff] }
0x40b5   :  { %41187 = vmatprep.subr.bf16.mxu0 %v44253_v23 }
0x40b7   :  { %41149 = vmatpush3.bf16.msra.mxu1 %v44468_v19  ;;  %41189 = vmatpush3.bf16.msra.mxu0 %v44253_v23  ;;  %v46312_v19 = vld [vmem:[#allocation132_spill] sm:$0xff] }
0x40b8   :  { %41151 = vmatprep.subr.bf16.mxu1 %v44475_v17  ;;  %41191 = vmatprep.subr.bf16.mxu0 %v44265_v56 }
0x40bb   :  { %41153 = vmatpush3.bf16.msra.mxu1 %v44475_v17  ;;  %41193 = vmatpush3.bf16.msra.mxu0 %v44265_v56  ;;  %v46313_v17 = vld [vmem:[#allocation133_spill] sm:$0xff] }
0x40bc   :  { %41155 = vmatprep.subr.bf16.mxu1 %v44484_v4  ;;  %41195 = vmatprep.subr.bf16.mxu0 %v44281_v20 }
0x40bf   :  { %41157 = vmatpush3.bf16.msra.mxu1 %v44484_v4  ;;  %41197 = vmatpush3.bf16.msra.mxu0 %v44281_v20  ;;  %v46315_v4 = vld [vmem:[#allocation135_spill] sm:$0xff] }
0x40c0   :  { %41159 = vmatprep.subr.bf16.mxu1 %v44492_v50  ;;  %41199 = vmatprep.subr.bf16.mxu0 %v44436_v40 }
0x40c3   :  { %41161 = vmatpush3.bf16.msra.mxu1 %v44492_v50  ;;  %41201 = vmatpush3.bf16.msra.mxu0 %v44436_v40 }
0x40c4   :  { %41163 = vmatprep.subr.bf16.mxu1 %v44500_v45  ;;  %41203 = vmatprep.subr.bf16.mxu0 %v44441_v59 }
0x40c7   :  { %41165 = vmatpush3.bf16.msra.mxu1 %v44500_v45  ;;  %41205 = vmatpush3.bf16.msra.mxu0 %v44441_v59 }
0x40c8   :  { %41167 = vmatprep.subr.bf16.mxu1 %v46311_v9  ;;  %41239 = vmatprep.subr.bf16.mxu0 %v44216_v7 }
0x40ca   :  { %38600 = vmatmul.mubr.f32.vlgmr.msra.gmra.mrb[74].mxu0 %v31862_v10  ;;  %v46326_v10 = vld [vmem:[#allocation41_spill] sm:$0xff] }
0x40cb   :  { %41169 = vmatpush3.bf16.msra.mxu1 %v46311_v9  ;;  %41241 = vmatpush3.bf16.msra.mxu0 %v44216_v7  ;;  %v46314_v7 = vld [vmem:[#allocation134_spill] sm:$0xff] }
0x40cc   :  { %38669 = vmatprep.mubr.f32.mxu0 %v31850_v25  ;;  %41171 = vmatprep.subr.bf16.mxu1 %v46312_v19 }
0x40cd   :  { %41243 = vmatprep.subr.bf16.mxu0 %v44222_v53 }
0x40cf   :  { %41173 = vmatpush3.bf16.msra.mxu1 %v46312_v19  ;;  %41245 = vmatpush3.bf16.msra.mxu0 %v44222_v53  ;;  %v46316_v53 = vld [vmem:[#allocation136_spill] sm:$0xff] }
0x40d0   :  { %41207 = vmatprep.subr.bf16.mxu1 %v46313_v17  ;;  %41247 = vmatprep.subr.bf16.mxu0 %v44237_v0 }
0x40d2   :  { %38565 = vmatmul.mubr.f32.vlgmr.msra.gmra.mrb[78].mxu1 %v31861_v26  ;;  %v46324_v26 = vld [vmem:[#allocation39_spill] sm:$0xff] }
0x40d3   :  { %41209 = vmatpush3.bf16.msra.mxu1 %v46313_v17  ;;  %38634 = vmatprep.mubr.f32.mxu1 %v31850_v25  ;;  %v46323_v25 = vld [vmem:[#allocation37_spill] sm:$0xff] }
0x40d4   :  { %41249 = vmatpush3.bf16.msra.mxu0 %v44237_v0  ;;  %41211 = vmatprep.subr.bf16.mxu1 %v46314_v7  ;;  %v46317_v0 = vld [vmem:[#allocation137_spill] sm:$0xff] }
0x40d5   :  { %41251 = vmatprep.subr.bf16.mxu0 %v44253_v23 }
0x40d7   :  { %41213 = vmatpush3.bf16.msra.mxu1 %v46314_v7 }
0x40d8   :  { %41253 = vmatpush3.bf16.msra.mxu0 %v44253_v23  ;;  %41215 = vmatprep.subr.bf16.mxu1 %v46315_v4  ;;  %v46318_v23 = vld [vmem:[#allocation138_spill] sm:$0xff] }
0x40d9   :  { %41255 = vmatprep.subr.bf16.mxu0 %v44265_v56 }
0x40db   :  { %41217 = vmatpush3.bf16.msra.mxu1 %v46315_v4 }
0x40dc   :  { %41257 = vmatpush3.bf16.msra.mxu0 %v44265_v56  ;;  %41219 = vmatprep.subr.bf16.mxu1 %v46316_v53  ;;  %v46319_v56 = vld [vmem:[#allocation139_spill] sm:$0xff] }
0x40dd   :  { %41259 = vmatprep.subr.bf16.mxu0 %v44281_v20 }
0x40df   :  { %41221 = vmatpush3.bf16.msra.mxu1 %v46316_v53 }
0x40e0   :  { %41261 = vmatpush3.bf16.msra.mxu0 %v44281_v20  ;;  %41223 = vmatprep.subr.bf16.mxu1 %v46317_v0  ;;  %v46320_v20 = vld [vmem:[#allocation140_spill] sm:$0xff] }
0x40e1   :  { %41263 = vmatprep.subr.bf16.mxu0 %v44436_v40 }
0x40e3   :  { %41225 = vmatpush3.bf16.msra.mxu1 %v46317_v0 }
0x40e4   :  { %41265 = vmatpush3.bf16.msra.mxu0 %v44436_v40  ;;  %41227 = vmatprep.subr.bf16.mxu1 %v46318_v23  ;;  %v46321_v40 = vmov 0.0  }
0x40e5   :  { %41267 = vmatprep.subr.bf16.mxu0 %v44441_v59 }
0x40e7   :  { %41229 = vmatpush3.bf16.msra.mxu1 %v46318_v23 }
0x40e8   :  { %41269 = vmatpush3.bf16.msra.mxu0 %v44441_v59  ;;  %41231 = vmatprep.subr.bf16.mxu1 %v46319_v56  ;;  %v46322_v59 = vld [vmem:[#allocation35_spill] sm:$0xff] }
0x40eb   :  { %38670 = vmatmul.mubr.f32.vlgmr.msra.gmra.mrb[76].mxu0 %v45613_v28  ;;  %41233 = vmatpush3.bf16.msra.mxu1 %v46319_v56 }
0x40ec   :  { %41235 = vmatprep.subr.bf16.mxu1 %v46320_v20 }
0x40ef   :  { %41237 = vmatpush3.bf16.msra.mxu1 %v46320_v20 }
0x40f0   :  { %41270 = vmatprep.subr.bf16.mxu1 %v46211_v52 }
0x40f2   :  { %38635 = vmatmul.mubr.f32.vlgmr.msra.gmra.mrb[80].mxu1 %v45613_v28 }
0x40f3   :  { %41272 = vmatpush3.bf16.msra.mxu1 %v44710_v46  ;;  %38680 = vmatprep.mubr.msk.f32.mxu1 %vm42392_vm0, %v46321_v40 }
0x40f4   :  { %41273 = vmatprep.subr.bf16.mxu1 %v46211_v52 }
0x40f7   :  { %41275 = vmatpush3.bf16.msra.mxu1 %v46322_v59 }
0x40f8   :  { %41276 = vmatprep.subr.bf16.mxu1 %v46211_v52 }
0x417d   :  { %v38531_v50 = vpop.f32.mrb[72].mxu0 }
0x417e   :  { %v32016_v45 = vpop.f32.mrb[73].mxu0 }
0x4185   :  { %v38496_v63 = vpop.f32.mrb[76].mxu1 }
0x4186   :  { %v31856_v18 = vpop.f32.mrb[77].mxu1 }
0x4187   :  { %v31857_v49 = vadd.f32 %v42117_v24, %v31856_v18 }
0x4189   :  { %v32017_v30 = vadd.f32 %v32016_v45, %v31857_v49 }
0x419d   :  { %v38601_v44 = vpop.f32.mrb[74].mxu0 }
0x419e   :  { %v32220_v42 = vpop.f32.mrb[75].mxu0 }
0x41a5   :  { %v38566_v29 = vpop.f32.mrb[78].mxu1 }
0x41a6   :  { %v32125_v60 = vpop.f32.mrb[79].mxu1 }
0x41a7   :  { %v32126_v32 = vadd.f32 %v32125_v60, %v32017_v30 }
0x41a9   :  { %v32221_v8 = vadd.f32 %v32220_v42, %v32126_v32 }
0x41be   :  { %v38671_v11 = vpop.f32.mrb[76].mxu0 }
0x41bf   :  { %v32438_v55 = vpop.f32.mrb[77].mxu0 }
0x41c5   :  { %v38636_v35 = vpop.f32.mrb[80].mxu1 }
0x41c6   :  { %v32346_v38 = vpop.f32.mrb[81].mxu1 }
0x41c7   :  { %v32347_v37 = vadd.f32 %v32346_v38, %v32221_v8 }
0x41c9   :  { %v32439_v47 = vadd.f32 %v32438_v55, %v32347_v37 }
0x41cb   :  { %v32447_v61 = vadd.f32 %v32439_v47, %v45572_v33 }
0x41cd   :  { %v32448_v6 = vsel %vm772_vm4, %v32447_v61, 0.0 }
0x41ce   :  { %32449 = vadd.xlane.f32.xlu1 %v32448_v6 }
0x425b   :  { %v32450_v14 = vpop.xlane.xlu1 %32449 }
0x425c   :  { %v32451_v16 = vmul.f32 0.03125, %v32450_v14 }
0x425e   :  { %v32452_v36 = vsub.f32 %v32447_v61, %v32451_v16 }
0x4260   :  { %v32453_v1 = vmul.f32 %v32452_v36, %v32452_v36 }
0x4262   :  { %v32454_v5 = vsel %vm772_vm4, %v32453_v1, 0.0 }
0x4263   :  { %32455 = vadd.xlane.f32.xlu0 %v32454_v5 }
0x42f0   :  { %v32456_v15 = vpop.xlane.xlu0 %32455 }
0x42f1   :  { %v32457_v54 = vmul.f32 0.03125, %v32456_v15 }
0x42f3   :  { %v32458_v57 = vadd.f32 1e-06, %v32457_v54 }
0x42f5   :  { %42098 = vrsqrt.f32 %v32458_v57 }
0x42ff   :  { %v42099_v31 = vpop.eup %42098 }
0x4300   :  { %v32460_v58 = vmul.f32 %v42099_v31, %v32452_v36 }
0x4302   :  { %v32461_v39 = vmul.f32 %v42118_v34, %v32460_v58 }
0x4304   :  { %v32462_v33 = vadd.f32 %v42119_v62, %v32461_v39 }
0x4306   :  { %v32464_v21 = vsel %vm772_vm4, %v32462_v33, 0 }
0x4307   :  { %v32535_v2 = vand.u32 4294901760, %v32464_v21 }
0x4309   :  { %v32536_v3 = vsub.f32 %v32464_v21, %v32535_v2 }
0x430b   :  { %v32537_v22 = vand.u32 4294901760, %v32536_v3 }
0x430d   :  { %v32538_v27 = vsub.f32 %v32536_v3, %v32537_v22 }
0x430f   :  { %v32539_v28 = vand.u32 4294901760, %v32538_v27 }
0x4311   :  { %38681 = vmatmul.mubr.f32.vlgmr.msra.gmra.mrb[82].mxu1 %v32539_v28 }
0x4312   :  { %41278 = vmatpush3.bf16.msra.mxu1 %v46323_v25  ;;  %38691 = vmatprep.mubr.msk.f32.mxu1 %vm42392_vm0, %v46321_v40 }
0x4313   :  { %41279 = vmatprep.subr.bf16.mxu1 %v46211_v52 }
0x4316   :  { %41281 = vmatpush3.bf16.msra.mxu1 %v46324_v26 }
0x4317   :  { %41282 = vmatprep.subr.bf16.mxu1 %v46211_v52 }
0x4319   :  { %38692 = vmatmul.mubr.f32.vlgmr.msra.gmra.mrb[82].mxu1 %v32535_v2 }
0x431a   :  { %41284 = vmatpush3.bf16.msra.mxu1 %v46325_v41  ;;  %38702 = vmatprep.mubr.msk.f32.mxu1 %vm42392_vm0, %v46321_v40 }
0x431b   :  { %41285 = vmatprep.subr.bf16.mxu1 %v46211_v52 }
0x431e   :  { %41287 = vmatpush3.bf16.msra.mxu1 %v46326_v10 }
0x431f   :  { %41288 = vmatprep.subr.bf16.mxu1 %v46211_v52 }
0x4321   :  { %38703 = vmatmul.mubr.f32.vlgmr.msra.gmra.mrb[82].mxu1 %v32536_v3 }
0x4322   :  { %41290 = vmatpush3.bf16.msra.mxu1 %v44710_v46  ;;  %38713 = vmatprep.mubr.msk.f32.mxu1 %vm42392_vm0, %v46321_v40 }
0x4323   :  { %41291 = vmatprep.subr.bf16.mxu1 %v46211_v52 }
0x4326   :  { %41293 = vmatpush3.bf16.msra.mxu1 %v46322_v59 }
0x4327   :  { %41294 = vmatprep.subr.bf16.mxu1 %v46211_v52 }
0x4329   :  { %38714 = vmatmul.mubr.f32.vlgmr.msra.gmra.mrb[82].mxu1 %v32537_v22 }
0x432a   :  { %41296 = vmatpush3.bf16.msra.mxu1 %v46327_v13  ;;  %38724 = vmatprep.mubr.msk.f32.mxu1 %vm42392_vm0, %v46321_v40 }
0x432b   :  { %41297 = vmatprep.subr.bf16.mxu1 %v46211_v52 }
0x432e   :  { %41299 = vmatpush3.bf16.msra.mxu1 %v46328_v12 }
0x432f   :  { %41300 = vmatprep.subr.bf16.mxu1 %v46211_v52 }
0x4331   :  { %38725 = vmatmul.mubr.f32.vlgmr.msra.gmra.mrb[82].mxu1 %v32535_v2 }
0x4332   :  { %41302 = vmatpush3.bf16.msra.mxu1 %v44710_v46  ;;  %38735 = vmatprep.mubr.msk.f32.mxu1 %vm42392_vm0, %v46321_v40 }
0x4333   :  { %41303 = vmatprep.subr.bf16.mxu1 %v46211_v52 }
0x4336   :  { %41305 = vmatpush3.bf16.msra.mxu1 %v46322_v59 }
0x4339   :  { %38736 = vmatmul.mubr.f32.vlgmr.msra.gmra.mrb[82].mxu1 %v32535_v2 }
0x440c   :  { %v32947_v48 = vpop.f32.mrb[82].mxu1 }
0x440d   :  { %v41361_v43 = vadd.f32 %v42120_v51, %v32947_v48  ;;  %v38737_v9 = vpop.f32.mrb[83].mxu1 }
0x440f   :  { %32952 = vst [vmem:[#allocation21 + $0x4] sm:$0xf] %v41361_v43 }
0x4410   :  { %42352 = shalt.err (!%p42349_p0)
}
0x4411   :  { %s42353_s28 = scalar_lea.hbm %s45756_s20, 128 }
0x4412   :  { %p42354_p1 = scmp.ne.s32.totalorder %s45756_s20, %s42353_s28  ;;  %p42357_p2 = scmp.lt.u32.totalorder %s42353_s28, %s45756_s20 }
0x4414   :  { %p42359_p3 = pnand %p42357_p2, %p42354_p1 }
0x4416   :  { %42362 = shalt.err (!%p42359_p3)
}
0x4417   :  { %s42399_s14 = smov 64   ;;  %s42400_s15 = smov 4  }
0x4418   :  { %32964 = dma.vmem_to_hbm [thread:$0]  %s32959_s30, 128, %s45756_s20, [#allocation6], %s42399_s14, %s42399_s14, %s42400_s15  }
0x4419   :  { %42375 = dma.done.wait [#allocation6], 128  }
0x441a   :  { %42376 = vsyncadd [#allocation6], 4294967168 }
0x441b   :  { %32968 = vsyncpa [#allocation5], 1 }
0x441c   :  { %32969 = vsyncpa [#allocation8], 1 }
0x441d   :  { %32970 = vsyncpa [#allocation11], 1 }
0x441e   :  { %32971 = vsyncpa [#allocation14], 1 }
0x441f   :  { %32972 = vsyncpa [#allocation17], 1 }
0x4420   :  { %32973 = vsyncpa [#allocation20], 1 }
0x4421   :  { %32974 = vsyncpa [#allocation6], 1 }

</bundles_post_ra>
